<compile_context>
chip_gen: v5e
topology: v5e:2x2
jax: 0.10.0
libtpu: 0.0.40
codegen_flags: <defaults>
</compile_context>

<pallas_src>
import functools

import jax
import jax.numpy as jnp
from jax.experimental import pallas as pl
from jax.experimental.pallas import tpu as pltpu

_BN_EPS = 1e-5  # PyTorch BatchNorm1d default


def _dmr_attn_kernel(q_ref, his_ref, w02_ref, w12_ref, w3_ref,
                     u_ref, v_ref, w2_ref, b2_ref,
                     out_ref, snsm_ref, sc_ref,
                     qh_scr, raw_scr, *, bb, t):
    # ---- Stage 1: build qh = broadcast(q) * his in the flat (bb*t, D) layout
    # so the "query * history" term becomes ONE big MXU matmul, not bb small ones.
    for b in range(bb):
        rows = pl.ds(b * t, t)
        qh_scr[rows, :] = q_ref[pl.ds(b, 1), :] * his_ref[rows, :]

    # ---- Stage 2: the two big matmuls (M = bb*t rows) + tiny query-only one.
    raw_scr[...] = (
        jnp.dot(his_ref[...], w12_ref[...], preferred_element_type=jnp.float32)
        + jnp.dot(qh_scr[...], w3_ref[...], preferred_element_type=jnp.float32))
    q2 = jnp.dot(q_ref[...], w02_ref[...],
                 preferred_element_type=jnp.float32)            # (bb, H)

    u = u_ref[...]        # (t, 1)   folded BN1*BN2 scale
    v = v_ref[...]        # (t, H)   folded shifts (c1*colsum(W1T), b1, c2)
    w2 = w2_ref[...]      # (1, H)
    b2 = b2_ref[...]      # (1, 1)

    # ---- Stage 3: per-element epilogue (VPU/XLU/EUP only; no transposes).
    for b in range(bb):
        rows = pl.ds(b * t, t)
        r_b = raw_scr[rows, :] + q2[b:b + 1, :]                  # (t, H)
        x_b = jax.nn.sigmoid(u * r_b + v)                        # (t, H)
        # Linear(256 -> 1) as multiply + lane reduce (keeps MXU/XLU-xpose free).
        col = jnp.sum(x_b * w2, axis=-1, keepdims=True) + b2     # (t, 1)
        snsm_ref[rows, :] = col
        # Softmax over the history axis (sublane reduces on the (t,1) column).
        mx = jnp.max(col, axis=0, keepdims=True)
        e = jnp.exp(col - mx)
        sc = e / jnp.sum(e, axis=0, keepdims=True)               # (t, 1)
        sc_ref[rows, :] = sc
        # output[b] = sum_t scores[t] * his[b, t, :]
        out_ref[pl.ds(b, 1), :] = jnp.sum(
            sc * his_ref[rows, :], axis=0, keepdims=True).astype(out_ref.dtype)


def dmr_fcn_attention(item_eb, item_his_eb, params, *, block_b=16,
                      use_bf16=False):
    """Pallas forward of DmrFcnAttention. Returns (output, scores, scores_no_softmax)."""
    B, T, D = item_his_eb.shape
    H = params["w1t"].shape[1]
    assert item_eb.shape == (B, D)
    assert params["w1t"].shape == (4 * D, H)

    f32 = jnp.float32
    g1, be1, m1, v1 = (params[k].astype(f32) for k in ("g1", "be1", "m1", "v1"))
    g2, be2, m2, v2 = (params[k].astype(f32) for k in ("g2", "be2", "m2", "v2"))
    w1t = params["w1t"].astype(f32)
    b1 = params["b1"].astype(f32)
    w2 = params["w2"].astype(f32).reshape(1, H)
    b2 = params["b2"].astype(f32).reshape(1, 1)

    # Fold BN1 / BN2 (eval mode) into a per-row scale + a (T, H) shift.
    s1 = g1 * jax.lax.rsqrt(v1 + _BN_EPS)
    c1 = be1 - m1 * s1
    s2 = g2 * jax.lax.rsqrt(v2 + _BN_EPS)
    c2 = be2 - m2 * s2

    w0, w1b, w2b, w3b = w1t[0:D], w1t[D:2 * D], w1t[2 * D:3 * D], w1t[3 * D:4 * D]
    w02 = w0 + w2b                  # weight seen by the broadcast query term
    w12 = w1b - w2b                 # weight seen by item_his_eb
    w3 = w3b                        # weight seen by query * item_his_eb
    wsum1 = jnp.sum(w1t, axis=0, keepdims=True)                       # (1, H)

    u = (s1 * s2).reshape(T, 1)                                       # (T, 1)
    vshift = s2[:, None] * (c1[:, None] * wsum1 + b1[None, :]) + c2[:, None]  # (T, H)

    # ---- batch blocking -------------------------------------------------
    bb = max(8, (int(block_b) // 8) * 8)
    # Prefer >=2 grid steps when B allows it (feeds both v7x TensorCores) and
    # avoid padding a tiny batch up to a large block.
    while bb > 8 and (B <= bb // 2 or -(-B // bb) < 2):
        bb //= 2
    bb = max(8, bb - bb % 8)
    nb = -(-B // bb)
    Bp = nb * bb

    cdt = jnp.bfloat16 if use_bf16 else jnp.float32   # MXU-input dtype
    q = item_eb.astype(cdt)
    his3 = item_his_eb.astype(cdt)
    if Bp != B:
        q = jnp.pad(q, ((0, Bp - B), (0, 0)))
        his3 = jnp.pad(his3, ((0, Bp - B), (0, 0), (0, 0)))
    his_flat = his3.reshape(Bp * T, D)     # contiguity-preserving -> free
    w02c, w12c, w3c = (w.astype(cdt) for w in (w02, w12, w3))

    batch_map = lambda i: (i, 0)
    const_map = lambda i: (0, 0)

    in_specs = [
        pl.BlockSpec((bb, D), batch_map),          # item_eb block
        pl.BlockSpec((bb * T, D), batch_map),      # item_his_eb (flattened)
        pl.BlockSpec((D, H), const_map),           # w02
        pl.BlockSpec((D, H), const_map),           # w12
        pl.BlockSpec((D, H), const_map),           # w3
        pl.BlockSpec((T, 1), const_map),           # u   (folded BN scale)
        pl.BlockSpec((T, H), const_map),           # V   (folded shifts)
        pl.BlockSpec((1, H), const_map),           # w2
        pl.BlockSpec((1, 1), const_map),           # b2
    ]
    out_specs = (
        pl.BlockSpec((bb, D), batch_map),          # output
        pl.BlockSpec((bb * T, 1), batch_map),      # scores_no_softmax (column)
        pl.BlockSpec((bb * T, 1), batch_map),      # scores            (column)
    )
    out_shape = (
        jax.ShapeDtypeStruct((Bp, D), jnp.float32),
        jax.ShapeDtypeStruct((Bp * T, 1), jnp.float32),
        jax.ShapeDtypeStruct((Bp * T, 1), jnp.float32),
    )

    kernel = functools.partial(_dmr_attn_kernel, bb=bb, t=T)
    out, snsm_col, sc_col = pl.pallas_call(
        kernel,
        grid=(Bp // bb,),
        in_specs=in_specs,
        out_specs=out_specs,
        out_shape=out_shape,
        scratch_shapes=[
            pltpu.VMEM((bb * T, D), cdt),          # qh = q * his (flat)
            pltpu.VMEM((bb * T, H), jnp.float32),  # pre-activation accumulator
        ],
        compiler_params=pltpu.CompilerParams(
            dimension_semantics=("parallel",)),
    )(q, his_flat, w02c, w12c, w3c, u, vshift, w2, b2)

    output = out[:B]
    scores = sc_col.reshape(Bp, 1, T)[:B]      # free reshape (row-major match)
    snsm = snsm_col.reshape(Bp, 1, T)[:B]
    return output, scores, snsm


def _reference(item_eb, his, p):
    """Pure-JAX reference of DmrFcnAttention.forward (eval-mode BN/dropout)."""
    B, T, D = his.shape
    q = jnp.broadcast_to(item_eb[:, None, :], (B, T, D))
    dmr = jnp.concatenate([q, his, q - his, q * his], axis=-1)

    def bn(x, g, b, m, v):
        return (g[None, :, None] * (x - m[None, :, None])
                / jnp.sqrt(v[None, :, None] + _BN_EPS) + b[None, :, None])

    x = bn(dmr, p["g1"], p["be1"], p["m1"], p["v1"])
    x = x @ p["w1t"] + p["b1"][None, None, :]
    x = bn(x, p["g2"], p["be2"], p["m2"], p["v2"])
    x = jax.nn.sigmoid(x)
    s = x @ p["w2"].T + p["b2"]                   # (B, T, 1)
    snsm = jnp.reshape(s, (B, 1, T))
    sc = jax.nn.softmax(snsm, axis=-1)
    out = jnp.sum(jnp.einsum("bqt,btd->bqd", sc, his), axis=1)
    return out, sc, snsm


if __name__ == "__main__":
    eb_size = 16          # module default is 128; kept small for the test
    D = 2 * eb_size       # item embedding width (dmr_all last dim = 4*D)
    T = 50                # fixed by BatchNorm1d(50) in the module
    H = 256               # fixed by Linear(eb_size*8, 256)
    B = 18                # exercises multi-step grid + batch padding

    key = jax.random.PRNGKey(0)
    ks = jax.random.split(key, 16)
    item_eb = jax.random.normal(ks[0], (B, D), jnp.float32)
    item_his_eb = jax.random.normal(ks[1], (B, T, D), jnp.float32)

    params = dict(
        g1=1.0 + 0.1 * jax.random.normal(ks[2], (T,), jnp.float32),
        be1=0.1 * jax.random.normal(ks[3], (T,), jnp.float32),
        m1=0.05 * jax.random.normal(ks[4], (T,), jnp.float32),
        v1=1.0 + 0.1 * jax.random.uniform(ks[5], (T,), jnp.float32),
        w1t=jax.random.normal(ks[6], (4 * D, H), jnp.float32) / jnp.sqrt(4.0 * D),
        b1=0.1 * jax.random.normal(ks[7], (H,), jnp.float32),
        g2=1.0 + 0.1 * jax.random.normal(ks[8], (T,), jnp.float32),
        be2=0.1 * jax.random.normal(ks[9], (T,), jnp.float32),
        m2=0.05 * jax.random.normal(ks[10], (T,), jnp.float32),
        v2=1.0 + 0.1 * jax.random.uniform(ks[11], (T,), jnp.float32),
        w2=jax.random.normal(ks[12], (1, H), jnp.float32) / jnp.sqrt(1.0 * H),
        b2=0.1 * jax.random.normal(ks[13], (1,), jnp.float32),
    )

    ref_out, ref_sc, ref_snsm = _reference(item_eb, item_his_eb, params)

    # f32 path (tight tolerances).
    out, scores, snsm = jax.block_until_ready(
        dmr_fcn_attention(item_eb, item_his_eb, params, block_b=8))
    assert out.shape == (B, D) and scores.shape == (B, 1, T) and snsm.shape == (B, 1, T)
    assert jnp.allclose(snsm, ref_snsm, atol=1e-4, rtol=1e-4)
    assert jnp.allclose(scores, ref_sc, atol=1e-5, rtol=1e-4)
    assert jnp.allclose(out, ref_out, atol=1e-4, rtol=1e-4)

    # bf16 MXU-input path (v6e/v7x optimization) with f32 accumulation.
    out16, scores16, snsm16 = jax.block_until_ready(
        dmr_fcn_attention(item_eb, item_his_eb, params, block_b=8, use_bf16=True))
    assert jnp.allclose(snsm16, ref_snsm, atol=5e-2, rtol=5e-2)
    assert jnp.allclose(scores16, ref_sc, atol=5e-3, rtol=5e-2)
    assert jnp.allclose(out16, ref_out, atol=5e-2, rtol=5e-2)

    print("KERNEL_OK")
</pallas_src>

<mosaic_0001>
module attributes {stable_mosaic.version = 11 : i64} {
  func.func @_dmr_attn_kernel(%arg0: i32, %arg1: memref<8x32xf32, #tpu.memory_space<vmem>>, %arg2: memref<400x32xf32, #tpu.memory_space<vmem>>, %arg3: memref<32x256xf32, #tpu.memory_space<vmem>>, %arg4: memref<32x256xf32, #tpu.memory_space<vmem>>, %arg5: memref<32x256xf32, #tpu.memory_space<vmem>>, %arg6: memref<50x1xf32, #tpu.memory_space<vmem>>, %arg7: memref<50x256xf32, #tpu.memory_space<vmem>>, %arg8: memref<1x256xf32, #tpu.memory_space<vmem>>, %arg9: memref<1x1xf32, #tpu.memory_space<vmem>>, %arg10: memref<8x32xf32, #tpu.memory_space<vmem>>, %arg11: memref<400x1xf32, #tpu.memory_space<vmem>>, %arg12: memref<400x1xf32, #tpu.memory_space<vmem>>, %arg13: memref<400x32xf32, #tpu.memory_space<vmem>>, %arg14: memref<400x256xf32, #tpu.memory_space<vmem>>) attributes {dimension_semantics = [#tpu.dimension_semantics<parallel>], iteration_bounds = array<i64: 3>, scalar_prefetch = 0 : i64, scratch_operands = 2 : i64, tpu.core_type = #tpu.core_type<tc>, window_params = [{transform_indices = @transform_0, window_bounds = array<i64: 8, 32>}, {transform_indices = @transform_1, window_bounds = array<i64: 400, 32>}, {pipeline_mode = #tpu.pipeline_mode<synchronous>, transform_indices = @transform_2, window_bounds = array<i64: 32, 256>}, {pipeline_mode = #tpu.pipeline_mode<synchronous>, transform_indices = @transform_3, window_bounds = array<i64: 32, 256>}, {pipeline_mode = #tpu.pipeline_mode<synchronous>, transform_indices = @transform_4, window_bounds = array<i64: 32, 256>}, {pipeline_mode = #tpu.pipeline_mode<synchronous>, transform_indices = @transform_5, window_bounds = array<i64: 50, 1>}, {pipeline_mode = #tpu.pipeline_mode<synchronous>, transform_indices = @transform_6, window_bounds = array<i64: 50, 256>}, {pipeline_mode = #tpu.pipeline_mode<synchronous>, transform_indices = @transform_7, window_bounds = array<i64: 1, 256>}, {pipeline_mode = #tpu.pipeline_mode<synchronous>, transform_indices = @transform_8, window_bounds = array<i64: 1, 1>}, {transform_indices = @transform_9, window_bounds = array<i64: 8, 32>}, {transform_indices = @transform_10, window_bounds = array<i64: 400, 1>}, {transform_indices = @transform_11, window_bounds = array<i64: 400, 1>}]} {
    %c0 = arith.constant 0 : index
    %c0_0 = arith.constant 0 : index
    %0 = vector.load %arg1[%c0, %c0_0] : memref<8x32xf32, #tpu.memory_space<vmem>>, vector<1x32xf32>
    %c0_1 = arith.constant 0 : index
    %c0_2 = arith.constant 0 : index
    %1 = vector.load %arg2[%c0_1, %c0_2] : memref<400x32xf32, #tpu.memory_space<vmem>>, vector<50x32xf32>
    %2 = vector.broadcast %0 : vector<1x32xf32> to vector<50x32xf32>
    %3 = arith.mulf %2, %1 : vector<50x32xf32>
    %c0_3 = arith.constant 0 : index
    %c0_4 = arith.constant 0 : index
    %4 = vector.load %arg13[%c0_3, %c0_4] : memref<400x32xf32, #tpu.memory_space<vmem>>, vector<50x32xf32>
    tpu.vector_store %arg13[%c0_3, %c0_4], %3 {strides = array<i32>} : memref<400x32xf32, #tpu.memory_space<vmem>>, vector<50x32xf32>,
    %c1 = arith.constant 1 : index
    %c0_5 = arith.constant 0 : index
    %5 = vector.load %arg1[%c1, %c0_5] : memref<8x32xf32, #tpu.memory_space<vmem>>, vector<1x32xf32>
    %c50 = arith.constant 50 : index
    %c0_6 = arith.constant 0 : index
    %6 = vector.load %arg2[%c50, %c0_6] : memref<400x32xf32, #tpu.memory_space<vmem>>, vector<50x32xf32>
    %7 = vector.broadcast %5 : vector<1x32xf32> to vector<50x32xf32>
    %8 = arith.mulf %7, %6 : vector<50x32xf32>
    %c50_7 = arith.constant 50 : index
    %c0_8 = arith.constant 0 : index
    %9 = vector.load %arg13[%c50_7, %c0_8] : memref<400x32xf32, #tpu.memory_space<vmem>>, vector<50x32xf32>
    tpu.vector_store %arg13[%c50_7, %c0_8], %8 {strides = array<i32>} : memref<400x32xf32, #tpu.memory_space<vmem>>, vector<50x32xf32>,
    %c2 = arith.constant 2 : index
    %c0_9 = arith.constant 0 : index
    %10 = vector.load %arg1[%c2, %c0_9] : memref<8x32xf32, #tpu.memory_space<vmem>>, vector<1x32xf32>
    %c100 = arith.constant 100 : index
    %c0_10 = arith.constant 0 : index
    %11 = vector.load %arg2[%c100, %c0_10] : memref<400x32xf32, #tpu.memory_space<vmem>>, vector<50x32xf32>
    %12 = vector.broadcast %10 : vector<1x32xf32> to vector<50x32xf32>
    %13 = arith.mulf %12, %11 : vector<50x32xf32>
    %c100_11 = arith.constant 100 : index
    %c0_12 = arith.constant 0 : index
    %14 = vector.load %arg13[%c100_11, %c0_12] : memref<400x32xf32, #tpu.memory_space<vmem>>, vector<50x32xf32>
    tpu.vector_store %arg13[%c100_11, %c0_12], %13 {strides = array<i32>} : memref<400x32xf32, #tpu.memory_space<vmem>>, vector<50x32xf32>,
    %c3 = arith.constant 3 : index
    %c0_13 = arith.constant 0 : index
    %15 = vector.load %arg1[%c3, %c0_13] : memref<8x32xf32, #tpu.memory_space<vmem>>, vector<1x32xf32>
    %c150 = arith.constant 150 : index
    %c0_14 = arith.constant 0 : index
    %16 = vector.load %arg2[%c150, %c0_14] : memref<400x32xf32, #tpu.memory_space<vmem>>, vector<50x32xf32>
    %17 = vector.broadcast %15 : vector<1x32xf32> to vector<50x32xf32>
    %18 = arith.mulf %17, %16 : vector<50x32xf32>
    %c150_15 = arith.constant 150 : index
    %c0_16 = arith.constant 0 : index
    %19 = vector.load %arg13[%c150_15, %c0_16] : memref<400x32xf32, #tpu.memory_space<vmem>>, vector<50x32xf32>
    tpu.vector_store %arg13[%c150_15, %c0_16], %18 {strides = array<i32>} : memref<400x32xf32, #tpu.memory_space<vmem>>, vector<50x32xf32>,
    %c4 = arith.constant 4 : index
    %c0_17 = arith.constant 0 : index
    %20 = vector.load %arg1[%c4, %c0_17] : memref<8x32xf32, #tpu.memory_space<vmem>>, vector<1x32xf32>
    %c200 = arith.constant 200 : index
    %c0_18 = arith.constant 0 : index
    %21 = vector.load %arg2[%c200, %c0_18] : memref<400x32xf32, #tpu.memory_space<vmem>>, vector<50x32xf32>
    %22 = vector.broadcast %20 : vector<1x32xf32> to vector<50x32xf32>
    %23 = arith.mulf %22, %21 : vector<50x32xf32>
    %c200_19 = arith.constant 200 : index
    %c0_20 = arith.constant 0 : index
    %24 = vector.load %arg13[%c200_19, %c0_20] : memref<400x32xf32, #tpu.memory_space<vmem>>, vector<50x32xf32>
    tpu.vector_store %arg13[%c200_19, %c0_20], %23 {strides = array<i32>} : memref<400x32xf32, #tpu.memory_space<vmem>>, vector<50x32xf32>,
    %c5 = arith.constant 5 : index
    %c0_21 = arith.constant 0 : index
    %25 = vector.load %arg1[%c5, %c0_21] : memref<8x32xf32, #tpu.memory_space<vmem>>, vector<1x32xf32>
    %c250 = arith.constant 250 : index
    %c0_22 = arith.constant 0 : index
    %26 = vector.load %arg2[%c250, %c0_22] : memref<400x32xf32, #tpu.memory_space<vmem>>, vector<50x32xf32>
    %27 = vector.broadcast %25 : vector<1x32xf32> to vector<50x32xf32>
    %28 = arith.mulf %27, %26 : vector<50x32xf32>
    %c250_23 = arith.constant 250 : index
    %c0_24 = arith.constant 0 : index
    %29 = vector.load %arg13[%c250_23, %c0_24] : memref<400x32xf32, #tpu.memory_space<vmem>>, vector<50x32xf32>
    tpu.vector_store %arg13[%c250_23, %c0_24], %28 {strides = array<i32>} : memref<400x32xf32, #tpu.memory_space<vmem>>, vector<50x32xf32>,
    %c6 = arith.constant 6 : index
    %c0_25 = arith.constant 0 : index
    %30 = vector.load %arg1[%c6, %c0_25] : memref<8x32xf32, #tpu.memory_space<vmem>>, vector<1x32xf32>
    %c300 = arith.constant 300 : index
    %c0_26 = arith.constant 0 : index
    %31 = vector.load %arg2[%c300, %c0_26] : memref<400x32xf32, #tpu.memory_space<vmem>>, vector<50x32xf32>
    %32 = vector.broadcast %30 : vector<1x32xf32> to vector<50x32xf32>
    %33 = arith.mulf %32, %31 : vector<50x32xf32>
    %c300_27 = arith.constant 300 : index
    %c0_28 = arith.constant 0 : index
    %34 = vector.load %arg13[%c300_27, %c0_28] : memref<400x32xf32, #tpu.memory_space<vmem>>, vector<50x32xf32>
    tpu.vector_store %arg13[%c300_27, %c0_28], %33 {strides = array<i32>} : memref<400x32xf32, #tpu.memory_space<vmem>>, vector<50x32xf32>,
    %c7 = arith.constant 7 : index
    %c0_29 = arith.constant 0 : index
    %35 = vector.load %arg1[%c7, %c0_29] : memref<8x32xf32, #tpu.memory_space<vmem>>, vector<1x32xf32>
    %c350 = arith.constant 350 : index
    %c0_30 = arith.constant 0 : index
    %36 = vector.load %arg2[%c350, %c0_30] : memref<400x32xf32, #tpu.memory_space<vmem>>, vector<50x32xf32>
    %37 = vector.broadcast %35 : vector<1x32xf32> to vector<50x32xf32>
    %38 = arith.mulf %37, %36 : vector<50x32xf32>
    %c350_31 = arith.constant 350 : index
    %c0_32 = arith.constant 0 : index
    %39 = vector.load %arg13[%c350_31, %c0_32] : memref<400x32xf32, #tpu.memory_space<vmem>>, vector<50x32xf32>
    tpu.vector_store %arg13[%c350_31, %c0_32], %38 {strides = array<i32>} : memref<400x32xf32, #tpu.memory_space<vmem>>, vector<50x32xf32>,
    %c0_33 = arith.constant 0 : index
    %c0_34 = arith.constant 0 : index
    %40 = vector.load %arg2[%c0_33, %c0_34] : memref<400x32xf32, #tpu.memory_space<vmem>>, vector<400x32xf32>
    %c0_35 = arith.constant 0 : index
    %c0_36 = arith.constant 0 : index
    %41 = vector.load %arg4[%c0_35, %c0_36] : memref<32x256xf32, #tpu.memory_space<vmem>>, vector<32x256xf32>
    %cst = arith.constant dense<0.000000e+00> : vector<400x256xf32>
    %42 = tpu.matmul %40, %41, %cst {dimension_numbers = #tpu.dot_dimension_numbers<[1], [0], [0], [1], [0, 0, 1, 1], [], []>} : vector<400x32xf32>, vector<32x256xf32>, vector<400x256xf32> -> vector<400x256xf32>
    %c0_37 = arith.constant 0 : index
    %c0_38 = arith.constant 0 : index
    %43 = vector.load %arg13[%c0_37, %c0_38] : memref<400x32xf32, #tpu.memory_space<vmem>>, vector<400x32xf32>
    %c0_39 = arith.constant 0 : index
    %c0_40 = arith.constant 0 : index
    %44 = vector.load %arg5[%c0_39, %c0_40] : memref<32x256xf32, #tpu.memory_space<vmem>>, vector<32x256xf32>
    %cst_41 = arith.constant dense<0.000000e+00> : vector<400x256xf32>
    %45 = tpu.matmul %43, %44, %cst_41 {dimension_numbers = #tpu.dot_dimension_numbers<[1], [0], [0], [1], [0, 0, 1, 1], [], []>} : vector<400x32xf32>, vector<32x256xf32>, vector<400x256xf32> -> vector<400x256xf32>
    %46 = arith.addf %42, %45 : vector<400x256xf32>
    %c0_42 = arith.constant 0 : index
    %c0_43 = arith.constant 0 : index
    %47 = vector.load %arg14[%c0_42, %c0_43] : memref<400x256xf32, #tpu.memory_space<vmem>>, vector<400x256xf32>
    tpu.vector_store %arg14[%c0_42, %c0_43], %46 {strides = array<i32>} : memref<400x256xf32, #tpu.memory_space<vmem>>, vector<400x256xf32>,
    %c0_44 = arith.constant 0 : index
    %c0_45 = arith.constant 0 : index
    %48 = vector.load %arg1[%c0_44, %c0_45] : memref<8x32xf32, #tpu.memory_space<vmem>>, vector<8x32xf32>
    %c0_46 = arith.constant 0 : index
    %c0_47 = arith.constant 0 : index
    %49 = vector.load %arg3[%c0_46, %c0_47] : memref<32x256xf32, #tpu.memory_space<vmem>>, vector<32x256xf32>
    %cst_48 = arith.constant dense<0.000000e+00> : vector<8x256xf32>
    %50 = tpu.matmul %48, %49, %cst_48 {dimension_numbers = #tpu.dot_dimension_numbers<[1], [0], [0], [1], [0, 0, 1, 1], [], []>} : vector<8x32xf32>, vector<32x256xf32>, vector<8x256xf32> -> vector<8x256xf32>
    %c0_49 = arith.constant 0 : index
    %c0_50 = arith.constant 0 : index
    %51 = vector.load %arg6[%c0_49, %c0_50] : memref<50x1xf32, #tpu.memory_space<vmem>>, vector<50x1xf32>
    %c0_51 = arith.constant 0 : index
    %c0_52 = arith.constant 0 : index
    %52 = vector.load %arg7[%c0_51, %c0_52] : memref<50x256xf32, #tpu.memory_space<vmem>>, vector<50x256xf32>
    %c0_53 = arith.constant 0 : index
    %c0_54 = arith.constant 0 : index
    %53 = vector.load %arg8[%c0_53, %c0_54] : memref<1x256xf32, #tpu.memory_space<vmem>>, vector<1x256xf32>
    %c0_55 = arith.constant 0 : index
    %c0_56 = arith.constant 0 : index
    %54 = vector.load %arg9[%c0_55, %c0_56] : memref<1x1xf32, #tpu.memory_space<vmem>>, vector<1x1xf32>
    %c0_57 = arith.constant 0 : index
    %c0_58 = arith.constant 0 : index
    %55 = vector.load %arg14[%c0_57, %c0_58] : memref<400x256xf32, #tpu.memory_space<vmem>>, vector<50x256xf32>
    %56 = vector.extract_strided_slice %50 {offsets = [0, 0], sizes = [1, 256], strides = [1, 1]} : vector<8x256xf32> to vector<1x256xf32>
    %57 = vector.broadcast %56 : vector<1x256xf32> to vector<50x256xf32>
    %58 = arith.addf %55, %57 : vector<50x256xf32>
    %59 = vector.broadcast %51 : vector<50x1xf32> to vector<50x256xf32>
    %60 = arith.mulf %59, %58 : vector<50x256xf32>
    %61 = arith.addf %60, %52 : vector<50x256xf32>
    %62 = arith.negf %61 : vector<50x256xf32>
    %63 = math.exp %62 : vector<50x256xf32>
    %cst_59 = arith.constant 1.000000e+00 : f32
    %64 = vector.broadcast %cst_59 : f32 to vector<50x256xf32>
    %65 = arith.addf %64, %63 : vector<50x256xf32>
    %66 = arith.divf %64, %65 : vector<50x256xf32>
    %67 = vector.broadcast %53 : vector<1x256xf32> to vector<50x256xf32>
    %68 = arith.mulf %66, %67 : vector<50x256xf32>
    %cst_60 = arith.constant dense<0.000000e+00> : vector<50xf32>
    %69 = vector.multi_reduction <add>, %68, %cst_60 [1] : vector<50x256xf32> to vector<50xf32>
    %70 = vector.shape_cast %69 : vector<50xf32> to vector<50x1xf32>
    %71 = vector.broadcast %54 : vector<1x1xf32> to vector<50x1xf32>
    %72 = arith.addf %70, %71 : vector<50x1xf32>
    %c0_61 = arith.constant 0 : index
    %c0_62 = arith.constant 0 : index
    %73 = vector.load %arg11[%c0_61, %c0_62] : memref<400x1xf32, #tpu.memory_space<vmem>>, vector<50x1xf32>
    tpu.vector_store %arg11[%c0_61, %c0_62], %72 {strides = array<i32>} : memref<400x1xf32, #tpu.memory_space<vmem>>, vector<50x1xf32>,
    %cst_63 = arith.constant dense<0xFF800000> : vector<1xf32>
    %74 = vector.multi_reduction <maximumf>, %72, %cst_63 [0] : vector<50x1xf32> to vector<1xf32>
    %75 = vector.shape_cast %74 : vector<1xf32> to vector<1x1xf32>
    %76 = vector.broadcast %75 : vector<1x1xf32> to vector<50x1xf32>
    %77 = arith.subf %72, %76 : vector<50x1xf32>
    %78 = math.exp %77 : vector<50x1xf32>
    %cst_64 = arith.constant dense<0.000000e+00> : vector<1xf32>
    %79 = vector.multi_reduction <add>, %78, %cst_64 [0] : vector<50x1xf32> to vector<1xf32>
    %80 = vector.shape_cast %79 : vector<1xf32> to vector<1x1xf32>
    %81 = vector.broadcast %80 : vector<1x1xf32> to vector<50x1xf32>
    %82 = arith.divf %78, %81 : vector<50x1xf32>
    %c0_65 = arith.constant 0 : index
    %c0_66 = arith.constant 0 : index
    %83 = vector.load %arg12[%c0_65, %c0_66] : memref<400x1xf32, #tpu.memory_space<vmem>>, vector<50x1xf32>
    tpu.vector_store %arg12[%c0_65, %c0_66], %82 {strides = array<i32>} : memref<400x1xf32, #tpu.memory_space<vmem>>, vector<50x1xf32>,
    %c0_67 = arith.constant 0 : index
    %c0_68 = arith.constant 0 : index
    %84 = vector.load %arg2[%c0_67, %c0_68] : memref<400x32xf32, #tpu.memory_space<vmem>>, vector<50x32xf32>
    %85 = vector.broadcast %82 : vector<50x1xf32> to vector<50x32xf32>
    %86 = arith.mulf %85, %84 : vector<50x32xf32>
    %cst_69 = arith.constant dense<0.000000e+00> : vector<32xf32>
    %87 = vector.multi_reduction <add>, %86, %cst_69 [0] : vector<50x32xf32> to vector<32xf32>
    %88 = vector.shape_cast %87 : vector<32xf32> to vector<1x32xf32>
    %c0_70 = arith.constant 0 : index
    %c0_71 = arith.constant 0 : index
    %89 = vector.load %arg10[%c0_70, %c0_71] : memref<8x32xf32, #tpu.memory_space<vmem>>, vector<1x32xf32>
    tpu.vector_store %arg10[%c0_70, %c0_71], %88 {strides = array<i32>} : memref<8x32xf32, #tpu.memory_space<vmem>>, vector<1x32xf32>,
    %c50_72 = arith.constant 50 : index
    %c0_73 = arith.constant 0 : index
    %90 = vector.load %arg14[%c50_72, %c0_73] : memref<400x256xf32, #tpu.memory_space<vmem>>, vector<50x256xf32>
    %91 = vector.extract_strided_slice %50 {offsets = [1, 0], sizes = [1, 256], strides = [1, 1]} : vector<8x256xf32> to vector<1x256xf32>
    %92 = vector.broadcast %91 : vector<1x256xf32> to vector<50x256xf32>
    %93 = arith.addf %90, %92 : vector<50x256xf32>
    %94 = vector.broadcast %51 : vector<50x1xf32> to vector<50x256xf32>
    %95 = arith.mulf %94, %93 : vector<50x256xf32>
    %96 = arith.addf %95, %52 : vector<50x256xf32>
    %97 = arith.negf %96 : vector<50x256xf32>
    %98 = math.exp %97 : vector<50x256xf32>
    %cst_74 = arith.constant 1.000000e+00 : f32
    %99 = vector.broadcast %cst_74 : f32 to vector<50x256xf32>
    %100 = arith.addf %99, %98 : vector<50x256xf32>
    %101 = arith.divf %99, %100 : vector<50x256xf32>
    %102 = vector.broadcast %53 : vector<1x256xf32> to vector<50x256xf32>
    %103 = arith.mulf %101, %102 : vector<50x256xf32>
    %cst_75 = arith.constant dense<0.000000e+00> : vector<50xf32>
    %104 = vector.multi_reduction <add>, %103, %cst_75 [1] : vector<50x256xf32> to vector<50xf32>
    %105 = vector.shape_cast %104 : vector<50xf32> to vector<50x1xf32>
    %106 = vector.broadcast %54 : vector<1x1xf32> to vector<50x1xf32>
    %107 = arith.addf %105, %106 : vector<50x1xf32>
    %c50_76 = arith.constant 50 : index
    %c0_77 = arith.constant 0 : index
    %108 = vector.load %arg11[%c50_76, %c0_77] : memref<400x1xf32, #tpu.memory_space<vmem>>, vector<50x1xf32>
    tpu.vector_store %arg11[%c50_76, %c0_77], %107 {strides = array<i32>} : memref<400x1xf32, #tpu.memory_space<vmem>>, vector<50x1xf32>,
    %cst_78 = arith.constant dense<0xFF800000> : vector<1xf32>
    %109 = vector.multi_reduction <maximumf>, %107, %cst_78 [0] : vector<50x1xf32> to vector<1xf32>
    %110 = vector.shape_cast %109 : vector<1xf32> to vector<1x1xf32>
    %111 = vector.broadcast %110 : vector<1x1xf32> to vector<50x1xf32>
    %112 = arith.subf %107, %111 : vector<50x1xf32>
    %113 = math.exp %112 : vector<50x1xf32>
    %cst_79 = arith.constant dense<0.000000e+00> : vector<1xf32>
    %114 = vector.multi_reduction <add>, %113, %cst_79 [0] : vector<50x1xf32> to vector<1xf32>
    %115 = vector.shape_cast %114 : vector<1xf32> to vector<1x1xf32>
    %116 = vector.broadcast %115 : vector<1x1xf32> to vector<50x1xf32>
    %117 = arith.divf %113, %116 : vector<50x1xf32>
    %c50_80 = arith.constant 50 : index
    %c0_81 = arith.constant 0 : index
    %118 = vector.load %arg12[%c50_80, %c0_81] : memref<400x1xf32, #tpu.memory_space<vmem>>, vector<50x1xf32>
    tpu.vector_store %arg12[%c50_80, %c0_81], %117 {strides = array<i32>} : memref<400x1xf32, #tpu.memory_space<vmem>>, vector<50x1xf32>,
    %c50_82 = arith.constant 50 : index
    %c0_83 = arith.constant 0 : index
    %119 = vector.load %arg2[%c50_82, %c0_83] : memref<400x32xf32, #tpu.memory_space<vmem>>, vector<50x32xf32>
    %120 = vector.broadcast %117 : vector<50x1xf32> to vector<50x32xf32>
    %121 = arith.mulf %120, %119 : vector<50x32xf32>
    %cst_84 = arith.constant dense<0.000000e+00> : vector<32xf32>
    %122 = vector.multi_reduction <add>, %121, %cst_84 [0] : vector<50x32xf32> to vector<32xf32>
    %123 = vector.shape_cast %122 : vector<32xf32> to vector<1x32xf32>
    %c1_85 = arith.constant 1 : index
    %c0_86 = arith.constant 0 : index
    %124 = vector.load %arg10[%c1_85, %c0_86] : memref<8x32xf32, #tpu.memory_space<vmem>>, vector<1x32xf32>
    tpu.vector_store %arg10[%c1_85, %c0_86], %123 {strides = array<i32>} : memref<8x32xf32, #tpu.memory_space<vmem>>, vector<1x32xf32>,
    %c100_87 = arith.constant 100 : index
    %c0_88 = arith.constant 0 : index
    %125 = vector.load %arg14[%c100_87, %c0_88] : memref<400x256xf32, #tpu.memory_space<vmem>>, vector<50x256xf32>
    %126 = vector.extract_strided_slice %50 {offsets = [2, 0], sizes = [1, 256], strides = [1, 1]} : vector<8x256xf32> to vector<1x256xf32>
    %127 = vector.broadcast %126 : vector<1x256xf32> to vector<50x256xf32>
    %128 = arith.addf %125, %127 : vector<50x256xf32>
    %129 = vector.broadcast %51 : vector<50x1xf32> to vector<50x256xf32>
    %130 = arith.mulf %129, %128 : vector<50x256xf32>
    %131 = arith.addf %130, %52 : vector<50x256xf32>
    %132 = arith.negf %131 : vector<50x256xf32>
    %133 = math.exp %132 : vector<50x256xf32>
    %cst_89 = arith.constant 1.000000e+00 : f32
    %134 = vector.broadcast %cst_89 : f32 to vector<50x256xf32>
    %135 = arith.addf %134, %133 : vector<50x256xf32>
    %136 = arith.divf %134, %135 : vector<50x256xf32>
    %137 = vector.broadcast %53 : vector<1x256xf32> to vector<50x256xf32>
    %138 = arith.mulf %136, %137 : vector<50x256xf32>
    %cst_90 = arith.constant dense<0.000000e+00> : vector<50xf32>
    %139 = vector.multi_reduction <add>, %138, %cst_90 [1] : vector<50x256xf32> to vector<50xf32>
    %140 = vector.shape_cast %139 : vector<50xf32> to vector<50x1xf32>
    %141 = vector.broadcast %54 : vector<1x1xf32> to vector<50x1xf32>
    %142 = arith.addf %140, %141 : vector<50x1xf32>
    %c100_91 = arith.constant 100 : index
    %c0_92 = arith.constant 0 : index
    %143 = vector.load %arg11[%c100_91, %c0_92] : memref<400x1xf32, #tpu.memory_space<vmem>>, vector<50x1xf32>
    tpu.vector_store %arg11[%c100_91, %c0_92], %142 {strides = array<i32>} : memref<400x1xf32, #tpu.memory_space<vmem>>, vector<50x1xf32>,
    %cst_93 = arith.constant dense<0xFF800000> : vector<1xf32>
    %144 = vector.multi_reduction <maximumf>, %142, %cst_93 [0] : vector<50x1xf32> to vector<1xf32>
    %145 = vector.shape_cast %144 : vector<1xf32> to vector<1x1xf32>
    %146 = vector.broadcast %145 : vector<1x1xf32> to vector<50x1xf32>
    %147 = arith.subf %142, %146 : vector<50x1xf32>
    %148 = math.exp %147 : vector<50x1xf32>
    %cst_94 = arith.constant dense<0.000000e+00> : vector<1xf32>
    %149 = vector.multi_reduction <add>, %148, %cst_94 [0] : vector<50x1xf32> to vector<1xf32>
    %150 = vector.shape_cast %149 : vector<1xf32> to vector<1x1xf32>
    %151 = vector.broadcast %150 : vector<1x1xf32> to vector<50x1xf32>
    %152 = arith.divf %148, %151 : vector<50x1xf32>
    %c100_95 = arith.constant 100 : index
    %c0_96 = arith.constant 0 : index
    %153 = vector.load %arg12[%c100_95, %c0_96] : memref<400x1xf32, #tpu.memory_space<vmem>>, vector<50x1xf32>
    tpu.vector_store %arg12[%c100_95, %c0_96], %152 {strides = array<i32>} : memref<400x1xf32, #tpu.memory_space<vmem>>, vector<50x1xf32>,
    %c100_97 = arith.constant 100 : index
    %c0_98 = arith.constant 0 : index
    %154 = vector.load %arg2[%c100_97, %c0_98] : memref<400x32xf32, #tpu.memory_space<vmem>>, vector<50x32xf32>
    %155 = vector.broadcast %152 : vector<50x1xf32> to vector<50x32xf32>
    %156 = arith.mulf %155, %154 : vector<50x32xf32>
    %cst_99 = arith.constant dense<0.000000e+00> : vector<32xf32>
    %157 = vector.multi_reduction <add>, %156, %cst_99 [0] : vector<50x32xf32> to vector<32xf32>
    %158 = vector.shape_cast %157 : vector<32xf32> to vector<1x32xf32>
    %c2_100 = arith.constant 2 : index
    %c0_101 = arith.constant 0 : index
    %159 = vector.load %arg10[%c2_100, %c0_101] : memref<8x32xf32, #tpu.memory_space<vmem>>, vector<1x32xf32>
    tpu.vector_store %arg10[%c2_100, %c0_101], %158 {strides = array<i32>} : memref<8x32xf32, #tpu.memory_space<vmem>>, vector<1x32xf32>,
    %c150_102 = arith.constant 150 : index
    %c0_103 = arith.constant 0 : index
    %160 = vector.load %arg14[%c150_102, %c0_103] : memref<400x256xf32, #tpu.memory_space<vmem>>, vector<50x256xf32>
    %161 = vector.extract_strided_slice %50 {offsets = [3, 0], sizes = [1, 256], strides = [1, 1]} : vector<8x256xf32> to vector<1x256xf32>
    %162 = vector.broadcast %161 : vector<1x256xf32> to vector<50x256xf32>
    %163 = arith.addf %160, %162 : vector<50x256xf32>
    %164 = vector.broadcast %51 : vector<50x1xf32> to vector<50x256xf32>
    %165 = arith.mulf %164, %163 : vector<50x256xf32>
    %166 = arith.addf %165, %52 : vector<50x256xf32>
    %167 = arith.negf %166 : vector<50x256xf32>
    %168 = math.exp %167 : vector<50x256xf32>
    %cst_104 = arith.constant 1.000000e+00 : f32
    %169 = vector.broadcast %cst_104 : f32 to vector<50x256xf32>
    %170 = arith.addf %169, %168 : vector<50x256xf32>
    %171 = arith.divf %169, %170 : vector<50x256xf32>
    %172 = vector.broadcast %53 : vector<1x256xf32> to vector<50x256xf32>
    %173 = arith.mulf %171, %172 : vector<50x256xf32>
    %cst_105 = arith.constant dense<0.000000e+00> : vector<50xf32>
    %174 = vector.multi_reduction <add>, %173, %cst_105 [1] : vector<50x256xf32> to vector<50xf32>
    %175 = vector.shape_cast %174 : vector<50xf32> to vector<50x1xf32>
    %176 = vector.broadcast %54 : vector<1x1xf32> to vector<50x1xf32>
    %177 = arith.addf %175, %176 : vector<50x1xf32>
    %c150_106 = arith.constant 150 : index
    %c0_107 = arith.constant 0 : index
    %178 = vector.load %arg11[%c150_106, %c0_107] : memref<400x1xf32, #tpu.memory_space<vmem>>, vector<50x1xf32>
    tpu.vector_store %arg11[%c150_106, %c0_107], %177 {strides = array<i32>} : memref<400x1xf32, #tpu.memory_space<vmem>>, vector<50x1xf32>,
    %cst_108 = arith.constant dense<0xFF800000> : vector<1xf32>
    %179 = vector.multi_reduction <maximumf>, %177, %cst_108 [0] : vector<50x1xf32> to vector<1xf32>
    %180 = vector.shape_cast %179 : vector<1xf32> to vector<1x1xf32>
    %181 = vector.broadcast %180 : vector<1x1xf32> to vector<50x1xf32>
    %182 = arith.subf %177, %181 : vector<50x1xf32>
    %183 = math.exp %182 : vector<50x1xf32>
    %cst_109 = arith.constant dense<0.000000e+00> : vector<1xf32>
    %184 = vector.multi_reduction <add>, %183, %cst_109 [0] : vector<50x1xf32> to vector<1xf32>
    %185 = vector.shape_cast %184 : vector<1xf32> to vector<1x1xf32>
    %186 = vector.broadcast %185 : vector<1x1xf32> to vector<50x1xf32>
    %187 = arith.divf %183, %186 : vector<50x1xf32>
    %c150_110 = arith.constant 150 : index
    %c0_111 = arith.constant 0 : index
    %188 = vector.load %arg12[%c150_110, %c0_111] : memref<400x1xf32, #tpu.memory_space<vmem>>, vector<50x1xf32>
    tpu.vector_store %arg12[%c150_110, %c0_111], %187 {strides = array<i32>} : memref<400x1xf32, #tpu.memory_space<vmem>>, vector<50x1xf32>,
    %c150_112 = arith.constant 150 : index
    %c0_113 = arith.constant 0 : index
    %189 = vector.load %arg2[%c150_112, %c0_113] : memref<400x32xf32, #tpu.memory_space<vmem>>, vector<50x32xf32>
    %190 = vector.broadcast %187 : vector<50x1xf32> to vector<50x32xf32>
    %191 = arith.mulf %190, %189 : vector<50x32xf32>
    %cst_114 = arith.constant dense<0.000000e+00> : vector<32xf32>
    %192 = vector.multi_reduction <add>, %191, %cst_114 [0] : vector<50x32xf32> to vector<32xf32>
    %193 = vector.shape_cast %192 : vector<32xf32> to vector<1x32xf32>
    %c3_115 = arith.constant 3 : index
    %c0_116 = arith.constant 0 : index
    %194 = vector.load %arg10[%c3_115, %c0_116] : memref<8x32xf32, #tpu.memory_space<vmem>>, vector<1x32xf32>
    tpu.vector_store %arg10[%c3_115, %c0_116], %193 {strides = array<i32>} : memref<8x32xf32, #tpu.memory_space<vmem>>, vector<1x32xf32>,
    %c200_117 = arith.constant 200 : index
    %c0_118 = arith.constant 0 : index
    %195 = vector.load %arg14[%c200_117, %c0_118] : memref<400x256xf32, #tpu.memory_space<vmem>>, vector<50x256xf32>
    %196 = vector.extract_strided_slice %50 {offsets = [4, 0], sizes = [1, 256], strides = [1, 1]} : vector<8x256xf32> to vector<1x256xf32>
    %197 = vector.broadcast %196 : vector<1x256xf32> to vector<50x256xf32>
    %198 = arith.addf %195, %197 : vector<50x256xf32>
    %199 = vector.broadcast %51 : vector<50x1xf32> to vector<50x256xf32>
    %200 = arith.mulf %199, %198 : vector<50x256xf32>
    %201 = arith.addf %200, %52 : vector<50x256xf32>
    %202 = arith.negf %201 : vector<50x256xf32>
    %203 = math.exp %202 : vector<50x256xf32>
    %cst_119 = arith.constant 1.000000e+00 : f32
    %204 = vector.broadcast %cst_119 : f32 to vector<50x256xf32>
    %205 = arith.addf %204, %203 : vector<50x256xf32>
    %206 = arith.divf %204, %205 : vector<50x256xf32>
    %207 = vector.broadcast %53 : vector<1x256xf32> to vector<50x256xf32>
    %208 = arith.mulf %206, %207 : vector<50x256xf32>
    %cst_120 = arith.constant dense<0.000000e+00> : vector<50xf32>
    %209 = vector.multi_reduction <add>, %208, %cst_120 [1] : vector<50x256xf32> to vector<50xf32>
    %210 = vector.shape_cast %209 : vector<50xf32> to vector<50x1xf32>
    %211 = vector.broadcast %54 : vector<1x1xf32> to vector<50x1xf32>
    %212 = arith.addf %210, %211 : vector<50x1xf32>
    %c200_121 = arith.constant 200 : index
    %c0_122 = arith.constant 0 : index
    %213 = vector.load %arg11[%c200_121, %c0_122] : memref<400x1xf32, #tpu.memory_space<vmem>>, vector<50x1xf32>
    tpu.vector_store %arg11[%c200_121, %c0_122], %212 {strides = array<i32>} : memref<400x1xf32, #tpu.memory_space<vmem>>, vector<50x1xf32>,
    %cst_123 = arith.constant dense<0xFF800000> : vector<1xf32>
    %214 = vector.multi_reduction <maximumf>, %212, %cst_123 [0] : vector<50x1xf32> to vector<1xf32>
    %215 = vector.shape_cast %214 : vector<1xf32> to vector<1x1xf32>
    %216 = vector.broadcast %215 : vector<1x1xf32> to vector<50x1xf32>
    %217 = arith.subf %212, %216 : vector<50x1xf32>
    %218 = math.exp %217 : vector<50x1xf32>
    %cst_124 = arith.constant dense<0.000000e+00> : vector<1xf32>
    %219 = vector.multi_reduction <add>, %218, %cst_124 [0] : vector<50x1xf32> to vector<1xf32>
    %220 = vector.shape_cast %219 : vector<1xf32> to vector<1x1xf32>
    %221 = vector.broadcast %220 : vector<1x1xf32> to vector<50x1xf32>
    %222 = arith.divf %218, %221 : vector<50x1xf32>
    %c200_125 = arith.constant 200 : index
    %c0_126 = arith.constant 0 : index
    %223 = vector.load %arg12[%c200_125, %c0_126] : memref<400x1xf32, #tpu.memory_space<vmem>>, vector<50x1xf32>
    tpu.vector_store %arg12[%c200_125, %c0_126], %222 {strides = array<i32>} : memref<400x1xf32, #tpu.memory_space<vmem>>, vector<50x1xf32>,
    %c200_127 = arith.constant 200 : index
    %c0_128 = arith.constant 0 : index
    %224 = vector.load %arg2[%c200_127, %c0_128] : memref<400x32xf32, #tpu.memory_space<vmem>>, vector<50x32xf32>
    %225 = vector.broadcast %222 : vector<50x1xf32> to vector<50x32xf32>
    %226 = arith.mulf %225, %224 : vector<50x32xf32>
    %cst_129 = arith.constant dense<0.000000e+00> : vector<32xf32>
    %227 = vector.multi_reduction <add>, %226, %cst_129 [0] : vector<50x32xf32> to vector<32xf32>
    %228 = vector.shape_cast %227 : vector<32xf32> to vector<1x32xf32>
    %c4_130 = arith.constant 4 : index
    %c0_131 = arith.constant 0 : index
    %229 = vector.load %arg10[%c4_130, %c0_131] : memref<8x32xf32, #tpu.memory_space<vmem>>, vector<1x32xf32>
    tpu.vector_store %arg10[%c4_130, %c0_131], %228 {strides = array<i32>} : memref<8x32xf32, #tpu.memory_space<vmem>>, vector<1x32xf32>,
    %c250_132 = arith.constant 250 : index
    %c0_133 = arith.constant 0 : index
    %230 = vector.load %arg14[%c250_132, %c0_133] : memref<400x256xf32, #tpu.memory_space<vmem>>, vector<50x256xf32>
    %231 = vector.extract_strided_slice %50 {offsets = [5, 0], sizes = [1, 256], strides = [1, 1]} : vector<8x256xf32> to vector<1x256xf32>
    %232 = vector.broadcast %231 : vector<1x256xf32> to vector<50x256xf32>
    %233 = arith.addf %230, %232 : vector<50x256xf32>
    %234 = vector.broadcast %51 : vector<50x1xf32> to vector<50x256xf32>
    %235 = arith.mulf %234, %233 : vector<50x256xf32>
    %236 = arith.addf %235, %52 : vector<50x256xf32>
    %237 = arith.negf %236 : vector<50x256xf32>
    %238 = math.exp %237 : vector<50x256xf32>
    %cst_134 = arith.constant 1.000000e+00 : f32
    %239 = vector.broadcast %cst_134 : f32 to vector<50x256xf32>
    %240 = arith.addf %239, %238 : vector<50x256xf32>
    %241 = arith.divf %239, %240 : vector<50x256xf32>
    %242 = vector.broadcast %53 : vector<1x256xf32> to vector<50x256xf32>
    %243 = arith.mulf %241, %242 : vector<50x256xf32>
    %cst_135 = arith.constant dense<0.000000e+00> : vector<50xf32>
    %244 = vector.multi_reduction <add>, %243, %cst_135 [1] : vector<50x256xf32> to vector<50xf32>
    %245 = vector.shape_cast %244 : vector<50xf32> to vector<50x1xf32>
    %246 = vector.broadcast %54 : vector<1x1xf32> to vector<50x1xf32>
    %247 = arith.addf %245, %246 : vector<50x1xf32>
    %c250_136 = arith.constant 250 : index
    %c0_137 = arith.constant 0 : index
    %248 = vector.load %arg11[%c250_136, %c0_137] : memref<400x1xf32, #tpu.memory_space<vmem>>, vector<50x1xf32>
    tpu.vector_store %arg11[%c250_136, %c0_137], %247 {strides = array<i32>} : memref<400x1xf32, #tpu.memory_space<vmem>>, vector<50x1xf32>,
    %cst_138 = arith.constant dense<0xFF800000> : vector<1xf32>
    %249 = vector.multi_reduction <maximumf>, %247, %cst_138 [0] : vector<50x1xf32> to vector<1xf32>
    %250 = vector.shape_cast %249 : vector<1xf32> to vector<1x1xf32>
    %251 = vector.broadcast %250 : vector<1x1xf32> to vector<50x1xf32>
    %252 = arith.subf %247, %251 : vector<50x1xf32>
    %253 = math.exp %252 : vector<50x1xf32>
    %cst_139 = arith.constant dense<0.000000e+00> : vector<1xf32>
    %254 = vector.multi_reduction <add>, %253, %cst_139 [0] : vector<50x1xf32> to vector<1xf32>
    %255 = vector.shape_cast %254 : vector<1xf32> to vector<1x1xf32>
    %256 = vector.broadcast %255 : vector<1x1xf32> to vector<50x1xf32>
    %257 = arith.divf %253, %256 : vector<50x1xf32>
    %c250_140 = arith.constant 250 : index
    %c0_141 = arith.constant 0 : index
    %258 = vector.load %arg12[%c250_140, %c0_141] : memref<400x1xf32, #tpu.memory_space<vmem>>, vector<50x1xf32>
    tpu.vector_store %arg12[%c250_140, %c0_141], %257 {strides = array<i32>} : memref<400x1xf32, #tpu.memory_space<vmem>>, vector<50x1xf32>,
    %c250_142 = arith.constant 250 : index
    %c0_143 = arith.constant 0 : index
    %259 = vector.load %arg2[%c250_142, %c0_143] : memref<400x32xf32, #tpu.memory_space<vmem>>, vector<50x32xf32>
    %260 = vector.broadcast %257 : vector<50x1xf32> to vector<50x32xf32>
    %261 = arith.mulf %260, %259 : vector<50x32xf32>
    %cst_144 = arith.constant dense<0.000000e+00> : vector<32xf32>
    %262 = vector.multi_reduction <add>, %261, %cst_144 [0] : vector<50x32xf32> to vector<32xf32>
    %263 = vector.shape_cast %262 : vector<32xf32> to vector<1x32xf32>
    %c5_145 = arith.constant 5 : index
    %c0_146 = arith.constant 0 : index
    %264 = vector.load %arg10[%c5_145, %c0_146] : memref<8x32xf32, #tpu.memory_space<vmem>>, vector<1x32xf32>
    tpu.vector_store %arg10[%c5_145, %c0_146], %263 {strides = array<i32>} : memref<8x32xf32, #tpu.memory_space<vmem>>, vector<1x32xf32>,
    %c300_147 = arith.constant 300 : index
    %c0_148 = arith.constant 0 : index
    %265 = vector.load %arg14[%c300_147, %c0_148] : memref<400x256xf32, #tpu.memory_space<vmem>>, vector<50x256xf32>
    %266 = vector.extract_strided_slice %50 {offsets = [6, 0], sizes = [1, 256], strides = [1, 1]} : vector<8x256xf32> to vector<1x256xf32>
    %267 = vector.broadcast %266 : vector<1x256xf32> to vector<50x256xf32>
    %268 = arith.addf %265, %267 : vector<50x256xf32>
    %269 = vector.broadcast %51 : vector<50x1xf32> to vector<50x256xf32>
    %270 = arith.mulf %269, %268 : vector<50x256xf32>
    %271 = arith.addf %270, %52 : vector<50x256xf32>
    %272 = arith.negf %271 : vector<50x256xf32>
    %273 = math.exp %272 : vector<50x256xf32>
    %cst_149 = arith.constant 1.000000e+00 : f32
    %274 = vector.broadcast %cst_149 : f32 to vector<50x256xf32>
    %275 = arith.addf %274, %273 : vector<50x256xf32>
    %276 = arith.divf %274, %275 : vector<50x256xf32>
    %277 = vector.broadcast %53 : vector<1x256xf32> to vector<50x256xf32>
    %278 = arith.mulf %276, %277 : vector<50x256xf32>
    %cst_150 = arith.constant dense<0.000000e+00> : vector<50xf32>
    %279 = vector.multi_reduction <add>, %278, %cst_150 [1] : vector<50x256xf32> to vector<50xf32>
    %280 = vector.shape_cast %279 : vector<50xf32> to vector<50x1xf32>
    %281 = vector.broadcast %54 : vector<1x1xf32> to vector<50x1xf32>
    %282 = arith.addf %280, %281 : vector<50x1xf32>
    %c300_151 = arith.constant 300 : index
    %c0_152 = arith.constant 0 : index
    %283 = vector.load %arg11[%c300_151, %c0_152] : memref<400x1xf32, #tpu.memory_space<vmem>>, vector<50x1xf32>
    tpu.vector_store %arg11[%c300_151, %c0_152], %282 {strides = array<i32>} : memref<400x1xf32, #tpu.memory_space<vmem>>, vector<50x1xf32>,
    %cst_153 = arith.constant dense<0xFF800000> : vector<1xf32>
    %284 = vector.multi_reduction <maximumf>, %282, %cst_153 [0] : vector<50x1xf32> to vector<1xf32>
    %285 = vector.shape_cast %284 : vector<1xf32> to vector<1x1xf32>
    %286 = vector.broadcast %285 : vector<1x1xf32> to vector<50x1xf32>
    %287 = arith.subf %282, %286 : vector<50x1xf32>
    %288 = math.exp %287 : vector<50x1xf32>
    %cst_154 = arith.constant dense<0.000000e+00> : vector<1xf32>
    %289 = vector.multi_reduction <add>, %288, %cst_154 [0] : vector<50x1xf32> to vector<1xf32>
    %290 = vector.shape_cast %289 : vector<1xf32> to vector<1x1xf32>
    %291 = vector.broadcast %290 : vector<1x1xf32> to vector<50x1xf32>
    %292 = arith.divf %288, %291 : vector<50x1xf32>
    %c300_155 = arith.constant 300 : index
    %c0_156 = arith.constant 0 : index
    %293 = vector.load %arg12[%c300_155, %c0_156] : memref<400x1xf32, #tpu.memory_space<vmem>>, vector<50x1xf32>
    tpu.vector_store %arg12[%c300_155, %c0_156], %292 {strides = array<i32>} : memref<400x1xf32, #tpu.memory_space<vmem>>, vector<50x1xf32>,
    %c300_157 = arith.constant 300 : index
    %c0_158 = arith.constant 0 : index
    %294 = vector.load %arg2[%c300_157, %c0_158] : memref<400x32xf32, #tpu.memory_space<vmem>>, vector<50x32xf32>
    %295 = vector.broadcast %292 : vector<50x1xf32> to vector<50x32xf32>
    %296 = arith.mulf %295, %294 : vector<50x32xf32>
    %cst_159 = arith.constant dense<0.000000e+00> : vector<32xf32>
    %297 = vector.multi_reduction <add>, %296, %cst_159 [0] : vector<50x32xf32> to vector<32xf32>
    %298 = vector.shape_cast %297 : vector<32xf32> to vector<1x32xf32>
    %c6_160 = arith.constant 6 : index
    %c0_161 = arith.constant 0 : index
    %299 = vector.load %arg10[%c6_160, %c0_161] : memref<8x32xf32, #tpu.memory_space<vmem>>, vector<1x32xf32>
    tpu.vector_store %arg10[%c6_160, %c0_161], %298 {strides = array<i32>} : memref<8x32xf32, #tpu.memory_space<vmem>>, vector<1x32xf32>,
    %c350_162 = arith.constant 350 : index
    %c0_163 = arith.constant 0 : index
    %300 = vector.load %arg14[%c350_162, %c0_163] : memref<400x256xf32, #tpu.memory_space<vmem>>, vector<50x256xf32>
    %301 = vector.extract_strided_slice %50 {offsets = [7, 0], sizes = [1, 256], strides = [1, 1]} : vector<8x256xf32> to vector<1x256xf32>
    %302 = vector.broadcast %301 : vector<1x256xf32> to vector<50x256xf32>
    %303 = arith.addf %300, %302 : vector<50x256xf32>
    %304 = vector.broadcast %51 : vector<50x1xf32> to vector<50x256xf32>
    %305 = arith.mulf %304, %303 : vector<50x256xf32>
    %306 = arith.addf %305, %52 : vector<50x256xf32>
    %307 = arith.negf %306 : vector<50x256xf32>
    %308 = math.exp %307 : vector<50x256xf32>
    %cst_164 = arith.constant 1.000000e+00 : f32
    %309 = vector.broadcast %cst_164 : f32 to vector<50x256xf32>
    %310 = arith.addf %309, %308 : vector<50x256xf32>
    %311 = arith.divf %309, %310 : vector<50x256xf32>
    %312 = vector.broadcast %53 : vector<1x256xf32> to vector<50x256xf32>
    %313 = arith.mulf %311, %312 : vector<50x256xf32>
    %cst_165 = arith.constant dense<0.000000e+00> : vector<50xf32>
    %314 = vector.multi_reduction <add>, %313, %cst_165 [1] : vector<50x256xf32> to vector<50xf32>
    %315 = vector.shape_cast %314 : vector<50xf32> to vector<50x1xf32>
    %316 = vector.broadcast %54 : vector<1x1xf32> to vector<50x1xf32>
    %317 = arith.addf %315, %316 : vector<50x1xf32>
    %c350_166 = arith.constant 350 : index
    %c0_167 = arith.constant 0 : index
    %318 = vector.load %arg11[%c350_166, %c0_167] : memref<400x1xf32, #tpu.memory_space<vmem>>, vector<50x1xf32>
    tpu.vector_store %arg11[%c350_166, %c0_167], %317 {strides = array<i32>} : memref<400x1xf32, #tpu.memory_space<vmem>>, vector<50x1xf32>,
    %cst_168 = arith.constant dense<0xFF800000> : vector<1xf32>
    %319 = vector.multi_reduction <maximumf>, %317, %cst_168 [0] : vector<50x1xf32> to vector<1xf32>
    %320 = vector.shape_cast %319 : vector<1xf32> to vector<1x1xf32>
    %321 = vector.broadcast %320 : vector<1x1xf32> to vector<50x1xf32>
    %322 = arith.subf %317, %321 : vector<50x1xf32>
    %323 = math.exp %322 : vector<50x1xf32>
    %cst_169 = arith.constant dense<0.000000e+00> : vector<1xf32>
    %324 = vector.multi_reduction <add>, %323, %cst_169 [0] : vector<50x1xf32> to vector<1xf32>
    %325 = vector.shape_cast %324 : vector<1xf32> to vector<1x1xf32>
    %326 = vector.broadcast %325 : vector<1x1xf32> to vector<50x1xf32>
    %327 = arith.divf %323, %326 : vector<50x1xf32>
    %c350_170 = arith.constant 350 : index
    %c0_171 = arith.constant 0 : index
    %328 = vector.load %arg12[%c350_170, %c0_171] : memref<400x1xf32, #tpu.memory_space<vmem>>, vector<50x1xf32>
    tpu.vector_store %arg12[%c350_170, %c0_171], %327 {strides = array<i32>} : memref<400x1xf32, #tpu.memory_space<vmem>>, vector<50x1xf32>,
    %c350_172 = arith.constant 350 : index
    %c0_173 = arith.constant 0 : index
    %329 = vector.load %arg2[%c350_172, %c0_173] : memref<400x32xf32, #tpu.memory_space<vmem>>, vector<50x32xf32>
    %330 = vector.broadcast %327 : vector<50x1xf32> to vector<50x32xf32>
    %331 = arith.mulf %330, %329 : vector<50x32xf32>
    %cst_174 = arith.constant dense<0.000000e+00> : vector<32xf32>
    %332 = vector.multi_reduction <add>, %331, %cst_174 [0] : vector<50x32xf32> to vector<32xf32>
    %333 = vector.shape_cast %332 : vector<32xf32> to vector<1x32xf32>
    %c7_175 = arith.constant 7 : index
    %c0_176 = arith.constant 0 : index
    %334 = vector.load %arg10[%c7_175, %c0_176] : memref<8x32xf32, #tpu.memory_space<vmem>>, vector<1x32xf32>
    tpu.vector_store %arg10[%c7_175, %c0_176], %333 {strides = array<i32>} : memref<8x32xf32, #tpu.memory_space<vmem>>, vector<1x32xf32>,
    return
  }
  func.func @transform_0(%arg0: i32) -> (i32, i32) {
    %c0_i32 = arith.constant 0 : i32
    %c0_i32_0 = arith.constant 0 : i32
    return %arg0, %c0_i32 : i32, i32
  }
  func.func @transform_1(%arg0: i32) -> (i32, i32) {
    %c0_i32 = arith.constant 0 : i32
    %c0_i32_0 = arith.constant 0 : i32
    return %arg0, %c0_i32 : i32, i32
  }
  func.func @transform_2(%arg0: i32) -> (i32, i32) {
    %c0_i32 = arith.constant 0 : i32
    %c0_i32_0 = arith.constant 0 : i32
    %c0_i32_1 = arith.constant 0 : i32
    return %c0_i32, %c0_i32_0 : i32, i32
  }
  func.func @transform_3(%arg0: i32) -> (i32, i32) {
    %c0_i32 = arith.constant 0 : i32
    %c0_i32_0 = arith.constant 0 : i32
    %c0_i32_1 = arith.constant 0 : i32
    return %c0_i32, %c0_i32_0 : i32, i32
  }
  func.func @transform_4(%arg0: i32) -> (i32, i32) {
    %c0_i32 = arith.constant 0 : i32
    %c0_i32_0 = arith.constant 0 : i32
    %c0_i32_1 = arith.constant 0 : i32
    return %c0_i32, %c0_i32_0 : i32, i32
  }
  func.func @transform_5(%arg0: i32) -> (i32, i32) {
    %c0_i32 = arith.constant 0 : i32
    %c0_i32_0 = arith.constant 0 : i32
    %c0_i32_1 = arith.constant 0 : i32
    return %c0_i32, %c0_i32_0 : i32, i32
  }
  func.func @transform_6(%arg0: i32) -> (i32, i32) {
    %c0_i32 = arith.constant 0 : i32
    %c0_i32_0 = arith.constant 0 : i32
    %c0_i32_1 = arith.constant 0 : i32
    return %c0_i32, %c0_i32_0 : i32, i32
  }
  func.func @transform_7(%arg0: i32) -> (i32, i32) {
    %c0_i32 = arith.constant 0 : i32
    %c0_i32_0 = arith.constant 0 : i32
    %c0_i32_1 = arith.constant 0 : i32
    return %c0_i32, %c0_i32_0 : i32, i32
  }
  func.func @transform_8(%arg0: i32) -> (i32, i32) {
    %c0_i32 = arith.constant 0 : i32
    %c0_i32_0 = arith.constant 0 : i32
    %c0_i32_1 = arith.constant 0 : i32
    return %c0_i32, %c0_i32_0 : i32, i32
  }
  func.func @transform_9(%arg0: i32) -> (i32, i32) {
    %c0_i32 = arith.constant 0 : i32
    %c0_i32_0 = arith.constant 0 : i32
    return %arg0, %c0_i32 : i32, i32
  }
  func.func @transform_10(%arg0: i32) -> (i32, i32) {
    %c0_i32 = arith.constant 0 : i32
    %c0_i32_0 = arith.constant 0 : i32
    return %arg0, %c0_i32 : i32, i32
  }
  func.func @transform_11(%arg0: i32) -> (i32, i32) {
    %c0_i32 = arith.constant 0 : i32
    %c0_i32_0 = arith.constant 0 : i32
    return %arg0, %c0_i32 : i32, i32
  }
}

</mosaic_0001>

<bundles_post_ra>
// kernel: tpu_custom_call.1
= control target key start
LH: loop header
LB: loop body
LE: loop exit
PB: predicated region body
PF: predicated region fallthrough
CT: control target
= control target key end

     0   :  { %s12513_s0 = inlined_call_operand.vmem [shape: f32[24,32], index: 0, kind: input, shape index: {}]   ;;  %s12514_s1 = inlined_call_operand.vmem [shape: f32[1200,32], index: 1, kind: input, shape index: {}]   ;;  %s12515_s2 = inlined_call_operand.vmem [shape: f32[32,256], index: 2, kind: input, shape index: {}]   ;;  %s12516_s3 = inlined_call_operand.vmem [shape: f32[32,256], index: 3, kind: input, shape index: {}]   ;;  %s12517_s4 = inlined_call_operand.vmem [shape: f32[32,256], index: 4, kind: input, shape index: {}]   ;;  %s12518_s5 = inlined_call_operand.vmem [shape: f32[50,1], index: 5, kind: input, shape index: {}]   ;;  %s12519_s6 = inlined_call_operand.vmem [shape: f32[50,256], index: 6, kind: input, shape index: {}]   ;;  %s12520_s7 = inlined_call_operand.vmem [shape: f32[1,256], index: 7, kind: input, shape index: {}]   ;;  %s12521_s8 = inlined_call_operand.<no memory space> [shape: f32[1,1], index: 8, kind: input, shape index: {}]   ;;  %s12522_s9 = inlined_call_operand.hbm [shape: f32[24,32], index: 9, kind: output, shape index: {0}]   ;;  %s12523_s10 = inlined_call_operand.vmem [shape: f32[1200,1], index: 10, kind: output, shape index: {1}]   ;;  %s12524_s11 = inlined_call_operand.vmem [shape: f32[1200,1], index: 11, kind: output, shape index: {2}]  }
   0x1   :  { %12578 = sst [smem:[#allocation17_spill]] %s12516_s3  ;;  %v17_v0 = vstv %s12521_s8 }
   0x2   :  { %18 = vst [vmem:[#allocation4] sm:$0x1] %v17_v0 }
   0x3   :  { %19 = vsyncpa [#allocation6], 0 }
   0x4   :  { %21 = vsyncpa [#allocation6 + $0x1], 0  ;;  %s7783_s19 = smov 0   ;;  %s7785_s20 = smov 0  }
   0x5   :  { %s7787_s21 = smov 0   ;;  %s7789_s22 = smov 0  }
   0x6 LB: > { %s7804_s8 = sadd.s32 4294967295, %s7717_s22   ;;  %s6654_s23 = sadd.s32 4294967294, %s7717_s22   ;;  %s7717_s22 = sphi %s7789_s22, %s12884_s22   ;;  %s7713_s21 = sphi %s7787_s21, %s12883_s21   ;;  %s7709_s20 = sphi %s7785_s20, %s12882_s20   ;;  %s7705_s19 = sphi %s7783_s19, %s12881_s19  }
   0x7   : > { %s7808_s24 = sadd.s32 1, %s7717_s22   ;;  %s233_s25 = sadd.s32 1, %s7713_s21 }
   0x8   : > { %s230_s26 = ssub.s32 %s7717_s22, %s7808_s24  ;;  %p243_p0 = scmp.ne.s32.totalorder %s7713_s21, %s7709_s20 }
   0x9   : > { %p231_p1 = scmp.eq.s32.totalorder %s230_s26, 0  ;;  %p244_p2 = scmp.eq.s32.totalorder %s7804_s8, 2 }
   0xa   : > { %p249_p3 = scmp.ne.s32.totalorder %s7709_s20, %s7705_s19  ;;  %p250_p4 = scmp.eq.s32.totalorder %s6654_s23, 2 }
   0xb   : > { %s7819_s27 = scalar_select %p231_p1, %s7713_s21, %s233_s25  }
   0xc   : > { %p7821_p5 = por %p244_p2, %p243_p0  ;;  %p7825_p6 = por %p250_p4, %p249_p3 }
   0xd   : > { %12579 = sst [smem:[#allocation8_spill]] %s7819_s27  ;;  %p6657_p7 = scmp.ge.s32.totalorder %s7717_s22, 1 }
   0xe   : > { %p357_p8 = scmp.lt.s32.totalorder %s7717_s22, 4 }
  0x10   : > { %p358_p9 = pnand %p6657_p7, %p357_p8 }
  0x12   : > { %361 = sbr.rel (%p358_p9) target bundleno = 1698 (0x6a2), region = 56 }
  0x17   : > { %s12582_s3 = sld [smem:[#allocation17_spill]]  ;;  %s415_s17 = smul.u32 50, %s7804_s8  ;;  %v733_v7 = vld [vmem:[%s12517_s4 + $0x30] sm:$0xff]  ;;  %v734_v8 = vld [vmem:[%s12517_s4 + $0x38] sm:$0xff]  ;;  %v731_v9 = vld [vmem:[%s12517_s4 + $0x20] sm:$0xff]  ;;  %vm12526_vm0 = vcmask 261120  }
  0x18   : > { %p411_p10 = scmp.lt.s32.totalorder %s7804_s8, 2  ;;  %v732_v10 = vld [vmem:[%s12517_s4 + $0x28] sm:$0xff]  ;;  %897 = vmatpush.msra.mxu0 %v733_v7  ;;  %1064 = vmatpush.msra.mxu1 %v734_v8  ;;  %v729_v13 = vld [vmem:[%s12517_s4 + $0x10] sm:$0xff]  ;;  %v730_v14 = vld [vmem:[%s12517_s4 + $0x18] sm:$0xff]  ;;  %vm12525_vm1 = vcmask 254976  }
  0x19   : > { %p416_p11 = scmp.lt.s32.totalorder %s415_s17, 149  ;;  %v727_v15 = vld [vmem:[%s12517_s4] sm:$0xff]  ;;  %v728_v16 = vld [vmem:[%s12517_s4 + $0x8] sm:$0xff]  ;;  %v1810_v17 = vld [vmem:[%s12515_s2 + $0x30] sm:$0xff] }
  0x1a   : > { %s412_s30 = scalar_select %p411_p10, %s7804_s8, 2  ;;  %898 = vmatpush.msra.mxu0 %v731_v9  ;;  %1065 = vmatpush.msra.mxu1 %v732_v10  ;;  %v1811_v18 = vld [vmem:[%s12515_s2 + $0x38] sm:$0xff] }
  0x1b   : > { %s12886_s17 = smov (!%p416_p11, %s415_s17), 149 }
  0x1c   : > { %s6659_s14 = sshll.u32 %s412_s30, 3  ;;  %s7882_s15 = sshll.u32 %s12886_s17, 3  ;;  %899 = vmatpush.msra.mxu0 %v729_v13  ;;  %1066 = vmatpush.msra.mxu1 %v730_v14 }
  0x1d   : > { %v675_v1 = vld [vmem:[%s12582_s3 + $0x30] sm:$0xff]  ;;  %v676_v2 = vld [vmem:[%s12582_s3 + $0x38] sm:$0xff]  ;;  %v673_v3 = vld [vmem:[%s12582_s3 + $0x20] sm:$0xff]  ;;  %s7899_s12 = scalar_lea.vmem %s12514_s1, %s7882_s15  ;;  %s10831_s13 = scalar_lea.vmem %s12523_s10, %s7882_s15 }
  0x1e   : > { %1381 = vmatpush.msra.mxu2 %v675_v1  ;;  %1548 = vmatpush.msra.mxu3 %v676_v2  ;;  %v674_v4 = vld [vmem:[%s12582_s3 + $0x28] sm:$0xff]  ;;  %v671_v5 = vld [vmem:[%s12582_s3 + $0x10] sm:$0xff]  ;;  %v672_v6 = vld [vmem:[%s12582_s3 + $0x18] sm:$0xff]  ;;  %s11788_s17 = scalar_lea.vmem %s12524_s11, %s7882_s15  ;;  %s394_s15 = sand.u32 1, %s7709_s20  }
  0x1f   : > { %v669_v11 = vld [vmem:[%s12582_s3] sm:$0xff]  ;;  %v670_v12 = vld [vmem:[%s12582_s3 + $0x8] sm:$0xff]  ;;  %s7887_s3 = scalar_lea.vmem %s12513_s0, %s6659_s14  ;;  %v621_v22 = vld [vmem:[%s7899_s12 + $0x10] sm:$0xff]  ;;  %900 = vmatpush.msra.mxu0 %v727_v15  ;;  %1067 = vmatpush.msra.mxu1 %v728_v16 }
  0x20   : > { %1382 = vmatpush.msra.mxu2 %v673_v3  ;;  %1549 = vmatpush.msra.mxu3 %v674_v4  ;;  %v7024_v19 = vld [vmem:[%s7887_s3] ss:$0 sm:$0xff]  ;;  %v620_v21 = vld [vmem:[%s7899_s12 + $0x8] sm:$0xff]  ;;  %v622_v26 = vld [vmem:[%s7899_s12 + $0x18] sm:$0xff] }
  0x21   : > { %v619_v20 = vld [vmem:[%s7899_s12] sm:$0xff]  ;;  %v443_v24 = vmul.f32 %v7024_v19, %v620_v21  ;;  %v444_v25 = vmul.f32 %v7024_v19, %v621_v22  ;;  %v445_v28 = vmul.f32 %v7024_v19, %v622_v26  ;;  %1827 = vmatpush.msrb.mxu0 %v1810_v17  ;;  %1847 = vmatpush.msrb.mxu1 %v1811_v18  ;;  %v624_v30 = vld [vmem:[%s7899_s12 + $0x28] sm:$0xff]  ;;  %v440_v35 = vld [vmem:[%s7899_s12 + $0x30] sm:$0x3] }
  0x22   : > { %1383 = vmatpush.msra.mxu2 %v671_v5  ;;  %1550 = vmatpush.msra.mxu3 %v672_v6  ;;  %v442_v23 = vmul.f32 %v7024_v19, %v619_v20  ;;  %v623_v27 = vld [vmem:[%s7899_s12 + $0x20] sm:$0xff]  ;;  %v447_v31 = vmul.f32 %v7024_v19, %v624_v30  ;;  %v459_v36 = vld [vmem:[%s7899_s12 + $0x32] sm:$0xff]  ;;  %v448_v37 = vmul.f32 %v7024_v19, %v440_v35  ;;  %v462_v46 = vld [vmem:[%s7899_s12 + $0x4a] sm:$0xff] }
  0x23   : > { %v446_v29 = vmul.f32 %v7024_v19, %v623_v27  ;;  %451 = vst.msk [vmem:[#allocation2 + $0x8] sm:$0xff] %vm12526_vm0, %v443_v24  ;;  %v7025_v33 = vld [vmem:[%s7887_s3 + $0x1] ss:$0 sm:$0xff]  ;;  %v461_v43 = vld [vmem:[%s7899_s12 + $0x42] sm:$0xff]  ;;  %v625_v48 = vld [vmem:[%s7899_s12 + $0x30] sm:$0xff] }
  0x24   : > { %1384 = vmatpush.msra.mxu2 %v669_v11  ;;  %1551 = vmatpush.msra.mxu3 %v670_v12  ;;  %450 = vst.msk [vmem:[#allocation2] sm:$0xff] %vm12526_vm0, %v442_v23  ;;  %v467_v38 = vmul.f32 %v7025_v33, %v459_v36  ;;  %v460_v40 = vld [vmem:[%s7899_s12 + $0x3a] sm:$0xff]  ;;  %v469_v44 = vmul.f32 %v7025_v33, %v461_v43  ;;  %v463_v50 = vld [vmem:[%s7899_s12 + $0x52] sm:$0xff]  ;;  %v7963_v57 = vld [vmem:[%s7887_s3 + $0x2] ss:$0 sm:$0xff] }
  0x25   : > { %6763 = vmatmul.msk.f32.vlgmr.msra.gmra.mxu2 %vm12526_vm0, %v619_v20  ;;  %6813 = vmatmul.msk.f32.vlgmr.msra.gmra.mxu3 %vm12526_vm0, %v619_v20  ;;  %452 = vst.msk [vmem:[#allocation2 + $0x10] sm:$0xff] %vm12526_vm0, %v444_v25  ;;  %v468_v41 = vmul.f32 %v7025_v33, %v460_v40  ;;  %v470_v47 = vmul.f32 %v7025_v33, %v462_v46  ;;  %v626_v52 = vld [vmem:[%s7899_s12 + $0x38] sm:$0xff]  ;;  %v627_v56 = vld [vmem:[%s7899_s12 + $0x40] sm:$0xff]  ;;  %v628_v63 = vld [vmem:[%s7899_s12 + $0x48] sm:$0xff] }
  0x26   : > { %453 = vst.msk [vmem:[#allocation2 + $0x18] sm:$0xff] %vm12526_vm0, %v445_v28  ;;  %v471_v51 = vmul.f32 %v7025_v33, %v463_v50  ;;  %v464_v54 = vld [vmem:[%s7899_s12 + $0x5a] sm:$0xff]  ;;  %v465_v59 = vld [vmem:[%s7899_s12 + $0x62] sm:$0x3]  ;;  %v482_v60 = vld [vmem:[%s7899_s12 + $0x64] sm:$0xff] }
  0x27   : > { %454 = vst.msk [vmem:[#allocation2 + $0x20] sm:$0xff] %vm12526_vm0, %v446_v29  ;;  %v472_v55 = vmul.f32 %v7025_v33, %v464_v54  ;;  %v473_v61 = vmul.f32 %v7025_v33, %v465_v59  ;;  %v490_v62 = vmul.f32 %v7963_v57, %v482_v60  ;;  %v483_v1 = vld [vmem:[%s7899_s12 + $0x6c] sm:$0xff]  ;;  %v1808_v3 = vld [vmem:[%s12515_s2 + $0x20] sm:$0xff]  ;;  %v484_v7 = vld [vmem:[%s7899_s12 + $0x74] sm:$0xff] }
  0x28   : > { %455 = vst.msk [vmem:[#allocation2 + $0x28] sm:$0xff] %vm12526_vm0, %v447_v31  ;;  %v491_v2 = vmul.f32 %v7963_v57, %v483_v1  ;;  %1828 = vmatpush.msrb.mxu0 %v1808_v3  ;;  %v1809_v4 = vld [vmem:[%s12515_s2 + $0x28] sm:$0xff]  ;;  %v629_v5 = vld [vmem:[%s7899_s12 + $0x50] sm:$0xff]  ;;  %v492_v8 = vmul.f32 %v7963_v57, %v484_v7  ;;  %v630_v9 = vld [vmem:[%s7899_s12 + $0x58] sm:$0xff] }
  0x29   : > { %457 = vst.msk [vmem:[#allocation2 + $0x30] sm:$0x3] %vm12525_vm1, %v448_v37  ;;  %1848 = vmatpush.msrb.mxu1 %v1809_v4  ;;  %v485_v11 = vld [vmem:[%s7899_s12 + $0x7c] sm:$0xff]  ;;  %v486_v15 = vld [vmem:[%s7899_s12 + $0x84] sm:$0xff]  ;;  %v487_v19 = vld [vmem:[%s7899_s12 + $0x8c] sm:$0xff] }
  0x2a   : > { %v678_v34 = vld [vmem:[#allocation2 + $0x8] sm:$0xff]  ;;  %474 = vst.msk [vmem:[#allocation2 + $0x32] sm:$0xff] %vm12526_vm0, %v467_v38  ;;  %v493_v12 = vmul.f32 %v7963_v57, %v485_v11  ;;  %v631_v13 = vld [vmem:[%s7899_s12 + $0x60] sm:$0xff]  ;;  %v494_v16 = vmul.f32 %v7963_v57, %v486_v15  ;;  %v495_v20 = vmul.f32 %v7963_v57, %v487_v19  ;;  %v488_v24 = vld [vmem:[%s7899_s12 + $0x94] sm:$0x3] }
  0x2b   : > { %v677_v32 = vld [vmem:[#allocation2] sm:$0xff]  ;;  %475 = vst.msk [vmem:[#allocation2 + $0x3a] sm:$0xff] %vm12526_vm0, %v468_v41  ;;  %v632_v17 = vld [vmem:[%s7899_s12 + $0x68] sm:$0xff]  ;;  %v505_v25 = vld [vmem:[%s7899_s12 + $0x96] sm:$0xff] }
  0x2c   : > { %6663 = vmatmul.msk.f32.vlgmr.msra.gmra.mxu0 %vm12526_vm0, %v677_v32  ;;  %6713 = vmatmul.msk.f32.vlgmr.msra.gmra.mxu1 %vm12526_vm0, %v677_v32  ;;  %v679_v39 = vld [vmem:[#allocation2 + $0x10] sm:$0xff]  ;;  %476 = vst.msk [vmem:[#allocation2 + $0x42] sm:$0xff] %vm12526_vm0, %v469_v44  ;;  %v8022_v23 = vld [vmem:[%s7887_s3 + $0x3] ss:$0 sm:$0xff]  ;;  %v634_v28 = vld [vmem:[%s7899_s12 + $0x78] sm:$0xff] }
  0x2d   : > { %6764 = vmatmul.msk.f32.gmra.mxu2 %vm12526_vm0, %v620_v21  ;;  %6814 = vmatmul.msk.f32.gmra.mxu3 %vm12526_vm0, %v620_v21  ;;  %v680_v42 = vld [vmem:[#allocation2 + $0x18] sm:$0xff]  ;;  %477 = vst.msk [vmem:[#allocation2 + $0x4a] sm:$0xff] %vm12526_vm0, %v470_v47  ;;  %v633_v21 = vld [vmem:[%s7899_s12 + $0x70] sm:$0xff]  ;;  %v635_v32 = vld [vmem:[%s7899_s12 + $0x80] sm:$0xff] }
  0x2e   : > { %v681_v45 = vld [vmem:[#allocation2 + $0x20] sm:$0xff]  ;;  %478 = vst.msk [vmem:[#allocation2 + $0x52] sm:$0xff] %vm12526_vm0, %v471_v51  ;;  %v636_v38 = vld [vmem:[%s7899_s12 + $0x88] sm:$0xff]  ;;  %v509_v54 = vld [vmem:[%s7899_s12 + $0xb6] sm:$0xff] }
  0x2f   : > { %v682_v49 = vld [vmem:[#allocation2 + $0x28] sm:$0xff]  ;;  %479 = vst.msk [vmem:[#allocation2 + $0x5a] sm:$0xff] %vm12526_vm0, %v472_v55  ;;  %v517_v55 = vmul.f32 %v8022_v23, %v509_v54  ;;  %v639_v4 = vld [vmem:[%s7899_s12 + $0xa0] sm:$0xff] }
  0x30   : > { %480 = vst.msk [vmem:[#allocation2 + $0x62] sm:$0x3] %vm12525_vm1, %v473_v61  ;;  %v508_v44 = vld [vmem:[%s7899_s12 + $0xae] sm:$0xff] }
  0x31   : > { %v683_v53 = vld [vmem:[#allocation2 + $0x30] sm:$0xff]  ;;  %497 = vst.msk [vmem:[#allocation2 + $0x64] sm:$0xff] %vm12526_vm0, %v490_v62 }
  0x32   : > { %v684_v58 = vld [vmem:[#allocation2 + $0x38] sm:$0xff]  ;;  %498 = vst.msk [vmem:[#allocation2 + $0x6c] sm:$0xff] %vm12526_vm0, %v491_v2 }
  0x33   : > { %v685_v0 = vld [vmem:[#allocation2 + $0x40] sm:$0xff]  ;;  %499 = vst.msk [vmem:[#allocation2 + $0x74] sm:$0xff] %vm12526_vm0, %v492_v8 }
  0x34   : > { %6664 = vmatmul.msk.f32.gmra.mxu0 %vm12526_vm0, %v678_v34  ;;  %6714 = vmatmul.msk.f32.gmra.mxu1 %vm12526_vm0, %v678_v34  ;;  %v686_v6 = vld [vmem:[#allocation2 + $0x48] sm:$0xff]  ;;  %500 = vst.msk [vmem:[#allocation2 + $0x7c] sm:$0xff] %vm12526_vm0, %v493_v12 }
  0x35   : > { %6765 = vmatmul.msk.f32.gmra.mxu2 %vm12526_vm0, %v621_v22  ;;  %6815 = vmatmul.msk.f32.gmra.mxu3 %vm12526_vm0, %v621_v22  ;;  %v687_v10 = vld [vmem:[#allocation2 + $0x50] sm:$0xff]  ;;  %501 = vst.msk [vmem:[#allocation2 + $0x84] sm:$0xff] %vm12526_vm0, %v494_v16  ;;  %v507_v34 = vld [vmem:[%s7899_s12 + $0xa6] sm:$0xff] }
  0x36   : > { %v688_v14 = vld [vmem:[#allocation2 + $0x58] sm:$0xff]  ;;  %502 = vst.msk [vmem:[#allocation2 + $0x8c] sm:$0xff] %vm12526_vm0, %v495_v20  ;;  %v515_v35 = vmul.f32 %v8022_v23, %v507_v34 }
  0x37   : > { %524 = vst.msk [vmem:[#allocation2 + $0xb6] sm:$0xff] %vm12526_vm0, %v517_v55 }
  0x38   : > { %v689_v18 = vld [vmem:[#allocation2 + $0x60] sm:$0xff]  ;;  %522 = vst.msk [vmem:[#allocation2 + $0xa6] sm:$0xff] %vm12526_vm0, %v515_v35  ;;  %v1806_v35 = vld [vmem:[%s12515_s2 + $0x10] sm:$0xff] }
  0x39   : > { %v690_v22 = vld [vmem:[#allocation2 + $0x68] sm:$0xff]  ;;  %1829 = vmatpush.msrb.mxu0 %v1806_v35 }
  0x3a   : > { %v691_v29 = vld [vmem:[#allocation2 + $0x70] sm:$0xff] }
  0x3b   : > { %v692_v33 = vld [vmem:[#allocation2 + $0x78] sm:$0xff] }
  0x3c   : > { %6665 = vmatmul.msk.f32.gmra.mxu0 %vm12526_vm0, %v679_v39  ;;  %6715 = vmatmul.msk.f32.gmra.mxu1 %vm12526_vm0, %v679_v39  ;;  %v693_v41 = vld [vmem:[#allocation2 + $0x80] sm:$0xff] }
  0x3d   : > { %6766 = vmatmul.msk.f32.gmra.mxu2 %vm12526_vm0, %v622_v26  ;;  %6816 = vmatmul.msk.f32.gmra.mxu3 %vm12526_vm0, %v622_v26  ;;  %v496_v26 = vmul.f32 %v7963_v57, %v488_v24  ;;  %v694_v51 = vld [vmem:[#allocation2 + $0x88] sm:$0xff] }
  0x3f   : > { %503 = vst.msk [vmem:[#allocation2 + $0x94] sm:$0x3] %vm12525_vm1, %v496_v26 }
  0x44   : > { %6666 = vmatmul.msk.f32.gmra.mxu0 %vm12526_vm0, %v680_v42  ;;  %6716 = vmatmul.msk.f32.gmra.mxu1 %vm12526_vm0, %v680_v42 }
  0x45   : > { %6767 = vmatmul.msk.f32.gmra.mxu2 %vm12526_vm0, %v623_v27  ;;  %6817 = vmatmul.msk.f32.gmra.mxu3 %vm12526_vm0, %v623_v27  ;;  %v513_v27 = vmul.f32 %v8022_v23, %v505_v25  ;;  %v641_v25 = vld [vmem:[%s7899_s12 + $0xb0] sm:$0xff] }
  0x47   : > { %520 = vst.msk [vmem:[#allocation2 + $0x96] sm:$0xff] %vm12526_vm0, %v513_v27 }
  0x4c   : > { %6667 = vmatmul.msk.f32.gmra.mxu0 %vm12526_vm0, %v681_v45  ;;  %6717 = vmatmul.msk.f32.gmra.mxu1 %vm12526_vm0, %v681_v45  ;;  %v516_v45 = vmul.f32 %v8022_v23, %v508_v44 }
  0x4d   : > { %6768 = vmatmul.msk.f32.gmra.mxu2 %vm12526_vm0, %v624_v30  ;;  %6818 = vmatmul.msk.f32.gmra.mxu3 %vm12526_vm0, %v624_v30  ;;  %v506_v30 = vld [vmem:[%s7899_s12 + $0x9e] sm:$0xff] }
  0x4e   : > { %v514_v31 = vmul.f32 %v8022_v23, %v506_v30  ;;  %523 = vst.msk [vmem:[#allocation2 + $0xae] sm:$0xff] %vm12526_vm0, %v516_v45  ;;  %v695_v61 = vld [vmem:[#allocation2 + $0x90] sm:$0xff] }
  0x50   : > { %521 = vst.msk [vmem:[#allocation2 + $0x9e] sm:$0xff] %vm12526_vm0, %v514_v31  ;;  %v8100_v31 = vld [vmem:[%s7899_s12 + $0xd0] sm:$0xff] }
  0x54   : > { %6668 = vmatmul.msk.f32.gmra.mxu0 %vm12526_vm0, %v682_v49  ;;  %6718 = vmatmul.msk.f32.gmra.mxu1 %vm12526_vm0, %v682_v49 }
  0x55   : > { %6769 = vmatmul.msk.f32.gmra.mxu2 %vm12526_vm0, %v625_v48  ;;  %6819 = vmatmul.msk.f32.gmra.mxu3 %vm12526_vm0, %v625_v48  ;;  %v637_v48 = vld [vmem:[%s7899_s12 + $0x90] sm:$0xff] }
  0x57   : > { %v696_v7 = vld [vmem:[#allocation2 + $0x98] sm:$0xff] }
  0x5c   : > { %6669 = vmatmul.msk.f32.gmra.mxu0 %vm12526_vm0, %v683_v53  ;;  %6719 = vmatmul.msk.f32.gmra.mxu1 %vm12526_vm0, %v683_v53 }
  0x5d   : > { %6770 = vmatmul.msk.f32.gmra.mxu2 %vm12526_vm0, %v626_v52  ;;  %6820 = vmatmul.msk.f32.gmra.mxu3 %vm12526_vm0, %v626_v52 }
  0x64   : > { %6670 = vmatmul.msk.f32.gmra.mxu0 %vm12526_vm0, %v684_v58  ;;  %6720 = vmatmul.msk.f32.gmra.mxu1 %vm12526_vm0, %v684_v58  ;;  %v638_v58 = vld [vmem:[%s7899_s12 + $0x98] sm:$0xff] }
  0x65   : > { %6771 = vmatmul.msk.f32.gmra.mxu2 %vm12526_vm0, %v627_v56  ;;  %6821 = vmatmul.msk.f32.gmra.mxu3 %vm12526_vm0, %v627_v56 }
  0x6c   : > { %6671 = vmatmul.msk.f32.gmra.mxu0 %vm12526_vm0, %v685_v0  ;;  %6721 = vmatmul.msk.f32.gmra.mxu1 %vm12526_vm0, %v685_v0  ;;  %v510_v0 = vld [vmem:[%s7899_s12 + $0xbe] sm:$0xff] }
  0x6d   : > { %6772 = vmatmul.msk.f32.gmra.mxu2 %vm12526_vm0, %v628_v63  ;;  %6822 = vmatmul.msk.f32.gmra.mxu3 %vm12526_vm0, %v628_v63  ;;  %v518_v1 = vmul.f32 %v8022_v23, %v510_v0 }
  0x6f   : > { %525 = vst.msk [vmem:[#allocation2 + $0xbe] sm:$0xff] %vm12526_vm0, %v518_v1 }
  0x74   : > { %6672 = vmatmul.msk.f32.gmra.mxu0 %vm12526_vm0, %v686_v6  ;;  %6722 = vmatmul.msk.f32.gmra.mxu1 %vm12526_vm0, %v686_v6 }
  0x75   : > { %6773 = vmatmul.msk.f32.gmra.mxu2 %vm12526_vm0, %v629_v5  ;;  %6823 = vmatmul.msk.f32.gmra.mxu3 %vm12526_vm0, %v629_v5 }
  0x7c   : > { %6673 = vmatmul.msk.f32.gmra.mxu0 %vm12526_vm0, %v687_v10  ;;  %6723 = vmatmul.msk.f32.gmra.mxu1 %vm12526_vm0, %v687_v10  ;;  %v511_v10 = vld [vmem:[%s7899_s12 + $0xc6] sm:$0x3] }
  0x7d   : > { %6774 = vmatmul.msk.f32.gmra.mxu2 %vm12526_vm0, %v630_v9  ;;  %6824 = vmatmul.msk.f32.gmra.mxu3 %vm12526_vm0, %v630_v9  ;;  %v519_v11 = vmul.f32 %v8022_v23, %v511_v10 }
  0x7f   : > { %526 = vst.msk [vmem:[#allocation2 + $0xc6] sm:$0x3] %vm12525_vm1, %v519_v11 }
  0x84   : > { %6674 = vmatmul.msk.f32.gmra.mxu0 %vm12526_vm0, %v688_v14  ;;  %6724 = vmatmul.msk.f32.gmra.mxu1 %vm12526_vm0, %v688_v14  ;;  %v640_v14 = vld [vmem:[%s7899_s12 + $0xa8] sm:$0xff] }
  0x85   : > { %6775 = vmatmul.msk.f32.gmra.mxu2 %vm12526_vm0, %v631_v13  ;;  %6825 = vmatmul.msk.f32.gmra.mxu3 %vm12526_vm0, %v631_v13 }
  0x8c   : > { %6675 = vmatmul.msk.f32.gmra.mxu0 %vm12526_vm0, %v689_v18  ;;  %6725 = vmatmul.msk.f32.gmra.mxu1 %vm12526_vm0, %v689_v18  ;;  %v8084_v18 = vld [vmem:[%s7887_s3 + $0x4] ss:$0 sm:$0xff] }
  0x8d   : > { %6776 = vmatmul.msk.f32.gmra.mxu2 %vm12526_vm0, %v632_v17  ;;  %6826 = vmatmul.msk.f32.gmra.mxu3 %vm12526_vm0, %v632_v17  ;;  %v697_v17 = vld [vmem:[#allocation2 + $0xa0] sm:$0xff] }
  0x94   : > { %6676 = vmatmul.msk.f32.gmra.mxu0 %vm12526_vm0, %v690_v22  ;;  %6726 = vmatmul.msk.f32.gmra.mxu1 %vm12526_vm0, %v690_v22 }
  0x95   : > { %6777 = vmatmul.msk.f32.gmra.mxu2 %vm12526_vm0, %v633_v21  ;;  %6827 = vmatmul.msk.f32.gmra.mxu3 %vm12526_vm0, %v633_v21  ;;  %v8089_v21 = vld [vmem:[%s7899_s12 + $0xc8] sm:$0xff] }
  0x96   : > { %v536_v22 = vmul.f32 %v8084_v18, %v8089_v21 }
  0x98   : > { %543 = vst.msk [vmem:[#allocation2 + $0xc8] sm:$0xff] %vm12526_vm0, %v536_v22 }
  0x9c   : > { %6677 = vmatmul.msk.f32.gmra.mxu0 %vm12526_vm0, %v691_v29  ;;  %6727 = vmatmul.msk.f32.gmra.mxu1 %vm12526_vm0, %v691_v29 }
  0x9d   : > { %6778 = vmatmul.msk.f32.gmra.mxu2 %vm12526_vm0, %v634_v28  ;;  %6828 = vmatmul.msk.f32.gmra.mxu3 %vm12526_vm0, %v634_v28  ;;  %v698_v28 = vld [vmem:[#allocation2 + $0xa8] sm:$0xff] }
  0xa4   : > { %6678 = vmatmul.msk.f32.gmra.mxu0 %vm12526_vm0, %v692_v33  ;;  %6728 = vmatmul.msk.f32.gmra.mxu1 %vm12526_vm0, %v692_v33 }
  0xa5   : > { %6779 = vmatmul.msk.f32.gmra.mxu2 %vm12526_vm0, %v635_v32  ;;  %6829 = vmatmul.msk.f32.gmra.mxu3 %vm12526_vm0, %v635_v32  ;;  %v537_v32 = vmul.f32 %v8084_v18, %v8100_v31 }
  0xa7   : > { %544 = vst.msk [vmem:[#allocation2 + $0xd0] sm:$0xff] %vm12526_vm0, %v537_v32 }
  0xa8   : > { %v1386_v36 = vpop.f32.mrf.mxu2  ;;  %v1553_v37 = vpop.f32.mrf.mxu3 }
  0xa9   : > { %v902_v39 = vpop.f32.mrf.mxu0  ;;  %v1069_v40 = vpop.f32.mrf.mxu1 }
  0xaa   : > { %v1387_v42 = vadd.f32 %v1386_v36, %v902_v39  ;;  %v1554_v43 = vadd.f32 %v1553_v37, %v1069_v40  ;;  %v1807_v36 = vld [vmem:[%s12515_s2 + $0x18] sm:$0xff]  ;;  %v699_v40 = vld [vmem:[#allocation2 + $0xb0] sm:$0xff] }
  0xab   : > { %1849 = vmatpush.msrb.mxu1 %v1807_v36  ;;  %v642_v37 = vld [vmem:[%s7899_s12 + $0xb8] sm:$0xff] }
  0xac   : > { %1703 = vst [vmem:[#allocation3 + $0x2b0] sm:$0xff] %v1387_v42  ;;  %6679 = vmatmul.msk.f32.gmra.mxu0 %vm12526_vm0, %v693_v41  ;;  %6729 = vmatmul.msk.f32.gmra.mxu1 %vm12526_vm0, %v693_v41 }
  0xad   : > { %6780 = vmatmul.msk.f32.gmra.mxu2 %vm12526_vm0, %v636_v38  ;;  %6830 = vmatmul.msk.f32.gmra.mxu3 %vm12526_vm0, %v636_v38  ;;  %1704 = vst [vmem:[#allocation3 + $0xd0] sm:$0xff] %v1554_v43  ;;  %v8117_v43 = vld [vmem:[%s7899_s12 + $0xd8] sm:$0xff] }
  0xae   : > { %v538_v44 = vmul.f32 %v8084_v18, %v8117_v43 }
  0xb0   : > { %v1389_v46 = vpop.f32.mrf.mxu2  ;;  %v1556_v47 = vpop.f32.mrf.mxu3  ;;  %545 = vst.msk [vmem:[#allocation2 + $0xd8] sm:$0xff] %vm12526_vm0, %v538_v44 }
  0xb1   : > { %v905_v49 = vpop.f32.mrf.mxu0  ;;  %v1072_v50 = vpop.f32.mrf.mxu1 }
  0xb2   : > { %v1390_v52 = vadd.f32 %v1389_v46, %v905_v49  ;;  %v1557_v53 = vadd.f32 %v1556_v47, %v1072_v50  ;;  %v643_v47 = vld [vmem:[%s7899_s12 + $0xc0] sm:$0xff]  ;;  %v700_v50 = vld [vmem:[#allocation2 + $0xb8] sm:$0xff] }
  0xb4   : > { %1705 = vst [vmem:[#allocation3 + $0x10] sm:$0xff] %v1390_v52  ;;  %6680 = vmatmul.msk.f32.gmra.mxu0 %vm12526_vm0, %v694_v51  ;;  %6730 = vmatmul.msk.f32.gmra.mxu1 %vm12526_vm0, %v694_v51 }
  0xb5   : > { %6781 = vmatmul.msk.f32.gmra.mxu2 %vm12526_vm0, %v637_v48  ;;  %6831 = vmatmul.msk.f32.gmra.mxu3 %vm12526_vm0, %v637_v48  ;;  %1706 = vst [vmem:[#allocation3 + $0x48] sm:$0xff] %v1557_v53  ;;  %v8128_v53 = vld [vmem:[%s7899_s12 + $0xe0] sm:$0xff] }
  0xb6   : > { %v539_v54 = vmul.f32 %v8084_v18, %v8128_v53 }
  0xb8   : > { %v1392_v56 = vpop.f32.mrf.mxu2  ;;  %v1559_v57 = vpop.f32.mrf.mxu3  ;;  %546 = vst.msk [vmem:[#allocation2 + $0xe0] sm:$0xff] %vm12526_vm0, %v539_v54 }
  0xb9   : > { %v908_v59 = vpop.f32.mrf.mxu0  ;;  %v1075_v60 = vpop.f32.mrf.mxu1 }
  0xba   : > { %v1393_v62 = vadd.f32 %v1392_v56, %v908_v59  ;;  %v1560_v63 = vadd.f32 %v1559_v57, %v1075_v60  ;;  %v701_v59 = vld [vmem:[#allocation2 + $0xc0] sm:$0xff] }
  0xbc   : > { %1707 = vst [vmem:[#allocation3 + $0x30] sm:$0xff] %v1393_v62  ;;  %6681 = vmatmul.msk.f32.gmra.mxu0 %vm12526_vm0, %v695_v61  ;;  %6731 = vmatmul.msk.f32.gmra.mxu1 %vm12526_vm0, %v695_v61  ;;  %v8140_v62 = vld [vmem:[%s7899_s12 + $0xe8] sm:$0xff] }
  0xbd   : > { %6782 = vmatmul.msk.f32.gmra.mxu2 %vm12526_vm0, %v638_v58  ;;  %6832 = vmatmul.msk.f32.gmra.mxu3 %vm12526_vm0, %v638_v58  ;;  %1708 = vst [vmem:[#allocation3 + $0xf0] sm:$0xff] %v1560_v63  ;;  %v540_v63 = vmul.f32 %v8084_v18, %v8140_v62 }
  0xbf   : > { %547 = vst.msk [vmem:[#allocation2 + $0xe8] sm:$0xff] %vm12526_vm0, %v540_v63 }
  0xc0   : > { %v1395_v2 = vpop.f32.mrf.mxu2  ;;  %v1562_v3 = vpop.f32.mrf.mxu3 }
  0xc1   : > { %v911_v5 = vpop.f32.mrf.mxu0  ;;  %v1078_v6 = vpop.f32.mrf.mxu1 }
  0xc2   : > { %v1396_v8 = vadd.f32 %v1395_v2, %v911_v5  ;;  %v1563_v9 = vadd.f32 %v1562_v3, %v1078_v6 }
  0xc4   : > { %1709 = vst [vmem:[#allocation3 + $0xf8] sm:$0xff] %v1396_v8  ;;  %6682 = vmatmul.msk.f32.gmra.mxu0 %vm12526_vm0, %v696_v7  ;;  %6732 = vmatmul.msk.f32.gmra.mxu1 %vm12526_vm0, %v696_v7  ;;  %v8152_v7 = vld [vmem:[%s7899_s12 + $0xf0] sm:$0xff] }
  0xc5   : > { %6783 = vmatmul.msk.f32.gmra.mxu2 %vm12526_vm0, %v639_v4  ;;  %6833 = vmatmul.msk.f32.gmra.mxu3 %vm12526_vm0, %v639_v4  ;;  %1710 = vst [vmem:[#allocation3 + $0x78] sm:$0xff] %v1563_v9  ;;  %v702_v4 = vld [vmem:[#allocation2 + $0xc8] sm:$0xff]  ;;  %v541_v8 = vmul.f32 %v8084_v18, %v8152_v7 }
  0xc7   : > { %548 = vst.msk [vmem:[#allocation2 + $0xf0] sm:$0xff] %vm12526_vm0, %v541_v8 }
  0xc8   : > { %v1398_v12 = vpop.f32.mrf.mxu2  ;;  %v1565_v13 = vpop.f32.mrf.mxu3 }
  0xc9   : > { %v914_v15 = vpop.f32.mrf.mxu0  ;;  %v1081_v16 = vpop.f32.mrf.mxu1 }
  0xca   : > { %v1399_v19 = vadd.f32 %v1398_v12, %v914_v15  ;;  %v1566_v20 = vadd.f32 %v1565_v13, %v1081_v16  ;;  %v703_v13 = vld [vmem:[#allocation2 + $0xd0] sm:$0xff] }
  0xcc   : > { %1711 = vst [vmem:[#allocation3 + $0x300] sm:$0xff] %v1399_v19  ;;  %6683 = vmatmul.msk.f32.gmra.mxu0 %vm12526_vm0, %v697_v17  ;;  %6733 = vmatmul.msk.f32.gmra.mxu1 %vm12526_vm0, %v697_v17  ;;  %v534_v17 = vld [vmem:[%s7899_s12 + $0xf8] sm:$0x3]  ;;  %v551_v19 = vld [vmem:[%s7899_s12 + $0xfa] sm:$0xff] }
  0xcd   : > { %6784 = vmatmul.msk.f32.gmra.mxu2 %vm12526_vm0, %v640_v14  ;;  %6834 = vmatmul.msk.f32.gmra.mxu3 %vm12526_vm0, %v640_v14  ;;  %1712 = vst [vmem:[#allocation3 + $0x130] sm:$0xff] %v1566_v20  ;;  %v8160_v14 = vld [vmem:[%s7887_s3 + $0x5] ss:$0 sm:$0xff]  ;;  %v542_v20 = vmul.f32 %v8084_v18, %v534_v17 }
  0xcf   : > { %549 = vst.msk [vmem:[#allocation2 + $0xf8] sm:$0x3] %vm12525_vm1, %v542_v20 }
  0xd0   : > { %v1401_v23 = vpop.f32.mrf.mxu2  ;;  %v1568_v24 = vpop.f32.mrf.mxu3 }
  0xd1   : > { %v917_v26 = vpop.f32.mrf.mxu0  ;;  %v1084_v27 = vpop.f32.mrf.mxu1 }
  0xd2   : > { %v1402_v29 = vadd.f32 %v1401_v23, %v917_v26  ;;  %v1569_v30 = vadd.f32 %v1568_v24, %v1084_v27  ;;  %v704_v26 = vld [vmem:[#allocation2 + $0xd8] sm:$0xff] }
  0xd4   : > { %1713 = vst [vmem:[#allocation3 + $0xe8] sm:$0xff] %v1402_v29  ;;  %6684 = vmatmul.msk.f32.gmra.mxu0 %vm12526_vm0, %v698_v28  ;;  %6734 = vmatmul.msk.f32.gmra.mxu1 %vm12526_vm0, %v698_v28  ;;  %v552_v28 = vld [vmem:[%s7899_s12 + $0x102] sm:$0xff] }
  0xd5   : > { %6785 = vmatmul.msk.f32.gmra.mxu2 %vm12526_vm0, %v641_v25  ;;  %6835 = vmatmul.msk.f32.gmra.mxu3 %vm12526_vm0, %v641_v25  ;;  %1714 = vst [vmem:[#allocation3 + $0x40] sm:$0xff] %v1569_v30  ;;  %v560_v29 = vmul.f32 %v8160_v14, %v552_v28 }
  0xd7   : > { %567 = vst.msk [vmem:[#allocation2 + $0x102] sm:$0xff] %vm12526_vm0, %v560_v29  ;;  %v1804_v29 = vld [vmem:[%s12515_s2] sm:$0xff] }
  0xd8   : > { %v1404_v33 = vpop.f32.mrf.mxu2  ;;  %v1571_v34 = vpop.f32.mrf.mxu3  ;;  %1830 = vmatpush.msrb.mxu0 %v1804_v29 }
  0xd9   : > { %v920_v38 = vpop.f32.mrf.mxu0  ;;  %v1087_v39 = vpop.f32.mrf.mxu1 }
  0xda   : > { %v1405_v41 = vadd.f32 %v1404_v33, %v920_v38  ;;  %v1572_v42 = vadd.f32 %v1571_v34, %v1087_v39  ;;  %v705_v34 = vld [vmem:[#allocation2 + $0xe0] sm:$0xff] }
  0xdc   : > { %1715 = vst [vmem:[#allocation3 + $0x2c0] sm:$0xff] %v1405_v41  ;;  %6685 = vmatmul.msk.f32.gmra.mxu0 %vm12526_vm0, %v699_v40  ;;  %6735 = vmatmul.msk.f32.gmra.mxu1 %vm12526_vm0, %v699_v40 }
  0xdd   : > { %6786 = vmatmul.msk.f32.gmra.mxu2 %vm12526_vm0, %v642_v37  ;;  %6836 = vmatmul.msk.f32.gmra.mxu3 %vm12526_vm0, %v642_v37  ;;  %1716 = vst [vmem:[#allocation3 + $0x310] sm:$0xff] %v1572_v42  ;;  %v553_v37 = vld [vmem:[%s7899_s12 + $0x10a] sm:$0xff] }
  0xde   : > { %v561_v38 = vmul.f32 %v8160_v14, %v553_v37  ;;  %v576_v37 = vld [vmem:[%s7899_s12 + $0x13c] sm:$0xff] }
  0xe0   : > { %v1407_v45 = vpop.f32.mrf.mxu2  ;;  %v1574_v46 = vpop.f32.mrf.mxu3  ;;  %568 = vst.msk [vmem:[#allocation2 + $0x10a] sm:$0xff] %vm12526_vm0, %v561_v38 }
  0xe1   : > { %v923_v48 = vpop.f32.mrf.mxu0  ;;  %v1090_v49 = vpop.f32.mrf.mxu1 }
  0xe2   : > { %v1408_v51 = vadd.f32 %v1407_v45, %v923_v48  ;;  %v1575_v52 = vadd.f32 %v1574_v46, %v1090_v49  ;;  %v554_v46 = vld [vmem:[%s7899_s12 + $0x112] sm:$0xff] }
  0xe4   : > { %1717 = vst [vmem:[#allocation3 + $0x318] sm:$0xff] %v1408_v51  ;;  %6686 = vmatmul.msk.f32.gmra.mxu0 %vm12526_vm0, %v700_v50  ;;  %6736 = vmatmul.msk.f32.gmra.mxu1 %vm12526_vm0, %v700_v50  ;;  %v650_v50 = vld [vmem:[%s7899_s12 + $0xf8] sm:$0xff] }
  0xe5   : > { %6787 = vmatmul.msk.f32.gmra.mxu2 %vm12526_vm0, %v643_v47  ;;  %6837 = vmatmul.msk.f32.gmra.mxu3 %vm12526_vm0, %v643_v47  ;;  %1718 = vst [vmem:[#allocation3 + $0x2b8] sm:$0xff] %v1575_v52  ;;  %v562_v47 = vmul.f32 %v8160_v14, %v554_v46 }
  0xe7   : > { %569 = vst.msk [vmem:[#allocation2 + $0x112] sm:$0xff] %vm12526_vm0, %v562_v47  ;;  %v577_v47 = vld [vmem:[%s7899_s12 + $0x144] sm:$0xff] }
  0xe8   : > { %v1410_v55 = vpop.f32.mrf.mxu2  ;;  %v1577_v56 = vpop.f32.mrf.mxu3 }
  0xe9   : > { %v926_v57 = vpop.f32.mrf.mxu0  ;;  %v1093_v58 = vpop.f32.mrf.mxu1 }
  0xea   : > { %v1411_v60 = vadd.f32 %v1410_v55, %v926_v57  ;;  %v1578_v61 = vadd.f32 %v1577_v56, %v1093_v58  ;;  %v555_v56 = vld [vmem:[%s7899_s12 + $0x11a] sm:$0xff] }
  0xeb   : > { %v563_v57 = vmul.f32 %v8160_v14, %v555_v56 }
  0xec   : > { %1719 = vst [vmem:[#allocation3 + $0x180] sm:$0xff] %v1411_v60  ;;  %6687 = vmatmul.msk.f32.gmra.mxu0 %vm12526_vm0, %v701_v59  ;;  %6737 = vmatmul.msk.f32.gmra.mxu1 %vm12526_vm0, %v701_v59  ;;  %v651_v60 = vld [vmem:[%s7899_s12 + $0x100] sm:$0xff] }
  0xed   : > { %6788 = vmatmul.msk.f32.gmra.mxu2 %vm12526_vm0, %v8089_v21  ;;  %6838 = vmatmul.msk.f32.gmra.mxu3 %vm12526_vm0, %v8089_v21  ;;  %1720 = vst [vmem:[#allocation3 + $0x190] sm:$0xff] %v1578_v61  ;;  %v559_v21 = vmul.f32 %v8160_v14, %v551_v19 }
  0xee   : > { %570 = vst.msk [vmem:[#allocation2 + $0x11a] sm:$0xff] %vm12526_vm0, %v563_v57  ;;  %v578_v57 = vld [vmem:[%s7899_s12 + $0x14c] sm:$0xff] }
  0xef   : > { %566 = vst.msk [vmem:[#allocation2 + $0xfa] sm:$0xff] %vm12526_vm0, %v559_v21  ;;  %v653_v21 = vld [vmem:[%s7899_s12 + $0x110] sm:$0xff] }
  0xf0   : > { %v1413_v0 = vpop.f32.mrf.mxu2  ;;  %v1580_v1 = vpop.f32.mrf.mxu3 }
  0xf1   : > { %v929_v2 = vpop.f32.mrf.mxu0  ;;  %v1096_v3 = vpop.f32.mrf.mxu1 }
  0xf2   : > { %v1414_v5 = vadd.f32 %v1413_v0, %v929_v2  ;;  %v1581_v6 = vadd.f32 %v1580_v1, %v1096_v3  ;;  %v556_v2 = vld [vmem:[%s7899_s12 + $0x122] sm:$0xff] }
  0xf3   : > { %v564_v3 = vmul.f32 %v8160_v14, %v556_v2 }
  0xf4   : > { %1721 = vst [vmem:[#allocation3 + $0x140] sm:$0xff] %v1414_v5  ;;  %6688 = vmatmul.msk.f32.gmra.mxu0 %vm12526_vm0, %v702_v4  ;;  %6738 = vmatmul.msk.f32.gmra.mxu1 %vm12526_vm0, %v702_v4 }
  0xf5   : > { %6789 = vmatmul.msk.f32.gmra.mxu2 %vm12526_vm0, %v8100_v31  ;;  %6839 = vmatmul.msk.f32.gmra.mxu3 %vm12526_vm0, %v8100_v31  ;;  %1722 = vst [vmem:[#allocation3 + $0x2c8] sm:$0xff] %v1581_v6  ;;  %v652_v6 = vld [vmem:[%s7899_s12 + $0x108] sm:$0xff] }
  0xf6   : > { %v708_v63 = vld [vmem:[#allocation2 + $0xf8] sm:$0xff]  ;;  %571 = vst.msk [vmem:[#allocation2 + $0x122] sm:$0xff] %vm12526_vm0, %v564_v3 }
  0xf7   : > { %v579_v3 = vld [vmem:[%s7899_s12 + $0x154] sm:$0xff] }
  0xf8   : > { %v1416_v9 = vpop.f32.mrf.mxu2  ;;  %v1583_v10 = vpop.f32.mrf.mxu3 }
  0xf9   : > { %v932_v11 = vpop.f32.mrf.mxu0  ;;  %v1099_v12 = vpop.f32.mrf.mxu1 }
  0xfa   : > { %v1417_v15 = vadd.f32 %v1416_v9, %v932_v11  ;;  %v1584_v16 = vadd.f32 %v1583_v10, %v1099_v12  ;;  %v709_v9 = vld [vmem:[#allocation2 + $0x100] sm:$0xff] }
  0xfb   : > { %v8219_v10 = vld [vmem:[%s7887_s3 + $0x6] ss:$0 sm:$0xff] }
  0xfc   : > { %1723 = vst [vmem:[#allocation3 + $0x260] sm:$0xff] %v1417_v15  ;;  %6689 = vmatmul.msk.f32.gmra.mxu0 %vm12526_vm0, %v703_v13  ;;  %6739 = vmatmul.msk.f32.gmra.mxu1 %vm12526_vm0, %v703_v13  ;;  %v557_v13 = vld [vmem:[%s7899_s12 + $0x12a] sm:$0x3]  ;;  %v574_v15 = vld [vmem:[%s7899_s12 + $0x12c] sm:$0xff]  ;;  %v584_v38 = vmul.f32 %v8219_v10, %v576_v37 }
  0xfd   : > { %6790 = vmatmul.msk.f32.gmra.mxu2 %vm12526_vm0, %v8117_v43  ;;  %6840 = vmatmul.msk.f32.gmra.mxu3 %vm12526_vm0, %v8117_v43  ;;  %1724 = vst [vmem:[#allocation3 + $0x100] sm:$0xff] %v1584_v16  ;;  %v706_v43 = vld [vmem:[#allocation2 + $0xe8] sm:$0xff]  ;;  %v565_v16 = vmul.f32 %v8160_v14, %v557_v13  ;;  %v582_v17 = vmul.f32 %v8219_v10, %v574_v15 }
  0xfe   : > { %591 = vst.msk [vmem:[#allocation2 + $0x13c] sm:$0xff] %vm12526_vm0, %v584_v38 }
  0xff   : > { %572 = vst.msk [vmem:[#allocation2 + $0x12a] sm:$0x3] %vm12525_vm1, %v565_v16  ;;  %v580_v16 = vld [vmem:[%s7899_s12 + $0x15c] sm:$0x3] }
 0x100   : > { %v1419_v22 = vpop.f32.mrf.mxu2  ;;  %v1586_v23 = vpop.f32.mrf.mxu3  ;;  %589 = vst.msk [vmem:[#allocation2 + $0x12c] sm:$0xff] %vm12526_vm0, %v582_v17  ;;  %v597_v17 = vld [vmem:[%s7899_s12 + $0x15e] sm:$0xff] }
 0x101   : > { %v935_v24 = vpop.f32.mrf.mxu0  ;;  %v1102_v25 = vpop.f32.mrf.mxu1 }
 0x102   : > { %v1420_v27 = vadd.f32 %v1419_v22, %v935_v24  ;;  %v1587_v18 = vadd.f32 %v1586_v23, %v1102_v25  ;;  %v710_v24 = vld [vmem:[#allocation2 + $0x108] sm:$0xff] }
 0x104   : > { %1725 = vst [vmem:[#allocation3 + $0x80] sm:$0xff] %v1420_v27  ;;  %6690 = vmatmul.msk.f32.gmra.mxu0 %vm12526_vm0, %v704_v26  ;;  %6740 = vmatmul.msk.f32.gmra.mxu1 %vm12526_vm0, %v704_v26  ;;  %v575_v26 = vld [vmem:[%s7899_s12 + $0x134] sm:$0xff] }
 0x105   : > { %6791 = vmatmul.msk.f32.gmra.mxu2 %vm12526_vm0, %v8128_v53  ;;  %6841 = vmatmul.msk.f32.gmra.mxu3 %vm12526_vm0, %v8128_v53  ;;  %1726 = vst [vmem:[#allocation3 + $0x240] sm:$0xff] %v1587_v18  ;;  %v707_v53 = vld [vmem:[#allocation2 + $0xf0] sm:$0xff]  ;;  %v583_v27 = vmul.f32 %v8219_v10, %v575_v26 }
 0x107   : > { %590 = vst.msk [vmem:[#allocation2 + $0x134] sm:$0xff] %vm12526_vm0, %v583_v27  ;;  %v598_v27 = vld [vmem:[%s7899_s12 + $0x166] sm:$0xff] }
 0x108   : > { %v1422_v30 = vpop.f32.mrf.mxu2  ;;  %v1589_v31 = vpop.f32.mrf.mxu3 }
 0x109   : > { %v938_v32 = vpop.f32.mrf.mxu0  ;;  %v1105_v33 = vpop.f32.mrf.mxu1 }
 0x10a   : > { %v1423_v35 = vadd.f32 %v1422_v30, %v938_v32  ;;  %v1590_v36 = vadd.f32 %v1589_v31, %v1105_v33  ;;  %v1805_v30 = vld [vmem:[%s12515_s2 + $0x8] sm:$0xff]  ;;  %v654_v31 = vld [vmem:[%s7899_s12 + $0x118] sm:$0xff] }
 0x10b   : > { %1850 = vmatpush.msrb.mxu1 %v1805_v30  ;;  %v660_v30 = vld [vmem:[%s7899_s12 + $0x148] sm:$0xff] }
 0x10c   : > { %1727 = vst [vmem:[#allocation3 + $0xc0] sm:$0xff] %v1423_v35  ;;  %6691 = vmatmul.msk.f32.gmra.mxu0 %vm12526_vm0, %v705_v34  ;;  %6741 = vmatmul.msk.f32.gmra.mxu1 %vm12526_vm0, %v705_v34  ;;  %v711_v34 = vld [vmem:[#allocation2 + $0x110] sm:$0xff] }
 0x10d   : > { %6792 = vmatmul.msk.f32.gmra.mxu2 %vm12526_vm0, %v8140_v62  ;;  %6842 = vmatmul.msk.f32.gmra.mxu3 %vm12526_vm0, %v8140_v62  ;;  %1728 = vst [vmem:[#allocation3 + $0x110] sm:$0xff] %v1590_v36 }
 0x110   : > { %v1425_v39 = vpop.f32.mrf.mxu2  ;;  %v1592_v40 = vpop.f32.mrf.mxu3 }
 0x111   : > { %v941_v41 = vpop.f32.mrf.mxu0  ;;  %v1108_v42 = vpop.f32.mrf.mxu1 }
 0x112   : > { %v1426_v44 = vadd.f32 %v1425_v39, %v941_v41  ;;  %v1593_v45 = vadd.f32 %v1592_v40, %v1108_v42  ;;  %v655_v41 = vld [vmem:[%s7899_s12 + $0x120] sm:$0xff] }
 0x114   : > { %1729 = vst [vmem:[#allocation3 + $0x1c8] sm:$0xff] %v1426_v44  ;;  %6692 = vmatmul.msk.f32.gmra.mxu0 %vm12526_vm0, %v706_v43  ;;  %6742 = vmatmul.msk.f32.gmra.mxu1 %vm12526_vm0, %v706_v43  ;;  %v712_v44 = vld [vmem:[#allocation2 + $0x118] sm:$0xff] }
 0x115   : > { %6793 = vmatmul.msk.f32.gmra.mxu2 %vm12526_vm0, %v8152_v7  ;;  %6843 = vmatmul.msk.f32.gmra.mxu3 %vm12526_vm0, %v8152_v7  ;;  %1730 = vst [vmem:[#allocation3 + $0x238] sm:$0xff] %v1593_v45 }
 0x118   : > { %v1428_v48 = vpop.f32.mrf.mxu2  ;;  %v1595_v49 = vpop.f32.mrf.mxu3 }
 0x119   : > { %v944_v51 = vpop.f32.mrf.mxu0  ;;  %v1111_v52 = vpop.f32.mrf.mxu1 }
 0x11a   : > { %v1429_v54 = vadd.f32 %v1428_v48, %v944_v51  ;;  %v1596_v55 = vadd.f32 %v1595_v49, %v1111_v52  ;;  %v585_v48 = vmul.f32 %v8219_v10, %v577_v47  ;;  %v656_v51 = vld [vmem:[%s7899_s12 + $0x128] sm:$0xff] }
 0x11c   : > { %1731 = vst [vmem:[#allocation3 + $0x270] sm:$0xff] %v1429_v54  ;;  %6693 = vmatmul.msk.f32.gmra.mxu0 %vm12526_vm0, %v707_v53  ;;  %6743 = vmatmul.msk.f32.gmra.mxu1 %vm12526_vm0, %v707_v53  ;;  %v713_v54 = vld [vmem:[#allocation2 + $0x120] sm:$0xff] }
 0x11d   : > { %6794 = vmatmul.msk.f32.gmra.mxu2 %vm12526_vm0, %v650_v50  ;;  %6844 = vmatmul.msk.f32.gmra.mxu3 %vm12526_vm0, %v650_v50  ;;  %1732 = vst [vmem:[#allocation3 + $0x250] sm:$0xff] %v1596_v55 }
 0x11e   : > { %592 = vst.msk [vmem:[#allocation2 + $0x144] sm:$0xff] %vm12526_vm0, %v585_v48 }
 0x120   : > { %v1431_v58 = vpop.f32.mrf.mxu2  ;;  %v1598_v59 = vpop.f32.mrf.mxu3 }
 0x121   : > { %v947_v61 = vpop.f32.mrf.mxu0  ;;  %v1114_v62 = vpop.f32.mrf.mxu1 }
 0x122   : > { %v1432_v0 = vadd.f32 %v1431_v58, %v947_v61  ;;  %v1599_v1 = vadd.f32 %v1598_v59, %v1114_v62  ;;  %v586_v58 = vmul.f32 %v8219_v10, %v578_v57  ;;  %v657_v61 = vld [vmem:[%s7899_s12 + $0x130] sm:$0xff] }
 0x124   : > { %1733 = vst [vmem:[#allocation3 + $0x148] sm:$0xff] %v1432_v0  ;;  %6694 = vmatmul.msk.f32.gmra.mxu0 %vm12526_vm0, %v708_v63  ;;  %6744 = vmatmul.msk.f32.gmra.mxu1 %vm12526_vm0, %v708_v63  ;;  %v714_v0 = vld [vmem:[#allocation2 + $0x128] sm:$0xff] }
 0x125   : > { %6795 = vmatmul.msk.f32.gmra.mxu2 %vm12526_vm0, %v651_v60  ;;  %6845 = vmatmul.msk.f32.gmra.mxu3 %vm12526_vm0, %v651_v60  ;;  %1734 = vst [vmem:[#allocation3 + $0x170] sm:$0xff] %v1599_v1 }
 0x126   : > { %593 = vst.msk [vmem:[#allocation2 + $0x14c] sm:$0xff] %vm12526_vm0, %v586_v58 }
 0x128   : > { %v1434_v4 = vpop.f32.mrf.mxu2  ;;  %v1601_v5 = vpop.f32.mrf.mxu3 }
 0x129   : > { %v950_v7 = vpop.f32.mrf.mxu0  ;;  %v1117_v8 = vpop.f32.mrf.mxu1 }
 0x12a   : > { %v1435_v11 = vadd.f32 %v1434_v4, %v950_v7  ;;  %v1602_v12 = vadd.f32 %v1601_v5, %v1117_v8  ;;  %v587_v4 = vmul.f32 %v8219_v10, %v579_v3  ;;  %v658_v7 = vld [vmem:[%s7899_s12 + $0x138] sm:$0xff] }
 0x12c   : > { %1735 = vst [vmem:[#allocation3 + $0xb0] sm:$0xff] %v1435_v11  ;;  %6695 = vmatmul.msk.f32.gmra.mxu0 %vm12526_vm0, %v709_v9  ;;  %6745 = vmatmul.msk.f32.gmra.mxu1 %vm12526_vm0, %v709_v9  ;;  %v715_v11 = vld [vmem:[#allocation2 + $0x130] sm:$0xff] }
 0x12d   : > { %6796 = vmatmul.msk.f32.gmra.mxu2 %vm12526_vm0, %v652_v6  ;;  %6846 = vmatmul.msk.f32.gmra.mxu3 %vm12526_vm0, %v652_v6  ;;  %1736 = vst [vmem:[#allocation3 + $0x2f8] sm:$0xff] %v1602_v12  ;;  %v8279_v12 = vld [vmem:[%s7887_s3 + $0x7] ss:$0 sm:$0xff] }
 0x12e   : > { %594 = vst.msk [vmem:[#allocation2 + $0x154] sm:$0xff] %vm12526_vm0, %v587_v4 }
 0x130   : > { %v1437_v19 = vpop.f32.mrf.mxu2  ;;  %v1604_v20 = vpop.f32.mrf.mxu3 }
 0x131   : > { %v953_v22 = vpop.f32.mrf.mxu0  ;;  %v1120_v23 = vpop.f32.mrf.mxu1 }
 0x132   : > { %v1438_v14 = vadd.f32 %v1437_v19, %v953_v22  ;;  %v1605_v25 = vadd.f32 %v1604_v20, %v1120_v23  ;;  %v588_v19 = vmul.f32 %v8219_v10, %v580_v16  ;;  %v605_v20 = vmul.f32 %v8279_v12, %v597_v17  ;;  %v659_v23 = vld [vmem:[%s7899_s12 + $0x140] sm:$0xff]  ;;  %v716_v10 = vld [vmem:[#allocation2 + $0x138] sm:$0xff] }
 0x134   : > { %1737 = vst [vmem:[#allocation3 + $0x1c0] sm:$0xff] %v1438_v14  ;;  %6696 = vmatmul.msk.f32.gmra.mxu0 %vm12526_vm0, %v710_v24  ;;  %6746 = vmatmul.msk.f32.gmra.mxu1 %vm12526_vm0, %v710_v24 }
 0x135   : > { %6797 = vmatmul.msk.f32.gmra.mxu2 %vm12526_vm0, %v653_v21  ;;  %6847 = vmatmul.msk.f32.gmra.mxu3 %vm12526_vm0, %v653_v21  ;;  %1738 = vst [vmem:[#allocation3 + $0x1d0] sm:$0xff] %v1605_v25 }
 0x136   : > { %595 = vst.msk [vmem:[#allocation2 + $0x15c] sm:$0x3] %vm12525_vm1, %v588_v19 }
 0x137   : > { %612 = vst.msk [vmem:[#allocation2 + $0x15e] sm:$0xff] %vm12526_vm0, %v605_v20  ;;  %v665_v20 = vld [vmem:[%s7899_s12 + $0x170] sm:$0xff] }
 0x138   : > { %v1440_v18 = vpop.f32.mrf.mxu2  ;;  %v1607_v28 = vpop.f32.mrf.mxu3 }
 0x139   : > { %v956_v32 = vpop.f32.mrf.mxu0  ;;  %v1123_v33 = vpop.f32.mrf.mxu1 }
 0x13a   : > { %v1441_v35 = vadd.f32 %v1440_v18, %v956_v32  ;;  %v1608_v36 = vadd.f32 %v1607_v28, %v1123_v33  ;;  %v606_v18 = vmul.f32 %v8279_v12, %v598_v27  ;;  %v717_v33 = vld [vmem:[#allocation2 + $0x140] sm:$0xff] }
 0x13c   : > { %1739 = vst [vmem:[#allocation3 + $0x98] sm:$0xff] %v1441_v35  ;;  %6697 = vmatmul.msk.f32.gmra.mxu0 %vm12526_vm0, %v711_v34  ;;  %6747 = vmatmul.msk.f32.gmra.mxu1 %vm12526_vm0, %v711_v34 }
 0x13d   : > { %6798 = vmatmul.msk.f32.gmra.mxu2 %vm12526_vm0, %v654_v31  ;;  %6848 = vmatmul.msk.f32.gmra.mxu3 %vm12526_vm0, %v654_v31  ;;  %1740 = vst [vmem:[#allocation3 + $0x1a0] sm:$0xff] %v1608_v36  ;;  %v599_v36 = vld [vmem:[%s7899_s12 + $0x16e] sm:$0xff] }
 0x13e   : > { %613 = vst.msk [vmem:[#allocation2 + $0x166] sm:$0xff] %vm12526_vm0, %v606_v18  ;;  %v607_v37 = vmul.f32 %v8279_v12, %v599_v36 }
 0x140   : > { %v1443_v39 = vpop.f32.mrf.mxu2  ;;  %v1610_v40 = vpop.f32.mrf.mxu3  ;;  %614 = vst.msk [vmem:[#allocation2 + $0x16e] sm:$0xff] %vm12526_vm0, %v607_v37 }
 0x141   : > { %v959_v42 = vpop.f32.mrf.mxu0  ;;  %v1126_v43 = vpop.f32.mrf.mxu1 }
 0x142   : > { %v1444_v45 = vadd.f32 %v1443_v39, %v959_v42  ;;  %v1611_v46 = vadd.f32 %v1610_v40, %v1126_v43  ;;  %v661_v40 = vld [vmem:[%s7899_s12 + $0x150] sm:$0xff]  ;;  %v718_v43 = vld [vmem:[#allocation2 + $0x148] sm:$0xff] }
 0x144   : > { %1741 = vst [vmem:[#allocation3 + $0x220] sm:$0xff] %v1444_v45  ;;  %6698 = vmatmul.msk.f32.gmra.mxu0 %vm12526_vm0, %v712_v44  ;;  %6748 = vmatmul.msk.f32.gmra.mxu1 %vm12526_vm0, %v712_v44 }
 0x145   : > { %6799 = vmatmul.msk.f32.gmra.mxu2 %vm12526_vm0, %v655_v41  ;;  %6849 = vmatmul.msk.f32.gmra.mxu3 %vm12526_vm0, %v655_v41  ;;  %1742 = vst [vmem:[#allocation3 + $0x90] sm:$0xff] %v1611_v46  ;;  %v600_v46 = vld [vmem:[%s7899_s12 + $0x176] sm:$0xff] }
 0x146   : > { %v608_v47 = vmul.f32 %v8279_v12, %v600_v46  ;;  %v668_v46 = vld [vmem:[%s7899_s12 + $0x188] sm:$0xff] }
 0x148   : > { %v1446_v49 = vpop.f32.mrf.mxu2  ;;  %v1613_v50 = vpop.f32.mrf.mxu3  ;;  %615 = vst.msk [vmem:[#allocation2 + $0x176] sm:$0xff] %vm12526_vm0, %v608_v47 }
 0x149   : > { %v962_v52 = vpop.f32.mrf.mxu0  ;;  %v1129_v53 = vpop.f32.mrf.mxu1 }
 0x14a   : > { %v1447_v55 = vadd.f32 %v1446_v49, %v962_v52  ;;  %v1614_v56 = vadd.f32 %v1613_v50, %v1129_v53  ;;  %v662_v50 = vld [vmem:[%s7899_s12 + $0x158] sm:$0xff]  ;;  %v719_v53 = vld [vmem:[#allocation2 + $0x150] sm:$0xff] }
 0x14c   : > { %1743 = vst [vmem:[#allocation3 + $0x1a8] sm:$0xff] %v1447_v55  ;;  %6699 = vmatmul.msk.f32.gmra.mxu0 %vm12526_vm0, %v713_v54  ;;  %6749 = vmatmul.msk.f32.gmra.mxu1 %vm12526_vm0, %v713_v54 }
 0x14d   : > { %6800 = vmatmul.msk.f32.gmra.mxu2 %vm12526_vm0, %v656_v51  ;;  %6850 = vmatmul.msk.f32.gmra.mxu3 %vm12526_vm0, %v656_v51  ;;  %1744 = vst [vmem:[#allocation3 + $0x230] sm:$0xff] %v1614_v56  ;;  %v601_v56 = vld [vmem:[%s7899_s12 + $0x17e] sm:$0xff] }
 0x14e   : > { %v609_v57 = vmul.f32 %v8279_v12, %v601_v56 }
 0x14f   : > { %v723_v18 = vld [vmem:[#allocation2 + $0x170] sm:$0xff] }
 0x150   : > { %v1449_v59 = vpop.f32.mrf.mxu2  ;;  %v1616_v60 = vpop.f32.mrf.mxu3  ;;  %616 = vst.msk [vmem:[#allocation2 + $0x17e] sm:$0xff] %vm12526_vm0, %v609_v57 }
 0x151   : > { %v965_v62 = vpop.f32.mrf.mxu0  ;;  %v1132_v63 = vpop.f32.mrf.mxu1 }
 0x152   : > { %v1450_v1 = vadd.f32 %v1449_v59, %v965_v62  ;;  %v1617_v2 = vadd.f32 %v1616_v60, %v1132_v63  ;;  %v663_v60 = vld [vmem:[%s7899_s12 + $0x160] sm:$0xff]  ;;  %v720_v63 = vld [vmem:[#allocation2 + $0x158] sm:$0xff] }
 0x154   : > { %1745 = vst [vmem:[#allocation3 + $0x268] sm:$0xff] %v1450_v1  ;;  %6700 = vmatmul.msk.f32.gmra.mxu0 %vm12526_vm0, %v714_v0  ;;  %6750 = vmatmul.msk.f32.gmra.mxu1 %vm12526_vm0, %v714_v0 }
 0x155   : > { %6801 = vmatmul.msk.f32.gmra.mxu2 %vm12526_vm0, %v657_v61  ;;  %6851 = vmatmul.msk.f32.gmra.mxu3 %vm12526_vm0, %v657_v61  ;;  %1746 = vst [vmem:[#allocation3 + $0x1e0] sm:$0xff] %v1617_v2  ;;  %v602_v2 = vld [vmem:[%s7899_s12 + $0x186] sm:$0xff] }
 0x156   : > { %v610_v3 = vmul.f32 %v8279_v12, %v602_v2 }
 0x157   : > { %v724_v37 = vld [vmem:[#allocation2 + $0x178] sm:$0xff] }
 0x158   : > { %v1452_v5 = vpop.f32.mrf.mxu2  ;;  %v1619_v6 = vpop.f32.mrf.mxu3  ;;  %617 = vst.msk [vmem:[#allocation2 + $0x186] sm:$0xff] %vm12526_vm0, %v610_v3 }
 0x159   : > { %v968_v8 = vpop.f32.mrf.mxu0  ;;  %v1135_v9 = vpop.f32.mrf.mxu1 }
 0x15a   : > { %v1453_v13 = vadd.f32 %v1452_v5, %v968_v8  ;;  %v1620_v15 = vadd.f32 %v1619_v6, %v1135_v9  ;;  %v664_v6 = vld [vmem:[%s7899_s12 + $0x168] sm:$0xff]  ;;  %v721_v9 = vld [vmem:[#allocation2 + $0x160] sm:$0xff] }
 0x15c   : > { %1747 = vst [vmem:[#allocation3 + $0x298] sm:$0xff] %v1453_v13  ;;  %6701 = vmatmul.msk.f32.gmra.mxu0 %vm12526_vm0, %v715_v11  ;;  %6751 = vmatmul.msk.f32.gmra.mxu1 %vm12526_vm0, %v715_v11 }
 0x15d   : > { %6802 = vmatmul.msk.f32.gmra.mxu2 %vm12526_vm0, %v658_v7  ;;  %6852 = vmatmul.msk.f32.gmra.mxu3 %vm12526_vm0, %v658_v7  ;;  %1748 = vst [vmem:[#allocation3 + $0x118] sm:$0xff] %v1620_v15  ;;  %v603_v15 = vld [vmem:[%s7899_s12 + $0x18e] sm:$0x3] }
 0x15e   : > { %v611_v16 = vmul.f32 %v8279_v12, %v603_v15 }
 0x160   : > { %v1455_v21 = vpop.f32.mrf.mxu2  ;;  %v1622_v22 = vpop.f32.mrf.mxu3  ;;  %618 = vst.msk [vmem:[#allocation2 + $0x18e] sm:$0x3] %vm12525_vm1, %v611_v16 }
 0x161   : > { %v971_v24 = vpop.f32.mrf.mxu0  ;;  %v1138_v14 = vpop.f32.mrf.mxu1 }
 0x162   : > { %v1456_v25 = vadd.f32 %v1455_v21, %v971_v24  ;;  %v1623_v26 = vadd.f32 %v1622_v22, %v1138_v14 }
 0x164   : > { %1749 = vst [vmem:[#allocation3 + $0x8] sm:$0xff] %v1456_v25  ;;  %6702 = vmatmul.msk.f32.gmra.mxu0 %vm12526_vm0, %v716_v10  ;;  %6752 = vmatmul.msk.f32.gmra.mxu1 %vm12526_vm0, %v716_v10  ;;  %v666_v25 = vld [vmem:[%s7899_s12 + $0x178] sm:$0xff] }
 0x165   : > { %6803 = vmatmul.msk.f32.gmra.mxu2 %vm12526_vm0, %v659_v23  ;;  %6853 = vmatmul.msk.f32.gmra.mxu3 %vm12526_vm0, %v659_v23  ;;  %1750 = vst [vmem:[#allocation3 + $0x2a0] sm:$0xff] %v1623_v26  ;;  %v722_v23 = vld [vmem:[#allocation2 + $0x168] sm:$0xff] }
 0x168   : > { %v1458_v28 = vpop.f32.mrf.mxu2  ;;  %v1625_v29 = vpop.f32.mrf.mxu3 }
 0x169   : > { %v974_v31 = vpop.f32.mrf.mxu0  ;;  %v1141_v32 = vpop.f32.mrf.mxu1 }
 0x16a   : > { %v1459_v34 = vadd.f32 %v1458_v28, %v974_v31  ;;  %v1626_v35 = vadd.f32 %v1625_v29, %v1141_v32  ;;  %v1855_v31 = vld [vmem:[%s12518_s5] sm:$0xff] }
 0x16c   : > { %1751 = vst [vmem:[#allocation3 + $0x70] sm:$0xff] %v1459_v34  ;;  %6703 = vmatmul.msk.f32.gmra.mxu0 %vm12526_vm0, %v717_v33  ;;  %6753 = vmatmul.msk.f32.gmra.mxu1 %vm12526_vm0, %v717_v33  ;;  %v667_v34 = vld [vmem:[%s7899_s12 + $0x180] sm:$0xff] }
 0x16d   : > { %6804 = vmatmul.msk.f32.gmra.mxu2 %vm12526_vm0, %v660_v30  ;;  %6854 = vmatmul.msk.f32.gmra.mxu3 %vm12526_vm0, %v660_v30  ;;  %1752 = vst [vmem:[#allocation3 + $0x60] sm:$0xff] %v1626_v35  ;;  %v7719_v30 = vmov 0  }
 0x16e   : > { %7021 = vset.pattern.permute.xlu0 %v7719_v30  ;;  %7022 = vset.pattern.permute.xlu1 %v7719_v30 }
 0x16f   : > { %1910 = vperm.xlu0 %7021, %v1855_v31   ;;  %7023 = vset.pattern.permute.xlu2 %v7719_v30 }
 0x170   : > { %v1461_v38 = vpop.f32.mrf.mxu2  ;;  %v1628_v39 = vpop.f32.mrf.mxu3 }
 0x171   : > { %v977_v41 = vpop.f32.mrf.mxu0  ;;  %v1144_v42 = vpop.f32.mrf.mxu1 }
 0x172   : > { %v8308_v44 = vadd.f32 %v1461_v38, %v977_v41  ;;  %v8310_v45 = vadd.f32 %v1628_v39, %v1144_v42  ;;  %v1856_v41 = vld [vmem:[%s12518_s5 + $0x8] sm:$0xff] }
 0x174   : > { %6704 = vmatmul.msk.f32.gmra.mxu0 %vm12526_vm0, %v718_v43  ;;  %6754 = vmatmul.msk.f32.gmra.mxu1 %vm12526_vm0, %v718_v43 }
 0x175   : > { %6805 = vmatmul.msk.f32.gmra.mxu2 %vm12526_vm0, %v661_v40  ;;  %6855 = vmatmul.msk.f32.gmra.mxu3 %vm12526_vm0, %v661_v40  ;;  %v1857_v40 = vld [vmem:[%s12518_s5 + $0x10] sm:$0xff] }
 0x176   : > { %1920 = vperm.xlu1 %7022, %v1857_v40  }
 0x177   : > { %1915 = vperm.xlu0 %7021, %v1856_v41  }
 0x178   : > { %v1464_v48 = vpop.f32.mrf.mxu2  ;;  %v1631_v49 = vpop.f32.mrf.mxu3 }
 0x179   : > { %v980_v51 = vpop.f32.mrf.mxu0  ;;  %v1147_v52 = vpop.f32.mrf.mxu1 }
 0x17a   : > { %v1465_v54 = vadd.f32 %v1464_v48, %v980_v51  ;;  %v1632_v55 = vadd.f32 %v1631_v49, %v1147_v52  ;;  %v725_v49 = vld [vmem:[#allocation2 + $0x180] sm:$0xff]  ;;  %v1858_v52 = vld [vmem:[%s12518_s5 + $0x18] sm:$0xff] }
 0x17c   : > { %1755 = vst [vmem:[#allocation3 + $0x208] sm:$0xff] %v1465_v54  ;;  %6705 = vmatmul.msk.f32.gmra.mxu0 %vm12526_vm0, %v719_v53  ;;  %6755 = vmatmul.msk.f32.gmra.mxu1 %vm12526_vm0, %v719_v53  ;;  %v1861_v53 = vld [vmem:[%s12518_s5 + $0x30] sm:$0x3] }
 0x17d   : > { %6806 = vmatmul.msk.f32.gmra.mxu2 %vm12526_vm0, %v662_v50  ;;  %6856 = vmatmul.msk.f32.gmra.mxu3 %vm12526_vm0, %v662_v50  ;;  %1756 = vst [vmem:[#allocation3 + $0x2f0] sm:$0xff] %v1632_v55 }
 0x17e   : > { %1925 = vperm.xlu1 %7022, %v1858_v52  }
 0x17f   : > { %1940 = vperm.xlu0 %7021, %v1861_v53  }
 0x180   : > { %v1467_v58 = vpop.f32.mrf.mxu2  ;;  %v1634_v59 = vpop.f32.mrf.mxu3 }
 0x181   : > { %v983_v61 = vpop.f32.mrf.mxu0  ;;  %v1150_v62 = vpop.f32.mrf.mxu1 }
 0x182   : > { %v1468_v0 = vadd.f32 %v1467_v58, %v983_v61  ;;  %v1635_v1 = vadd.f32 %v1634_v59, %v1150_v62  ;;  %v726_v58 = vld [vmem:[#allocation2 + $0x188] sm:$0xff] }
 0x184   : > { %1757 = vst [vmem:[#allocation3 + $0x210] sm:$0xff] %v1468_v0  ;;  %6706 = vmatmul.msk.f32.gmra.mxu0 %vm12526_vm0, %v720_v63  ;;  %6756 = vmatmul.msk.f32.gmra.mxu1 %vm12526_vm0, %v720_v63 }
 0x185   : > { %6807 = vmatmul.msk.f32.gmra.mxu2 %vm12526_vm0, %v663_v60  ;;  %6857 = vmatmul.msk.f32.gmra.mxu3 %vm12526_vm0, %v663_v60  ;;  %1758 = vst [vmem:[#allocation3 + $0x58] sm:$0xff] %v1635_v1  ;;  %v1803_v1 = vld [vmem:[%s7887_s3] sm:$0xff] }
 0x188   : > { %v1470_v4 = vpop.f32.mrf.mxu2  ;;  %v1637_v5 = vpop.f32.mrf.mxu3 }
 0x189   : > { %v986_v7 = vpop.f32.mrf.mxu0  ;;  %v1153_v8 = vpop.f32.mrf.mxu1 }
 0x18a   : > { %v1471_v11 = vadd.f32 %v1470_v4, %v986_v7  ;;  %v1638_v13 = vadd.f32 %v1637_v5, %v1153_v8  ;;  %v1859_v4 = vld [vmem:[%s12518_s5 + $0x20] sm:$0xff] }
 0x18b   : > { %1930 = vperm.xlu2 %7023, %v1859_v4  }
 0x18c   : > { %1759 = vst [vmem:[#allocation3 + $0xe0] sm:$0xff] %v1471_v11  ;;  %6707 = vmatmul.msk.f32.gmra.mxu0 %vm12526_vm0, %v721_v9  ;;  %6757 = vmatmul.msk.f32.gmra.mxu1 %vm12526_vm0, %v721_v9 }
 0x18d   : > { %6808 = vmatmul.msk.f32.gmra.mxu2 %vm12526_vm0, %v664_v6  ;;  %6858 = vmatmul.msk.f32.gmra.mxu3 %vm12526_vm0, %v664_v6  ;;  %1760 = vst [vmem:[#allocation3 + $0x278] sm:$0xff] %v1638_v13  ;;  %v1860_v13 = vld [vmem:[%s12518_s5 + $0x28] sm:$0xff] }
 0x190   : > { %v1473_v17 = vpop.f32.mrf.mxu2  ;;  %v1640_v19 = vpop.f32.mrf.mxu3 }
 0x191   : > { %v989_v21 = vpop.f32.mrf.mxu0  ;;  %v1156_v22 = vpop.f32.mrf.mxu1 }
 0x192   : > { %v1474_v24 = vadd.f32 %v1473_v17, %v989_v21  ;;  %v1641_v14 = vadd.f32 %v1640_v19, %v1156_v22 }
 0x193   : > { %1935 = vperm.xlu2 %7023, %v1860_v13  }
 0x194   : > { %1761 = vst [vmem:[#allocation3 + $0x2d8] sm:$0xff] %v1474_v24  ;;  %6708 = vmatmul.msk.f32.gmra.mxu0 %vm12526_vm0, %v722_v23  ;;  %6758 = vmatmul.msk.f32.gmra.mxu1 %vm12526_vm0, %v722_v23 }
 0x195   : > { %6809 = vmatmul.msk.f32.gmra.mxu2 %vm12526_vm0, %v665_v20  ;;  %6859 = vmatmul.msk.f32.gmra.mxu3 %vm12526_vm0, %v665_v20  ;;  %1762 = vst [vmem:[#allocation3 + $0x158] sm:$0xff] %v1641_v14 }
 0x198   : > { %v1476_v12 = vpop.f32.mrf.mxu2  ;;  %v1643_v10 = vpop.f32.mrf.mxu3 }
 0x199   : > { %v992_v26 = vpop.f32.mrf.mxu0  ;;  %v1159_v27 = vpop.f32.mrf.mxu1 }
 0x19a   : > { %v1477_v28 = vadd.f32 %v1476_v12, %v992_v26  ;;  %v1644_v29 = vadd.f32 %v1643_v10, %v1159_v27 }
 0x19c   : > { %1763 = vst [vmem:[#allocation3 + $0x38] sm:$0xff] %v1477_v28  ;;  %6709 = vmatmul.msk.f32.gmra.mxu0 %vm12526_vm0, %v723_v18  ;;  %6759 = vmatmul.msk.f32.gmra.mxu1 %vm12526_vm0, %v723_v18 }
 0x19d   : > { %6810 = vmatmul.msk.f32.gmra.mxu2 %vm12526_vm0, %v666_v25  ;;  %6860 = vmatmul.msk.f32.gmra.mxu3 %vm12526_vm0, %v666_v25  ;;  %1764 = vst [vmem:[#allocation3 + $0x198] sm:$0xff] %v1644_v29 }
 0x1a0   : > { %v1479_v32 = vpop.f32.mrf.mxu2  ;;  %v1646_v33 = vpop.f32.mrf.mxu3 }
 0x1a1   : > { %v995_v35 = vpop.f32.mrf.mxu0  ;;  %v1162_v36 = vpop.f32.mrf.mxu1 }
 0x1a2   : > { %v1480_v38 = vadd.f32 %v1479_v32, %v995_v35  ;;  %v1647_v39 = vadd.f32 %v1646_v33, %v1162_v36 }
 0x1a4   : > { %1765 = vst [vmem:[#allocation3 + $0x168] sm:$0xff] %v1480_v38  ;;  %6710 = vmatmul.msk.f32.gmra.mxu0 %vm12526_vm0, %v724_v37  ;;  %6760 = vmatmul.msk.f32.gmra.mxu1 %vm12526_vm0, %v724_v37 }
 0x1a5   : > { %6811 = vmatmul.msk.f32.gmra.mxu2 %vm12526_vm0, %v667_v34  ;;  %6861 = vmatmul.msk.f32.gmra.mxu3 %vm12526_vm0, %v667_v34  ;;  %1766 = vst [vmem:[#allocation3 + $0x1b0] sm:$0xff] %v1647_v39 }
 0x1a8   : > { %v1482_v42 = vpop.f32.mrf.mxu2  ;;  %v1649_v43 = vpop.f32.mrf.mxu3 }
 0x1a9   : > { %v998_v47 = vpop.f32.mrf.mxu0  ;;  %v1165_v48 = vpop.f32.mrf.mxu1 }
 0x1aa   : > { %v1483_v50 = vadd.f32 %v1482_v42, %v998_v47  ;;  %v1650_v51 = vadd.f32 %v1649_v43, %v1165_v48 }
 0x1ac   : > { %1767 = vst [vmem:[#allocation3 + $0xa0] sm:$0xff] %v1483_v50  ;;  %6711 = vmatmul.msk.f32.gmra.mxu0 %vm12526_vm0, %v725_v49  ;;  %6761 = vmatmul.msk.f32.gmra.mxu1 %vm12526_vm0, %v725_v49 }
 0x1ad   : > { %6812 = vmatmul.msk.f32.gmra.mxu2 %vm12526_vm0, %v668_v46  ;;  %6862 = vmatmul.msk.f32.gmra.mxu3 %vm12526_vm0, %v668_v46  ;;  %1768 = vst [vmem:[#allocation3 + $0x128] sm:$0xff] %v1650_v51 }
 0x1b0   : > { %v1485_v54 = vpop.f32.mrf.mxu2  ;;  %v1652_v55 = vpop.f32.mrf.mxu3 }
 0x1b1   : > { %v1001_v56 = vpop.f32.mrf.mxu0  ;;  %v1168_v57 = vpop.f32.mrf.mxu1 }
 0x1b2   : > { %v1486_v59 = vadd.f32 %v1485_v54, %v1001_v56  ;;  %v1653_v60 = vadd.f32 %v1652_v55, %v1168_v57 }
 0x1b4   : > { %1769 = vst [vmem:[#allocation3 + $0x218] sm:$0xff] %v1486_v59  ;;  %6712 = vmatmul.msk.f32.gmra.mxu0 %vm12526_vm0, %v726_v58  ;;  %6762 = vmatmul.msk.f32.gmra.mxu1 %vm12526_vm0, %v726_v58 }
 0x1b5   : > { %1770 = vst [vmem:[#allocation3 + $0xc8] sm:$0xff] %v1653_v60 }
 0x1b8   : > { %v1488_v61 = vpop.f32.mrf.mxu2  ;;  %v1655_v62 = vpop.f32.mrf.mxu3 }
 0x1b9   : > { %v1004_v63 = vpop.f32.mrf.mxu0  ;;  %v1171_v0 = vpop.f32.mrf.mxu1 }
 0x1ba   : > { %v1489_v2 = vadd.f32 %v1488_v61, %v1004_v63  ;;  %v1656_v3 = vadd.f32 %v1655_v62, %v1171_v0 }
 0x1bc   : > { %1771 = vst [vmem:[#allocation3 + $0x248] sm:$0xff] %v1489_v2  ;;  %6863 = vmatmul.msk.f32.vlgmr.msrb.gmra.mxu0 %vm12526_vm0, %v1803_v1  ;;  %6864 = vmatmul.msk.f32.vlgmr.msrb.gmra.mxu1 %vm12526_vm0, %v1803_v1 }
 0x1bd   : > { %1772 = vst [vmem:[#allocation3 + $0x160] sm:$0xff] %v1656_v3 }
 0x1c0   : > { %v1491_v5 = vpop.f32.mrf.mxu2  ;;  %v1658_v6 = vpop.f32.mrf.mxu3 }
 0x1c1   : > { %v1007_v7 = vpop.f32.mrf.mxu0  ;;  %v1174_v8 = vpop.f32.mrf.mxu1 }
 0x1c2   : > { %v1492_v9 = vadd.f32 %v1491_v5, %v1007_v7  ;;  %v1659_v11 = vadd.f32 %v1658_v6, %v1174_v8 }
 0x1c4   : > { %1773 = vst [vmem:[#allocation3 + $0x258] sm:$0xff] %v1492_v9 }
 0x1c5   : > { %1774 = vst [vmem:[#allocation3 + $0x2e0] sm:$0xff] %v1659_v11 }
 0x1c8   : > { %v1494_v15 = vpop.f32.mrf.mxu2  ;;  %v1661_v16 = vpop.f32.mrf.mxu3 }
 0x1c9   : > { %v1010_v17 = vpop.f32.mrf.mxu0  ;;  %v1177_v19 = vpop.f32.mrf.mxu1 }
 0x1ca   : > { %v1495_v20 = vadd.f32 %v1494_v15, %v1010_v17  ;;  %v1662_v21 = vadd.f32 %v1661_v16, %v1177_v19 }
 0x1cc   : > { %1775 = vst [vmem:[#allocation3 + $0x290] sm:$0xff] %v1495_v20 }
 0x1cd   : > { %1776 = vst [vmem:[#allocation3] sm:$0xff] %v1662_v21 }
 0x1d0   : > { %v1497_v22 = vpop.f32.mrf.mxu2  ;;  %v1664_v23 = vpop.f32.mrf.mxu3 }
 0x1d1   : > { %v1013_v24 = vpop.f32.mrf.mxu0  ;;  %v1180_v14 = vpop.f32.mrf.mxu1 }
 0x1d2   : > { %v1498_v12 = vadd.f32 %v1497_v22, %v1013_v24  ;;  %v1665_v10 = vadd.f32 %v1664_v23, %v1180_v14 }
 0x1d4   : > { %1777 = vst [vmem:[#allocation3 + $0x120] sm:$0xff] %v1498_v12 }
 0x1d5   : > { %1778 = vst [vmem:[#allocation3 + $0x68] sm:$0xff] %v1665_v10 }
 0x1d8   : > { %v1500_v25 = vpop.f32.mrf.mxu2  ;;  %v1667_v26 = vpop.f32.mrf.mxu3 }
 0x1d9   : > { %v1016_v27 = vpop.f32.mrf.mxu0  ;;  %v1183_v18 = vpop.f32.mrf.mxu1 }
 0x1da   : > { %v1501_v28 = vadd.f32 %v1500_v25, %v1016_v27  ;;  %v1668_v29 = vadd.f32 %v1667_v26, %v1183_v18 }
 0x1dc   : > { %1779 = vst [vmem:[#allocation3 + $0x200] sm:$0xff] %v1501_v28 }
 0x1dd   : > { %1780 = vst [vmem:[#allocation3 + $0x1d8] sm:$0xff] %v1668_v29 }
 0x1e0   : > { %v1503_v30 = vpop.f32.mrf.mxu2  ;;  %v1670_v31 = vpop.f32.mrf.mxu3 }
 0x1e1   : > { %v1019_v32 = vpop.f32.mrf.mxu0  ;;  %v1186_v33 = vpop.f32.mrf.mxu1 }
 0x1e2   : > { %v1504_v34 = vadd.f32 %v1503_v30, %v1019_v32  ;;  %v1671_v35 = vadd.f32 %v1670_v31, %v1186_v33 }
 0x1e4   : > { %1781 = vst [vmem:[#allocation3 + $0x2e8] sm:$0xff] %v1504_v34  ;;  %v8389_v34 = vpop.permute.xlu0 %1910 }
 0x1e5   : > { %1782 = vst [vmem:[#allocation3 + $0x1f0] sm:$0xff] %v1671_v35 }
 0x1e8   : > { %v1506_v36 = vpop.f32.mrf.mxu2  ;;  %v1673_v37 = vpop.f32.mrf.mxu3 }
 0x1e9   : > { %v1022_v38 = vpop.f32.mrf.mxu0  ;;  %v1189_v39 = vpop.f32.mrf.mxu1 }
 0x1ea   : > { %v1507_v40 = vadd.f32 %v1506_v36, %v1022_v38  ;;  %v1674_v41 = vadd.f32 %v1673_v37, %v1189_v39  ;;  %v8391_v35 = vpop.permute.xlu1 %1920 }
 0x1ec   : > { %1783 = vst [vmem:[#allocation3 + $0x1e8] sm:$0xff] %v1507_v40  ;;  %v1880_v40 = vld [vmem:[#allocation3 + $0x10] sm:$0xff] }
 0x1ed   : > { %1784 = vst [vmem:[#allocation3 + $0x50] sm:$0xff] %v1674_v41 }
 0x1f0   : > { %v1509_v42 = vpop.f32.mrf.mxu2  ;;  %v1676_v43 = vpop.f32.mrf.mxu3 }
 0x1f1   : > { %v1025_v46 = vpop.f32.mrf.mxu0  ;;  %v1192_v47 = vpop.f32.mrf.mxu1 }
 0x1f2   : > { %v1510_v48 = vadd.f32 %v1509_v42, %v1025_v46  ;;  %v1677_v49 = vadd.f32 %v1676_v43, %v1192_v47  ;;  %v1882_v43 = vld [vmem:[#allocation3 + $0x30] sm:$0xff]  ;;  %v1881_v47 = vld [vmem:[#allocation3 + $0x48] sm:$0xff] }
 0x1f3   : > { %v1883_v46 = vld [vmem:[#allocation3 + $0xf0] sm:$0xff] }
 0x1f4   : > { %1785 = vst [vmem:[#allocation3 + $0x2a8] sm:$0xff] %v1510_v48  ;;  %v8412_v48 = vld [vmem:[%s12519_s6 + $0x20] sm:$0xff] }
 0x1f5   : > { %1786 = vst [vmem:[#allocation3 + $0x108] sm:$0xff] %v1677_v49 }
 0x1f8   : > { %v1512_v50 = vpop.f32.mrf.mxu2  ;;  %v1679_v51 = vpop.f32.mrf.mxu3 }
 0x1f9   : > { %v1028_v52 = vpop.f32.mrf.mxu0  ;;  %v1195_v53 = vpop.f32.mrf.mxu1 }
 0x1fa   : > { %v1513_v54 = vadd.f32 %v1512_v50, %v1028_v52  ;;  %v1680_v55 = vadd.f32 %v1679_v51, %v1195_v53  ;;  %v1878_v53 = vld [vmem:[#allocation3 + $0x2b0] sm:$0xff] }
 0x1fc   : > { %1787 = vst [vmem:[#allocation3 + $0xb8] sm:$0xff] %v1513_v54  ;;  %v1879_v54 = vld [vmem:[#allocation3 + $0xd0] sm:$0xff] }
 0x1fd   : > { %1788 = vst [vmem:[#allocation3 + $0x88] sm:$0xff] %v1680_v55  ;;  %v8418_v55 = vpop.permute.xlu0 %1915 }
 0x200   : > { %v1515_v56 = vpop.f32.mrf.mxu2  ;;  %v1682_v57 = vpop.f32.mrf.mxu3 }
 0x201   : > { %v1031_v58 = vpop.f32.mrf.mxu0  ;;  %v1198_v59 = vpop.f32.mrf.mxu1 }
 0x202   : > { %v1516_v60 = vadd.f32 %v1515_v56, %v1031_v58  ;;  %v1683_v61 = vadd.f32 %v1682_v57, %v1198_v59  ;;  %v8423_v56 = vld [vmem:[%s12519_s6 + $0x28] sm:$0xff]  ;;  %v8428_v57 = vld [vmem:[%s12519_s6 + $0x10] sm:$0xff]  ;;  %v8433_v58 = vld [vmem:[%s12519_s6 + $0x18] sm:$0xff] }
 0x204   : > { %1789 = vst [vmem:[#allocation3 + $0x188] sm:$0xff] %v1516_v60 }
 0x205   : > { %1790 = vst [vmem:[#allocation3 + $0x20] sm:$0xff] %v1683_v61 }
 0x208   : > { %v1518_v62 = vpop.f32.mrf.mxu2  ;;  %v1685_v63 = vpop.f32.mrf.mxu3 }
 0x209   : > { %v1034_v0 = vpop.f32.mrf.mxu0  ;;  %v1201_v1 = vpop.f32.mrf.mxu1 }
 0x20a   : > { %v1519_v2 = vadd.f32 %v1518_v62, %v1034_v0  ;;  %v1686_v3 = vadd.f32 %v1685_v63, %v1201_v1  ;;  %v1862_v1 = vld [vmem:[%s12519_s6] sm:$0xff] }
 0x20c   : > { %1791 = vst [vmem:[#allocation3 + $0x18] sm:$0xff] %v1519_v2  ;;  %v1863_v2 = vld [vmem:[%s12519_s6 + $0x8] sm:$0xff] }
 0x20d   : > { %1792 = vst [vmem:[#allocation3 + $0xd8] sm:$0xff] %v1686_v3 }
 0x210   : > { %v1521_v4 = vpop.f32.mrf.mxu2  ;;  %v1688_v5 = vpop.f32.mrf.mxu3 }
 0x211   : > { %v1037_v6 = vpop.f32.mrf.mxu0  ;;  %v1204_v7 = vpop.f32.mrf.mxu1 }
 0x212   : > { %v1522_v8 = vadd.f32 %v1521_v4, %v1037_v6  ;;  %v1689_v9 = vadd.f32 %v1688_v5, %v1204_v7 }
 0x214   : > { %1793 = vst [vmem:[#allocation3 + $0x1f8] sm:$0xff] %v1522_v8 }
 0x215   : > { %1794 = vst [vmem:[#allocation3 + $0x308] sm:$0xff] %v1689_v9 }
 0x218   : > { %v1524_v11 = vpop.f32.mrf.mxu2  ;;  %v1691_v13 = vpop.f32.mrf.mxu3 }
 0x219   : > { %v1040_v15 = vpop.f32.mrf.mxu0  ;;  %v1207_v16 = vpop.f32.mrf.mxu1 }
 0x21a   : > { %v1525_v17 = vadd.f32 %v1524_v11, %v1040_v15  ;;  %v1692_v19 = vadd.f32 %v1691_v13, %v1207_v16  ;;  %v8457_v13 = vpop.permute.xlu1 %1925 }
 0x21c   : > { %1795 = vst [vmem:[#allocation3 + $0x280] sm:$0xff] %v1525_v17 }
 0x21d   : > { %1796 = vst [vmem:[#allocation3 + $0x288] sm:$0xff] %v1692_v19  ;;  %v1884_v19 = vld [vmem:[#allocation3 + $0xf8] sm:$0xff] }
 0x220   : > { %v1527_v20 = vpop.f32.mrf.mxu2  ;;  %v1694_v21 = vpop.f32.mrf.mxu3 }
 0x221   : > { %v1043_v22 = vpop.f32.mrf.mxu0  ;;  %v1210_v23 = vpop.f32.mrf.mxu1 }
 0x222   : > { %v1528_v24 = vadd.f32 %v1527_v20, %v1043_v22  ;;  %v1695_v14 = vadd.f32 %v1694_v21, %v1210_v23 }
 0x224   : > { %1797 = vst [vmem:[#allocation3 + $0x150] sm:$0xff] %v1528_v24 }
 0x225   : > { %1798 = vst [vmem:[#allocation3 + $0x138] sm:$0xff] %v1695_v14 }
 0x228   : > { %v1530_v12 = vpop.f32.mrf.mxu2  ;;  %v1697_v10 = vpop.f32.mrf.mxu3 }
 0x229   : > { %v1046_v25 = vpop.f32.mrf.mxu0  ;;  %v1213_v26 = vpop.f32.mrf.mxu1 }
 0x22a   : > { %v1531_v27 = vadd.f32 %v1530_v12, %v1046_v25  ;;  %v1698_v18 = vadd.f32 %v1697_v10, %v1213_v26  ;;  %v8466_v25 = vld [vmem:[%s12519_s6 + $0x30] sm:$0xff]  ;;  %v1885_v26 = vld [vmem:[#allocation3 + $0x78] sm:$0xff] }
 0x22c   : > { %1799 = vst [vmem:[#allocation3 + $0x2d0] sm:$0xff] %v1531_v27  ;;  %v1886_v27 = vld [vmem:[#allocation3 + $0x300] sm:$0xff] }
 0x22d   : > { %1800 = vst [vmem:[#allocation3 + $0x1b8] sm:$0xff] %v1698_v18 }
 0x230   : > { %v1533_v28 = vpop.f32.mrf.mxu2  ;;  %v1700_v29 = vpop.f32.mrf.mxu3 }
 0x231   : > { %v1049_v30 = vpop.f32.mrf.mxu0  ;;  %v1216_v31 = vpop.f32.mrf.mxu1 }
 0x232   : > { %v1534_v32 = vadd.f32 %v1533_v28, %v1049_v30  ;;  %v1701_v33 = vadd.f32 %v1700_v29, %v1216_v31  ;;  %v1887_v28 = vld [vmem:[#allocation3 + $0x130] sm:$0xff] }
 0x234   : > { %1801 = vst [vmem:[#allocation3 + $0x178] sm:$0xff] %v1534_v32 }
 0x235   : > { %1802 = vst [vmem:[#allocation3 + $0x228] sm:$0xff] %v1701_v33 }
 0x239   : > { %v8393_v36 = vpop.f32.mrf.mxu0  ;;  %v8395_v37 = vpop.f32.mrf.mxu1 }
 0x23a   : > { %v8398_v38 = vperm.slane %v8393_v36, 0  ;;  %v8401_v39 = vperm.slane %v8395_v37, 0  ;;  %v8404_v41 = vperm.slane %v8393_v36, 4  ;;  %v8407_v42 = vperm.slane %v8395_v37, 4 }
 0x23c   : > { %v1898_v49 = vadd.f32 %v8398_v38, %v1882_v43  ;;  %v1899_v50 = vadd.f32 %v8401_v39, %v1883_v46  ;;  %v1896_v51 = vadd.f32 %v8398_v38, %v1880_v40  ;;  %v1897_v52 = vadd.f32 %v8401_v39, %v1881_v47  ;;  %v8472_v40 = vpop.permute.xlu2 %1930  ;;  %v1876_v46 = vld [vmem:[%s12520_s7] sm:$0x3] }
 0x23d   : > { %v1894_v59 = vadd.f32 %v8398_v38, %v1878_v53  ;;  %v1895_v60 = vadd.f32 %v8401_v39, %v1879_v54  ;;  %v4229_v5 = vadd.f32 %v8404_v41, %v8308_v44  ;;  %v4230_v6 = vadd.f32 %v8407_v42, %v8310_v45  ;;  %12583 = vst [vmem:[#allocation9_spill] sm:$0xff] %v8472_v40  ;;  %v8484_v53 = vld [vmem:[%s12519_s6 + $0x38] sm:$0xff]  ;;  %v1870_v54 = vld [vmem:[%s12519_s6 + $0x40] sm:$0xff] }
 0x23e   : > { %v1947_v61 = vmul.f32 %v8391_v35, %v1898_v49  ;;  %v1948_v62 = vmul.f32 %v8391_v35, %v1899_v50  ;;  %v1945_v63 = vmul.f32 %v8418_v55, %v1896_v51  ;;  %v1946_v0 = vmul.f32 %v8418_v55, %v1897_v52 }
 0x23f   : > { %v1943_v3 = vmul.f32 %v8389_v34, %v1894_v59  ;;  %v1944_v4 = vmul.f32 %v8389_v34, %v1895_v60  ;;  %v4243_v17 = vmul.f32 %v4229_v5, %v8389_v34  ;;  %v1900_v45 = vadd.f32 %v8398_v38, %v1884_v19 }
 0x240   : > { %v1961_v7 = vadd.f32 %v1947_v61, %v8412_v48  ;;  %v1962_v8 = vadd.f32 %v1948_v62, %v8423_v56  ;;  %v1959_v9 = vadd.f32 %v1945_v63, %v8428_v57  ;;  %v1960_v11 = vadd.f32 %v1946_v0, %v8433_v58  ;;  %v1871_v63 = vld [vmem:[%s12519_s6 + $0x48] sm:$0xff] }
 0x241   : > { %v1957_v15 = vadd.f32 %v1943_v3, %v1862_v1  ;;  %v1958_v16 = vadd.f32 %v1944_v4, %v1863_v2  ;;  %v4244_v23 = vmul.f32 %v4230_v6, %v8389_v34  ;;  %v4257_v14 = vadd.f32 %v4243_v17, %v1862_v1  ;;  %v4219_v3 = vld [vmem:[#allocation3 + $0xe0] sm:$0xff] }
 0x242   : > { %v6869_v20 = vmul.f32 -1.442695, %v1961_v7  ;;  %v6870_v44 = vmul.f32 -1.442695, %v1962_v8  ;;  %v6867_v21 = vmul.f32 -1.442695, %v1959_v9  ;;  %v1949_v12 = vmul.f32 %v8457_v13, %v1900_v45 }
 0x243   : > { %v6868_v22 = vmul.f32 -1.442695, %v1960_v11  ;;  %v6865_v24 = vmul.f32 -1.442695, %v1957_v15  ;;  %v6866_v10 = vmul.f32 -1.442695, %v1958_v16  ;;  %v1901_v18 = vadd.f32 %v8401_v39, %v1885_v26 }
 0x244   : > { %7033 = vpow2.f32 %v6869_v20  ;;  %v1902_v29 = vadd.f32 %v8398_v38, %v1886_v27  ;;  %v4258_v30 = vadd.f32 %v4244_v23, %v1863_v2  ;;  %v1903_v31 = vadd.f32 %v8401_v39, %v1887_v28  ;;  %v4220_v20 = vld [vmem:[#allocation3 + $0x278] sm:$0xff] }
 0x245   : > { %7035 = vpow2.f32 %v6870_v44  ;;  %v6921_v32 = vmul.f32 -1.442695, %v4257_v14  ;;  %v1963_v33 = vadd.f32 %v1949_v12, %v8466_v25  ;;  %v1950_v47 = vmul.f32 %v8457_v13, %v1901_v18 }
 0x246   : > { %7037 = vpow2.f32 %v6867_v21  ;;  %v1951_v49 = vmul.f32 %v8472_v40, %v1902_v29  ;;  %v6922_v52 = vmul.f32 -1.442695, %v4258_v30  ;;  %v1952_v59 = vmul.f32 %v8472_v40, %v1903_v31 }
 0x247   : > { %7039 = vpow2.f32 %v6868_v22  ;;  %v6871_v62 = vmul.f32 -1.442695, %v1963_v33  ;;  %v8496_v1 = vperm.slane %v1876_v46, 0  ;;  %v8498_v2 = vperm.slane %v1876_v46, 1 }
 0x248   : > { %7041 = vpow2.f32 %v6865_v24  ;;  %v1964_v5 = vadd.f32 %v1950_v47, %v8484_v53  ;;  %v8502_v6 = vadd.f32 %v1951_v49, %v1870_v54  ;;  %v8505_v7 = vadd.f32 %v8404_v41, %v4219_v3 }
 0x249   : > { %7043 = vpow2.f32 %v6866_v10  ;;  %v8511_v15 = vadd.f32 %v1952_v59, %v1871_v63  ;;  %v8521_v45 = vadd.f32 %v8407_v42, %v4220_v20 }
 0x24a   : > { %v7034_v43 = vpop.eup %7033  ;;  %7045 = vpow2.f32 %v6921_v32  ;;  %v6872_v14 = vmul.f32 -1.442695, %v1964_v5 }
 0x24b   : > { %v7036_v50 = vpop.eup %7035  ;;  %v8479_v51 = vadd.f32 1.0, %v7034_v43 }
 0x24c   : > { %v7038_v60 = vpop.eup %7037  ;;  %v8490_v61 = vadd.f32 1.0, %v7036_v50 }
 0x24d   : > { %v7040_v0 = vpop.eup %7039  ;;  %7047 = vrcp.f32 %v8479_v51  ;;  %v8507_v9 = vadd.f32 1.0, %v7038_v60  ;;  %v2096_v16 = vand.u32 2147483647, %v8479_v51  ;;  %v2098_v17 = vand.u32 2147483648, %v8479_v51 }
 0x24e   : > { %v7042_v4 = vpop.eup %7041  ;;  %7049 = vrcp.f32 %v8490_v61  ;;  %v8509_v11 = vadd.f32 1.0, %v7040_v0  ;;  %v2111_v44 = vand.u32 2147483647, %v8490_v61  ;;  %v2113_v21 = vand.u32 2147483648, %v8490_v61 }
 0x24f   : > { %v7044_v8 = vpop.eup %7043  ;;  %7051 = vpow2.f32 %v6922_v52  ;;  %v8515_v19 = vadd.f32 1.0, %v7042_v4  ;;  %v2068_v23 = vand.u32 2147483648, %v8507_v9  ;;  %vm2092_vm2 = vweird.f32 %v8479_v51 }
 0x250   : > { %7053 = vpow2.f32 %v6871_v62  ;;  %v7046_v22 = vpop.eup %7045  ;;  %v8525_v24 = vadd.f32 1.0, %v7044_v8  ;;  %vm2107_vm3 = vweird.f32 %v8490_v61  ;;  %v2083_v10 = vand.u32 2147483648, %v8509_v11 }
 0x251   : > { %7055 = vrcp.f32 %v8507_v9  ;;  %vm8532_vm4 = vcmp.eq.f32.partialorder %v2096_v16, 8.507059e+37  ;;  %v2099_v28 = vor.u32 1.1754944e-38, %v2098_v17  ;;  %v2066_v29 = vand.u32 2147483647, %v8507_v9 }
 0x252   : > { %7057 = vrcp.f32 %v8509_v11  ;;  %vm8538_vm5 = vcmp.eq.f32.partialorder %v2111_v44, 8.507059e+37  ;;  %v2114_v33 = vor.u32 1.1754944e-38, %v2113_v21  ;;  %v2081_v43 = vand.u32 2147483647, %v8509_v11 }
 0x253   : > { %v7048_v12 = vpop.eup %7047  ;;  %7059 = vrcp.f32 %v8515_v19  ;;  %v2038_v46 = vand.u32 2147483648, %v8515_v19  ;;  %vm2062_vm7 = vweird.f32 %v8507_v9  ;;  %v2069_v50 = vor.u32 1.1754944e-38, %v2068_v23 }
 0x254   : > { %v7050_v26 = vpop.eup %7049  ;;  %v2088_v27 = vmul.f32 %v7048_v12, %v8479_v51  ;;  %vm2093_vm6 = vweird.f32 %v7048_v12  ;;  %7061 = vrcp.f32 %v8525_v24  ;;  %vm2077_vm9 = vweird.f32 %v8509_v11 }
 0x255   : > { %v7052_v30 = vpop.eup %7051  ;;  %v2103_v31 = vmul.f32 %v7050_v26, %v8490_v61  ;;  %vm2108_vm8 = vweird.f32 %v7050_v26  ;;  %v2084_v59 = vor.u32 1.1754944e-38, %v2083_v10  ;;  %v2036_v60 = vand.u32 2147483647, %v8515_v19  ;;  %vm2094_vm15 = vmor %vm2092_vm2, %vm2093_vm6 }
 0x256   : > { %v8544_v47 = vpop.eup %7053  ;;  %v2089_v49 = vsub.f32 1.0, %v2088_v27  ;;  %vm8551_vm10 = vcmp.eq.f32.partialorder %v2066_v29, 8.507059e+37  ;;  %vm2032_vm11 = vweird.f32 %v8515_v19  ;;  %v2039_v4 = vor.u32 1.1754944e-38, %v2038_v46  ;;  %vm2109_vm0 = vmor %vm2107_vm3, %vm2108_vm8 }
 0x257   : > { %v7056_v52 = vpop.eup %7055  ;;  %v2104_v54 = vsub.f32 1.0, %v2103_v31  ;;  %v2051_v5 = vand.u32 2147483647, %v8525_v24  ;;  %vm8558_vm13 = vcmp.eq.f32.partialorder %v2081_v43, 8.507059e+37  ;;  %v2053_v44 = vand.u32 2147483648, %v8525_v24 }
 0x258   : > { %v7058_v62 = vpop.eup %7057  ;;  %v2090_v63 = vmul.f32 %v7048_v12, %v2089_v49  ;;  %v2058_v0 = vmul.f32 %v7056_v52, %v8507_v9  ;;  %vm2063_vm12 = vweird.f32 %v7056_v52  ;;  %v8567_v31 = vadd.f32 1.0, %v7046_v22 }
 0x259   : > { %v7060_v8 = vpop.eup %7059  ;;  %v2105_v16 = vmul.f32 %v7050_v26, %v2104_v54  ;;  %v2073_v17 = vmul.f32 %v7058_v62, %v8509_v11  ;;  %vm2078_vm14 = vweird.f32 %v7058_v62  ;;  %7063 = vpow2.f32 %v6872_v14  ;;  %vm2064_vm2 = vmor %vm2062_vm7, %vm2063_vm12 }
 0x25a   : > { %v2091_v21 = vadd.f32 %v7048_v12, %v2090_v63  ;;  %v2059_v23 = vsub.f32 1.0, %v2058_v0  ;;  %v2028_v10 = vmul.f32 %v7060_v8, %v8515_v19  ;;  %vm2033_vm1 = vweird.f32 %v7060_v8  ;;  %v7062_v43 = vpop.eup %7061 }
 0x25b   : > { %v2106_v27 = vadd.f32 %v7050_v26, %v2105_v16  ;;  %v2074_v29 = vsub.f32 1.0, %v2073_v17  ;;  %v2043_v16 = vmul.f32 %v7062_v43, %v8525_v24  ;;  %vm2048_vm3 = vweird.f32 %v7062_v43 }
 0x25c   : > { %v2095_v46 = vsel %vm2094_vm15, %v7048_v12, %v2091_v21  ;;  %v2060_v49 = vmul.f32 %v7056_v52, %v2059_v23  ;;  %v2029_v54 = vsub.f32 1.0, %v2028_v10  ;;  %7065 = vrcp.f32 %v8567_v31 }
 0x25d   : > { %v2100_v63 = vsel %vm8532_vm4, %v2099_v28, %v2095_v46  ;;  %v2110_v0 = vsel %vm2109_vm0, %v7050_v26, %v2106_v27  ;;  %v2075_v51 = vmul.f32 %v7058_v62, %v2074_v29  ;;  %v2044_v18 = vsub.f32 1.0, %v2043_v16  ;;  %vm2079_vm0 = vmor %vm2077_vm9, %vm2078_vm14 }
 0x25e   : > { %v2115_v22 = vsel %vm8538_vm5, %v2114_v33, %v2110_v0  ;;  %v2246_v17 = vmul.f32 %v8496_v1, %v2100_v63  ;;  %v2061_v12 = vadd.f32 %v7056_v52, %v2060_v49  ;;  %v2030_v21 = vmul.f32 %v7060_v8, %v2029_v54  ;;  %vm2034_vm4 = vmor %vm2032_vm11, %vm2033_vm1 }
 0x25f   : > { %v2247_v61 = vmul.f32 %v8498_v2, %v2115_v22  ;;  %v2076_v14 = vadd.f32 %v7058_v62, %v2075_v51  ;;  %v8582_v28 = vadd.f32 1.0, %v7052_v30  ;;  %v2045_v9 = vmul.f32 %v7062_v43, %v2044_v18  ;;  %v7064_v30 = vpop.eup %7063 }
 0x260   : > { %v2065_v26 = vsel %vm2064_vm2, %v7056_v52, %v2061_v12  ;;  %v2031_v32 = vadd.f32 %v7060_v8, %v2030_v21  ;;  %vm2037_vm5 = vcmp.eq.f32.partialorder %v2036_v60, 8.507059e+37  ;;  %vm2047_vm6 = vweird.f32 %v8525_v24 }
 0x261   : > { %v2262_v33 = vadd.f32 %v2247_v61, %v2246_v17  ;;  %v2070_v23 = vsel %vm8551_vm10, %v2069_v50, %v2065_v26  ;;  %v2080_v10 = vsel %vm2079_vm0, %v7058_v62, %v2076_v14  ;;  %v2046_v3 = vadd.f32 %v7062_v43, %v2045_v9  ;;  %vm2049_vm7 = vmor %vm2047_vm6, %vm2048_vm3 }
 0x262   : > { %v2085_v52 = vsel %vm8558_vm13, %v2084_v59, %v2080_v10  ;;  %v2244_v11 = vmul.f32 %v8496_v1, %v2070_v23  ;;  %v2035_v27 = vsel %vm2034_vm4, %v7060_v8, %v2031_v32  ;;  %vm2052_vm8 = vcmp.eq.f32.partialorder %v2051_v5, 8.507059e+37  ;;  %v7066_v20 = vpop.eup %7065 }
 0x263   : > { %2263 = vadd.xlane.f32.xlu0 %v2262_v33  ;;  %v2245_v29 = vmul.f32 %v8498_v2, %v2085_v52  ;;  %v2040_v46 = vsel %vm2037_vm5, %v2039_v4, %v2035_v27  ;;  %v2054_v19 = vor.u32 1.1754944e-38, %v2053_v44  ;;  %7067 = vrcp.f32 %v8582_v28 }
 0x264   : > { %v4249_v50 = vmul.f32 %v8505_v7, %v8457_v13  ;;  %v2050_v62 = vsel %vm2049_vm7, %v7062_v43, %v2046_v3  ;;  %v2242_v60 = vmul.f32 %v8496_v1, %v2040_v46  ;;  %v4336_v8 = vand.u32 2147483647, %v8567_v31 }
 0x265   : > { %v2259_v59 = vadd.f32 %v2245_v29, %v2244_v11  ;;  %v2055_v4 = vsel %vm2052_vm8, %v2054_v19, %v2050_v62  ;;  %v4338_v49 = vand.u32 2147483648, %v8567_v31  ;;  %v8606_v24 = vadd.f32 1.0, %v8544_v47  ;;  %v1888_v29 = vld [vmem:[#allocation3 + $0xe8] sm:$0xff]  ;;  %v8649_v19 = vpop.permute.xlu2 %1935 }
 0x266   : > { %v8608_v5 = vadd.f32 1.0, %v7064_v30  ;;  %v2243_v44 = vmul.f32 %v8498_v2, %v2055_v4  ;;  %v4328_v7 = vmul.f32 %v7066_v20, %v8567_v31  ;;  %v6873_v43 = vmul.f32 -1.442695, %v8502_v6 }
 0x267   : > { %2260 = vadd.xlane.f32.xlu2 %v2259_v59  ;;  %v6874_v54 = vmul.f32 -1.442695, %v8511_v15  ;;  %v4351_v63 = vand.u32 2147483647, %v8582_v28  ;;  %v4353_v0 = vand.u32 2147483648, %v8582_v28  ;;  %7069 = vrcp.f32 %v8606_v24 }
 0x268   : > { %v4250_v47 = vmul.f32 %v8521_v45, %v8457_v13  ;;  %v2256_v51 = vadd.f32 %v2243_v44, %v2242_v60  ;;  %v4329_v16 = vsub.f32 1.0, %v4328_v7  ;;  %7071 = vrcp.f32 %v8608_v5  ;;  %v1889_v60 = vld [vmem:[#allocation3 + $0x40] sm:$0xff] }
 0x269   : > { %v4263_v22 = vadd.f32 %v4249_v50, %v8466_v25  ;;  %v7068_v17 = vpop.eup %7067  ;;  %vm4332_vm1 = vweird.f32 %v8567_v31  ;;  %vm8622_vm9 = vcmp.eq.f32.partialorder %v4336_v8, 8.507059e+37  ;;  %v4339_v15 = vor.u32 1.1754944e-38, %v4338_v49 }
 0x26a   : > { %vm4347_vm10 = vweird.f32 %v8582_v28  ;;  %2257 = vadd.xlane.f32.xlu1 %v2256_v51  ;;  %v4330_v12 = vmul.f32 %v7066_v20, %v4329_v16  ;;  %vm4333_vm11 = vweird.f32 %v7066_v20  ;;  %v4343_v45 = vmul.f32 %v7068_v17, %v8582_v28  ;;  %v4215_v51 = vld [vmem:[#allocation3 + $0x208] sm:$0xff] }
 0x26b   : > { %v2126_v21 = vand.u32 2147483647, %v8606_v24  ;;  %vm8629_vm12 = vcmp.eq.f32.partialorder %v4351_v63, 8.507059e+37  ;;  %v4354_v25 = vor.u32 1.1754944e-38, %v4353_v0  ;;  %7073 = vpow2.f32 %v6873_v43  ;;  %vm4334_vm14 = vmor %vm4332_vm1, %vm4333_vm11 }
 0x26c   : > { %v4264_v14 = vadd.f32 %v4250_v47, %v8484_v53  ;;  %v4331_v18 = vadd.f32 %v7066_v20, %v4330_v12  ;;  %v4344_v26 = vsub.f32 1.0, %v4343_v45  ;;  %vm2122_vm13 = vweird.f32 %v8606_v24 }
 0x26d   : > { %7075 = vpow2.f32 %v6874_v54  ;;  %v6927_v32 = vmul.f32 -1.442695, %v4263_v22  ;;  %v7070_v33 = vpop.eup %7069  ;;  %v2128_v23 = vand.u32 2147483648, %v8606_v24  ;;  %vm2137_vm15 = vweird.f32 %v8608_v5 }
 0x26e   : > { %v2141_v10 = vand.u32 2147483647, %v8608_v5  ;;  %v6928_v9 = vmul.f32 -1.442695, %v4264_v14  ;;  %v7072_v30 = vpop.eup %7071  ;;  %v4335_v52 = vsel %vm4334_vm14, %v7066_v20, %v4331_v18  ;;  %v4345_v53 = vmul.f32 %v7068_v17, %v4344_v26  ;;  %v4216_v26 = vld [vmem:[#allocation3 + $0x2f0] sm:$0xff] }
 0x26f   : > { %vm4348_vm2 = vweird.f32 %v7068_v17  ;;  %v2118_v11 = vmul.f32 %v7070_v33, %v8606_v24  ;;  %vm8641_vm0 = vcmp.eq.f32.partialorder %v2126_v21, 8.507059e+37  ;;  %v4340_v31 = vsel %vm8622_vm9, %v4339_v15, %v4335_v52 }
 0x270   : > { %v2133_v46 = vmul.f32 %v7072_v30, %v8608_v5  ;;  %7077 = vpow2.f32 %v6927_v32  ;;  %v1904_v3 = vadd.f32 %v8398_v38, %v1888_v29  ;;  %v4346_v50 = vadd.f32 %v7068_v17, %v4345_v53  ;;  %vm4349_vm3 = vmor %vm4347_vm10, %vm4348_vm2 }
 0x271   : > { %v2119_v59 = vsub.f32 1.0, %v2118_v11  ;;  %v2143_v62 = vand.u32 2147483648, %v8608_v5  ;;  %7079 = vpow2.f32 %v6928_v9  ;;  %v7074_v8 = vpop.eup %7073  ;;  %vm2123_vm4 = vweird.f32 %v7070_v33 }
 0x272   : > { %v2134_v20 = vsub.f32 1.0, %v2133_v46  ;;  %vm2138_vm5 = vweird.f32 %v7072_v30  ;;  %v1905_v4 = vadd.f32 %v8401_v39, %v1889_v60  ;;  %v4350_v44 = vsel %vm4349_vm3, %v7068_v17, %v4346_v50  ;;  %v8669_v17 = vld [vmem:[%s12519_s6 + $0x50] sm:$0xff]  ;;  %vm2124_vm6 = vmor %vm2122_vm13, %vm2123_vm4 }
 0x273   : > { %v7076_v49 = vpop.eup %7075  ;;  %v4537_v7 = vmul.f32 %v4340_v31, %v8496_v1  ;;  %v2120_v43 = vmul.f32 %v7070_v33, %v2119_v59  ;;  %v8657_v54 = vadd.f32 1.0, %v7074_v8  ;;  %v4355_v63 = vsel %vm8629_vm12, %v4354_v25, %v4350_v44  ;;  %vm2139_vm8 = vmor %vm2137_vm15, %vm2138_vm5 }
 0x274   : > { %v2135_v0 = vmul.f32 %v7072_v30, %v2134_v20  ;;  %v8661_v47 = vadd.f32 1.0, %v7076_v49  ;;  %v1953_v28 = vmul.f32 %v8649_v19, %v1904_v3  ;;  %v4538_v16 = vmul.f32 %v4355_v63, %v8498_v2 }
 0x275   : > { %v2121_v22 = vadd.f32 %v7070_v33, %v2120_v43  ;;  %7081 = vrcp.f32 %v8657_v54  ;;  %v4231_v6 = vadd.f32 %v8404_v41, %v4215_v51  ;;  %v2129_v12 = vor.u32 1.1754944e-38, %v2128_v23  ;;  %v8685_v23 = vld [vmem:[%s12519_s6 + $0x58] sm:$0xff] }
 0x276   : > { %v7078_v15 = vpop.eup %7077  ;;  %v2136_v45 = vadd.f32 %v7072_v30, %v2135_v0  ;;  %vm2142_vm7 = vcmp.eq.f32.partialorder %v2141_v10, 8.507059e+37  ;;  %7083 = vrcp.f32 %v8661_v47  ;;  %v4551_v61 = vadd.f32 %v4538_v16, %v4537_v7 }
 0x277   : > { %v7080_v21 = vpop.eup %7079  ;;  %v2125_v25 = vsel %vm2124_vm6, %v7070_v33, %v2121_v22  ;;  %v2144_v14 = vor.u32 1.1754944e-38, %v2143_v62  ;;  %v1954_v18 = vmul.f32 %v8649_v19, %v1905_v4  ;;  %v1967_v10 = vadd.f32 %v1953_v28, %v8669_v17 }
 0x278   : > { %v2130_v24 = vsel %vm8641_vm0, %v2129_v12, %v2125_v25  ;;  %v2140_v32 = vsel %vm2139_vm8, %v7072_v30, %v2136_v45  ;;  %v4232_v33 = vadd.f32 %v8407_v42, %v4216_v26  ;;  %4552 = vadd.xlane.f32.xlu0 %v4551_v61  ;;  %v2156_v52 = vand.u32 2147483647, %v8657_v54  ;;  %v1890_v26 = vld [vmem:[#allocation3 + $0x2c0] sm:$0x3] }
 0x279   : > { %v2145_v5 = vsel %vm2142_vm7, %v2144_v14, %v2140_v32  ;;  %v2248_v9 = vmul.f32 %v8496_v1, %v2130_v24  ;;  %v4245_v53 = vmul.f32 %v4231_v6, %v8418_v55  ;;  %v2158_v30 = vand.u32 2147483648, %v8657_v54 }
 0x27a   : > { %v2249_v11 = vmul.f32 %v8498_v2, %v2145_v5  ;;  %v8694_v27 = vadd.f32 1.0, %v7078_v15  ;;  %v8696_v29 = vadd.f32 1.0, %v7080_v21  ;;  %vm2152_vm1 = vweird.f32 %v8657_v54 }
 0x27b   : > { %v7082_v31 = vpop.eup %7081  ;;  %v2171_v46 = vand.u32 2147483647, %v8661_v47  ;;  %v2173_v3 = vand.u32 2147483648, %v8661_v47  ;;  %v1968_v50 = vadd.f32 %v1954_v18, %v8685_v23  ;;  %v6875_v8 = vmul.f32 -1.442695, %v1967_v10 }
 0x27c   : > { %v7084_v59 = vpop.eup %7083  ;;  %v2265_v62 = vadd.f32 %v2249_v11, %v2248_v9  ;;  %v2148_v60 = vmul.f32 %v7082_v31, %v8657_v54  ;;  %7085 = vrcp.f32 %v8694_v27  ;;  %vm8704_vm9 = vcmp.eq.f32.partialorder %v2156_v52, 8.507059e+37 }
 0x27d   : > { %v2163_v4 = vmul.f32 %v7084_v59, %v8661_v47  ;;  %vm2167_vm10 = vweird.f32 %v8661_v47  ;;  %v4246_v49 = vmul.f32 %v4232_v33, %v8418_v55  ;;  %v2159_v7 = vor.u32 1.1754944e-38, %v2158_v30  ;;  %v8737_v47 = vpop.permute.xlu0 %1940 }
 0x27e   : > { %2266 = vadd.xlane.f32.xlu2 %v2265_v62  ;;  %v2149_v44 = vsub.f32 1.0, %v2148_v60  ;;  %7087 = vrcp.f32 %v8696_v29  ;;  %v4259_v43 = vadd.f32 %v4245_v53, %v8428_v57  ;;  %vm2153_vm11 = vweird.f32 %v7082_v31 }
 0x27f   : > { %v2164_v63 = vsub.f32 1.0, %v2163_v4  ;;  %vm8713_vm12 = vcmp.eq.f32.partialorder %v2171_v46, 8.507059e+37  ;;  %v2174_v28 = vor.u32 1.1754944e-38, %v2173_v3  ;;  %vm2168_vm13 = vweird.f32 %v7084_v59  ;;  %vm2154_vm15 = vmor %vm2152_vm1, %vm2153_vm11  ;;  %v1891_v3 = vld [vmem:[#allocation3 + $0x310] sm:$0x3] }
 0x280   : > { %v2150_v51 = vmul.f32 %v7082_v31, %v2149_v44  ;;  %7089 = vpow2.f32 %v6875_v8  ;;  %v6876_v16 = vmul.f32 -1.442695, %v1968_v50  ;;  %vm4422_vm14 = vweird.f32 %v8694_v27  ;;  %vm2169_vm2 = vmor %vm2167_vm10, %vm2168_vm13 }
 0x281   : > { %v2165_v22 = vmul.f32 %v7084_v59, %v2164_v63  ;;  %v4426_v6 = vand.u32 2147483647, %v8694_v27  ;;  %v4260_v15 = vadd.f32 %v4246_v49, %v8433_v58  ;;  %v4428_v45 = vand.u32 2147483648, %v8694_v27 }
 0x282   : > { %v7086_v12 = vpop.eup %7085  ;;  %v2151_v57 = vadd.f32 %v7082_v31, %v2150_v51  ;;  %7091 = vpow2.f32 %v6876_v16  ;;  %v6923_v21 = vmul.f32 -1.442695, %v4259_v43  ;;  %v4441_v14 = vand.u32 2147483647, %v8696_v29 }
 0x283   : > { %v2166_v61 = vadd.f32 %v7084_v59, %v2165_v22  ;;  %v4418_v25 = vmul.f32 %v7086_v12, %v8694_v27  ;;  %v6924_v18 = vmul.f32 -1.442695, %v4260_v15  ;;  %v4443_v58 = vand.u32 2147483648, %v8696_v29  ;;  %v8763_v27 = vld [vmem:[%s12519_s6 + $0x60] sm:$0x3] }
 0x284   : > { %v7088_v24 = vpop.eup %7087  ;;  %v2155_v32 = vsel %vm2154_vm15, %v7082_v31, %v2151_v57  ;;  %7093 = vpow2.f32 %v6923_v21  ;;  %v1906_v10 = vadd.f32 %v8398_v38, %v1890_v26  ;;  %vm4423_vm0 = vweird.f32 %v7086_v12  ;;  %v8780_v21 = vld [vmem:[%s12519_s6 + $0x68] sm:$0x3] }
 0x285   : > { %v2160_v54 = vsel %vm8704_vm9, %v2159_v7, %v2155_v32  ;;  %v2170_v33 = vsel %vm2169_vm2, %v7084_v59, %v2166_v61  ;;  %v4419_v5 = vsub.f32 1.0, %v4418_v25  ;;  %v4433_v9 = vmul.f32 %v7088_v24, %v8696_v29  ;;  %vm4424_vm6 = vmor %vm4422_vm14, %vm4423_vm0 }
 0x286   : > { %v7090_v52 = vpop.eup %7089  ;;  %v2175_v53 = vsel %vm8713_vm12, %v2174_v28, %v2170_v33  ;;  %v2250_v11 = vmul.f32 %v8496_v1, %v2160_v54  ;;  %7095 = vpow2.f32 %v6924_v18  ;;  %vm8742_vm3 = vcmp.eq.f32.partialorder %v4426_v6, 8.507059e+37  ;;  %v4217_v18 = vld [vmem:[#allocation3 + $0x210] sm:$0xff] }
 0x287   : > { %v2251_v30 = vmul.f32 %v8498_v2, %v2175_v53  ;;  %v4420_v38 = vmul.f32 %v7086_v12, %v4419_v5  ;;  %v4434_v31 = vsub.f32 1.0, %v4433_v9  ;;  %v8740_v46 = vadd.f32 1.0, %v7090_v52 }
 0x288   : > { %v7092_v50 = vpop.eup %7091  ;;  %vm4437_vm4 = vweird.f32 %v8696_v29  ;;  %vm4438_vm5 = vweird.f32 %v7088_v24  ;;  %v1907_v62 = vadd.f32 %v8401_v39, %v1891_v3  ;;  %v4429_v44 = vor.u32 1.1754944e-38, %v4428_v45 }
 0x289   : > { %v2268_v60 = vadd.f32 %v2251_v30, %v2250_v11  ;;  %v4421_v8 = vadd.f32 %v7086_v12, %v4420_v38  ;;  %v4435_v20 = vmul.f32 %v7088_v24, %v4434_v31  ;;  %v8748_v4 = vadd.f32 1.0, %v7092_v50  ;;  %vm4439_vm8 = vmor %vm4437_vm4, %vm4438_vm5 }
 0x28a   : > { %v7094_v49 = vpop.eup %7093  ;;  %vm8753_vm7 = vcmp.eq.f32.partialorder %v4441_v14, 8.507059e+37  ;;  %7097 = vrcp.f32 %v8740_v46  ;;  %v1955_v43 = vmul.f32 %v8737_v47, %v1906_v10  ;;  %v4444_v0 = vor.u32 1.1754944e-38, %v4443_v58 }
 0x28b   : > { %2269 = vadd.xlane.f32.xlu1 %v2268_v60  ;;  %v4425_v39 = vsel %vm4424_vm6, %v7086_v12, %v4421_v8  ;;  %v4436_v63 = vadd.f32 %v7088_v24, %v4435_v20  ;;  %7099 = vrcp.f32 %v8748_v4  ;;  %v2186_v16 = vand.u32 2147483647, %v8740_v46 }
 0x28c   : > { %v7096_v28 = vpop.eup %7095  ;;  %v4430_v51 = vsel %vm8742_vm3, %v4429_v44, %v4425_v39  ;;  %v2188_v22 = vand.u32 2147483648, %v8740_v46  ;;  %v1956_v6 = vmul.f32 %v8737_v47, %v1907_v62  ;;  %v2203_v57 = vand.u32 2147483648, %v8748_v4  ;;  %v4218_v62 = vld [vmem:[#allocation3 + $0x58] sm:$0xff] }
 0x28d   : > { %v4440_v15 = vsel %vm4439_vm8, %v7088_v24, %v4436_v63  ;;  %v4543_v12 = vmul.f32 %v4430_v51, %v8496_v1  ;;  %v8775_v45 = vadd.f32 1.0, %v7094_v49  ;;  %v2201_v61 = vand.u32 2147483647, %v8748_v4  ;;  %v4223_v63 = vld [vmem:[#allocation3 + $0x38] sm:$0xff] }
 0x28e   : > { %v4445_v29 = vsel %vm8753_vm7, %v4444_v0, %v4440_v15  ;;  %v8785_v25 = vadd.f32 1.0, %v7096_v28  ;;  %v1969_v14 = vadd.f32 %v1955_v43, %v8763_v27  ;;  %vm2182_vm1 = vweird.f32 %v8740_v46 }
 0x28f   : > { %v4544_v26 = vmul.f32 %v4445_v29, %v8498_v2  ;;  %7101 = vrcp.f32 %v8775_v45  ;;  %v4233_v24 = vadd.f32 %v8404_v41, %v4217_v18  ;;  %v2189_v58 = vor.u32 1.1754944e-38, %v2188_v22 }
 0x290   : > { %v7098_v32 = vpop.eup %7097  ;;  %vm2197_vm9 = vweird.f32 %v8748_v4  ;;  %7103 = vrcp.f32 %v8785_v25  ;;  %v1970_v10 = vadd.f32 %v1956_v6, %v8780_v21  ;;  %vm8796_vm10 = vcmp.eq.f32.partialorder %v2186_v16, 8.507059e+37 }
 0x291   : > { %v7100_v54 = vpop.eup %7099  ;;  %v4560_v33 = vadd.f32 %v4544_v26, %v4543_v12  ;;  %v2178_v5 = vmul.f32 %v7098_v32, %v8740_v46  ;;  %v2204_v52 = vor.u32 1.1754944e-38, %v2203_v57  ;;  %v4368_v53 = vand.u32 2147483648, %v8775_v45 }
 0x292   : > { %vm2183_vm11 = vweird.f32 %v7098_v32  ;;  %v2193_v11 = vmul.f32 %v7100_v54, %v8748_v4  ;;  %vm8802_vm12 = vcmp.eq.f32.partialorder %v2201_v61, 8.507059e+37  ;;  %v4366_v38 = vand.u32 2147483647, %v8775_v45 }
 0x293   : > { %v4381_v31 = vand.u32 2147483647, %v8785_v25  ;;  %4561 = vadd.xlane.f32.xlu0 %v4560_v33  ;;  %v2179_v3 = vsub.f32 1.0, %v2178_v5  ;;  %vm2198_vm13 = vweird.f32 %v7100_v54  ;;  %v4383_v50 = vand.u32 2147483648, %v8785_v25  ;;  %vm2184_vm3 = vmor %vm2182_vm1, %vm2183_vm11 }
 0x294   : > { %v6877_v59 = vmul.f32 -1.442695, %v1969_v14  ;;  %v2194_v60 = vsub.f32 1.0, %v2193_v11  ;;  %vm4362_vm14 = vweird.f32 %v8775_v45  ;;  %v6878_v8 = vmul.f32 -1.442695, %v1970_v10  ;;  %v4224_v14 = vld [vmem:[#allocation3 + $0x198] sm:$0xff]  ;;  %vm2199_vm5 = vmor %vm2197_vm9, %vm2198_vm13 }
 0x295   : > { %v4234_v20 = vadd.f32 %v8407_v42, %v4218_v62  ;;  %v4247_v49 = vmul.f32 %v4233_v24, %v8391_v35  ;;  %v7102_v44 = vpop.eup %7101  ;;  %v2180_v7 = vmul.f32 %v7098_v32, %v2179_v3  ;;  %v4369_v43 = vor.u32 1.1754944e-38, %v4368_v53 }
 0x296   : > { %vm4377_vm15 = vweird.f32 %v8785_v25  ;;  %v4384_v39 = vor.u32 1.1754944e-38, %v4383_v50  ;;  %7105 = vpow2.f32 %v6877_v59  ;;  %v7104_v0 = vpop.eup %7103  ;;  %v2195_v28 = vmul.f32 %v7100_v54, %v2194_v60 }
 0x297   : > { %v4358_v51 = vmul.f32 %v7102_v44, %v8775_v45  ;;  %vm8814_vm2 = vcmp.eq.f32.partialorder %v4366_v38, 8.507059e+37  ;;  %7107 = vpow2.f32 %v6878_v8  ;;  %v4239_v22 = vadd.f32 %v8404_v41, %v4223_v63 }
 0x298   : > { %v2181_v6 = vadd.f32 %v7098_v32, %v2180_v7  ;;  %vm4363_vm0 = vweird.f32 %v7102_v44  ;;  %v4373_v15 = vmul.f32 %v7104_v0, %v8785_v25  ;;  %v4248_v12 = vmul.f32 %v4234_v20, %v8391_v35 }
 0x299   : > { %v2196_v57 = vadd.f32 %v7100_v54, %v2195_v28  ;;  %v4359_v29 = vsub.f32 1.0, %v4358_v51  ;;  %vm4378_vm4 = vweird.f32 %v7104_v0  ;;  %v4261_v61 = vadd.f32 %v4247_v49, %v8412_v48  ;;  %vm4364_vm6 = vmor %vm4362_vm14, %vm4363_vm0  ;;  %v4225_v51 = vld [vmem:[#allocation3 + $0x168] sm:$0x3] }
 0x29a   : > { %v2185_v18 = vsel %vm2184_vm3, %v7098_v32, %v2181_v6  ;;  %v4374_v26 = vsub.f32 1.0, %v4373_v15  ;;  %v4262_v24 = vadd.f32 %v4248_v12, %v8423_v56  ;;  %v4240_v10 = vadd.f32 %v8407_v42, %v4224_v14  ;;  %vm4379_vm7 = vmor %vm4377_vm15, %vm4378_vm4 }
 0x29b   : > { %v2190_v46 = vsel %vm8796_vm10, %v2189_v58, %v2185_v18  ;;  %v2200_v33 = vsel %vm2199_vm5, %v7100_v54, %v2196_v57  ;;  %v4360_v5 = vmul.f32 %v7102_v44, %v4359_v29  ;;  %v6925_v53 = vmul.f32 -1.442695, %v4261_v61  ;;  %v4226_v29 = vld [vmem:[#allocation3 + $0x1b0] sm:$0x3] }
 0x29c   : > { %v7106_v11 = vpop.eup %7105  ;;  %v2205_v48 = vsel %vm8802_vm12, %v2204_v52, %v2200_v33  ;;  %v2252_v32 = vmul.f32 %v8496_v1, %v2190_v46  ;;  %v4375_v38 = vmul.f32 %v7104_v0, %v4374_v26  ;;  %v6926_v4 = vmul.f32 -1.442695, %v4262_v24 }
 0x29d   : > { %v7108_v3 = vpop.eup %7107  ;;  %v2253_v50 = vmul.f32 %v8498_v2, %v2205_v48  ;;  %v4361_v56 = vadd.f32 %v7102_v44, %v4360_v5  ;;  %v8836_v59 = vadd.f32 1.0, %v7106_v11  ;;  %7109 = vpow2.f32 %v6925_v53 }
 0x29e   : > { %v4376_v58 = vadd.f32 %v7104_v0, %v4375_v38  ;;  %v8841_v54 = vadd.f32 1.0, %v7108_v3  ;;  %7111 = vpow2.f32 %v6926_v4  ;;  %v4253_v9 = vmul.f32 %v4239_v22, %v8649_v19 }
 0x29f   : > { %v2271_v52 = vadd.f32 %v2253_v50, %v2252_v32  ;;  %v4365_v30 = vsel %vm4364_vm6, %v7102_v44, %v4361_v56  ;;  %7113 = vrcp.f32 %v8836_v59  ;;  %v4254_v62 = vmul.f32 %v4240_v10, %v8649_v19 }
 0x2a0   : > { %v4370_v45 = vsel %vm8814_vm2, %v4369_v43, %v4365_v30  ;;  %v4380_v60 = vsel %vm4379_vm7, %v7104_v0, %v4376_v58  ;;  %vm4382_vm8 = vcmp.eq.f32.partialorder %v4381_v31, 8.507059e+37  ;;  %7115 = vrcp.f32 %v8841_v54 }
 0x2a1   : > { %2272 = vadd.xlane.f32.xlu2 %v2271_v52  ;;  %v4385_v8 = vsel %vm4382_vm8, %v4384_v39, %v4380_v60  ;;  %v4539_v20 = vmul.f32 %v4370_v45, %v8496_v1  ;;  %v8857_v7 = vperm.slane %v8393_v36, 1  ;;  %v4267_v63 = vadd.f32 %v4253_v9, %v8669_v17 }
 0x2a2   : > { %v4540_v49 = vmul.f32 %v4385_v8, %v8498_v2  ;;  %v4268_v43 = vadd.f32 %v4254_v62, %v8685_v23  ;;  %v2216_v25 = vand.u32 2147483647, %v8836_v59  ;;  %v2218_v31 = vand.u32 2147483648, %v8836_v59 }
 0x2a3   : > { %v7110_v44 = vpop.eup %7109  ;;  %v2231_v22 = vand.u32 2147483647, %v8841_v54  ;;  %v2233_v6 = vand.u32 2147483648, %v8841_v54  ;;  %v6931_v12 = vmul.f32 -1.442695, %v4267_v63  ;;  %v8870_v17 = vperm.slane %v8395_v37, 1 }
 0x2a4   : > { %v7112_v0 = vpop.eup %7111  ;;  %v4554_v28 = vadd.f32 %v4540_v49, %v4539_v20  ;;  %v8863_v39 = vadd.f32 1.0, %v7110_v44  ;;  %v6932_v57 = vmul.f32 -1.442695, %v4268_v43  ;;  %vm2212_vm1 = vweird.f32 %v8836_v59 }
 0x2a5   : > { %v7114_v16 = vpop.eup %7113  ;;  %v8867_v15 = vadd.f32 1.0, %v7112_v0  ;;  %v4241_v14 = vadd.f32 %v8404_v41, %v4225_v51  ;;  %v4242_v18 = vadd.f32 %v8407_v42, %v4226_v29  ;;  %vm8878_vm9 = vcmp.eq.f32.partialorder %v2216_v25, 8.507059e+37 }
 0x2a6   : > { %4555 = vadd.xlane.f32.xlu1 %v4554_v28  ;;  %v2208_v23 = vmul.f32 %v7114_v16, %v8836_v59  ;;  %7117 = vrcp.f32 %v8863_v39  ;;  %v7116_v61 = vpop.eup %7115  ;;  %vm2227_vm10 = vweird.f32 %v8841_v54  ;;  %v2219_v46 = vor.u32 1.1754944e-38, %v2218_v31 }
 0x2a7   : > { %7119 = vrcp.f32 %v8867_v15  ;;  %v2223_v10 = vmul.f32 %v7116_v61, %v8841_v54  ;;  %vm8884_vm11 = vcmp.eq.f32.partialorder %v2231_v22, 8.507059e+37  ;;  %v2234_v5 = vor.u32 1.1754944e-38, %v2233_v6  ;;  %v4221_v6 = vld [vmem:[#allocation3 + $0x2d8] sm:$0xff] }
 0x2a8   : > { %v2209_v26 = vsub.f32 1.0, %v2208_v23  ;;  %vm2274_vm12 = vcmask 1041408   ;;  %7121 = vpow2.f32 %v6931_v12  ;;  %vm2213_vm13 = vweird.f32 %v7114_v16 }
 0x2a9   : > { %v2224_v11 = vsub.f32 1.0, %v2223_v10  ;;  %7123 = vpow2.f32 %v6932_v57  ;;  %vm4392_vm14 = vweird.f32 %v8863_v39  ;;  %v4396_v48 = vand.u32 2147483647, %v8863_v39  ;;  %vm2214_vm0 = vmor %vm2212_vm1, %vm2213_vm13 }
 0x2aa   : > { %v2210_v53 = vmul.f32 %v7114_v16, %v2209_v26  ;;  %v4398_v32 = vand.u32 2147483648, %v8863_v39  ;;  %v4255_v38 = vmul.f32 %v4241_v14, %v8737_v47  ;;  %v4256_v4 = vmul.f32 %v4242_v18, %v8737_v47  ;;  %v4222_v18 = vld [vmem:[#allocation3 + $0x158] sm:$0xff] }
 0x2ab   : > { %v2225_v56 = vmul.f32 %v7116_v61, %v2224_v11  ;;  %vm2228_vm15 = vweird.f32 %v7116_v61  ;;  %vm4407_vm2 = vweird.f32 %v8867_v15  ;;  %v4411_v58 = vand.u32 2147483647, %v8867_v15 }
 0x2ac   : > { %v7118_v3 = vpop.eup %7117  ;;  %v2211_v50 = vadd.f32 %v7114_v16, %v2210_v53  ;;  %v4413_v30 = vand.u32 2147483648, %v8867_v15  ;;  %v4269_v62 = vadd.f32 %v4255_v38, %v8763_v27  ;;  %v4270_v20 = vadd.f32 %v4256_v4, %v8780_v21  ;;  %vm2229_vm4 = vmor %vm2227_vm10, %vm2228_vm15 }
 0x2ad   : > { %v7120_v9 = vpop.eup %7119  ;;  %v4388_v52 = vmul.f32 %v7118_v3, %v8863_v39  ;;  %vm4393_vm3 = vweird.f32 %v7118_v3  ;;  %v2226_v60 = vadd.f32 %v7116_v61, %v2225_v56  ;;  %vm4397_vm6 = vcmp.eq.f32.partialorder %v4396_v48, 8.507059e+37 }
 0x2ae   : > { %v2215_v45 = vsel %vm2214_vm0, %v7114_v16, %v2211_v50  ;;  %v4403_v8 = vmul.f32 %v7120_v9, %v8867_v15  ;;  %v7122_v49 = vpop.eup %7121  ;;  %vm4408_vm5 = vweird.f32 %v7120_v9  ;;  %v6933_v63 = vmul.f32 -1.442695, %v4269_v62  ;;  %vm4394_vm7 = vmor %vm4392_vm14, %vm4393_vm3 }
 0x2af   : > { %v2220_v44 = vsel %vm8878_vm9, %v2219_v46, %v2215_v45  ;;  %v4389_v59 = vsub.f32 1.0, %v4388_v52  ;;  %v7124_v43 = vpop.eup %7123  ;;  %v2230_v0 = vsel %vm2229_vm4, %v7116_v61, %v2226_v60  ;;  %v8909_v25 = vadd.f32 1.0, %v7122_v49  ;;  %vm4409_vm8 = vmor %vm4407_vm2, %vm4408_vm5  ;;  %v2460_v52 = vld [vmem:[#allocation3 + $0x180] sm:$0xff] }
 0x2b0   : > { %v2254_v27 = vmul.f32 %v8496_v1, %v2220_v44  ;;  %v4404_v28 = vsub.f32 1.0, %v4403_v8  ;;  %v2235_v21 = vsel %vm8884_vm11, %v2234_v5, %v2230_v0  ;;  %v8913_v51 = vadd.f32 1.0, %v7124_v43  ;;  %v2456_v44 = vld [vmem:[#allocation3 + $0x2c0] sm:$0xfc] }
 0x2b1   : > { %v4390_v31 = vmul.f32 %v7118_v3, %v4389_v59  ;;  %7125 = vpow2.f32 %v6933_v63  ;;  %v2255_v54 = vmul.f32 %v8498_v2, %v2235_v21  ;;  %v6934_v23 = vmul.f32 -1.442695, %v4270_v20  ;;  %v8963_v59 = vld [vmem:[%s12519_s6 + $0x48] sm:$0xff] }
 0x2b2   : > { %v2275_v16 = vsel %vm2274_vm12, %v2254_v27, 0.0  ;;  %v4405_v22 = vmul.f32 %v7120_v9, %v4404_v28  ;;  %7127 = vrcp.f32 %v8909_v25  ;;  %v4237_v57 = vadd.f32 %v8404_v41, %v4221_v6 }
 0x2b3   : > { %v4391_v12 = vadd.f32 %v7118_v3, %v4390_v31  ;;  %v2276_v29 = vsel %vm2274_vm12, %v2255_v54, 0.0  ;;  %v4399_v61 = vor.u32 1.1754944e-38, %v4398_v32  ;;  %7129 = vrcp.f32 %v8913_v51 }
 0x2b4   : > { %v4406_v14 = vadd.f32 %v7120_v9, %v4405_v22  ;;  %v2277_v26 = vadd.f32 %v2276_v29, %v2275_v16  ;;  %v4414_v10 = vor.u32 1.1754944e-38, %v4413_v30  ;;  %v4238_v41 = vadd.f32 %v8407_v42, %v4222_v18  ;;  %v2461_v22 = vld [vmem:[#allocation3 + $0x190] sm:$0xff] }
 0x2b5   : > { %v4395_v24 = vsel %vm4394_vm7, %v7118_v3, %v4391_v12  ;;  %vm4412_vm1 = vcmp.eq.f32.partialorder %v4411_v58, 8.507059e+37  ;;  %v4486_v39 = vand.u32 2147483647, %v8909_v25  ;;  %7131 = vpow2.f32 %v6934_v23  ;;  %v8942_v58 = vld [vmem:[%s12519_s6 + $0x40] sm:$0xff]  ;;  %v2462_v23 = vld [vmem:[#allocation3 + $0x140] sm:$0xff] }
 0x2b6   : > { %v4400_v46 = vsel %vm4397_vm6, %v4399_v61, %v4395_v24  ;;  %v4410_v33 = vsel %vm4409_vm8, %v7120_v9, %v4406_v14  ;;  %2278 = vadd.xlane.f32.xlu0 %v2277_v26  ;;  %v4251_v48 = vmul.f32 %v4237_v57, %v8472_v40  ;;  %v4488_v38 = vand.u32 2147483648, %v8909_v25  ;;  %v2463_v57 = vld [vmem:[#allocation3 + $0x2c8] sm:$0xff] }
 0x2b7   : > { %v7126_v5 = vpop.eup %7125  ;;  %v4415_v53 = vsel %vm4412_vm1, %v4414_v10, %v4410_v33  ;;  %v4541_v11 = vmul.f32 %v4400_v46, %v8496_v1  ;;  %v4501_v42 = vand.u32 2147483647, %v8913_v51  ;;  %v4503_v50 = vand.u32 2147483648, %v8913_v51 }
 0x2b8   : > { %v7128_v32 = vpop.eup %7127  ;;  %v4542_v15 = vmul.f32 %v4415_v53, %v8498_v2  ;;  %v8934_v4 = vadd.f32 1.0, %v7126_v5  ;;  %v4252_v56 = vmul.f32 %v4238_v41, %v8472_v40  ;;  %v4265_v9 = vadd.f32 %v8942_v58, %v4251_v48 }
 0x2b9   : > { %v4478_v3 = vmul.f32 %v7128_v32, %v8909_v25  ;;  %v7130_v30 = vpop.eup %7129  ;;  %vm4482_vm9 = vweird.f32 %v8909_v25  ;;  %v8948_v45 = vadd.f32 %v8857_v7, %v2460_v52  ;;  %vm8950_vm10 = vcmp.eq.f32.partialorder %v4486_v39, 8.507059e+37 }
 0x2ba   : > { %v4557_v62 = vadd.f32 %v4542_v15, %v4541_v11  ;;  %7133 = vrcp.f32 %v8934_v4  ;;  %v4493_v20 = vmul.f32 %v7130_v30, %v8913_v51  ;;  %vm4497_vm11 = vweird.f32 %v8913_v51 }
 0x2bb   : > { %v4479_v60 = vsub.f32 1.0, %v4478_v3  ;;  %v4489_v49 = vor.u32 1.1754944e-38, %v4488_v38  ;;  %vm8956_vm13 = vcmp.eq.f32.partialorder %v4501_v42, 8.507059e+37  ;;  %v4266_v63 = vadd.f32 %v8963_v59, %v4252_v56  ;;  %v7132_v0 = vpop.eup %7131 }
 0x2bc   : > { %4558 = vadd.xlane.f32.xlu2 %v4557_v62  ;;  %v6929_v43 = vmul.f32 -1.442695, %v4265_v9  ;;  %vm4483_vm14 = vweird.f32 %v7128_v32  ;;  %v4494_v28 = vsub.f32 1.0, %v4493_v20  ;;  %v4504_v21 = vor.u32 1.1754944e-38, %v4503_v50 }
 0x2bd   : > { %v4480_v27 = vmul.f32 %v7128_v32, %v4479_v60  ;;  %v8966_v31 = vadd.f32 1.0, %v7132_v0  ;;  %v4516_v54 = vand.u32 2147483647, %v8934_v4  ;;  %v6930_v16 = vmul.f32 -1.442695, %v4266_v63  ;;  %vm4484_vm0 = vmor %vm4482_vm9, %vm4483_vm14  ;;  %v2458_v63 = vld [vmem:[#allocation3 + $0x318] sm:$0xff] }
 0x2be   : > { %7135 = vpow2.f32 %v6929_v43  ;;  %v4495_v12 = vmul.f32 %v7130_v30, %v4494_v28  ;;  %vm4498_vm15 = vweird.f32 %v7130_v30  ;;  %vm4512_vm2 = vweird.f32 %v8934_v4 }
 0x2bf   : > { %v4481_v6 = vadd.f32 %v7128_v32, %v4480_v27  ;;  %v8971_v29 = vadd.f32 %v8870_v17, %v2461_v22  ;;  %v4518_v14 = vand.u32 2147483648, %v8934_v4  ;;  %7137 = vrcp.f32 %v8966_v31  ;;  %vm4499_vm4 = vmor %vm4497_vm11, %vm4498_vm15 }
 0x2c0   : > { %v7134_v61 = vpop.eup %7133  ;;  %v8979_v18 = vadd.f32 %v8857_v7, %v2462_v23  ;;  %v8982_v26 = vadd.f32 %v8870_v17, %v2463_v57  ;;  %v4496_v10 = vadd.f32 %v7130_v30, %v4495_v12  ;;  %vm12533_vm3 = vcmask 1045504  }
 0x2c1   : > { %v4485_v24 = vsel %vm4484_vm0, %v7128_v32, %v4481_v6  ;;  %v4508_v41 = vmul.f32 %v7134_v61, %v8934_v4  ;;  %v4531_v25 = vand.u32 2147483647, %v8966_v31  ;;  %7139 = vpow2.f32 %v6930_v16 }
 0x2c2   : > { %v4490_v46 = vsel %vm8950_vm10, %v4489_v49, %v4485_v24  ;;  %v2507_v33 = vrot.slane %v8948_v45, 2  ;;  %v4500_v39 = vsel %vm4499_vm4, %v7130_v30, %v4496_v10  ;;  %v2509_v11 = vrot.slane %v8971_v29, 2  ;;  %v2459_v24 = vld [vmem:[#allocation3 + $0x2b8] sm:$0xff]  ;;  %v9041_v10 = vld [vmem:[%s12519_s6 + $0x20] sm:$0xff] }
 0x2c3   : > { %v4547_v5 = vmul.f32 %v4490_v46, %v8496_v1  ;;  %v4509_v53 = vsub.f32 1.0, %v4508_v41  ;;  %v4505_v32 = vsel %vm8956_vm13, %v4504_v21, %v4500_v39  ;;  %v4533_v15 = vand.u32 2147483648, %v8966_v31  ;;  %v9047_v46 = vld [vmem:[%s12519_s6 + $0x28] sm:$0xff] }
 0x2c4   : > { %v7136_v48 = vpop.eup %7135  ;;  %v2511_v51 = vrot.slane %v8979_v18, 2  ;;  %v2513_v38 = vrot.slane %v8982_v26, 2  ;;  %v4548_v42 = vmul.f32 %v4505_v32, %v8498_v2  ;;  %vm4513_vm5 = vweird.f32 %v7134_v61 }
 0x2c5   : > { %v4510_v3 = vmul.f32 %v7134_v61, %v4509_v53  ;;  %v9000_v50 = vadd.f32 1.0, %v7136_v48  ;;  %v7138_v56 = vpop.eup %7137  ;;  %vm9002_vm6 = vcmp.eq.f32.partialorder %v4516_v54, 8.507059e+37  ;;  %v4519_v52 = vor.u32 1.1754944e-38, %v4518_v14  ;;  %vm4514_vm1 = vmor %vm4512_vm2, %vm4513_vm5 }
 0x2c6   : > { %vm4527_vm7 = vweird.f32 %v8966_v31  ;;  %v2512_v30 = vsel %vm12533_vm3, %v2507_v33, %v2511_v51  ;;  %v4566_v62 = vadd.f32 %v4548_v42, %v4547_v5  ;;  %v4523_v8 = vmul.f32 %v7138_v56, %v8966_v31 }
 0x2c7   : > { %v4511_v60 = vadd.f32 %v7134_v61, %v4510_v3  ;;  %vm9013_vm8 = vcmp.eq.f32.partialorder %v4531_v25, 8.507059e+37  ;;  %v2514_v49 = vsel %vm12533_vm3, %v2509_v11, %v2513_v38  ;;  %v7140_v43 = vpop.eup %7139  ;;  %v4534_v0 = vor.u32 1.1754944e-38, %v4533_v15 }
 0x2c8   : > { %7141 = vrcp.f32 %v9000_v50  ;;  %v2472_v27 = vadd.f32 %v8857_v7, %v2456_v44  ;;  %v2474_v28 = vadd.f32 %v8857_v7, %v2458_v63  ;;  %4567 = vadd.xlane.f32.xlu1 %v4566_v62  ;;  %v4524_v54 = vsub.f32 1.0, %v4523_v8 }
 0x2c9   : > { %v4515_v21 = vsel %vm4514_vm1, %v7134_v61, %v4511_v60  ;;  %v9028_v16 = vadd.f32 1.0, %v7140_v43  ;;  %v2545_v22 = vmul.f32 %v2512_v30, %v8391_v35  ;;  %vm4528_vm9 = vweird.f32 %v7138_v56  ;;  %v2457_v61 = vld [vmem:[#allocation3 + $0x310] sm:$0xfc] }
 0x2ca   : > { %v4520_v6 = vsel %vm9002_vm6, %v4519_v52, %v4515_v21  ;;  %v4458_v4 = vand.u32 2147483648, %v9000_v50  ;;  %v2546_v12 = vmul.f32 %v2514_v49, %v8391_v35  ;;  %v4525_v23 = vmul.f32 %v7138_v56, %v4524_v54  ;;  %vm4529_vm11 = vmor %vm4527_vm7, %vm4528_vm9 }
 0x2cb   : > { %v4549_v57 = vmul.f32 %v4520_v6, %v8496_v1  ;;  %v4456_v14 = vand.u32 2147483647, %v9000_v50  ;;  %7143 = vrcp.f32 %v9028_v16  ;;  %v2559_v41 = vadd.f32 %v9041_v10, %v2545_v22 }
 0x2cc   : > { %v2560_v25 = vadd.f32 %v9047_v46, %v2546_v12  ;;  %v2473_v39 = vadd.f32 %v8870_v17, %v2457_v61  ;;  %v2475_v5 = vadd.f32 %v8870_v17, %v2459_v24  ;;  %v4526_v53 = vadd.f32 %v7138_v56, %v4525_v23  ;;  %v9088_v61 = vld [vmem:[%s12519_s6 + $0x8] sm:$0xff] }
 0x2cd   : > { %vm4452_vm10 = vweird.f32 %v9000_v50  ;;  %v2501_v48 = vrot.slane %v2472_v27, 2  ;;  %v2502_v32 = vrot.slane %v2474_v28, 2  ;;  %v4459_v42 = vor.u32 1.1754944e-38, %v4458_v4  ;;  %v9078_v4 = vld [vmem:[%s12519_s6] sm:$0xff] }
 0x2ce   : > { %v7142_v15 = vpop.eup %7141  ;;  %v4473_v3 = vand.u32 2147483648, %v9028_v16  ;;  %v6883_v9 = vmul.f32 -1.442695, %v2559_v41  ;;  %v6884_v52 = vmul.f32 -1.442695, %v2560_v25  ;;  %v4530_v30 = vsel %vm4529_vm11, %v7138_v56, %v4526_v53 }
 0x2cf   : > { %v4569_v62 = vsel %vm2274_vm12, %v4549_v57, 0.0  ;;  %v4448_v60 = vmul.f32 %v7142_v15, %v9000_v50  ;;  %vm9059_vm13 = vcmp.eq.f32.partialorder %v4456_v14, 8.507059e+37  ;;  %v2503_v49 = vsel %vm12533_vm3, %v2501_v48, %v2502_v32 }
 0x2d0   : > { %v4535_v31 = vsel %vm9013_vm8, %v4534_v0, %v4530_v30  ;;  %7145 = vpow2.f32 %v6883_v9  ;;  %v2504_v44 = vrot.slane %v2473_v39, 2  ;;  %v2505_v63 = vrot.slane %v2475_v5, 2 }
 0x2d1   : > { %v7144_v43 = vpop.eup %7143  ;;  %v4550_v27 = vmul.f32 %v4535_v31, %v8498_v2  ;;  %v4449_v56 = vsub.f32 1.0, %v4448_v60  ;;  %7147 = vpow2.f32 %v6884_v52  ;;  %v2541_v28 = vmul.f32 %v2503_v49, %v8389_v34 }
 0x2d2   : > { %vm4453_vm14 = vweird.f32 %v7142_v15  ;;  %v4463_v21 = vmul.f32 %v7144_v43, %v9028_v16  ;;  %v2506_v54 = vsel %vm12533_vm3, %v2504_v44, %v2505_v63  ;;  %v2508_v20 = vsel %vm12533_vm3, %v2502_v32, %v2507_v33  ;;  %v9102_v32 = vld [vmem:[%s12519_s6 + $0x10] sm:$0xff] }
 0x2d3   : > { %v4570_v0 = vsel %vm2274_vm12, %v4550_v27, 0.0  ;;  %v4450_v22 = vmul.f32 %v7142_v15, %v4449_v56  ;;  %v2542_v6 = vmul.f32 %v2506_v54, %v8389_v34  ;;  %v2555_v12 = vadd.f32 %v9078_v4, %v2541_v28  ;;  %vm4454_vm15 = vmor %vm4452_vm10, %vm4453_vm14  ;;  %v2467_v44 = vld [vmem:[#allocation3 + $0x240] sm:$0xff] }
 0x2d4   : > { %v4571_v23 = vadd.f32 %v4570_v0, %v4569_v62  ;;  %v4464_v57 = vsub.f32 1.0, %v4463_v21  ;;  %v2510_v45 = vsel %vm12533_vm3, %v2505_v63, %v2509_v11  ;;  %v2543_v33 = vmul.f32 %v2508_v20, %v8418_v55  ;;  %v2468_v56 = vld [vmem:[#allocation3 + $0xc0] sm:$0xf] }
 0x2d5   : > { %v4451_v14 = vadd.f32 %v7142_v15, %v4450_v22  ;;  %v2556_v24 = vadd.f32 %v9088_v61, %v2542_v6  ;;  %v6879_v41 = vmul.f32 -1.442695, %v2555_v12  ;;  %v2544_v25 = vmul.f32 %v2510_v45, %v8418_v55 }
 0x2d6   : > { %v7146_v39 = vpop.eup %7145  ;;  %4572 = vadd.xlane.f32.xlu0 %v4571_v23  ;;  %v4465_v29 = vmul.f32 %v7144_v43, %v4464_v57  ;;  %vm4467_vm2 = vweird.f32 %v9028_v16  ;;  %vm4468_vm0 = vweird.f32 %v7144_v43  ;;  %v4471_v11 = vand.u32 2147483647, %v9028_v16  ;;  %v2469_v23 = vld [vmem:[#allocation3 + $0x110] sm:$0xf] }
 0x2d7   : > { %v7148_v5 = vpop.eup %7147  ;;  %v4455_v53 = vsel %vm4454_vm15, %v7142_v15, %v4451_v14  ;;  %v9097_v48 = vadd.f32 1.0, %v7146_v39  ;;  %7149 = vpow2.f32 %v6879_v41  ;;  %v2557_v9 = vadd.f32 %v9102_v32, %v2543_v33  ;;  %vm4469_vm4 = vmor %vm4467_vm2, %vm4468_vm0  ;;  %v9113_v15 = vld [vmem:[%s12519_s6 + $0x18] sm:$0xff] }
 0x2d8   : > { %v4460_v50 = vsel %vm9059_vm13, %v4459_v42, %v4455_v53  ;;  %v4466_v52 = vadd.f32 %v7144_v43, %v4465_v29  ;;  %v9107_v30 = vadd.f32 1.0, %v7148_v5  ;;  %v6880_v62 = vmul.f32 -1.442695, %v2556_v24  ;;  %v2466_v42 = vld [vmem:[#allocation3 + $0x80] sm:$0xff] }
 0x2d9   : > { %v4474_v16 = vor.u32 1.1754944e-38, %v4473_v3  ;;  %7151 = vrcp.f32 %v9097_v48  ;;  %v2558_v60 = vadd.f32 %v9113_v15, %v2544_v25  ;;  %vm4472_vm5 = vcmp.eq.f32.partialorder %v4471_v11, 8.507059e+37 }
 0x2da   : > { %v4470_v49 = vsel %vm4469_vm4, %v7144_v43, %v4466_v52  ;;  %v4545_v8 = vmul.f32 %v4460_v50, %v8496_v1  ;;  %7153 = vrcp.f32 %v9107_v30  ;;  %v9119_v3 = vadd.f32 %v8857_v7, %v2466_v42 }
 0x2db   : > { %v4475_v31 = vsel %vm4472_vm5, %v4474_v16, %v4470_v49  ;;  %7155 = vpow2.f32 %v6880_v62  ;;  %v6881_v27 = vmul.f32 -1.442695, %v2557_v9  ;;  %v9123_v28 = vadd.f32 %v8870_v17, %v2467_v44 }
 0x2dc   : > { %v4546_v63 = vmul.f32 %v4475_v31, %v8498_v2  ;;  %v2694_v21 = vand.u32 2147483647, %v9097_v48  ;;  %v2696_v54 = vand.u32 2147483648, %v9097_v48  ;;  %v6882_v20 = vmul.f32 -1.442695, %v2558_v60 }
 0x2dd   : > { %v7150_v43 = vpop.eup %7149  ;;  %v9128_v0 = vadd.f32 %v8857_v7, %v2468_v56  ;;  %v2709_v6 = vand.u32 2147483647, %v9107_v30  ;;  %7157 = vpow2.f32 %v6881_v27  ;;  %vm2690_vm6 = vweird.f32 %v9097_v48 }
 0x2de   : > { %v4563_v22 = vadd.f32 %v4546_v63, %v4545_v8  ;;  %v9131_v12 = vadd.f32 1.0, %v7150_v43  ;;  %v2711_v45 = vand.u32 2147483648, %v9107_v30  ;;  %7159 = vpow2.f32 %v6882_v20  ;;  %v2464_v63 = vld [vmem:[#allocation3 + $0x260] sm:$0xff] }
 0x2df   : > { %v7152_v57 = vpop.eup %7151  ;;  %v9136_v33 = vadd.f32 %v8870_v17, %v2469_v23  ;;  %v2519_v41 = vrot.slane %v9119_v3, 2  ;;  %v2523_v25 = vrot.slane %v9128_v0, 2  ;;  %vm9142_vm7 = vcmp.eq.f32.partialorder %v2694_v21, 8.507059e+37  ;;  %v9268_v3 = vld [vmem:[%s12519_s6 + $0x30] sm:$0xff] }
 0x2e0   : > { %v7154_v14 = vpop.eup %7153  ;;  %4564 = vadd.xlane.f32.xlu2 %v4563_v22  ;;  %v2686_v24 = vmul.f32 %v7152_v57, %v9097_v48  ;;  %7161 = vrcp.f32 %v9131_v12  ;;  %v2697_v29 = vor.u32 1.1754944e-38, %v2696_v54  ;;  %vm2705_vm8 = vweird.f32 %v9107_v30 }
 0x2e1   : > { %v2701_v11 = vmul.f32 %v7154_v14, %v9107_v30  ;;  %v7156_v5 = vpop.eup %7155  ;;  %vm9148_vm1 = vcmp.eq.f32.partialorder %v2709_v6, 8.507059e+37  ;;  %v2636_v50 = vand.u32 2147483648, %v9131_v12  ;;  %v2521_v52 = vrot.slane %v9123_v28, 2  ;;  %v9284_v28 = vld [vmem:[%s12519_s6 + $0x38] sm:$0xff] }
 0x2e2   : > { %v2687_v53 = vsub.f32 1.0, %v2686_v24  ;;  %v9154_v16 = vadd.f32 1.0, %v7156_v5  ;;  %v2634_v60 = vand.u32 2147483647, %v9131_v12  ;;  %v2525_v49 = vrot.slane %v9136_v33, 2 }
 0x2e3   : > { %v2702_v62 = vsub.f32 1.0, %v2701_v11  ;;  %v7158_v8 = vpop.eup %7157  ;;  %vm2691_vm9 = vweird.f32 %v7152_v57  ;;  %v2712_v31 = vor.u32 1.1754944e-38, %v2711_v45  ;;  %v2524_v44 = vsel %vm12533_vm3, %v2519_v41, %v2523_v25 }
 0x2e4   : > { %v2688_v42 = vmul.f32 %v7152_v57, %v2687_v53  ;;  %v7160_v27 = vpop.eup %7159  ;;  %vm2706_vm10 = vweird.f32 %v7154_v14  ;;  %vm2630_vm11 = vweird.f32 %v9131_v12  ;;  %7163 = vrcp.f32 %v9154_v16  ;;  %vm2692_vm13 = vmor %vm2690_vm6, %vm2691_vm9 }
 0x2e5   : > { %v2703_v56 = vmul.f32 %v7154_v14, %v2702_v62  ;;  %v9166_v43 = vadd.f32 %v8857_v7, %v2464_v63  ;;  %v2637_v20 = vor.u32 1.1754944e-38, %v2636_v50  ;;  %v9168_v22 = vadd.f32 1.0, %v7158_v8  ;;  %vm2707_vm15 = vmor %vm2705_vm8, %vm2706_vm10  ;;  %v2465_v50 = vld [vmem:[#allocation3 + $0x100] sm:$0xff] }
 0x2e6   : > { %v7162_v21 = vpop.eup %7161  ;;  %v2689_v54 = vadd.f32 %v7152_v57, %v2688_v42  ;;  %v9170_v6 = vadd.f32 1.0, %v7160_v27  ;;  %vm9176_vm14 = vcmp.eq.f32.partialorder %v2634_v60, 8.507059e+37  ;;  %v2526_v7 = vsel %vm12533_vm3, %v2521_v52, %v2525_v49 }
 0x2e7   : > { %v2704_v23 = vadd.f32 %v7154_v14, %v2703_v56  ;;  %v2626_v45 = vmul.f32 %v7162_v21, %v9131_v12  ;;  %v2551_v11 = vmul.f32 %v2524_v44, %v8649_v19  ;;  %v2649_v48 = vand.u32 2147483647, %v9154_v16 }
 0x2e8   : > { %v2693_v5 = vsel %vm2692_vm13, %v7152_v57, %v2689_v54  ;;  %v2651_v53 = vand.u32 2147483648, %v9154_v16  ;;  %7165 = vrcp.f32 %v9168_v22  ;;  %v9195_v42 = vadd.f32 %v8870_v17, %v2465_v50 }
 0x2e9   : > { %v2698_v62 = vsel %vm9142_vm7, %v2697_v29, %v2693_v5  ;;  %v2708_v60 = vsel %vm2707_vm15, %v7154_v14, %v2704_v23  ;;  %v2627_v8 = vsub.f32 1.0, %v2626_v45  ;;  %vm2631_vm2 = vweird.f32 %v7162_v21 }
 0x2ea   : > { %v2713_v57 = vsel %vm9148_vm1, %v2712_v31, %v2708_v60  ;;  %v2839_v30 = vmul.f32 %v2698_v62, %v8496_v1  ;;  %vm2645_vm0 = vweird.f32 %v9154_v16  ;;  %7167 = vrcp.f32 %v9170_v6  ;;  %v7164_v44 = vpop.eup %7163  ;;  %vm2632_vm6 = vmor %vm2630_vm11, %vm2631_vm2 }
 0x2eb   : > { %v2840_v63 = vmul.f32 %v2713_v57, %v8498_v2  ;;  %v2628_v39 = vmul.f32 %v7162_v21, %v2627_v8  ;;  %v2664_v14 = vand.u32 2147483647, %v9168_v22  ;;  %v2666_v29 = vand.u32 2147483648, %v9168_v22 }
 0x2ec   : > { %v2641_v17 = vmul.f32 %v7164_v44, %v9154_v16  ;;  %vm9206_vm4 = vcmp.eq.f32.partialorder %v2649_v48, 8.507059e+37  ;;  %v2652_v31 = vor.u32 1.1754944e-38, %v2651_v53  ;;  %v2679_v27 = vand.u32 2147483647, %v9170_v6  ;;  %v9220_v53 = vld [vmem:[%s12519_s6 + $0x50] sm:$0xff] }
 0x2ed   : > { %v2855_v56 = vadd.f32 %v2840_v63, %v2839_v30  ;;  %v2629_v54 = vadd.f32 %v7162_v21, %v2628_v39  ;;  %vm2660_vm5 = vweird.f32 %v9168_v22  ;;  %v2681_v23 = vand.u32 2147483648, %v9170_v6 }
 0x2ee   : > { %v2552_v45 = vmul.f32 %v2526_v7, %v8649_v19  ;;  %v7166_v5 = vpop.eup %7165  ;;  %v2642_v48 = vsub.f32 1.0, %v2641_v17  ;;  %vm2646_vm7 = vweird.f32 %v7164_v44  ;;  %v2565_v50 = vadd.f32 %v9220_v53, %v2551_v11 }
 0x2ef   : > { %v2515_v62 = vrot.slane %v9166_v43, 2  ;;  %2856 = vadd.xlane.f32.xlu1 %v2855_v56  ;;  %v2633_v60 = vsel %vm2632_vm6, %v7162_v21, %v2629_v54  ;;  %v2656_v7 = vmul.f32 %v7166_v5, %v9168_v22  ;;  %vm2661_vm8 = vweird.f32 %v7166_v5  ;;  %v9235_v43 = vld [vmem:[%s12519_s6 + $0x58] sm:$0xff]  ;;  %vm2647_vm11 = vmor %vm2645_vm0, %vm2646_vm7 }
 0x2f0   : > { %vm9225_vm1 = vcmp.eq.f32.partialorder %v2664_v14, 8.507059e+37  ;;  %v2667_v12 = vor.u32 1.1754944e-38, %v2666_v29  ;;  %vm2675_vm9 = vweird.f32 %v9170_v6  ;;  %v7168_v57 = vpop.eup %7167  ;;  %v2638_v30 = vsel %vm9176_vm14, %v2637_v20, %v2633_v60  ;;  %vm2662_vm14 = vmor %vm2660_vm5, %vm2661_vm8 }
 0x2f1   : > { %v2643_v63 = vmul.f32 %v7164_v44, %v2642_v48  ;;  %v2566_v21 = vadd.f32 %v9235_v43, %v2552_v45  ;;  %v6889_v11 = vmul.f32 -1.442695, %v2565_v50  ;;  %v2835_v39 = vmul.f32 %v2638_v30, %v8496_v1 }
 0x2f2   : > { %v2657_v14 = vsub.f32 1.0, %v2656_v7  ;;  %v2671_v29 = vmul.f32 %v7168_v57, %v9170_v6  ;;  %vm9240_vm10 = vcmp.eq.f32.partialorder %v2679_v27, 8.507059e+37  ;;  %v2682_v24 = vor.u32 1.1754944e-38, %v2681_v23 }
 0x2f3   : > { %v2644_v20 = vadd.f32 %v7164_v44, %v2643_v63  ;;  %7169 = vpow2.f32 %v6889_v11  ;;  %v6890_v56 = vmul.f32 -1.442695, %v2566_v21  ;;  %v2516_v54 = vsel %vm12533_vm3, %v2511_v51, %v2515_v62 }
 0x2f4   : > { %v2658_v45 = vmul.f32 %v7166_v5, %v2657_v14  ;;  %v2672_v48 = vsub.f32 1.0, %v2671_v29  ;;  %v2517_v50 = vrot.slane %v9195_v42, 2  ;;  %v2547_v27 = vmul.f32 %v2516_v54, %v8457_v13 }
 0x2f5   : > { %v2648_v60 = vsel %vm2647_vm11, %v7164_v44, %v2644_v20  ;;  %vm2676_vm13 = vweird.f32 %v7168_v57  ;;  %7171 = vpow2.f32 %v6890_v56  ;;  %v2520_v23 = vsel %vm12533_vm3, %v2515_v62, %v2519_v41 }
 0x2f6   : > { %v2653_v18 = vsel %vm9206_vm4, %v2652_v31, %v2648_v60  ;;  %v2659_v51 = vadd.f32 %v7166_v5, %v2658_v45  ;;  %v2673_v7 = vmul.f32 %v7168_v57, %v2672_v48  ;;  %v2518_v16 = vsel %vm12533_vm3, %v2513_v38, %v2517_v50  ;;  %vm2677_vm15 = vmor %vm2675_vm9, %vm2676_vm13 }
 0x2f7   : > { %v2836_v42 = vmul.f32 %v2653_v18, %v8498_v2  ;;  %v2548_v44 = vmul.f32 %v2518_v16, %v8457_v13  ;;  %v2561_v41 = vadd.f32 %v9268_v3, %v2547_v27  ;;  %v2522_v26 = vsel %vm12533_vm3, %v2517_v50, %v2521_v52  ;;  %v3044_v50 = vld [vmem:[#allocation3 + $0x1c8] sm:$0xff]  ;;  %v3046_v18 = vld [vmem:[#allocation3 + $0x270] sm:$0xff] }
 0x2f8   : > { %v2663_v38 = vsel %vm2662_vm14, %v7166_v5, %v2659_v51  ;;  %v2674_v9 = vadd.f32 %v7168_v57, %v2673_v7  ;;  %v2549_v31 = vmul.f32 %v2520_v23, %v8472_v40  ;;  %v2550_v22 = vmul.f32 %v2522_v26, %v8472_v40  ;;  %v3045_v23 = vld [vmem:[#allocation3 + $0x238] sm:$0xff] }
 0x2f9   : > { %v7170_v62 = vpop.eup %7169  ;;  %v2849_v30 = vadd.f32 %v2836_v42, %v2835_v39  ;;  %v2668_v63 = vsel %vm9225_vm1, %v2667_v12, %v2663_v38  ;;  %v2562_v52 = vadd.f32 %v9284_v28, %v2548_v44  ;;  %v6885_v5 = vmul.f32 -1.442695, %v2561_v41 }
 0x2fa   : > { %v2678_v21 = vsel %vm2677_vm15, %v7168_v57, %v2674_v9  ;;  %v2837_v11 = vmul.f32 %v2668_v63, %v8496_v1  ;;  %v9288_v14 = vadd.f32 1.0, %v7170_v62  ;;  %v2563_v8 = vadd.f32 %v8942_v58, %v2549_v31  ;;  %v3047_v31 = vld [vmem:[#allocation3 + $0x250] sm:$0xff] }
 0x2fb   : > { %v7172_v12 = vpop.eup %7171  ;;  %2850 = vadd.xlane.f32.xlu0 %v2849_v30  ;;  %v2683_v6 = vsel %vm9240_vm10, %v2682_v24, %v2678_v21  ;;  %7173 = vpow2.f32 %v6885_v5  ;;  %v6886_v39 = vmul.f32 -1.442695, %v2562_v52  ;;  %v2564_v57 = vadd.f32 %v8963_v59, %v2550_v22 }
 0x2fc   : > { %v2838_v29 = vmul.f32 %v2683_v6, %v8498_v2  ;;  %v9294_v20 = vadd.f32 1.0, %v7172_v12  ;;  %7175 = vrcp.f32 %v9288_v14  ;;  %v9299_v56 = vperm.slane %v8393_v36, 2 }
 0x2fd   : > { %7177 = vpow2.f32 %v6886_v39  ;;  %v6887_v58 = vmul.f32 -1.442695, %v2563_v8  ;;  %v9302_v54 = vperm.slane %v8395_v37, 2  ;;  %v2784_v24 = vand.u32 2147483647, %v9288_v14 }
 0x2fe   : > { %v2852_v17 = vadd.f32 %v2838_v29, %v2837_v11  ;;  %7179 = vrcp.f32 %v9294_v20  ;;  %v2786_v45 = vand.u32 2147483648, %v9288_v14  ;;  %v2801_v48 = vand.u32 2147483648, %v9294_v20 }
 0x2ff   : > { %7181 = vpow2.f32 %v6887_v58  ;;  %v6888_v59 = vmul.f32 -1.442695, %v2564_v57  ;;  %vm2780_vm2 = vweird.f32 %v9288_v14  ;;  %v2799_v60 = vand.u32 2147483647, %v9294_v20 }
 0x300   : > { %2853 = vadd.xlane.f32.xlu2 %v2852_v17  ;;  %v9311_v51 = vadd.f32 %v9299_v56, %v3044_v50  ;;  %v9316_v42 = vadd.f32 %v9302_v54, %v3045_v23  ;;  %v9319_v44 = vadd.f32 %v9299_v56, %v3046_v18  ;;  %vm9322_vm0 = vcmp.eq.f32.partialorder %v2784_v24, 8.507059e+37 }
 0x301   : > { %v7174_v27 = vpop.eup %7173  ;;  %7183 = vpow2.f32 %v6888_v59  ;;  %v2787_v9 = vor.u32 1.1754944e-38, %v2786_v45  ;;  %vm2795_vm4 = vweird.f32 %v9294_v20  ;;  %v2802_v62 = vor.u32 1.1754944e-38, %v2801_v48 }
 0x302   : > { %v7176_v7 = vpop.eup %7175  ;;  %v9313_v16 = vadd.f32 1.0, %v7174_v27  ;;  %v9331_v63 = vadd.f32 %v9302_v54, %v3047_v31  ;;  %vm9334_vm5 = vcmp.eq.f32.partialorder %v2799_v60, 8.507059e+37  ;;  %vm3086_vm6 = vcmask 1043456  }
 0x303   : > { %v7178_v41 = vpop.eup %7177  ;;  %v2776_v26 = vmul.f32 %v7176_v7, %v9288_v14  ;;  %v12532_v8 = vrot.slane %v9311_v51, 4  ;;  %v12527_v6 = vrot.slane %v9316_v42, 4  ;;  %v3093_v39 = vrot.slane %v9319_v44, 4 }
 0x304   : > { %v7180_v22 = vpop.eup %7179  ;;  %v9327_v30 = vadd.f32 1.0, %v7178_v41  ;;  %7185 = vrcp.f32 %v9313_v16  ;;  %v2726_v12 = vand.u32 2147483648, %v9313_v16  ;;  %vm2781_vm7 = vweird.f32 %v7176_v7 }
 0x305   : > { %v7182_v52 = vpop.eup %7181  ;;  %v2777_v5 = vsub.f32 1.0, %v2776_v26  ;;  %v2791_v21 = vmul.f32 %v7180_v22, %v9294_v20  ;;  %v2724_v58 = vand.u32 2147483647, %v9313_v16  ;;  %vm2796_vm8 = vweird.f32 %v7180_v22  ;;  %vm2782_vm9 = vmor %vm2780_vm2, %vm2781_vm7 }
 0x306   : > { %7187 = vrcp.f32 %v9327_v30  ;;  %v9344_v24 = vadd.f32 1.0, %v7182_v52  ;;  %v3095_v45 = vrot.slane %v9331_v63, 4  ;;  %v9350_v48 = vmul.f32 %v2523_v25, %v8737_v47  ;;  %vm2797_vm13 = vmor %vm2795_vm4, %vm2796_vm8  ;;  %v9431_v52 = vld [vmem:[%s12519_s6 + $0x68] sm:$0x3] }
 0x307   : > { %v2778_v29 = vmul.f32 %v7176_v7, %v2777_v5  ;;  %v2792_v57 = vsub.f32 1.0, %v2791_v21  ;;  %v7184_v17 = vpop.eup %7183  ;;  %vm2720_vm1 = vweird.f32 %v9313_v16  ;;  %v2739_v27 = vand.u32 2147483647, %v9327_v30 }
 0x308   : > { %v9354_v60 = vadd.f32 1.0, %v7184_v17  ;;  %v2727_v18 = vor.u32 1.1754944e-38, %v2726_v12  ;;  %v2741_v41 = vand.u32 2147483648, %v9327_v30  ;;  %7189 = vrcp.f32 %v9344_v24 }
 0x309   : > { %v2779_v59 = vadd.f32 %v7176_v7, %v2778_v29  ;;  %v2793_v50 = vmul.f32 %v7180_v22, %v2792_v57  ;;  %v2756_v0 = vand.u32 2147483648, %v9344_v24  ;;  %vm9362_vm10 = vcmp.eq.f32.partialorder %v2724_v58, 8.507059e+37 }
 0x30a   : > { %v7186_v23 = vpop.eup %7185  ;;  %vm2735_vm11 = vweird.f32 %v9327_v30  ;;  %v3094_v14 = vsel %vm3086_vm6, %v12532_v8, %v3093_v39  ;;  %7191 = vrcp.f32 %v9354_v60  ;;  %v3096_v12 = vsel %vm3086_vm6, %v12527_v6, %v3095_v45 }
 0x30b   : > { %v2783_v25 = vsel %vm2782_vm9, %v7176_v7, %v2779_v59  ;;  %v2794_v26 = vadd.f32 %v7180_v22, %v2793_v50  ;;  %v2716_v31 = vmul.f32 %v7186_v23, %v9313_v16  ;;  %v2754_v7 = vand.u32 2147483647, %v9344_v24 }
 0x30c   : > { %v7188_v5 = vpop.eup %7187  ;;  %v2788_v21 = vsel %vm9322_vm0, %v2787_v9, %v2783_v25  ;;  %vm9386_vm14 = vcmp.eq.f32.partialorder %v2739_v27, 8.507059e+37  ;;  %vm2721_vm15 = vweird.f32 %v7186_v23  ;;  %v2742_v17 = vor.u32 1.1754944e-38, %v2741_v41 }
 0x30d   : > { %v2798_v29 = vsel %vm2797_vm13, %v7180_v22, %v2794_v26  ;;  %v2845_v57 = vmul.f32 %v2788_v21, %v8496_v1  ;;  %v2717_v58 = vsub.f32 1.0, %v2716_v31  ;;  %v2731_v38 = vmul.f32 %v7188_v5, %v9327_v30  ;;  %vm2722_vm7 = vmor %vm2720_vm1, %vm2721_vm15 }
 0x30e   : > { %v2803_v20 = vsel %vm9334_vm5, %v2802_v62, %v2798_v29  ;;  %v2757_v59 = vor.u32 1.1754944e-38, %v2756_v0  ;;  %vm2736_vm2 = vweird.f32 %v7188_v5  ;;  %vm2750_vm0 = vweird.f32 %v9344_v24  ;;  %v7190_v22 = vpop.eup %7189 }
 0x30f   : > { %v2846_v50 = vmul.f32 %v2803_v20, %v8498_v2  ;;  %v2718_v25 = vmul.f32 %v7186_v23, %v2717_v58  ;;  %v2732_v6 = vsub.f32 1.0, %v2731_v38  ;;  %v2769_v26 = vand.u32 2147483647, %v9354_v60  ;;  %vm2737_vm1 = vmor %vm2735_vm11, %vm2736_vm2 }
 0x310   : > { %v2771_v27 = vand.u32 2147483648, %v9354_v60  ;;  %v3129_v31 = vmul.f32 %v3094_v14, %v8418_v55  ;;  %v3130_v11 = vmul.f32 %v3096_v12, %v8418_v55  ;;  %v2746_v0 = vmul.f32 %v7190_v22, %v9344_v24  ;;  %v7192_v58 = vpop.eup %7191 }
 0x311   : > { %v2864_v62 = vadd.f32 %v2846_v50, %v2845_v57  ;;  %v2719_v21 = vadd.f32 %v7186_v23, %v2718_v25  ;;  %v2733_v41 = vmul.f32 %v7188_v5, %v2732_v6  ;;  %vm9399_vm4 = vcmp.eq.f32.partialorder %v2754_v7, 8.507059e+37 }
 0x312   : > { %vm2765_vm5 = vweird.f32 %v9354_v60  ;;  %vm2751_vm8 = vweird.f32 %v7190_v22  ;;  %v3143_v14 = vadd.f32 %v9102_v32, %v3129_v31  ;;  %v3144_v12 = vadd.f32 %v9113_v15, %v3130_v11  ;;  %v3048_v11 = vld [vmem:[#allocation3 + $0x148] sm:$0xff] }
 0x313   : > { %v2554_v6 = vmul.f32 %v2525_v49, %v8737_v47  ;;  %2865 = vadd.xlane.f32.xlu1 %v2864_v62  ;;  %v2723_v7 = vsel %vm2722_vm7, %v7186_v23, %v2719_v21  ;;  %v2734_v57 = vadd.f32 %v7188_v5, %v2733_v41  ;;  %v2747_v38 = vsub.f32 1.0, %v2746_v0  ;;  %v3049_v62 = vld [vmem:[#allocation3 + $0x170] sm:$0xff] }
 0x314   : > { %v2761_v20 = vmul.f32 %v7192_v58, %v9354_v60  ;;  %v2728_v50 = vsel %vm9362_vm10, %v2727_v18, %v2723_v7  ;;  %vm2766_vm9 = vweird.f32 %v7192_v58  ;;  %v6895_v32 = vmul.f32 -1.442695, %v3143_v14  ;;  %v9424_v18 = vld [vmem:[%s12519_s6 + $0x60] sm:$0x3]  ;;  %vm2752_vm10 = vmor %vm2750_vm0, %vm2751_vm8 }
 0x315   : > { %v6896_v15 = vmul.f32 -1.442695, %v3144_v12  ;;  %v2738_v16 = vsel %vm2737_vm1, %v7188_v5, %v2734_v57  ;;  %v2841_v33 = vmul.f32 %v2728_v50, %v8496_v1  ;;  %v2748_v49 = vmul.f32 %v7190_v22, %v2747_v38  ;;  %vm2767_vm11 = vmor %vm2765_vm5, %vm2766_vm9 }
 0x316   : > { %v2762_v25 = vsub.f32 1.0, %v2761_v20  ;;  %v2743_v23 = vsel %vm9386_vm14, %v2742_v17, %v2738_v16  ;;  %7193 = vpow2.f32 %v6895_v32  ;;  %v2567_v30 = vadd.f32 %v9424_v18, %v9350_v48 }
 0x317   : > { %v2568_v5 = vadd.f32 %v9431_v52, %v2554_v6  ;;  %v2842_v31 = vmul.f32 %v2743_v23, %v8498_v2  ;;  %v2749_v9 = vadd.f32 %v7190_v22, %v2748_v49  ;;  %7195 = vpow2.f32 %v6896_v15 }
 0x318   : > { %v2763_v17 = vmul.f32 %v7192_v58, %v2762_v25  ;;  %v6891_v21 = vmul.f32 -1.442695, %v2567_v30  ;;  %v9439_v41 = vadd.f32 %v9299_v56, %v3048_v11  ;;  %v9442_v0 = vadd.f32 %v9302_v54, %v3049_v62  ;;  %v3052_v62 = vld [vmem:[#allocation3 + $0x1c0] sm:$0xff] }
 0x319   : > { %v6892_v48 = vmul.f32 -1.442695, %v2568_v5  ;;  %v2858_v14 = vadd.f32 %v2842_v31, %v2841_v33  ;;  %v2753_v12 = vsel %vm2752_vm10, %v7190_v22, %v2749_v9  ;;  %v2772_v7 = vor.u32 1.1754944e-38, %v2771_v27  ;;  %v3051_v33 = vld [vmem:[#allocation3 + $0x2f8] sm:$0xff] }
 0x31a   : > { %v2764_v6 = vadd.f32 %v7192_v58, %v2763_v17  ;;  %v2758_v57 = vsel %vm9399_vm4, %v2757_v59, %v2753_v12  ;;  %7197 = vpow2.f32 %v6891_v21  ;;  %v12529_v24 = vrot.slane %v9439_v41, 4  ;;  %v3053_v21 = vld [vmem:[#allocation3 + $0x1d0] sm:$0xff] }
 0x31b   : > { %v12528_v38 = vrot.slane %v9442_v0, 4  ;;  %2859 = vadd.xlane.f32.xlu0 %v2858_v14  ;;  %vm2770_vm13 = vcmp.eq.f32.partialorder %v2769_v26, 8.507059e+37  ;;  %v2843_v50 = vmul.f32 %v2758_v57, %v8496_v1  ;;  %7199 = vpow2.f32 %v6892_v48 }
 0x31c   : > { %v2768_v20 = vsel %vm2767_vm11, %v7192_v58, %v2764_v6  ;;  %v7194_v22 = vpop.eup %7193  ;;  %v3098_v60 = vsel %vm3086_vm6, %v3093_v39, %v12529_v24  ;;  %v3050_v39 = vld [vmem:[#allocation3 + $0xb0] sm:$0xff]  ;;  %v9489_v14 = vadd.f32 %v9299_v56, %v3052_v62  ;;  %v9492_v12 = vadd.f32 %v9302_v54, %v3053_v21 }
 0x31d   : > { %v2773_v27 = vsel %vm2770_vm13, %v2772_v7, %v2768_v20  ;;  %v3100_v59 = vsel %vm3086_vm6, %v3095_v45, %v12528_v38  ;;  %v7196_v29 = vpop.eup %7195  ;;  %v9463_v58 = vadd.f32 1.0, %v7194_v22  ;;  %v3131_v32 = vmul.f32 %v3098_v60, %v8391_v35 }
 0x31e   : > { %v2844_v26 = vmul.f32 %v2773_v27, %v8498_v2  ;;  %v9466_v15 = vadd.f32 1.0, %v7196_v29  ;;  %v3132_v16 = vmul.f32 %v3100_v59, %v8391_v35  ;;  %v9472_v63 = vadd.f32 %v9299_v56, %v3050_v39 }
 0x31f   : > { %7201 = vrcp.f32 %v9463_v58  ;;  %v9475_v45 = vadd.f32 %v9302_v54, %v3051_v33  ;;  %v3250_v23 = vand.u32 2147483647, %v9463_v58  ;;  %v3145_v5 = vadd.f32 %v9041_v10, %v3131_v32 }
 0x320   : > { %v2861_v44 = vadd.f32 %v2844_v26, %v2843_v50  ;;  %v7198_v49 = vpop.eup %7197  ;;  %7203 = vrcp.f32 %v9466_v15  ;;  %v3252_v31 = vand.u32 2147483648, %v9463_v58  ;;  %v3267_v9 = vand.u32 2147483648, %v9466_v15 }
 0x321   : > { %v7200_v25 = vpop.eup %7199  ;;  %v9478_v30 = vadd.f32 1.0, %v7198_v49  ;;  %v3146_v11 = vadd.f32 %v9047_v46, %v3132_v16  ;;  %v3265_v48 = vand.u32 2147483647, %v9466_v15  ;;  %vm3246_vm14 = vweird.f32 %v9463_v58 }
 0x322   : > { %2862 = vadd.xlane.f32.xlu2 %v2861_v44  ;;  %v9483_v17 = vadd.f32 1.0, %v7200_v25  ;;  %v12530_v10 = vrot.slane %v9472_v63, 4  ;;  %v3103_v46 = vrot.slane %v9475_v45, 4  ;;  %vm3261_vm15 = vweird.f32 %v9466_v15  ;;  %v9763_v45 = vld [vmem:[%s12519_s6 + $0x28] sm:$0xff] }
 0x323   : > { %7205 = vrcp.f32 %v9478_v30  ;;  %v2816_v7 = vand.u32 2147483648, %v9478_v30  ;;  %v6897_v57 = vmul.f32 -1.442695, %v3145_v5  ;;  %v6898_v20 = vmul.f32 -1.442695, %v3146_v11 }
 0x324   : > { %7207 = vrcp.f32 %v9483_v17  ;;  %vm9501_vm2 = vcmp.eq.f32.partialorder %v3250_v23, 8.507059e+37  ;;  %v3253_v60 = vor.u32 1.1754944e-38, %v3252_v31  ;;  %v3268_v59 = vor.u32 1.1754944e-38, %v3267_v9 }
 0x325   : > { %v7202_v6 = vpop.eup %7201  ;;  %v2814_v29 = vand.u32 2147483647, %v9478_v30  ;;  %vm9507_vm0 = vcmp.eq.f32.partialorder %v3265_v48, 8.507059e+37  ;;  %v2829_v16 = vand.u32 2147483647, %v9483_v17  ;;  %v2831_v44 = vand.u32 2147483648, %v9483_v17 }
 0x326   : > { %v7204_v50 = vpop.eup %7203  ;;  %v3242_v22 = vmul.f32 %v7202_v6, %v9463_v58  ;;  %7209 = vpow2.f32 %v6897_v57  ;;  %vm2810_vm4 = vweird.f32 %v9478_v30  ;;  %v12531_v33 = vrot.slane %v9489_v14, 4  ;;  %v3042_v48 = vld [vmem:[#allocation3 + $0xc0] sm:$0xf0] }
 0x327   : > { %v3257_v26 = vmul.f32 %v7204_v50, %v9466_v15  ;;  %7211 = vpow2.f32 %v6898_v20  ;;  %vm3247_vm5 = vweird.f32 %v7202_v6  ;;  %vm3262_vm7 = vweird.f32 %v7204_v50 }
 0x328   : > { %v3243_v39 = vsub.f32 1.0, %v3242_v22  ;;  %v2817_v23 = vor.u32 1.1754944e-38, %v2816_v7  ;;  %vm2825_vm8 = vweird.f32 %v9483_v17  ;;  %vm9517_vm1 = vcmp.eq.f32.partialorder %v2814_v29, 8.507059e+37  ;;  %v3043_v29 = vld [vmem:[#allocation3 + $0x110] sm:$0xf0]  ;;  %vm3248_vm11 = vmor %vm3246_vm14, %vm3247_vm5 }
 0x329   : > { %v7206_v49 = vpop.eup %7205  ;;  %v3258_v25 = vsub.f32 1.0, %v3257_v26  ;;  %v3106_v62 = vsel %vm3086_vm6, %v12530_v10, %v12531_v33  ;;  %v3107_v21 = vrot.slane %v9492_v12, 4  ;;  %vm9528_vm9 = vcmp.eq.f32.partialorder %v2829_v16, 8.507059e+37  ;;  %vm3263_vm3 = vmor %vm3261_vm15, %vm3262_vm7 }
 0x32a   : > { %v7208_v5 = vpop.eup %7207  ;;  %v3244_v31 = vmul.f32 %v7202_v6, %v3243_v39  ;;  %v2806_v9 = vmul.f32 %v7206_v49, %v9478_v30  ;;  %v2832_v22 = vor.u32 1.1754944e-38, %v2831_v44  ;;  %v3058_v26 = vadd.f32 %v9299_v56, %v3042_v48 }
 0x32b   : > { %v3259_v7 = vmul.f32 %v7204_v50, %v3258_v25  ;;  %v2821_v57 = vmul.f32 %v7208_v5, %v9483_v17  ;;  %vm2811_vm10 = vweird.f32 %v7206_v49  ;;  %v3059_v24 = vadd.f32 %v9302_v54, %v3043_v29 }
 0x32c   : > { %v3245_v39 = vadd.f32 %v7202_v6, %v3244_v31  ;;  %v2807_v38 = vsub.f32 1.0, %v2806_v9  ;;  %v7210_v10 = vpop.eup %7209  ;;  %vm2826_vm13 = vweird.f32 %v7208_v5  ;;  %v3135_v16 = vmul.f32 %v3106_v62, %v8472_v40  ;;  %vm2812_vm14 = vmor %vm2810_vm4, %vm2811_vm10 }
 0x32d   : > { %v3260_v25 = vadd.f32 %v7204_v50, %v3259_v7  ;;  %v2822_v33 = vsub.f32 1.0, %v2821_v57  ;;  %v7212_v8 = vpop.eup %7211  ;;  %v9541_v9 = vadd.f32 1.0, %v7210_v10  ;;  %v3108_v58 = vsel %vm3086_vm6, %v3103_v46, %v3107_v21 }
 0x32e   : > { %v3249_v44 = vsel %vm3248_vm11, %v7202_v6, %v3245_v39  ;;  %v2808_v31 = vmul.f32 %v7206_v49, %v2807_v38  ;;  %v9550_v57 = vadd.f32 1.0, %v7212_v8  ;;  %v9564_v8 = vld [vmem:[%s12519_s6 + $0x40] sm:$0xff]  ;;  %v3087_v32 = vrot.slane %v3058_v26, 4 }
 0x32f   : > { %v3254_v48 = vsel %vm9501_vm2, %v3253_v60, %v3249_v44  ;;  %v3264_v7 = vsel %vm3263_vm3, %v7204_v50, %v3260_v25  ;;  %v2823_v62 = vmul.f32 %v7208_v5, %v2822_v33  ;;  %7213 = vrcp.f32 %v9541_v9  ;;  %vm2827_vm3 = vmor %vm2825_vm8, %vm2826_vm13  ;;  %v3054_v44 = vld [vmem:[#allocation3 + $0x98] sm:$0x3f] }
 0x330   : > { %v3269_v15 = vsel %vm9507_vm0, %v3268_v59, %v3264_v7  ;;  %v3423_v38 = vmul.f32 %v3254_v48, %v8496_v1  ;;  %v2809_v10 = vadd.f32 %v7206_v49, %v2808_v31  ;;  %v3136_v50 = vmul.f32 %v3108_v58, %v8472_v40 }
 0x331   : > { %v3424_v6 = vmul.f32 %v3269_v15, %v8498_v2  ;;  %v2824_v27 = vadd.f32 %v7208_v5, %v2823_v62  ;;  %v3149_v60 = vadd.f32 %v9564_v8, %v3135_v16  ;;  %7215 = vrcp.f32 %v9550_v57 }
 0x332   : > { %v2813_v59 = vsel %vm2812_vm14, %v7206_v49, %v2809_v10  ;;  %v3090_v30 = vrot.slane %v3059_v24, 4  ;;  %v3280_v25 = vand.u32 2147483647, %v9541_v9  ;;  %v9575_v31 = vperm.slane %v8393_v36, 3 }
 0x333   : > { %v3438_v33 = vadd.f32 %v3424_v6, %v3423_v38  ;;  %v2818_v29 = vsel %vm9517_vm1, %v2817_v23, %v2813_v59  ;;  %v2828_v39 = vsel %vm2827_vm3, %v7208_v5, %v2824_v27  ;;  %v9581_v16 = vadd.f32 %v9299_v56, %v3054_v44  ;;  %v9588_v23 = vld [vmem:[%s12519_s6 + $0x48] sm:$0xff] }
 0x334   : > { %v2833_v49 = vsel %vm9528_vm9, %v2832_v22, %v2828_v39  ;;  %v2847_v17 = vmul.f32 %v2818_v29, %v8496_v1  ;;  %vm3276_vm15 = vweird.f32 %v9541_v9  ;;  %v3150_v5 = vadd.f32 %v9588_v23, %v3136_v50 }
 0x335   : > { %3439 = vadd.xlane.f32.xlu1 %v3438_v33  ;;  %v2848_v24 = vmul.f32 %v2833_v49, %v8498_v2  ;;  %v6901_v11 = vmul.f32 -1.442695, %v3149_v60  ;;  %v7214_v20 = vpop.eup %7213  ;;  %v3282_v26 = vand.u32 2147483648, %v9541_v9  ;;  %v12656_v56 = vrot.slane %v9311_v51, 4 }
 0x336   : > { %v2867_v22 = vsel %vm2274_vm12, %v2847_v17, 0.0  ;;  %v12657_v48 = vrot.slane %v9316_v42, 4  ;;  %v3272_v15 = vmul.f32 %v7214_v20, %v9541_v9  ;;  %vm9601_vm2 = vcmp.eq.f32.partialorder %v3280_v25, 8.507059e+37 }
 0x337   : > { %v3089_v58 = vsel %vm3086_vm6, %v3087_v32, %v12656_v56  ;;  %v2868_v62 = vsel %vm2274_vm12, %v2848_v24, 0.0  ;;  %vm3291_vm0 = vweird.f32 %v9550_v57  ;;  %v7216_v10 = vpop.eup %7215  ;;  %7217 = vpow2.f32 %v6901_v11  ;;  %v3055_v32 = vld [vmem:[#allocation3 + $0x1a0] sm:$0x3f] }
 0x338   : > { %v3092_v7 = vsel %vm3086_vm6, %v3090_v30, %v12657_v48  ;;  %v2869_v6 = vadd.f32 %v2868_v62, %v2867_v22  ;;  %v6902_v51 = vmul.f32 -1.442695, %v3150_v5  ;;  %v3127_v27 = vmul.f32 %v3089_v58, %v8389_v34 }
 0x339   : > { %v3273_v50 = vsub.f32 1.0, %v3272_v15  ;;  %v3287_v42 = vmul.f32 %v7216_v10, %v9550_v57  ;;  %v3295_v60 = vand.u32 2147483647, %v9550_v57  ;;  %v3128_v59 = vmul.f32 %v3092_v7, %v8389_v34 }
 0x33a   : > { %2870 = vadd.xlane.f32.xlu0 %v2869_v6  ;;  %7219 = vpow2.f32 %v6902_v51  ;;  %v3141_v30 = vadd.f32 %v9078_v4, %v3127_v27  ;;  %v9612_v33 = vadd.f32 %v9302_v54, %v3055_v32  ;;  %v12536_v29 = vrot.slane %v9581_v16, 4 }
 0x33b   : > { %v3274_v39 = vmul.f32 %v7214_v20, %v3273_v50  ;;  %vm3277_vm4 = vweird.f32 %v7214_v20  ;;  %v3288_v25 = vsub.f32 1.0, %v3287_v42  ;;  %v3142_v44 = vadd.f32 %v9088_v61, %v3128_v59  ;;  %v3632_v50 = vld [vmem:[#allocation3 + $0x1a8] sm:$0xff] }
 0x33c   : > { %v3297_v49 = vand.u32 2147483648, %v9550_v57  ;;  %v6893_v17 = vmul.f32 -1.442695, %v3141_v30  ;;  %v12660_v24 = vrot.slane %v9489_v14, 4  ;;  %v12535_v4 = vrot.slane %v9612_v33, 4  ;;  %vm3278_vm7 = vmor %vm3276_vm15, %vm3277_vm4 }
 0x33d   : > { %v3275_v54 = vadd.f32 %v7214_v20, %v3274_v39  ;;  %v3289_v11 = vmul.f32 %v7216_v10, %v3288_v25  ;;  %vm3292_vm5 = vweird.f32 %v7216_v10  ;;  %v6894_v22 = vmul.f32 -1.442695, %v3142_v44  ;;  %v7218_v56 = vpop.eup %7217  ;;  %v3633_v44 = vld [vmem:[#allocation3 + $0x230] sm:$0xff] }
 0x33e   : > { %v3110_v5 = vsel %vm3086_vm6, %v12660_v24, %v12536_v29  ;;  %v3283_v61 = vor.u32 1.1754944e-38, %v3282_v26  ;;  %7221 = vpow2.f32 %v6893_v17  ;;  %v3112_v14 = vsel %vm3086_vm6, %v3107_v21, %v12535_v4  ;;  %vm3293_vm8 = vmor %vm3291_vm0, %vm3292_vm5 }
 0x33f   : > { %v3137_v58 = vmul.f32 %v3110_v5, %v8649_v19  ;;  %v3279_v48 = vsel %vm3278_vm7, %v7214_v20, %v3275_v54  ;;  %v3290_v7 = vadd.f32 %v7216_v10, %v3289_v11  ;;  %v9631_v62 = vadd.f32 1.0, %v7218_v56  ;;  %v3634_v5 = vld [vmem:[#allocation3 + $0x268] sm:$0xff]  ;;  %v3635_v56 = vld [vmem:[#allocation3 + $0x1e0] sm:$0xff] }
 0x340   : > { %7223 = vpow2.f32 %v6894_v22  ;;  %v7220_v15 = vpop.eup %7219  ;;  %v3284_v9 = vsel %vm9601_vm2, %v3283_v61, %v3279_v48  ;;  %vm3296_vm1 = vcmp.eq.f32.partialorder %v3295_v60, 8.507059e+37  ;;  %v3298_v26 = vor.u32 1.1754944e-38, %v3297_v49 }
 0x341   : > { %v3138_v12 = vmul.f32 %v3112_v14, %v8649_v19  ;;  %v3294_v6 = vsel %vm3293_vm8, %v7216_v10, %v3290_v7  ;;  %v3425_v21 = vmul.f32 %v3284_v9, %v8496_v1  ;;  %v9639_v51 = vadd.f32 1.0, %v7220_v15 }
 0x342   : > { %7225 = vrcp.f32 %v9631_v62  ;;  %v9643_v20 = vperm.slane %v8395_v37, 3  ;;  %v3299_v27 = vsel %vm3296_vm1, %v3298_v26, %v3294_v6  ;;  %v3151_v38 = vadd.f32 %v9220_v53, %v3137_v58 }
 0x343   : > { %v3426_v57 = vmul.f32 %v3299_v27, %v8498_v2  ;;  %7227 = vrcp.f32 %v9639_v51  ;;  %v9649_v10 = vperm.slane %v8393_v36, 5  ;;  %v3152_v60 = vadd.f32 %v9235_v43, %v3138_v12 }
 0x344   : > { %v7222_v42 = vpop.eup %7221  ;;  %v9653_v59 = vadd.f32 %v9575_v31, %v3632_v50  ;;  %v3340_v39 = vand.u32 2147483647, %v9631_v62  ;;  %v3342_v53 = vand.u32 2147483648, %v9631_v62  ;;  %v3355_v49 = vand.u32 2147483647, %v9639_v51 }
 0x345   : > { %v3441_v30 = vadd.f32 %v3426_v57, %v3425_v21  ;;  %v9657_v25 = vadd.f32 1.0, %v7222_v42  ;;  %v6903_v24 = vmul.f32 -1.442695, %v3151_v38  ;;  %v9663_v43 = vadd.f32 %v9643_v20, %v3633_v44 }
 0x346   : > { %v7224_v32 = vpop.eup %7223  ;;  %v3357_v11 = vand.u32 2147483648, %v9639_v51  ;;  %v6904_v22 = vmul.f32 -1.442695, %v3152_v60  ;;  %v9668_v61 = vadd.f32 %v9575_v31, %v3634_v5  ;;  %v9673_v58 = vadd.f32 %v9643_v20, %v3635_v56 }
 0x347   : > { %v9660_v17 = vadd.f32 1.0, %v7224_v32  ;;  %3442 = vadd.xlane.f32.xlu2 %v3441_v30  ;;  %7229 = vrcp.f32 %v9657_v25  ;;  %v12537_v48 = vrot.slane %v9653_v59, 6  ;;  %vm3336_vm9 = vweird.f32 %v9631_v62 }
 0x348   : > { %v7226_v54 = vpop.eup %7225  ;;  %vm9677_vm10 = vcmp.eq.f32.partialorder %v3340_v39, 8.507059e+37  ;;  %v3343_v9 = vor.u32 1.1754944e-38, %v3342_v53  ;;  %vm3351_vm11 = vweird.f32 %v9639_v51  ;;  %vm9683_vm13 = vcmp.eq.f32.partialorder %v3355_v49, 8.507059e+37 }
 0x349   : > { %v3332_v14 = vmul.f32 %v7226_v54, %v9631_v62  ;;  %7231 = vrcp.f32 %v9660_v17  ;;  %v7228_v7 = vpop.eup %7227  ;;  %v3220_v21 = vand.u32 2147483647, %v9657_v25  ;;  %v3358_v27 = vor.u32 1.1754944e-38, %v3357_v11 }
 0x34a   : > { %v3347_v12 = vmul.f32 %v7228_v7, %v9639_v51  ;;  %7233 = vpow2.f32 %v6903_v24  ;;  %v3680_v38 = vrot.slane %v9663_v43, 6  ;;  %v12534_v57 = vrot.slane %v9668_v61, 6 }
 0x34b   : > { %v3333_v26 = vsub.f32 1.0, %v3332_v14  ;;  %7235 = vpow2.f32 %v6904_v22  ;;  %vm3337_vm14 = vweird.f32 %v7226_v54  ;;  %vm3216_vm3 = vweird.f32 %v9657_v25 }
 0x34c   : > { %v3348_v42 = vsub.f32 1.0, %v3347_v12  ;;  %v3222_v60 = vand.u32 2147483648, %v9657_v25  ;;  %vm3231_vm15 = vweird.f32 %v9660_v17  ;;  %v3235_v30 = vand.u32 2147483647, %v9660_v17  ;;  %vm3338_vm4 = vmor %vm3336_vm9, %vm3337_vm14 }
 0x34d   : > { %v3334_v50 = vmul.f32 %v7226_v54, %v3333_v26  ;;  %v7230_v32 = vpop.eup %7229  ;;  %v3683_v39 = vsel %vm2274_vm12, %v12537_v48, %v12534_v57  ;;  %v12539_v53 = vrot.slane %v9673_v58, 6  ;;  %vm3352_vm2 = vweird.f32 %v7228_v7 }
 0x34e   : > { %v3349_v24 = vmul.f32 %v7228_v7, %v3348_v42  ;;  %v3212_v5 = vmul.f32 %v7230_v32, %v9657_v25  ;;  %vm9701_vm0 = vcmp.eq.f32.partialorder %v3220_v21, 8.507059e+37  ;;  %vm3217_vm5 = vweird.f32 %v7230_v32  ;;  %vm3353_vm7 = vmor %vm3351_vm11, %vm3352_vm2  ;;  %v3630_v25 = vld [vmem:[#allocation3 + $0x220] sm:$0xff] }
 0x34f   : > { %v7232_v44 = vpop.eup %7231  ;;  %v3335_v49 = vadd.f32 %v7226_v54, %v3334_v50  ;;  %v3237_v56 = vand.u32 2147483648, %v9660_v17  ;;  %v12667_v14 = vrot.slane %v9472_v63, 4  ;;  %v12668_v26 = vrot.slane %v9439_v41, 4  ;;  %vm3218_vm1 = vmor %vm3216_vm3, %vm3217_vm5 }
 0x350   : > { %v3227_v22 = vmul.f32 %v7232_v44, %v9660_v17  ;;  %v7234_v50 = vpop.eup %7233  ;;  %v3350_v42 = vadd.f32 %v7228_v7, %v3349_v24  ;;  %v3213_v57 = vsub.f32 1.0, %v3212_v5  ;;  %v3716_v4 = vmul.f32 %v3683_v39, %v8391_v35 }
 0x351   : > { %v3102_v12 = vsel %vm3086_vm6, %v12668_v26, %v12667_v14  ;;  %v3339_v21 = vsel %vm3338_vm4, %v7226_v54, %v3335_v49  ;;  %v7236_v29 = vpop.eup %7235  ;;  %v9721_v63 = vadd.f32 1.0, %v7234_v50  ;;  %v3685_v41 = vsel %vm2274_vm12, %v3680_v38, %v12539_v53 }
 0x352   : > { %v3344_v62 = vsel %vm9677_vm10, %v3343_v9, %v3339_v21  ;;  %v3228_v48 = vsub.f32 1.0, %v3227_v22  ;;  %v3354_v54 = vsel %vm3353_vm7, %v7228_v7, %v3350_v42  ;;  %v3214_v49 = vmul.f32 %v7230_v32, %v3213_v57  ;;  %v9739_v7 = vld [vmem:[%s12519_s6 + $0x20] sm:$0xff] }
 0x353   : > { %v3429_v39 = vmul.f32 %v3344_v62, %v8496_v1  ;;  %v9729_v24 = vadd.f32 1.0, %v7236_v29  ;;  %v3359_v15 = vsel %vm9683_vm13, %v3358_v27, %v3354_v54  ;;  %vm3232_vm8 = vweird.f32 %v7232_v44  ;;  %v3631_v54 = vld [vmem:[#allocation3 + $0x90] sm:$0xff] }
 0x354   : > { %v3229_v51 = vmul.f32 %v7232_v44, %v3228_v48  ;;  %7237 = vrcp.f32 %v9721_v63  ;;  %v3430_v9 = vmul.f32 %v3359_v15, %v8498_v2  ;;  %v3215_v5 = vadd.f32 %v7230_v32, %v3214_v49  ;;  %vm3233_vm9 = vmor %vm3231_vm15, %vm3232_vm8 }
 0x355   : > { %v3717_v22 = vmul.f32 %v3685_v41, %v8391_v35  ;;  %v3730_v29 = vadd.f32 %v9739_v7, %v3716_v4  ;;  %v3223_v48 = vor.u32 1.1754944e-38, %v3222_v60  ;;  %7239 = vrcp.f32 %v9729_v24 }
 0x356   : > { %v3230_v6 = vadd.f32 %v7232_v44, %v3229_v51  ;;  %v3133_v27 = vmul.f32 %v3102_v12, %v8457_v13  ;;  %v3447_v57 = vadd.f32 %v3430_v9, %v3429_v39  ;;  %v3219_v14 = vsel %vm3218_vm1, %v7230_v32, %v3215_v5 }
 0x357   : > { %v3238_v26 = vor.u32 1.1754944e-38, %v3237_v56  ;;  %v12669_v4 = vrot.slane %v9442_v0, 4  ;;  %v3224_v60 = vsel %vm9701_vm0, %v3223_v48, %v3219_v14  ;;  %vm3236_vm10 = vcmp.eq.f32.partialorder %v3235_v30, 8.507059e+37 }
 0x358   : > { %v3234_v21 = vsel %vm3233_vm9, %v7232_v44, %v3230_v6  ;;  %v9757_v12 = vadd.f32 %v9575_v31, %v3630_v25  ;;  %3448 = vadd.xlane.f32.xlu1 %v3447_v57  ;;  %v3421_v17 = vmul.f32 %v3224_v60, %v8496_v1  ;;  %v3731_v0 = vadd.f32 %v9763_v45, %v3717_v22 }
 0x359   : > { %v3104_v50 = vsel %vm3086_vm6, %v12669_v4, %v3103_v46  ;;  %v3239_v32 = vsel %vm3236_vm10, %v3238_v26, %v3234_v21  ;;  %v6911_v46 = vmul.f32 -1.442695, %v3730_v29  ;;  %vm3366_vm11 = vweird.f32 %v9721_v63 }
 0x35a   : > { %v7238_v56 = vpop.eup %7237  ;;  %v3422_v11 = vmul.f32 %v3239_v32, %v8498_v2  ;;  %v3134_v30 = vmul.f32 %v3104_v50, %v8457_v13  ;;  %v3147_v44 = vadd.f32 %v9268_v3, %v3133_v27  ;;  %v3370_v62 = vand.u32 2147483647, %v9721_v63 }
 0x35b   : > { %v3362_v42 = vmul.f32 %v7238_v56, %v9721_v63  ;;  %7241 = vpow2.f32 %v6911_v46  ;;  %v6912_v41 = vmul.f32 -1.442695, %v3731_v0  ;;  %v7240_v39 = vpop.eup %7239  ;;  %v9774_v9 = vadd.f32 %v9643_v20, %v3631_v54  ;;  %v9806_v54 = vld [vmem:[%s12519_s6 + $0x10] sm:$0xff] }
 0x35c   : > { %v3435_v49 = vadd.f32 %v3422_v11, %v3421_v17  ;;  %v3148_v15 = vadd.f32 %v9284_v28, %v3134_v30  ;;  %v6899_v51 = vmul.f32 -1.442695, %v3147_v44  ;;  %v3372_v22 = vand.u32 2147483648, %v9721_v63  ;;  %v3638_v63 = vld [vmem:[#allocation3 + $0x8] sm:$0xff] }
 0x35d   : > { %v3363_v5 = vsub.f32 1.0, %v3362_v42  ;;  %v3377_v3 = vmul.f32 %v7240_v39, %v9729_v24  ;;  %7243 = vpow2.f32 %v6912_v41  ;;  %v3385_v29 = vand.u32 2147483647, %v9729_v24 }
 0x35e   : > { %3436 = vadd.xlane.f32.xlu0 %v3435_v49  ;;  %v6900_v48 = vmul.f32 -1.442695, %v3148_v15  ;;  %v12541_v6 = vrot.slane %v9757_v12, 6  ;;  %v12540_v27 = vrot.slane %v9774_v9, 6  ;;  %vm3367_vm13 = vweird.f32 %v7238_v56 }
 0x35f   : > { %v3364_v57 = vmul.f32 %v7238_v56, %v3363_v5  ;;  %v3378_v28 = vsub.f32 1.0, %v3377_v3  ;;  %7245 = vpow2.f32 %v6899_v51  ;;  %v3387_v14 = vand.u32 2147483648, %v9729_v24  ;;  %vm3368_vm3 = vmor %vm3366_vm11, %vm3367_vm13  ;;  %v3641_v3 = vld [vmem:[#allocation3 + $0x60] sm:$0xff] }
 0x360   : > { %7247 = vpow2.f32 %v6900_v48  ;;  %v12670_v26 = vrot.slane %v9653_v59, 6  ;;  %v3681_v50 = vsel %vm2274_vm12, %v12540_v27, %v3680_v38  ;;  %vm3382_vm14 = vweird.f32 %v7240_v39 }
 0x361   : > { %v7242_v25 = vpop.eup %7241  ;;  %v3365_v60 = vadd.f32 %v7238_v56, %v3364_v57  ;;  %v3379_v21 = vmul.f32 %v7240_v39, %v3378_v28  ;;  %v3373_v59 = vor.u32 1.1754944e-38, %v3372_v22  ;;  %vm3381_vm15 = vweird.f32 %v9729_v24  ;;  %v3639_v22 = vld [vmem:[#allocation3 + $0x2a0] sm:$0xff] }
 0x362   : > { %v3679_v4 = vsel %vm2274_vm12, %v12541_v6, %v12670_v26  ;;  %v9796_v17 = vadd.f32 1.0, %v7242_v25  ;;  %v3715_v43 = vmul.f32 %v3681_v50, %v8418_v55  ;;  %vm3371_vm2 = vcmp.eq.f32.partialorder %v3370_v62, 8.507059e+37  ;;  %vm3383_vm4 = vmor %vm3381_vm15, %vm3382_vm14  ;;  %v3640_v62 = vld [vmem:[#allocation3 + $0x70] sm:$0xff] }
 0x363   : > { %v3714_v32 = vmul.f32 %v3679_v4, %v8418_v55  ;;  %v7244_v0 = vpop.eup %7243  ;;  %v3369_v46 = vsel %vm3368_vm3, %v7238_v56, %v3365_v60  ;;  %v3380_v38 = vadd.f32 %v7240_v39, %v3379_v21  ;;  %vm3386_vm0 = vcmp.eq.f32.partialorder %v3385_v29, 8.507059e+37 }
 0x364   : > { %v3374_v11 = vsel %vm3371_vm2, %v3373_v59, %v3369_v46  ;;  %v3388_v30 = vor.u32 1.1754944e-38, %v3387_v14  ;;  %v9799_v44 = vadd.f32 1.0, %v7244_v0  ;;  %7249 = vrcp.f32 %v9796_v17 }
 0x365   : > { %v7246_v42 = vpop.eup %7245  ;;  %v3384_v41 = vsel %vm3383_vm4, %v7240_v39, %v3380_v38  ;;  %v3431_v24 = vmul.f32 %v3374_v11, %v8496_v1  ;;  %v3728_v56 = vadd.f32 %v9806_v54, %v3714_v32  ;;  %v9810_v49 = vadd.f32 %v9575_v31, %v3638_v63  ;;  %v9816_v39 = vld [vmem:[%s12519_s6 + $0x18] sm:$0xff] }
 0x366   : > { %v7248_v15 = vpop.eup %7247  ;;  %v3389_v51 = vsel %vm3386_vm0, %v3388_v30, %v3384_v41  ;;  %7251 = vrcp.f32 %v9799_v44  ;;  %v3729_v5 = vadd.f32 %v9816_v39, %v3715_v43  ;;  %v9820_v29 = vadd.f32 %v9575_v31, %v3640_v62 }
 0x367   : > { %v9823_v48 = vperm.slane %v8395_v37, 5  ;;  %v3432_v57 = vmul.f32 %v3389_v51, %v8498_v2  ;;  %v9827_v28 = vadd.f32 %v9643_v20, %v3639_v22  ;;  %v9830_v14 = vadd.f32 %v9643_v20, %v3641_v3 }
 0x368   : > { %12671 = vst [vmem:[#allocation10_spill] sm:$0xff] %v9820_v29  ;;  %v3865_v26 = vand.u32 2147483647, %v9796_v17  ;;  %v3867_v4 = vand.u32 2147483648, %v9796_v17  ;;  %v9834_v50 = vadd.f32 1.0, %v7246_v42  ;;  %v9836_v25 = vadd.f32 1.0, %v7248_v15 }
 0x369   : > { %v3450_v60 = vadd.f32 %v3432_v57, %v3431_v24  ;;  %v3880_v21 = vand.u32 2147483647, %v9799_v44  ;;  %v6909_v32 = vmul.f32 -1.442695, %v3728_v56  ;;  %v12542_v59 = vrot.slane %v9810_v49, 6 }
 0x36a   : > { %v7250_v43 = vpop.eup %7249  ;;  %v3882_v0 = vand.u32 2147483648, %v9799_v44  ;;  %7253 = vrcp.f32 %v9834_v50  ;;  %v6910_v46 = vmul.f32 -1.442695, %v3729_v5  ;;  %v12538_v38 = vrot.slane %v9820_v29, 6 }
 0x36b   : > { %3451 = vadd.xlane.f32.xlu2 %v3450_v60  ;;  %v3857_v11 = vmul.f32 %v7250_v43, %v9796_v17  ;;  %vm3861_vm5 = vweird.f32 %v9796_v17  ;;  %7255 = vrcp.f32 %v9836_v25  ;;  %vm9847_vm7 = vcmp.eq.f32.partialorder %v3865_v26, 8.507059e+37 }
 0x36c   : > { %v7252_v63 = vpop.eup %7251  ;;  %v3868_v41 = vor.u32 1.1754944e-38, %v3867_v4  ;;  %vm3876_vm8 = vweird.f32 %v9799_v44  ;;  %v3312_v24 = vand.u32 2147483648, %v9834_v50  ;;  %v3310_v15 = vand.u32 2147483647, %v9834_v50 }
 0x36d   : > { %v3858_v56 = vsub.f32 1.0, %v3857_v11  ;;  %v3872_v62 = vmul.f32 %v7252_v63, %v9799_v44  ;;  %7257 = vpow2.f32 %v6909_v32  ;;  %vm9855_vm1 = vcmp.eq.f32.partialorder %v3880_v21, 8.507059e+37 }
 0x36e   : > { %v3883_v5 = vor.u32 1.1754944e-38, %v3882_v0  ;;  %7259 = vpow2.f32 %v6910_v46  ;;  %v3695_v22 = vsel %vm2274_vm12, %v12542_v59, %v12538_v38  ;;  %vm3862_vm9 = vweird.f32 %v7250_v43 }
 0x36f   : > { %v3859_v3 = vmul.f32 %v7250_v43, %v3858_v56  ;;  %v3873_v57 = vsub.f32 1.0, %v3872_v62  ;;  %v3722_v26 = vmul.f32 %v3695_v22, %v8649_v19  ;;  %vm3306_vm10 = vweird.f32 %v9834_v50  ;;  %vm3863_vm3 = vmor %vm3861_vm5, %vm3862_vm9 }
 0x370   : > { %v7254_v4 = vpop.eup %7253  ;;  %v3313_v60 = vor.u32 1.1754944e-38, %v3312_v24  ;;  %vm3321_vm11 = vweird.f32 %v9836_v25  ;;  %v12544_v21 = vrot.slane %v9830_v14, 6  ;;  %vm3877_vm13 = vweird.f32 %v7252_v63 }
 0x371   : > { %v7256_v32 = vpop.eup %7255  ;;  %v3860_v0 = vadd.f32 %v7250_v43, %v3859_v3  ;;  %v3874_v46 = vmul.f32 %v7252_v63, %v3873_v57  ;;  %v3302_v11 = vmul.f32 %v7254_v4, %v9834_v50  ;;  %vm9869_vm14 = vcmp.eq.f32.partialorder %v3310_v15, 8.507059e+37  ;;  %v9881_v15 = vld [vmem:[%s12519_s6 + $0x50] sm:$0xff]  ;;  %vm3878_vm2 = vmor %vm3876_vm8, %vm3877_vm13  ;;  %v3637_v50 = vld [vmem:[#allocation3 + $0x118] sm:$0xff] }
 0x372   : > { %vm3307_vm15 = vweird.f32 %v7254_v4  ;;  %v3317_v24 = vmul.f32 %v7256_v32, %v9836_v25  ;;  %v3325_v62 = vand.u32 2147483647, %v9836_v25  ;;  %v3327_v22 = vand.u32 2147483648, %v9836_v25  ;;  %v9928_v25 = vld [vmem:[%s12519_s6 + $0x58] sm:$0xff] }
 0x373   : > { %v7258_v38 = vpop.eup %7257  ;;  %v3864_v3 = vsel %vm3863_vm3, %v7250_v43, %v3860_v0  ;;  %v3875_v57 = vadd.f32 %v7252_v63, %v3874_v46  ;;  %v3303_v53 = vsub.f32 1.0, %v3302_v11  ;;  %v3736_v27 = vadd.f32 %v9881_v15, %v3722_v26  ;;  %vm3308_vm4 = vmor %vm3306_vm10, %vm3307_vm15 }
 0x374   : > { %v7260_v17 = vpop.eup %7259  ;;  %v3869_v6 = vsel %vm9847_vm7, %v3868_v41, %v3864_v3  ;;  %v3318_v59 = vsub.f32 1.0, %v3317_v24  ;;  %v9889_v30 = vadd.f32 1.0, %v7258_v38  ;;  %v12678_v43 = vrot.slane %v9827_v28, 6 }
 0x375   : > { %v3879_v46 = vsel %vm3878_vm2, %v7252_v63, %v3875_v57  ;;  %v4010_v26 = vmul.f32 %v3869_v6, %v8496_v1  ;;  %v3304_v11 = vmul.f32 %v7254_v4, %v3303_v53  ;;  %v9897_v29 = vadd.f32 1.0, %v7260_v17 }
 0x376   : > { %v3697_v0 = vsel %vm2274_vm12, %v12678_v43, %v12544_v21  ;;  %v3884_v42 = vsel %vm9855_vm1, %v3883_v5, %v3879_v46  ;;  %v3319_v44 = vmul.f32 %v7256_v32, %v3318_v59  ;;  %vm3322_vm0 = vweird.f32 %v7256_v32  ;;  %v3636_v5 = vld [vmem:[#allocation3 + $0x298] sm:$0xff] }
 0x377   : > { %7261 = vrcp.f32 %v9889_v30  ;;  %v4011_v38 = vmul.f32 %v3884_v42, %v8498_v2  ;;  %v3305_v41 = vadd.f32 %v7254_v4, %v3304_v11  ;;  %v3723_v24 = vmul.f32 %v3697_v0, %v8649_v19  ;;  %vm3323_vm5 = vmor %vm3321_vm11, %vm3322_vm0 }
 0x378   : > { %v6917_v3 = vmul.f32 -1.442695, %v3736_v27  ;;  %v3320_v53 = vadd.f32 %v7256_v32, %v3319_v44  ;;  %7263 = vrcp.f32 %v9897_v29  ;;  %v12679_v6 = vrot.slane %v9581_v16, 4 }
 0x379   : > { %v12680_v63 = vrot.slane %v9612_v33, 4  ;;  %v4026_v57 = vadd.f32 %v4011_v38, %v4010_v26  ;;  %v3309_v17 = vsel %vm3308_vm4, %v7254_v4, %v3305_v41  ;;  %v3328_v27 = vor.u32 1.1754944e-38, %v3327_v22 }
 0x37a   : > { %v3139_v59 = vmul.f32 %v12679_v6, %v8737_v47  ;;  %v9917_v43 = vadd.f32 %v9575_v31, %v3636_v5  ;;  %v3314_v0 = vsel %vm9869_vm14, %v3313_v60, %v3309_v17  ;;  %v3324_v16 = vsel %vm3323_vm5, %v7256_v32, %v3320_v53 }
 0x37b   : > { %v3140_v51 = vmul.f32 %v12680_v63, %v8737_v47  ;;  %vm3326_vm7 = vcmp.eq.f32.partialorder %v3325_v62, 8.507059e+37  ;;  %v9922_v46 = vadd.f32 %v9643_v20, %v3637_v50  ;;  %4027 = vadd.xlane.f32.xlu1 %v4026_v57  ;;  %v3427_v4 = vmul.f32 %v3314_v0, %v8496_v1 }
 0x37c   : > { %v3329_v33 = vsel %vm3326_vm7, %v3328_v27, %v3324_v16  ;;  %v3737_v22 = vadd.f32 %v9928_v25, %v3723_v24  ;;  %7265 = vpow2.f32 %v6917_v3  ;;  %vm3831_vm8 = vweird.f32 %v9889_v30 }
 0x37d   : > { %v7262_v26 = vpop.eup %7261  ;;  %v3428_v60 = vmul.f32 %v3329_v33, %v8498_v2  ;;  %v3153_v32 = vadd.f32 %v9424_v18, %v3139_v59  ;;  %v3154_v56 = vadd.f32 %v9431_v52, %v3140_v51  ;;  %v3835_v11 = vand.u32 2147483647, %v9889_v30 }
 0x37e   : > { %v3827_v62 = vmul.f32 %v7262_v26, %v9889_v30  ;;  %v6918_v42 = vmul.f32 -1.442695, %v3737_v22  ;;  %v3686_v44 = vrot.slane %v9917_v43, 6  ;;  %v7264_v38 = vpop.eup %7263  ;;  %v12545_v53 = vrot.slane %v9922_v46, 6 }
 0x37f   : > { %v3444_v41 = vadd.f32 %v3428_v60, %v3427_v4  ;;  %v6905_v24 = vmul.f32 -1.442695, %v3153_v32  ;;  %v6906_v3 = vmul.f32 -1.442695, %v3154_v56  ;;  %v3837_v63 = vand.u32 2147483648, %v9889_v30 }
 0x380   : > { %v3828_v6 = vsub.f32 1.0, %v3827_v62  ;;  %v3842_v18 = vmul.f32 %v7264_v38, %v9897_v29  ;;  %7267 = vpow2.f32 %v6918_v42  ;;  %vm3832_vm1 = vweird.f32 %v7262_v26 }
 0x381   : > { %3445 = vadd.xlane.f32.xlu0 %v3444_v41  ;;  %v3850_v52 = vand.u32 2147483647, %v9897_v29  ;;  %7269 = vpow2.f32 %v6905_v24  ;;  %v12681_v59 = vrot.slane %v9810_v49, 6  ;;  %vm3846_vm9 = vweird.f32 %v9897_v29  ;;  %vm3833_vm11 = vmor %vm3831_vm8, %vm3832_vm1  ;;  %v4746_v24 = vld [vmem:[#allocation3 + $0xa0] sm:$0xff] }
 0x382   : > { %v7266_v5 = vpop.eup %7265  ;;  %v3829_v57 = vmul.f32 %v7262_v26, %v3828_v6  ;;  %v3843_v17 = vsub.f32 1.0, %v3842_v18  ;;  %7271 = vpow2.f32 %v6906_v3  ;;  %v3852_v50 = vand.u32 2147483648, %v9897_v29 }
 0x383   : > { %v3691_v51 = vsel %vm2274_vm12, %v3686_v44, %v12681_v59  ;;  %v9950_v0 = vadd.f32 1.0, %v7266_v5  ;;  %v12682_v16 = vrot.slane %v9827_v28, 6  ;;  %vm3847_vm10 = vweird.f32 %v7264_v38 }
 0x384   : > { %v3720_v27 = vmul.f32 %v3691_v51, %v8472_v40  ;;  %v3830_v33 = vadd.f32 %v7262_v26, %v3829_v57  ;;  %v3844_v4 = vmul.f32 %v7264_v38, %v3843_v17  ;;  %vm3836_vm13 = vcmp.eq.f32.partialorder %v3835_v11, 8.507059e+37  ;;  %vm3848_vm3 = vmor %vm3846_vm9, %vm3847_vm10  ;;  %v4747_v17 = vld [vmem:[#allocation3 + $0x128] sm:$0xff] }
 0x385   : > { %v3693_v49 = vsel %vm2274_vm12, %v12545_v53, %v12682_v16  ;;  %v3838_v60 = vor.u32 1.1754944e-38, %v3837_v63  ;;  %vm9961_vm14 = vcmp.eq.f32.partialorder %v3850_v52, 8.507059e+37  ;;  %7273 = vrcp.f32 %v9950_v0 }
 0x386   : > { %v3734_v22 = vadd.f32 %v9564_v8, %v3720_v27  ;;  %v7268_v28 = vpop.eup %7267  ;;  %v3834_v56 = vsel %vm3833_vm11, %v7262_v26, %v3830_v33  ;;  %v3845_v62 = vadd.f32 %v7264_v38, %v3844_v4  ;;  %v3721_v42 = vmul.f32 %v3693_v49, %v8472_v40  ;;  %v4748_v27 = vld [vmem:[#allocation3 + $0x218] sm:$0xff] }
 0x387   : > { %v7270_v8 = vpop.eup %7269  ;;  %v3839_v3 = vsel %vm3836_vm13, %v3838_v60, %v3834_v56  ;;  %v3853_v30 = vor.u32 1.1754944e-38, %v3852_v50  ;;  %v9970_v11 = vadd.f32 1.0, %v7268_v28  ;;  %v9973_v6 = vadd.f32 %v9649_v10, %v4746_v24  ;;  %v4749_v50 = vld [vmem:[#allocation3 + $0xc8] sm:$0xff] }
 0x388   : > { %v6915_v41 = vmul.f32 -1.442695, %v3734_v22  ;;  %v7272_v63 = vpop.eup %7271  ;;  %v3849_v18 = vsel %vm3848_vm3, %v7264_v38, %v3845_v62  ;;  %v4008_v26 = vmul.f32 %v3839_v3, %v8496_v1  ;;  %v9976_v52 = vadd.f32 1.0, %v7270_v8 }
 0x389   : > { %v3854_v59 = vsel %vm9961_vm14, %v3853_v30, %v3849_v18  ;;  %v3955_v51 = vand.u32 2147483647, %v9950_v0  ;;  %v3957_v29 = vand.u32 2147483648, %v9950_v0  ;;  %v9984_v57 = vadd.f32 1.0, %v7272_v63 }
 0x38a   : > { %7275 = vpow2.f32 %v6915_v41  ;;  %v4009_v5 = vmul.f32 %v3854_v59, %v8498_v2  ;;  %v3735_v38 = vadd.f32 %v9588_v23, %v3721_v42  ;;  %v3972_v49 = vand.u32 2147483648, %v9970_v11 }
 0x38b   : > { %7277 = vrcp.f32 %v9970_v11  ;;  %v7274_v16 = vpop.eup %7273  ;;  %v9990_v33 = vadd.f32 %v9823_v48, %v4747_v17  ;;  %v9993_v4 = vadd.f32 %v9649_v10, %v4748_v27  ;;  %v9996_v22 = vadd.f32 %v9823_v48, %v4749_v50 }
 0x38c   : > { %7279 = vrcp.f32 %v9976_v52  ;;  %v4023_v60 = vadd.f32 %v4009_v5, %v4008_v26  ;;  %v3947_v32 = vmul.f32 %v7274_v16, %v9950_v0  ;;  %vm3951_vm15 = vweird.f32 %v9950_v0 }
 0x38d   : > { %v3970_v23 = vand.u32 2147483647, %v9970_v11  ;;  %vm10001_vm2 = vcmp.eq.f32.partialorder %v3955_v51, 8.507059e+37  ;;  %v3958_v56 = vor.u32 1.1754944e-38, %v3957_v29  ;;  %v3400_v62 = vand.u32 2147483647, %v9976_v52 }
 0x38e   : > { %7281 = vrcp.f32 %v9984_v57  ;;  %4024 = vadd.xlane.f32.xlu2 %v4023_v60  ;;  %v3948_v41 = vsub.f32 1.0, %v3947_v32  ;;  %vm3966_vm0 = vweird.f32 %v9970_v11  ;;  %v3402_v24 = vand.u32 2147483648, %v9976_v52  ;;  %v3628_v51 = vld [vmem:[#allocation3 + $0x98] sm:$0xc0] }
 0x38f   : > { %v6916_v8 = vmul.f32 -1.442695, %v3735_v38  ;;  %vm3952_vm4 = vweird.f32 %v7274_v16  ;;  %v3973_v30 = vor.u32 1.1754944e-38, %v3972_v49  ;;  %vm3396_vm5 = vweird.f32 %v9976_v52 }
 0x390   : > { %v7276_v42 = vpop.eup %7275  ;;  %v3949_v26 = vmul.f32 %v7274_v16, %v3948_v41  ;;  %vm10013_vm7 = vcmp.eq.f32.partialorder %v3970_v23, 8.507059e+37  ;;  %v3415_v29 = vand.u32 2147483647, %v9984_v57  ;;  %v3417_v5 = vand.u32 2147483648, %v9984_v57  ;;  %vm3953_vm1 = vmor %vm3951_vm15, %vm3952_vm4 }
 0x391   : > { %v7278_v3 = vpop.eup %7277  ;;  %v10010_v63 = vadd.f32 1.0, %v7276_v42  ;;  %vm10020_vm8 = vcmp.eq.f32.partialorder %v3400_v62, 8.507059e+37  ;;  %7283 = vpow2.f32 %v6916_v8  ;;  %v12546_v27 = vrot.slane %v9973_v6, 2 }
 0x392   : > { %v7280_v18 = vpop.eup %7279  ;;  %v3962_v59 = vmul.f32 %v7278_v3, %v9970_v11  ;;  %v4794_v50 = vrot.slane %v9993_v4, 2  ;;  %v3950_v49 = vadd.f32 %v7274_v16, %v3949_v26  ;;  %v3403_v32 = vor.u32 1.1754944e-38, %v3402_v24 }
 0x393   : > { %v3392_v38 = vmul.f32 %v7280_v18, %v9976_v52  ;;  %7285 = vrcp.f32 %v10010_v63  ;;  %vm3967_vm9 = vweird.f32 %v7278_v3  ;;  %vm3411_vm10 = vweird.f32 %v9984_v57 }
 0x394   : > { %v3963_v60 = vsub.f32 1.0, %v3962_v59  ;;  %v7282_v23 = vpop.eup %7281  ;;  %v12557_v42 = vrot.slane %v9990_v33, 2  ;;  %v3954_v41 = vsel %vm3953_vm1, %v7274_v16, %v3950_v49  ;;  %vm3397_vm11 = vweird.f32 %v7280_v18  ;;  %vm3968_vm3 = vmor %vm3966_vm0, %vm3967_vm9 }
 0x395   : > { %v3393_v62 = vsub.f32 1.0, %v3392_v38  ;;  %v3407_v26 = vmul.f32 %v7282_v23, %v9984_v57  ;;  %vm10033_vm13 = vcmp.eq.f32.partialorder %v3415_v29, 8.507059e+37  ;;  %v3959_v59 = vsel %vm10001_vm2, %v3958_v56, %v3954_v41  ;;  %vm3398_vm2 = vmor %vm3396_vm5, %vm3397_vm11 }
 0x396   : > { %v3964_v8 = vmul.f32 %v7278_v3, %v3963_v60  ;;  %v3418_v21 = vor.u32 1.1754944e-38, %v3417_v5  ;;  %vm12693_vm14 = vcmask 1045504   ;;  %v3925_v60 = vand.u32 2147483647, %v10010_v63 }
 0x397   : > { %v3394_v0 = vmul.f32 %v7280_v18, %v3393_v62  ;;  %v4795_v38 = vsel %vm12693_vm14, %v12546_v27, %v4794_v50  ;;  %v3408_v49 = vsub.f32 1.0, %v3407_v26  ;;  %v4796_v29 = vrot.slane %v9996_v22, 2  ;;  %v7284_v53 = vpop.eup %7283  ;;  %vm12694_vm0 = vmmov %vm12693_vm14 }
 0x398   : > { %v3965_v16 = vadd.f32 %v7278_v3, %v3964_v8  ;;  %v4016_v28 = vmul.f32 %v3959_v59, %v8496_v1  ;;  %vm3412_vm15 = vweird.f32 %v7282_v23  ;;  %v3927_v5 = vand.u32 2147483648, %v10010_v63  ;;  %vm12704_vm14 = vmmov %vm12694_vm0 }
 0x399   : > { %v3395_v56 = vadd.f32 %v7280_v18, %v3394_v0  ;;  %v10051_v62 = vpop.eup %7285  ;;  %v3409_v8 = vmul.f32 %v7282_v23, %v3408_v49  ;;  %v10056_v26 = vadd.f32 1.0, %v7284_v53  ;;  %vm3921_vm4 = vweird.f32 %v10010_v63  ;;  %vm3413_vm5 = vmor %vm3411_vm10, %vm3412_vm15 }
 0x39a   : > { %v3969_v41 = vsel %vm3968_vm3, %v7278_v3, %v3965_v16  ;;  %v4830_v11 = vmul.f32 %v4795_v38, %v8418_v55  ;;  %v3917_v27 = vmul.f32 %v10051_v62, %v10010_v63  ;;  %v4797_v52 = vsel %vm12694_vm0, %v12557_v42, %v4796_v29  ;;  %vm12705_vm15 = vmmov %vm12694_vm0 }
 0x39b   : > { %v3974_v59 = vsel %vm10013_vm7, %v3973_v30, %v3969_v41  ;;  %v3399_v0 = vsel %vm3398_vm2, %v7280_v18, %v3395_v56  ;;  %v3410_v16 = vadd.f32 %v7282_v23, %v3409_v8  ;;  %7287 = vrcp.f32 %v10056_v26  ;;  %v3629_v30 = vld [vmem:[#allocation3 + $0x1a0] sm:$0xc0] }
 0x39c   : > { %v4017_v53 = vmul.f32 %v3974_v59, %v8498_v2  ;;  %v3404_v3 = vsel %vm10020_vm8, %v3403_v32, %v3399_v0  ;;  %v3918_v38 = vsub.f32 1.0, %v3917_v27  ;;  %v3644_v49 = vadd.f32 %v9575_v31, %v3628_v51 }
 0x39d   : > { %v3433_v18 = vmul.f32 %v3404_v3, %v8496_v1  ;;  %v3645_v56 = vadd.f32 %v9643_v20, %v3629_v30  ;;  %v3414_v59 = vsel %vm3413_vm5, %v7282_v23, %v3410_v16  ;;  %vm10079_vm7 = vcmp.eq.f32.partialorder %v3925_v60, 8.507059e+37 }
 0x39e   : > { %v4035_v41 = vadd.f32 %v4017_v53, %v4016_v28  ;;  %v3928_v32 = vor.u32 1.1754944e-38, %v3927_v5  ;;  %v4831_v8 = vmul.f32 %v4797_v52, %v8418_v55  ;;  %v3419_v57 = vsel %vm10033_vm13, %v3418_v21, %v3414_v59  ;;  %v4750_v28 = vld [vmem:[#allocation3 + $0x248] sm:$0xff]  ;;  %v4751_v52 = vld [vmem:[#allocation3 + $0x160] sm:$0xff]  ;;  %vm12703_vm13 = vmmov %vm12694_vm0 }
 0x39f   : > { %v3919_v0 = vmul.f32 %v10051_v62, %v3918_v38  ;;  %vm3922_vm8 = vweird.f32 %v10051_v62  ;;  %v3940_v31 = vand.u32 2147483647, %v10056_v26  ;;  %v3434_v20 = vmul.f32 %v3419_v57, %v8498_v2 }
 0x3a0   : > { %4036 = vadd.xlane.f32.xlu1 %v4035_v41  ;;  %v3453_v27 = vsel %vm2274_vm12, %v3433_v18, 0.0  ;;  %v4844_v23 = vadd.f32 %v9806_v54, %v4830_v11  ;;  %v4845_v60 = vadd.f32 %v9816_v39, %v4831_v8  ;;  %vm3936_vm1 = vweird.f32 %v10056_v26  ;;  %vm10106_vm9 = vmor %vm3921_vm4, %vm3922_vm8 }
 0x3a1   : > { %v3920_v5 = vadd.f32 %v10051_v62, %v3919_v0  ;;  %v3672_v21 = vrot.slane %v3644_v49, 6  ;;  %v3675_v24 = vrot.slane %v3645_v56, 6  ;;  %v10096_v53 = vadd.f32 %v9649_v10, %v4750_v28  ;;  %v7288_v3 = vpop.eup %7287  ;;  %v10137_v28 = vld [vmem:[%s12519_s6] sm:$0xff] }
 0x3a2   : > { %v3454_v16 = vsel %vm2274_vm12, %v3434_v20, 0.0  ;;  %v6937_v51 = vmul.f32 -1.442695, %v4844_v23  ;;  %v6938_v30 = vmul.f32 -1.442695, %v4845_v60  ;;  %v10100_v54 = vadd.f32 %v9823_v48, %v4751_v52  ;;  %v10146_v52 = vld [vmem:[%s12519_s6 + $0x8] sm:$0xff] }
 0x3a3   : > { %v3455_v39 = vadd.f32 %v3454_v16, %v3453_v27  ;;  %v3932_v18 = vmul.f32 %v7288_v3, %v10056_v26  ;;  %vm10111_vm10 = vcmp.eq.f32.partialorder %v3940_v31, 8.507059e+37  ;;  %v3942_v49 = vand.u32 2147483648, %v10056_v26  ;;  %v4752_v31 = vld [vmem:[#allocation3 + $0x258] sm:$0xff] }
 0x3a4   : > { %v3924_v56 = vsel %vm10106_vm9, %v10051_v62, %v3920_v5  ;;  %7289 = vpow2.f32 %v6937_v51  ;;  %v12701_v41 = vrot.slane %v9757_v12, 6  ;;  %v12702_v59 = vrot.slane %v9774_v9, 6  ;;  %v4754_v12 = vld [vmem:[#allocation3 + $0x290] sm:$0xff] }
 0x3a5   : > { %3456 = vadd.xlane.f32.xlu0 %v3455_v39  ;;  %v3933_v57 = vsub.f32 1.0, %v3932_v18  ;;  %vm3937_vm11 = vweird.f32 %v7288_v3  ;;  %7291 = vpow2.f32 %v6938_v30  ;;  %v12552_v62 = vrot.slane %v10096_v53, 2 }
 0x3a6   : > { %v3674_v63 = vsel %vm2274_vm12, %v3672_v21, %v12701_v41  ;;  %v3677_v8 = vsel %vm2274_vm12, %v3675_v24, %v12702_v59  ;;  %v12547_v27 = vrot.slane %v10100_v54, 2  ;;  %v10130_v23 = vadd.f32 %v9649_v10, %v4752_v31  ;;  %vm3938_vm3 = vmor %vm3936_vm1, %vm3937_vm11  ;;  %v4755_v31 = vld [vmem:[#allocation3] sm:$0xff] }
 0x3a7   : > { %v3712_v0 = vmul.f32 %v3674_v63, %v8389_v34  ;;  %v3713_v20 = vmul.f32 %v3677_v8, %v8389_v34  ;;  %v3929_v9 = vsel %vm10079_vm7, %v3928_v32, %v3924_v56  ;;  %v3934_v60 = vmul.f32 %v7288_v3, %v3933_v57  ;;  %vm12711_vm7 = vmmov %vm12703_vm13 }
 0x3a8   : > { %v10141_v21 = vadd.f32 %v9649_v10, %v4754_v12  ;;  %v3943_v24 = vor.u32 1.1754944e-38, %v3942_v49  ;;  %v4799_v32 = vsel %vm12703_vm13, %v4794_v50, %v12552_v62  ;;  %v4801_v16 = vsel %vm12704_vm14, %v4796_v29, %v12547_v27 }
 0x3a9   : > { %v3726_v5 = vadd.f32 %v10137_v28, %v3712_v0  ;;  %v3727_v17 = vadd.f32 %v10146_v52, %v3713_v20  ;;  %v3935_v51 = vadd.f32 %v7288_v3, %v3934_v60  ;;  %v4832_v39 = vmul.f32 %v4799_v32, %v8391_v35  ;;  %v4753_v0 = vld [vmem:[#allocation3 + $0x2e0] sm:$0xff] }
 0x3aa   : > { %v4833_v11 = vmul.f32 %v4801_v16, %v8391_v35  ;;  %v7290_v18 = vpop.eup %7289  ;;  %v4014_v4 = vmul.f32 %v3929_v9, %v8496_v1  ;;  %v12553_v49 = vrot.slane %v10130_v23, 2  ;;  %v4806_v22 = vrot.slane %v10141_v21, 2 }
 0x3ab   : > { %v6907_v30 = vmul.f32 -1.442695, %v3726_v5  ;;  %v6908_v50 = vmul.f32 -1.442695, %v3727_v17  ;;  %v7292_v56 = vpop.eup %7291  ;;  %v3939_v29 = vsel %vm3938_vm3, %v7288_v3, %v3935_v51  ;;  %v10167_v41 = vadd.f32 1.0, %v7290_v18 }
 0x3ac   : > { %v4846_v63 = vadd.f32 %v9739_v7, %v4832_v39  ;;  %v3944_v59 = vsel %vm10111_vm10, %v3943_v24, %v3939_v29  ;;  %v10172_v8 = vadd.f32 1.0, %v7292_v56  ;;  %v4847_v26 = vadd.f32 %v9763_v45, %v4833_v11 }
 0x3ad   : > { %7293 = vpow2.f32 %v6907_v30  ;;  %v4015_v57 = vmul.f32 %v3944_v59, %v8498_v2  ;;  %v10179_v3 = vadd.f32 %v9823_v48, %v4753_v0  ;;  %v10182_v7 = vadd.f32 %v9823_v48, %v4755_v31  ;;  %v7634_v59 = vld [vmem:[%s12519_s6 + $0x48] sm:$0xff] }
 0x3ae   : > { %7295 = vpow2.f32 %v6908_v50  ;;  %v6939_v20 = vmul.f32 -1.442695, %v4846_v63  ;;  %v4951_v12 = vand.u32 2147483647, %v10167_v41  ;;  %v4953_v45 = vand.u32 2147483648, %v10167_v41 }
 0x3af   : > { %7297 = vrcp.f32 %v10167_v41  ;;  %v4032_v38 = vadd.f32 %v4015_v57, %v4014_v4  ;;  %v6940_v9 = vmul.f32 -1.442695, %v4847_v26  ;;  %v4807_v60 = vsel %vm12705_vm15, %v12553_v49, %v4806_v22 }
 0x3b0   : > { %7299 = vrcp.f32 %v10172_v8  ;;  %v4966_v24 = vand.u32 2147483647, %v10172_v8  ;;  %v4968_v17 = vand.u32 2147483648, %v10172_v8  ;;  %v12548_v51 = vrot.slane %v10179_v3, 2 }
 0x3b1   : > { %4033 = vadd.xlane.f32.xlu2 %v4032_v38  ;;  %7301 = vpow2.f32 %v6939_v20  ;;  %v4808_v30 = vrot.slane %v10182_v7, 2  ;;  %vm4947_vm2 = vweird.f32 %v10167_v41  ;;  %vm4962_vm4 = vweird.f32 %v10172_v8 }
 0x3b2   : > { %7303 = vpow2.f32 %v6940_v9  ;;  %v4836_v18 = vmul.f32 %v4807_v60, %v8472_v40  ;;  %vm10203_vm0 = vcmp.eq.f32.partialorder %v4951_v12, 8.507059e+37  ;;  %v4954_v29 = vor.u32 1.1754944e-38, %v4953_v45  ;;  %v7633_v60 = vld [vmem:[%s12519_s6 + $0x40] sm:$0xff] }
 0x3b3   : > { %v7294_v5 = vpop.eup %7293  ;;  %vm10209_vm5 = vcmp.eq.f32.partialorder %v4966_v24, 8.507059e+37  ;;  %v4969_v26 = vor.u32 1.1754944e-38, %v4968_v17  ;;  %v12710_v57 = vrot.slane %v9668_v61, 6  ;;  %v4809_v38 = vsel %vm12711_vm7, %v12548_v51, %v4808_v30 }
 0x3b4   : > { %v7296_v32 = vpop.eup %7295  ;;  %v10193_v16 = vadd.f32 1.0, %v7294_v5  ;;  %v12712_v20 = vrot.slane %v9922_v46, 6  ;;  %v12713_v12 = vrot.slane %v9673_v58, 6  ;;  %v4850_v5 = vadd.f32 %v7633_v60, %v4836_v18 }
 0x3b5   : > { %v7298_v39 = vpop.eup %7297  ;;  %v10199_v11 = vadd.f32 1.0, %v7296_v32  ;;  %v3687_v0 = vsel %vm2274_vm12, %v12710_v57, %v3686_v44  ;;  %v10349_v21 = vperm.slane %v8395_v37, 6  ;;  %v12734_v62 = vrot.slane %v9830_v14, 6 }
 0x3b6   : > { %v7300_v4 = vpop.eup %7299  ;;  %v4943_v50 = vmul.f32 %v7298_v39, %v10167_v41  ;;  %7305 = vrcp.f32 %v10193_v16  ;;  %v10229_v45 = vsel %vm2274_vm12, %v12713_v12, %v12712_v20  ;;  %v3805_v44 = vand.u32 2147483647, %v10193_v16 }
 0x3b7   : > { %v4958_v63 = vmul.f32 %v7300_v4, %v10172_v8  ;;  %7307 = vrcp.f32 %v10199_v11  ;;  %v7302_v43 = vpop.eup %7301  ;;  %v3807_v9 = vand.u32 2147483648, %v10193_v16  ;;  %vm4948_vm8 = vweird.f32 %v7298_v39 }
 0x3b8   : > { %v4944_v31 = vsub.f32 1.0, %v4943_v50  ;;  %v7304_v24 = vpop.eup %7303  ;;  %v10236_v46 = vadd.f32 1.0, %v7302_v43  ;;  %v10239_v58 = vmul.f32 %v3687_v0, %v8457_v13  ;;  %vm4963_vm1 = vweird.f32 %v7300_v4  ;;  %vm4949_vm10 = vmor %vm4947_vm2, %vm4948_vm8 }
 0x3b9   : > { %v4959_v61 = vsub.f32 1.0, %v4958_v63  ;;  %v3820_v50 = vand.u32 2147483647, %v10199_v11  ;;  %v10242_v63 = vadd.f32 1.0, %v7304_v24  ;;  %vm3801_vm9 = vweird.f32 %v10193_v16  ;;  %vm4964_vm14 = vmor %vm4962_vm4, %vm4963_vm1 }
 0x3ba   : > { %v4945_v17 = vmul.f32 %v7298_v39, %v4944_v31  ;;  %v3822_v18 = vand.u32 2147483648, %v10199_v11  ;;  %7309 = vrcp.f32 %v10236_v46  ;;  %vm10250_vm11 = vcmp.eq.f32.partialorder %v3805_v44, 8.507059e+37 }
 0x3bb   : > { %v4960_v32 = vmul.f32 %v7300_v4, %v4959_v61  ;;  %v3808_v43 = vor.u32 1.1754944e-38, %v3807_v9  ;;  %vm3816_vm13 = vweird.f32 %v10199_v11  ;;  %v4837_v61 = vmul.f32 %v4809_v38, %v8472_v40 }
 0x3bc   : > { %v7306_v57 = vpop.eup %7305  ;;  %v4946_v20 = vadd.f32 %v7298_v39, %v4945_v17  ;;  %v4981_v41 = vand.u32 2147483647, %v10236_v46  ;;  %7311 = vrcp.f32 %v10242_v63  ;;  %v6943_v17 = vmul.f32 -1.442695, %v4850_v5 }
 0x3bd   : > { %v4961_v31 = vadd.f32 %v7300_v4, %v4960_v32  ;;  %v3797_v0 = vmul.f32 %v7306_v57, %v10193_v16  ;;  %v7308_v60 = vpop.eup %7307  ;;  %vm10264_vm3 = vcmp.eq.f32.partialorder %v3820_v50, 8.507059e+37  ;;  %vm3802_vm15 = vweird.f32 %v7306_v57  ;;  %v10299_v16 = vld [vmem:[%s12519_s6 + $0x30] sm:$0xff] }
 0x3be   : > { %v4950_v24 = vsel %vm4949_vm10, %v7298_v39, %v4946_v20  ;;  %v3812_v27 = vmul.f32 %v7308_v60, %v10199_v11  ;;  %v3823_v20 = vor.u32 1.1754944e-38, %v3822_v18  ;;  %vm4977_vm2 = vweird.f32 %v10236_v46  ;;  %vm3803_vm7 = vmor %vm3801_vm9, %vm3802_vm15 }
 0x3bf   : > { %v4955_v44 = vsel %vm10203_vm0, %v4954_v29, %v4950_v24  ;;  %v4965_v32 = vsel %vm4964_vm14, %v7300_v4, %v4961_v31  ;;  %v3798_v9 = vsub.f32 1.0, %v3797_v0  ;;  %v4983_v4 = vand.u32 2147483648, %v10236_v46 }
 0x3c0   : > { %v4970_v8 = vsel %vm10209_vm5, %v4969_v26, %v4965_v32  ;;  %v5124_v39 = vmul.f32 %v4955_v44, %v8496_v1  ;;  %v3813_v56 = vsub.f32 1.0, %v3812_v27  ;;  %v7310_v29 = vpop.eup %7309  ;;  %vm3817_vm4 = vweird.f32 %v7308_v60 }
 0x3c1   : > { %v5125_v5 = vmul.f32 %v4970_v8, %v8498_v2  ;;  %v3799_v51 = vmul.f32 %v7306_v57, %v3798_v9  ;;  %v4996_v50 = vand.u32 2147483647, %v10242_v63  ;;  %v4851_v26 = vadd.f32 %v7634_v59, %v4837_v61  ;;  %vm3818_vm1 = vmor %vm3816_vm13, %vm3817_vm4 }
 0x3c2   : > { %7313 = vpow2.f32 %v6943_v17  ;;  %v3814_v0 = vmul.f32 %v7308_v60, %v3813_v56  ;;  %v4973_v24 = vmul.f32 %v7310_v29, %v10236_v46  ;;  %vm10279_vm0 = vcmp.eq.f32.partialorder %v4981_v41, 8.507059e+37  ;;  %v7312_v44 = vpop.eup %7311 }
 0x3c3   : > { %v5139_v31 = vadd.f32 %v5125_v5, %v5124_v39  ;;  %v3800_v18 = vadd.f32 %v7306_v57, %v3799_v51  ;;  %vm4992_vm5 = vweird.f32 %v10242_v63  ;;  %vm4978_vm8 = vweird.f32 %v7310_v29 }
 0x3c4   : > { %v4998_v61 = vand.u32 2147483648, %v10242_v63  ;;  %v6944_v17 = vmul.f32 -1.442695, %v4851_v26  ;;  %v3719_v51 = vmul.f32 %v10229_v45, %v8457_v13  ;;  %v3815_v41 = vadd.f32 %v7308_v60, %v3814_v0  ;;  %v10309_v26 = vld [vmem:[%s12519_s6 + $0x38] sm:$0xff]  ;;  %vm4979_vm10 = vmor %vm4977_vm2, %vm4978_vm8 }
 0x3c5   : > { %5140 = vadd.xlane.f32.xlu1 %v5139_v31  ;;  %v3804_v32 = vsel %vm3803_vm7, %v7306_v57, %v3800_v18  ;;  %v4974_v9 = vsub.f32 1.0, %v4973_v24  ;;  %v4988_v8 = vmul.f32 %v7312_v44, %v10242_v63  ;;  %vm4993_vm9 = vweird.f32 %v7312_v44 }
 0x3c6   : > { %v3809_v39 = vsel %vm10250_vm11, %v3808_v43, %v3804_v32  ;;  %7315 = vpow2.f32 %v6944_v17  ;;  %v3732_v45 = vadd.f32 %v10299_v16, %v10239_v58  ;;  %v3819_v57 = vsel %vm3818_vm1, %v7308_v60, %v3815_v41  ;;  %v4756_v43 = vld [vmem:[#allocation3 + $0x120] sm:$0xf]  ;;  %vm4994_vm11 = vmor %vm4992_vm5, %vm4993_vm9 }
 0x3c7   : > { %v4006_v5 = vmul.f32 %v3809_v39, %v8496_v1  ;;  %v4975_v56 = vmul.f32 %v7310_v29, %v4974_v9  ;;  %v4989_v12 = vsub.f32 1.0, %v4988_v8  ;;  %v3824_v11 = vsel %vm10264_vm3, %v3823_v20, %v3819_v57  ;;  %v4757_v8 = vld [vmem:[#allocation3 + $0x68] sm:$0xf] }
 0x3c8   : > { %v7314_v59 = vpop.eup %7313  ;;  %v3733_v31 = vadd.f32 %v10309_v26, %v3719_v51  ;;  %v6913_v18 = vmul.f32 -1.442695, %v3732_v45  ;;  %v10313_v58 = vadd.f32 %v9649_v10, %v4756_v43  ;;  %v4007_v60 = vmul.f32 %v3824_v11, %v8498_v2 }
 0x3c9   : > { %v4976_v0 = vadd.f32 %v7310_v29, %v4975_v56  ;;  %v4990_v24 = vmul.f32 %v7312_v44, %v4989_v12  ;;  %v10316_v17 = vadd.f32 1.0, %v7314_v59  ;;  %v4984_v38 = vor.u32 1.1754944e-38, %v4983_v4 }
 0x3ca   : > { %12720 = vst [vmem:[#allocation11_spill] sm:$0xff] %v10313_v58  ;;  %7317 = vpow2.f32 %v6913_v18  ;;  %v6914_v20 = vmul.f32 -1.442695, %v3733_v31  ;;  %v12550_v32 = vrot.slane %v10313_v58, 2  ;;  %v4020_v51 = vadd.f32 %v4007_v60, %v4006_v5 }
 0x3cb   : > { %v4980_v41 = vsel %vm4979_vm10, %v7310_v29, %v4976_v0  ;;  %v4991_v9 = vadd.f32 %v7312_v44, %v4990_v24  ;;  %7319 = vrcp.f32 %v10316_v17  ;;  %vm4997_vm13 = vcmp.eq.f32.partialorder %v4996_v50, 8.507059e+37 }
 0x3cc   : > { %v7316_v39 = vpop.eup %7315  ;;  %v4985_v45 = vsel %vm10279_vm0, %v4984_v38, %v4980_v41  ;;  %v4999_v46 = vor.u32 1.1754944e-38, %v4998_v61  ;;  %v10329_v4 = vadd.f32 %v9823_v48, %v4757_v8  ;;  %4021 = vadd.xlane.f32.xlu0 %v4020_v51  ;;  %7321 = vpow2.f32 %v6914_v20 }
 0x3cd   : > { %v4995_v57 = vsel %vm4994_vm11, %v7312_v44, %v4991_v9  ;;  %v5126_v29 = vmul.f32 %v4985_v45, %v8496_v1  ;;  %v10332_v5 = vadd.f32 1.0, %v7316_v39  ;;  %vm12722_vm14 = vcmask 1045504   ;;  %v5333_v39 = vld [vmem:[#allocation3 + $0x2e8] sm:$0xff]  ;;  %v5334_v45 = vld [vmem:[#allocation3 + $0x1f0] sm:$0xff] }
 0x3ce   : > { %12721 = vst [vmem:[#allocation12_spill] sm:$0xff] %v10329_v4  ;;  %v5000_v56 = vsel %vm4997_vm13, %v4999_v46, %v4995_v57  ;;  %v4811_v63 = vsel %vm12722_vm14, %v4806_v22, %v12550_v32  ;;  %v5041_v27 = vand.u32 2147483647, %v10316_v17  ;;  %v5043_v61 = vand.u32 2147483648, %v10316_v17  ;;  %vm12723_vm15 = vmmov %vm12722_vm14 }
 0x3cf   : > { %v5127_v50 = vmul.f32 %v5000_v56, %v8498_v2  ;;  %7323 = vrcp.f32 %v10332_v5  ;;  %v10344_v12 = vperm.slane %v8393_v36, 6  ;;  %v12549_v43 = vrot.slane %v10329_v4, 2 }
 0x3d0   : > { %v7318_v44 = vpop.eup %7317  ;;  %v4838_v59 = vmul.f32 %v4811_v63, %v8649_v19  ;;  %v5058_v31 = vand.u32 2147483648, %v10332_v5  ;;  %vm5037_vm3 = vweird.f32 %v10316_v17  ;;  %v5056_v0 = vand.u32 2147483647, %v10332_v5 }
 0x3d1   : > { %v7320_v11 = vpop.eup %7319  ;;  %v5142_v22 = vadd.f32 %v5127_v50, %v5126_v29  ;;  %v10352_v18 = vadd.f32 1.0, %v7318_v44  ;;  %v4813_v24 = vsel %vm12723_vm15, %v4808_v30, %v12549_v43  ;;  %vm10362_vm2 = vcmp.eq.f32.partialorder %v5041_v27, 8.507059e+37  ;;  %v5336_v44 = vld [vmem:[#allocation3 + $0x50] sm:$0xff] }
 0x3d2   : > { %v5033_v60 = vmul.f32 %v7320_v11, %v10316_v17  ;;  %v7322_v38 = vpop.eup %7321  ;;  %v5044_v51 = vor.u32 1.1754944e-38, %v5043_v61  ;;  %vm5052_vm4 = vweird.f32 %v10332_v5  ;;  %v4839_v7 = vmul.f32 %v4813_v24, %v8649_v19  ;;  %v5335_v61 = vld [vmem:[#allocation3 + $0x1e8] sm:$0xff] }
 0x3d3   : > { %5143 = vadd.xlane.f32.xlu2 %v5142_v22  ;;  %7325 = vrcp.f32 %v10352_v18  ;;  %v3897_v41 = vand.u32 2147483648, %v10352_v18  ;;  %v10369_v8 = vadd.f32 1.0, %v7322_v38  ;;  %v4852_v30 = vadd.f32 %v9881_v15, %v4838_v59 }
 0x3d4   : > { %v5034_v9 = vsub.f32 1.0, %v5033_v60  ;;  %vm5038_vm0 = vweird.f32 %v7320_v11  ;;  %v5059_v57 = vor.u32 1.1754944e-38, %v5058_v31  ;;  %v10374_v29 = vadd.f32 %v10344_v12, %v5333_v39 }
 0x3d5   : > { %v7324_v46 = vpop.eup %7323  ;;  %v10377_v56 = vadd.f32 %v10349_v21, %v5334_v45  ;;  %vm10380_vm5 = vcmp.eq.f32.partialorder %v5056_v0, 8.507059e+37  ;;  %v3895_v15 = vand.u32 2147483647, %v10352_v18  ;;  %7327 = vrcp.f32 %v10369_v8  ;;  %vm5039_vm1 = vmor %vm5037_vm3, %vm5038_vm0 }
 0x3d6   : > { %v5035_v63 = vmul.f32 %v7320_v11, %v5034_v9  ;;  %v5048_v50 = vmul.f32 %v7324_v46, %v10332_v5  ;;  %v3898_v59 = vor.u32 1.1754944e-38, %v3897_v41  ;;  %v4853_v22 = vadd.f32 %v9928_v25, %v4839_v7 }
 0x3d7   : > { %v10388_v31 = vadd.f32 %v10344_v12, %v5335_v61  ;;  %v10391_v60 = vadd.f32 %v10349_v21, %v5336_v44  ;;  %vm5053_vm7 = vweird.f32 %v7324_v46  ;;  %vm3891_vm8 = vweird.f32 %v10352_v18 }
 0x3d8   : > { %v5036_v24 = vadd.f32 %v7320_v11, %v5035_v63  ;;  %v5049_v0 = vsub.f32 1.0, %v5048_v50  ;;  %v6945_v38 = vmul.f32 -1.442695, %v4852_v30  ;;  %v3910_v41 = vand.u32 2147483647, %v10369_v8  ;;  %vm5054_vm11 = vmor %vm5052_vm4, %vm5053_vm7 }
 0x3d9   : > { %12728 = vst [vmem:[#allocation13_spill] sm:$0xff] %v10388_v31  ;;  %v7326_v9 = vpop.eup %7325  ;;  %v6946_v25 = vmul.f32 -1.442695, %v4853_v22  ;;  %v5379_v7 = vrot.slane %v10374_v29, 4  ;;  %v5381_v39 = vrot.slane %v10377_v56, 4  ;;  %vm10401_vm9 = vcmp.eq.f32.partialorder %v3895_v15, 8.507059e+37 }
 0x3da   : > { %12729 = vst [vmem:[#allocation14_spill] sm:$0xff] %v10391_v60  ;;  %v5040_v45 = vsel %vm5039_vm1, %v7320_v11, %v5036_v24  ;;  %v5050_v61 = vmul.f32 %v7324_v46, %v5049_v0  ;;  %v3887_v63 = vmul.f32 %v7326_v9, %v10352_v18  ;;  %v3912_v30 = vand.u32 2147483648, %v10369_v8 }
 0x3db   : > { %v5045_v17 = vsel %vm10362_vm2, %v5044_v51, %v5040_v45  ;;  %7329 = vpow2.f32 %v6945_v38  ;;  %v12551_v44 = vrot.slane %v10388_v31, 4  ;;  %v12554_v22 = vrot.slane %v10391_v60, 4  ;;  %v7328_v43 = vpop.eup %7327 }
 0x3dc   : > { %v5051_v32 = vadd.f32 %v7324_v46, %v5050_v61  ;;  %v3888_v11 = vsub.f32 1.0, %v3887_v63  ;;  %vm3892_vm10 = vweird.f32 %v7326_v9  ;;  %7331 = vpow2.f32 %v6946_v25  ;;  %v12732_v63 = vld [vmem:[#allocation10_spill] sm:$0xff] }
 0x3dd   : > { %v5130_v15 = vmul.f32 %v5045_v17, %v8496_v1  ;;  %v3902_v24 = vmul.f32 %v7328_v43, %v10369_v8  ;;  %v5384_v20 = vsel %vm3086_vm6, %v5379_v7, %v12551_v44  ;;  %v5386_v51 = vsel %vm3086_vm6, %v5381_v39, %v12554_v22  ;;  %vm3893_vm13 = vmor %vm3891_vm8, %vm3892_vm10 }
 0x3de   : > { %v5055_v0 = vsel %vm5054_vm11, %v7324_v46, %v5051_v32  ;;  %v3889_v38 = vmul.f32 %v7326_v9, %v3888_v11  ;;  %v5417_v5 = vmul.f32 %v5384_v20, %v8391_v35  ;;  %v5418_v25 = vmul.f32 %v5386_v51, %v8391_v35  ;;  %v10439_v46 = vld [vmem:[%s12519_s6 + $0x20] sm:$0xff] }
 0x3df   : > { %v5060_v45 = vsel %vm10380_vm5, %v5059_v57, %v5055_v0  ;;  %v3903_v61 = vsub.f32 1.0, %v3902_v24  ;;  %v12733_v17 = vrot.slane %v12732_v63, 6  ;;  %v3725_v49 = vmul.f32 %v12734_v62, %v8737_v47  ;;  %v10445_v57 = vld [vmem:[%s12519_s6 + $0x28] sm:$0xff] }
 0x3e0   : > { %v5131_v22 = vmul.f32 %v5060_v45, %v8498_v2  ;;  %v3890_v32 = vadd.f32 %v7326_v9, %v3889_v38  ;;  %v5431_v27 = vadd.f32 %v10439_v46, %v5417_v5  ;;  %v5432_v11 = vadd.f32 %v10445_v57, %v5418_v25  ;;  %v10461_v5 = vld [vmem:[%s12519_s6 + $0x60] sm:$0x3] }
 0x3e1   : > { %v3724_v44 = vmul.f32 %v12733_v17, %v8737_v47  ;;  %v7330_v24 = vpop.eup %7329  ;;  %v3904_v14 = vmul.f32 %v7328_v43, %v3903_v61  ;;  %vm3906_vm14 = vweird.f32 %v10369_v8  ;;  %vm3907_vm3 = vweird.f32 %v7328_v43  ;;  %v5331_v61 = vld [vmem:[#allocation3 + $0x200] sm:$0xff] }
 0x3e2   : > { %vm10452_vm15 = vcmp.eq.f32.partialorder %v3910_v41, 8.507059e+37  ;;  %v7332_v20 = vpop.eup %7331  ;;  %v5148_v51 = vadd.f32 %v5131_v22, %v5130_v15  ;;  %v3894_v0 = vsel %vm3893_vm13, %v7326_v9, %v3890_v32  ;;  %v10456_v38 = vadd.f32 1.0, %v7330_v24  ;;  %vm3908_vm2 = vmor %vm3906_vm14, %vm3907_vm3  ;;  %v10472_v15 = vld [vmem:[%s12519_s6 + $0x68] sm:$0x3] }
 0x3e3   : > { %v3738_v18 = vadd.f32 %v10461_v5, %v3724_v44  ;;  %v3899_v8 = vsel %vm10401_vm9, %v3898_v59, %v3894_v0  ;;  %v3905_v25 = vadd.f32 %v7328_v43, %v3904_v14  ;;  %v10466_v41 = vadd.f32 1.0, %v7332_v20  ;;  %12737 = vst [vmem:[#allocation10_spill] sm:$0xff] %v10472_v15  ;;  %v5332_v14 = vld [vmem:[#allocation3 + $0x1d8] sm:$0xff] }
 0x3e4   : > { %v6953_v45 = vmul.f32 -1.442695, %v5431_v27  ;;  %5149 = vadd.xlane.f32.xlu1 %v5148_v51  ;;  %v3913_v22 = vor.u32 1.1754944e-38, %v3912_v30  ;;  %7333 = vrcp.f32 %v10456_v38  ;;  %v6954_v9 = vmul.f32 -1.442695, %v5432_v11 }
 0x3e5   : > { %v3739_v44 = vadd.f32 %v10472_v15, %v3725_v49  ;;  %v3909_v50 = vsel %vm3908_vm2, %v7328_v43, %v3905_v25  ;;  %v4012_v59 = vmul.f32 %v3899_v8, %v8496_v1  ;;  %7335 = vrcp.f32 %v10466_v41 }
 0x3e6   : > { %v10478_v63 = vadd.f32 %v10344_v12, %v5331_v61  ;;  %v3914_v30 = vsel %vm10452_vm15, %v3913_v22, %v3909_v50  ;;  %v5071_v17 = vand.u32 2147483647, %v10456_v38  ;;  %v5073_v27 = vand.u32 2147483648, %v10456_v38  ;;  %v5341_v22 = vld [vmem:[#allocation3 + $0x188] sm:$0x3f] }
 0x3e7   : > { %v4013_v32 = vmul.f32 %v3914_v30, %v8498_v2  ;;  %7337 = vpow2.f32 %v6953_v45  ;;  %v6919_v49 = vmul.f32 -1.442695, %v3738_v18  ;;  %v5086_v43 = vand.u32 2147483647, %v10466_v41  ;;  %v5342_v50 = vld [vmem:[#allocation3 + $0x20] sm:$0x3f] }
 0x3e8   : > { %12738 = vst [vmem:[#allocation15_spill] sm:$0xff] %v10478_v63  ;;  %v5088_v11 = vand.u32 2147483648, %v10466_v41  ;;  %7339 = vpow2.f32 %v6954_v9  ;;  %v6920_v24 = vmul.f32 -1.442695, %v3739_v44  ;;  %v10488_v62 = vadd.f32 %v10349_v21, %v5332_v14 }
 0x3e9   : > { %v4029_v20 = vadd.f32 %v4013_v32, %v4012_v59  ;;  %7341 = vpow2.f32 %v6919_v49  ;;  %v12555_v51 = vrot.slane %v10478_v63, 4  ;;  %vm5067_vm4 = vweird.f32 %v10456_v38 }
 0x3ea   : > { %12739 = vst [vmem:[#allocation16_spill] sm:$0xff] %v10488_v62  ;;  %v7334_v0 = vpop.eup %7333  ;;  %7343 = vpow2.f32 %v6920_v24  ;;  %vm5082_vm0 = vweird.f32 %v10466_v41  ;;  %v12556_v25 = vrot.slane %v10488_v62, 4  ;;  %vm10500_vm5 = vcmp.eq.f32.partialorder %v5071_v17, 8.507059e+37  ;;  %v4744_v17 = vld [vmem:[#allocation3 + $0x168] sm:$0xfc] }
 0x3eb   : > { %v7336_v8 = vpop.eup %7335  ;;  %4030 = vadd.xlane.f32.xlu0 %v4029_v20  ;;  %v5063_v18 = vmul.f32 %v7334_v0, %v10456_v38  ;;  %v5380_v45 = vsel %vm3086_vm6, %v12555_v51, %v5379_v7  ;;  %v5074_v44 = vor.u32 1.1754944e-38, %v5073_v27  ;;  %v10506_v59 = vadd.f32 %v10344_v12, %v5341_v22 }
 0x3ec   : > { %v5078_v61 = vmul.f32 %v7336_v8, %v10466_v41  ;;  %vm10508_vm7 = vcmp.eq.f32.partialorder %v5086_v43, 8.507059e+37  ;;  %v5089_v49 = vor.u32 1.1754944e-38, %v5088_v11  ;;  %v10513_v7 = vadd.f32 %v10349_v21, %v5342_v50 }
 0x3ed   : > { %v7338_v30 = vpop.eup %7337  ;;  %v5064_v32 = vsub.f32 1.0, %v5063_v18  ;;  %v5415_v20 = vmul.f32 %v5380_v45, %v8418_v55  ;;  %v10519_v22 = vadd.f32 %v9649_v10, %v4744_v17  ;;  %vm5068_vm8 = vweird.f32 %v7334_v0  ;;  %v4745_v10 = vld [vmem:[#allocation3 + $0x1b0] sm:$0xfc] }
 0x3ee   : > { %v7340_v24 = vpop.eup %7339  ;;  %v5079_v14 = vsub.f32 1.0, %v5078_v61  ;;  %v10515_v27 = vadd.f32 1.0, %v7338_v30  ;;  %v5382_v11 = vsel %vm3086_vm6, %v12556_v25, %v5381_v39  ;;  %vm5083_vm1 = vweird.f32 %v7336_v8  ;;  %vm5069_vm9 = vmor %vm5067_vm4, %vm5068_vm8 }
 0x3ef   : > { %v7342_v51 = vpop.eup %7341  ;;  %v5065_v18 = vmul.f32 %v7334_v0, %v5064_v32  ;;  %v10521_v43 = vadd.f32 1.0, %v7340_v24  ;;  %v12558_v45 = vrot.slane %v10506_v59, 4  ;;  %v10533_v17 = vadd.f32 %v9823_v48, %v4745_v10  ;;  %vm5084_vm10 = vmor %vm5082_vm0, %vm5083_vm1 }
 0x3f0   : > { %v7344_v50 = vpop.eup %7343  ;;  %v5080_v61 = vmul.f32 %v7336_v8, %v5079_v14  ;;  %7345 = vrcp.f32 %v10515_v27  ;;  %v5566_v39 = vand.u32 2147483647, %v10515_v27  ;;  %v5416_v24 = vmul.f32 %v5382_v11, %v8418_v55  ;;  %v10542_v14 = vld [vmem:[%s12519_s6 + $0x10] sm:$0xff] }
 0x3f1   : > { %v5066_v30 = vadd.f32 %v7334_v0, %v5065_v18  ;;  %7347 = vrcp.f32 %v10521_v43  ;;  %v5429_v18 = vadd.f32 %v10542_v14, %v5415_v20  ;;  %v5568_v48 = vand.u32 2147483648, %v10515_v27 }
 0x3f2   : > { %v5081_v56 = vadd.f32 %v7336_v8, %v5080_v61  ;;  %v10549_v38 = vadd.f32 1.0, %v7342_v51  ;;  %v10551_v61 = vadd.f32 1.0, %v7344_v50  ;;  %v5581_v42 = vand.u32 2147483647, %v10521_v43 }
 0x3f3   : > { %v5070_v25 = vsel %vm5069_vm9, %v7334_v0, %v5066_v30  ;;  %v5583_v32 = vand.u32 2147483648, %v10521_v43  ;;  %v5425_v51 = vmul.f32 %v12558_v45, %v8737_v47  ;;  %vm5562_vm11 = vweird.f32 %v10515_v27 }
 0x3f4   : > { %v5075_v11 = vsel %vm10500_vm5, %v5074_v44, %v5070_v25  ;;  %v5085_v10 = vsel %vm5084_vm10, %v7336_v8, %v5081_v56  ;;  %7349 = vrcp.f32 %v10549_v38  ;;  %v12744_v8 = vrot.slane %v10513_v7, 4 }
 0x3f5   : > { %v5090_v0 = vsel %vm10508_vm7, %v5089_v49, %v5085_v10  ;;  %v5132_v41 = vmul.f32 %v5075_v11, %v8496_v1  ;;  %7351 = vrcp.f32 %v10551_v61  ;;  %vm10571_vm13 = vcmp.eq.f32.partialorder %v5566_v39, 8.507059e+37 }
 0x3f6   : > { %v7346_v20 = vpop.eup %7345  ;;  %v5133_v9 = vmul.f32 %v5090_v0, %v8498_v2  ;;  %v5426_v25 = vmul.f32 %v12744_v8, %v8737_v47  ;;  %v5569_v50 = vor.u32 1.1754944e-38, %v5568_v48  ;;  %vm5577_vm14 = vweird.f32 %v10521_v43 }
 0x3f7   : > { %v7348_v44 = vpop.eup %7347  ;;  %v5558_v29 = vmul.f32 %v7346_v20, %v10515_v27  ;;  %vm10577_vm3 = vcmp.eq.f32.partialorder %v5581_v42, 8.507059e+37  ;;  %v5584_v10 = vor.u32 1.1754944e-38, %v5583_v32  ;;  %v3985_v0 = vand.u32 2147483647, %v10549_v38  ;;  %v10588_v42 = vld [vmem:[%s12519_s6 + $0x18] sm:$0xff] }
 0x3f8   : > { %v5151_v30 = vadd.f32 %v5133_v9, %v5132_v41  ;;  %v5573_v56 = vmul.f32 %v7348_v44, %v10521_v43  ;;  %vm5563_vm15 = vweird.f32 %v7346_v20  ;;  %v3987_v39 = vand.u32 2147483648, %v10549_v38 }
 0x3f9   : > { %v5559_v8 = vsub.f32 1.0, %v5558_v29  ;;  %v4000_v45 = vand.u32 2147483647, %v10551_v61  ;;  %vm3981_vm2 = vweird.f32 %v10549_v38  ;;  %v5430_v41 = vadd.f32 %v10588_v42, %v5416_v24  ;;  %vm5564_vm7 = vmor %vm5562_vm11, %vm5563_vm15 }
 0x3fa   : > { %5152 = vadd.xlane.f32.xlu2 %v5151_v30  ;;  %v5574_v48 = vsub.f32 1.0, %v5573_v56  ;;  %v6951_v32 = vmul.f32 -1.442695, %v5429_v18  ;;  %v5439_v9 = vadd.f32 %v10461_v5, %v5425_v51  ;;  %v7350_v29 = vpop.eup %7349  ;;  %vm5578_vm4 = vweird.f32 %v7348_v44 }
 0x3fb   : > { %v5560_v60 = vmul.f32 %v7346_v20, %v5559_v8  ;;  %vm3996_vm0 = vweird.f32 %v10551_v61  ;;  %v4002_v30 = vand.u32 2147483648, %v10551_v61  ;;  %v5440_v56 = vadd.f32 %v10472_v15, %v5426_v25  ;;  %v7352_v31 = vpop.eup %7351  ;;  %vm5579_vm8 = vmor %vm5577_vm14, %vm5578_vm4 }
 0x3fc   : > { %v5575_v40 = vmul.f32 %v7348_v44, %v5574_v48  ;;  %v3977_v62 = vmul.f32 %v7350_v29, %v10549_v38  ;;  %7353 = vpow2.f32 %v6951_v32  ;;  %v4788_v63 = vrot.slane %v10519_v22, 2 }
 0x3fd   : > { %v5561_v24 = vadd.f32 %v7346_v20, %v5560_v60  ;;  %vm3982_vm5 = vweird.f32 %v7350_v29  ;;  %v3992_v18 = vmul.f32 %v7352_v31, %v10551_v61  ;;  %v6952_v51 = vmul.f32 -1.442695, %v5430_v41 }
 0x3fe   : > { %v5576_v8 = vadd.f32 %v7348_v44, %v5575_v40  ;;  %v3978_v4 = vsub.f32 1.0, %v3977_v62  ;;  %v6961_v58 = vmul.f32 -1.442695, %v5439_v9  ;;  %v6962_v25 = vmul.f32 -1.442695, %v5440_v56  ;;  %vm3983_vm11 = vmor %vm3981_vm2, %vm3982_vm5 }
 0x3ff   : > { %v5565_v15 = vsel %vm5564_vm7, %v7346_v20, %v5561_v24  ;;  %v3993_v48 = vsub.f32 1.0, %v3992_v18  ;;  %vm3997_vm1 = vweird.f32 %v7352_v31  ;;  %7355 = vpow2.f32 %v6952_v51  ;;  %v5339_v51 = vld [vmem:[#allocation3 + $0xb8] sm:$0xff] }
 0x400   : > { %v5570_v60 = vsel %vm10571_vm13, %v5569_v50, %v5565_v15  ;;  %v5580_v22 = vsel %vm5579_vm8, %v7348_v44, %v5576_v8  ;;  %v3979_v41 = vmul.f32 %v7350_v29, %v3978_v4  ;;  %7357 = vpow2.f32 %v6961_v58  ;;  %vm3998_vm13 = vmor %vm3996_vm0, %vm3997_vm1 }
 0x401   : > { %v5585_v40 = vsel %vm10577_vm3, %v5584_v10, %v5580_v22  ;;  %v5711_v62 = vmul.f32 %v5570_v60, %v8496_v1  ;;  %v3994_v27 = vmul.f32 %v7352_v31, %v3993_v48  ;;  %7359 = vpow2.f32 %v6962_v25 }
 0x402   : > { %v7354_v20 = vpop.eup %7353  ;;  %v5712_v43 = vmul.f32 %v5585_v40, %v8498_v2  ;;  %v3980_v32 = vadd.f32 %v7350_v29, %v3979_v41  ;;  %vm3986_vm9 = vcmp.eq.f32.partialorder %v3985_v0, 8.507059e+37  ;;  %v12749_v9 = vrot.slane %v9973_v6, 2 }
 0x403   : > { %vm12750_vm10 = vcmask 1045504   ;;  %v3988_v58 = vor.u32 1.1754944e-38, %v3987_v39  ;;  %v3995_v4 = vadd.f32 %v7352_v31, %v3994_v27  ;;  %v10616_v15 = vadd.f32 1.0, %v7354_v20  ;;  %v5340_v27 = vld [vmem:[#allocation3 + $0x88] sm:$0xff] }
 0x404   : > { %v4790_v49 = vsel %vm12750_vm10, %v4788_v63, %v12749_v9  ;;  %v4791_v44 = vrot.slane %v10533_v17, 2  ;;  %v5727_v50 = vadd.f32 %v5712_v43, %v5711_v62  ;;  %v3984_v11 = vsel %vm3983_vm11, %v7350_v29, %v3980_v32  ;;  %vm12752_vm3 = vmmov %vm12750_vm10 }
 0x405   : > { %vm4001_vm14 = vcmp.eq.f32.partialorder %v4000_v45, 8.507059e+37  ;;  %v4003_v6 = vor.u32 1.1754944e-38, %v4002_v30  ;;  %v7356_v10 = vpop.eup %7355  ;;  %v3989_v63 = vsel %vm3986_vm9, %v3988_v58, %v3984_v11  ;;  %v3999_v0 = vsel %vm3998_vm13, %v7352_v31, %v3995_v4 }
 0x406   : > { %7361 = vrcp.f32 %v10616_v15  ;;  %v4828_v38 = vmul.f32 %v4790_v49, %v8389_v34  ;;  %v7358_v39 = vpop.eup %7357  ;;  %5728 = vadd.xlane.f32.xlu1 %v5727_v50  ;;  %v4018_v17 = vmul.f32 %v3989_v63, %v8496_v1  ;;  %v10625_v24 = vadd.f32 1.0, %v7356_v10 }
 0x407   : > { %v4004_v56 = vsel %vm4001_vm14, %v4003_v6, %v3999_v0  ;;  %v7360_v29 = vpop.eup %7359  ;;  %v10628_v61 = vperm.slane %v8393_v36, 7  ;;  %v10631_v30 = vadd.f32 1.0, %v7358_v39  ;;  %v12751_v31 = vrot.slane %v9990_v33, 2 }
 0x408   : > { %v4019_v45 = vmul.f32 %v4004_v56, %v8498_v2  ;;  %v4038_v8 = vsel %vm2274_vm12, %v4018_v17, 0.0  ;;  %v5536_v25 = vand.u32 2147483647, %v10616_v15  ;;  %7363 = vrcp.f32 %v10625_v24 }
 0x409   : > { %v4793_v18 = vsel %vm12752_vm3, %v4791_v44, %v12751_v31  ;;  %v10640_v48 = vadd.f32 %v10344_v12, %v5339_v51  ;;  %v5538_v60 = vand.u32 2147483648, %v10616_v15  ;;  %v5553_v22 = vand.u32 2147483648, %v10625_v24 }
 0x40a   : > { %v4039_v36 = vsel %vm2274_vm12, %v4019_v45, 0.0  ;;  %v4842_v33 = vadd.f32 %v10137_v28, %v4828_v38  ;;  %v10646_v40 = vadd.f32 1.0, %v7360_v29  ;;  %7365 = vrcp.f32 %v10631_v30  ;;  %v5919_v38 = vld [vmem:[#allocation3 + $0x308] sm:$0xff] }
 0x40b   : > { %v4040_v41 = vadd.f32 %v4039_v36, %v4038_v8  ;;  %v4829_v62 = vmul.f32 %v4793_v18, %v8389_v34  ;;  %v10651_v43 = vperm.slane %v8395_v37, 7  ;;  %v5551_v32 = vand.u32 2147483647, %v10625_v24 }
 0x40c   : > { %v7362_v20 = vpop.eup %7361  ;;  %v5688_v9 = vand.u32 2147483648, %v10631_v30  ;;  %v10656_v49 = vadd.f32 %v10349_v21, %v5340_v27  ;;  %vm5532_vm15 = vweird.f32 %v10616_v15  ;;  %vm10660_vm2 = vcmp.eq.f32.partialorder %v5536_v25, 8.507059e+37 }
 0x40d   : > { %4041 = vadd.xlane.f32.xlu0 %v4040_v41  ;;  %v5528_v28 = vmul.f32 %v7362_v20, %v10616_v15  ;;  %7367 = vrcp.f32 %v10646_v40  ;;  %v5539_v37 = vor.u32 1.1754944e-38, %v5538_v60  ;;  %vm5547_vm4 = vweird.f32 %v10625_v24 }
 0x40e   : > { %v5554_v4 = vor.u32 1.1754944e-38, %v5553_v22  ;;  %v5686_v44 = vand.u32 2147483647, %v10631_v30  ;;  %v7364_v50 = vpop.eup %7363  ;;  %v4843_v6 = vadd.f32 %v10146_v52, %v4829_v62  ;;  %v6935_v10 = vmul.f32 -1.442695, %v4842_v33 }
 0x40f   : > { %v5529_v11 = vsub.f32 1.0, %v5528_v28  ;;  %v5391_v63 = vrot.slane %v10640_v48, 4  ;;  %vm5533_vm0 = vweird.f32 %v7362_v20  ;;  %v5543_v0 = vmul.f32 %v7364_v50, %v10625_v24 }
 0x410   : > { %vm10670_vm5 = vcmp.eq.f32.partialorder %v5551_v32, 8.507059e+37  ;;  %vm5682_vm7 = vweird.f32 %v10631_v30  ;;  %v5689_v39 = vor.u32 1.1754944e-38, %v5688_v9  ;;  %v5701_v56 = vand.u32 2147483647, %v10646_v40  ;;  %v7366_v17 = vpop.eup %7365  ;;  %vm5534_vm9 = vmor %vm5532_vm15, %vm5533_vm0 }
 0x411   : > { %v5530_v29 = vmul.f32 %v7362_v20, %v5529_v11  ;;  %7369 = vpow2.f32 %v6935_v10  ;;  %v6936_v45 = vmul.f32 -1.442695, %v4843_v6  ;;  %v5393_v52 = vrot.slane %v10656_v49, 4 }
 0x412   : > { %v5544_v31 = vsub.f32 1.0, %v5543_v0  ;;  %v5678_v18 = vmul.f32 %v7366_v17, %v10631_v30  ;;  %vm10678_vm8 = vcmp.eq.f32.partialorder %v5686_v44, 8.507059e+37  ;;  %vm5697_vm1 = vweird.f32 %v10646_v40 }
 0x413   : > { %v5703_v8 = vand.u32 2147483648, %v10646_v40  ;;  %v12759_v25 = vrot.slane %v10506_v59, 4  ;;  %v7368_v60 = vpop.eup %7367  ;;  %v5531_v22 = vadd.f32 %v7362_v20, %v5530_v29  ;;  %7371 = vpow2.f32 %v6936_v45  ;;  %v10714_v29 = vld [vmem:[%s12519_s6 + $0x58] sm:$0xff] }
 0x414   : > { %v12760_v33 = vrot.slane %v10513_v7, 4  ;;  %v5545_v59 = vmul.f32 %v7364_v50, %v5544_v31  ;;  %vm5548_vm10 = vweird.f32 %v7364_v50  ;;  %v5679_v27 = vsub.f32 1.0, %v5678_v18  ;;  %v10703_v7 = vld [vmem:[%s12519_s6 + $0x50] sm:$0xff] }
 0x415   : > { %v5396_v36 = vsel %vm3086_vm6, %v5391_v63, %v12759_v25  ;;  %v5693_v32 = vmul.f32 %v7368_v60, %v10646_v40  ;;  %v5535_v9 = vsel %vm5534_vm9, %v7362_v20, %v5531_v22  ;;  %vm5683_vm11 = vweird.f32 %v7366_v17  ;;  %vm5549_vm13 = vmor %vm5547_vm4, %vm5548_vm10 }
 0x416   : > { %v5398_v41 = vsel %vm3086_vm6, %v5393_v52, %v12760_v33  ;;  %v5423_v62 = vmul.f32 %v5396_v36, %v8649_v19  ;;  %v5540_v15 = vsel %vm10660_vm2, %v5539_v37, %v5535_v9  ;;  %v5546_v11 = vadd.f32 %v7364_v50, %v5545_v59  ;;  %vm5684_vm3 = vmor %vm5682_vm7, %vm5683_vm11  ;;  %v5920_v9 = vld [vmem:[#allocation3 + $0x280] sm:$0xff] }
 0x417   : > { %v5424_v28 = vmul.f32 %v5398_v41, %v8649_v19  ;;  %v5680_v6 = vmul.f32 %v7366_v17, %v5679_v27  ;;  %v5694_v10 = vsub.f32 1.0, %v5693_v32  ;;  %v7370_v0 = vpop.eup %7369  ;;  %v5709_v20 = vmul.f32 %v5540_v15, %v8496_v1  ;;  %v5918_v27 = vld [vmem:[#allocation3 + $0x1f8] sm:$0xff]  ;;  %v5921_v15 = vld [vmem:[#allocation3 + $0x288] sm:$0xff] }
 0x418   : > { %v5437_v44 = vadd.f32 %v10703_v7, %v5423_v62  ;;  %vm5698_vm14 = vweird.f32 %v7368_v60  ;;  %v5550_v58 = vsel %vm5549_vm13, %v7364_v50, %v5546_v11  ;;  %v10717_v25 = vadd.f32 1.0, %v7370_v0 }
 0x419   : > { %v5438_v45 = vadd.f32 %v10714_v29, %v5424_v28  ;;  %v5681_v37 = vadd.f32 %v7366_v17, %v5680_v6  ;;  %v5695_v18 = vmul.f32 %v7368_v60, %v5694_v10  ;;  %v7372_v36 = vpop.eup %7371  ;;  %v5555_v24 = vsel %vm10670_vm5, %v5554_v4, %v5550_v58  ;;  %vm5699_vm2 = vmor %vm5697_vm1, %vm5698_vm14 }
 0x41a   : > { %v6959_v31 = vmul.f32 -1.442695, %v5437_v44  ;;  %vm10724_vm15 = vcmp.eq.f32.partialorder %v5701_v56, 8.507059e+37  ;;  %v5704_v33 = vor.u32 1.1754944e-38, %v5703_v8  ;;  %v5710_v50 = vmul.f32 %v5555_v24, %v8498_v2 }
 0x41b   : > { %v5685_v41 = vsel %vm5684_vm3, %v7366_v17, %v5681_v37  ;;  %v5696_v62 = vadd.f32 %v7368_v60, %v5695_v18  ;;  %v10729_v59 = vadd.f32 1.0, %v7372_v36  ;;  %v6960_v30 = vmul.f32 -1.442695, %v5438_v45 }
 0x41c   : > { %7373 = vpow2.f32 %v6959_v31  ;;  %v5690_v4 = vsel %vm10678_vm8, %v5689_v39, %v5685_v41  ;;  %v10738_v56 = vadd.f32 %v10628_v61, %v5918_v27  ;;  %v5724_v8 = vadd.f32 %v5710_v50, %v5709_v20 }
 0x41d   : > { %7375 = vrcp.f32 %v10717_v25  ;;  %v5700_v17 = vsel %vm5699_vm2, %v7368_v60, %v5696_v62  ;;  %v5719_v32 = vmul.f32 %v5690_v4, %v8496_v1  ;;  %v10742_v28 = vadd.f32 %v10651_v43, %v5919_v38 }
 0x41e   : > { %v5705_v39 = vsel %vm10724_vm15, %v5704_v33, %v5700_v17  ;;  %7377 = vrcp.f32 %v10729_v59  ;;  %v10748_v40 = vadd.f32 %v10628_v61, %v5920_v9  ;;  %5725 = vadd.xlane.f32.xlu2 %v5724_v8  ;;  %v4921_v60 = vand.u32 2147483647, %v10717_v25 }
 0x41f   : > { %v5720_v51 = vmul.f32 %v5705_v39, %v8498_v2  ;;  %v5739_v44 = vsel %vm2274_vm12, %v5719_v32, 0.0  ;;  %7379 = vpow2.f32 %v6960_v30  ;;  %v10754_v6 = vadd.f32 %v10651_v43, %v5921_v15 }
 0x420   : > { %v5964_v10 = vrot.slane %v10738_v56, 6  ;;  %v5966_v45 = vrot.slane %v10742_v28, 6  ;;  %v4923_v37 = vand.u32 2147483648, %v10717_v25  ;;  %v5968_v18 = vrot.slane %v10748_v40, 6 }
 0x421   : > { %v5740_v0 = vsel %vm2274_vm12, %v5720_v51, 0.0  ;;  %v5970_v36 = vrot.slane %v10754_v6, 6  ;;  %vm4917_vm4 = vweird.f32 %v10717_v25  ;;  %vm10766_vm0 = vcmp.eq.f32.partialorder %v4921_v60, 8.507059e+37  ;;  %v11274_v6 = vld [vmem:[%s12519_s6 + $0x48] sm:$0xff] }
 0x422   : > { %v7374_v11 = vpop.eup %7373  ;;  %v5741_v58 = vadd.f32 %v5740_v0, %v5739_v44  ;;  %v4936_v50 = vand.u32 2147483647, %v10729_v59  ;;  %v4938_v41 = vand.u32 2147483648, %v10729_v59  ;;  %v5969_v62 = vsel %vm2274_vm12, %v5964_v10, %v5968_v18 }
 0x423   : > { %v10758_v20 = vadd.f32 1.0, %v7374_v11  ;;  %v7376_v31 = vpop.eup %7375  ;;  %v5971_v27 = vsel %vm2274_vm12, %v5966_v45, %v5970_v36  ;;  %vm4932_vm5 = vweird.f32 %v10729_v59  ;;  %v6002_v38 = vmul.f32 %v5969_v62, %v8391_v35 }
 0x424   : > { %v4913_v24 = vmul.f32 %v7376_v31, %v10717_v25  ;;  %v7378_v33 = vpop.eup %7377  ;;  %5742 = vadd.xlane.f32.xlu1 %v5741_v58  ;;  %vm4918_vm7 = vweird.f32 %v7376_v31  ;;  %v4924_v17 = vor.u32 1.1754944e-38, %v4923_v37  ;;  %v6003_v32 = vmul.f32 %v5971_v27, %v8391_v35  ;;  %v5916_v25 = vld [vmem:[#allocation3 + $0x18] sm:$0xff] }
 0x425   : > { %7381 = vrcp.f32 %v10758_v20  ;;  %v4928_v30 = vmul.f32 %v7378_v33, %v10729_v59  ;;  %v7380_v8 = vpop.eup %7379  ;;  %v12765_v9 = vrot.slane %v10130_v23, 2  ;;  %v12766_v39 = vrot.slane %v10096_v53, 2  ;;  %vm4919_vm10 = vmor %vm4917_vm4, %vm4918_vm7  ;;  %v2258_v59 = vpop.xlane.xlu1 %2257 }
 0x426   : > { %v4914_v4 = vsub.f32 1.0, %v4913_v24  ;;  %vm12767_vm8 = vcmask 1045504   ;;  %v10792_v15 = vadd.f32 1.0, %v7380_v8  ;;  %v6016_v11 = vadd.f32 %v10439_v46, %v6002_v38 }
 0x427   : > { %v4803_v51 = vsel %vm12767_vm8, %v12766_v39, %v12765_v9  ;;  %v4929_v60 = vsub.f32 1.0, %v4928_v30  ;;  %vm10795_vm1 = vcmp.eq.f32.partialorder %v4936_v50, 8.507059e+37  ;;  %v4939_v58 = vor.u32 1.1754944e-38, %v4938_v41  ;;  %vm12772_vm11 = vmmov %vm12767_vm8  ;;  %v2261_v39 = vpop.xlane.xlu2 %2260 }
 0x428   : > { %v4915_v44 = vmul.f32 %v7376_v31, %v4914_v4  ;;  %v5656_v37 = vand.u32 2147483647, %v10758_v20  ;;  %v6017_v35 = vadd.f32 %v10445_v57, %v6003_v32  ;;  %vm4933_vm9 = vweird.f32 %v7378_v33 }
 0x429   : > { %v4930_v24 = vmul.f32 %v7378_v33, %v4929_v60  ;;  %7383 = vrcp.f32 %v10792_v15  ;;  %v5658_v50 = vand.u32 2147483648, %v10758_v20  ;;  %v12770_v41 = vrot.slane %v10179_v3, 2  ;;  %vm4934_vm13 = vmor %vm4932_vm5, %vm4933_vm9  ;;  %v2264_v3 = vpop.xlane.xlu0 %2263 }
 0x42a   : > { %v4916_v53 = vadd.f32 %v7376_v31, %v4915_v44  ;;  %v12771_v57 = vrot.slane %v10100_v54, 2  ;;  %v4834_v27 = vmul.f32 %v4803_v51, %v8457_v13  ;;  %v6967_v38 = vmul.f32 -1.442695, %v6016_v11  ;;  %v10821_v54 = vld [vmem:[#allocation4] ss:$0 sm:$0xff] }
 0x42b   : > { %v10801_v23 = vpop.eup %7381  ;;  %v4931_v30 = vadd.f32 %v7378_v33, %v4930_v24  ;;  %v6968_v8 = vmul.f32 -1.442695, %v6017_v35  ;;  %vm2290_vm3 = vcmask 7168   ;;  %v10841_v35 = vadd.f32 %v10821_v54, %v2261_v39 }
 0x42c   : > { %v5648_v46 = vmul.f32 %v10801_v23, %v10758_v20  ;;  %v4805_v62 = vsel %vm12772_vm11, %v12771_v57, %v12770_v41  ;;  %v4920_v4 = vsel %vm4919_vm10, %v7376_v31, %v4916_v53  ;;  %vm5653_vm14 = vweird.f32 %v10801_v23 }
 0x42d   : > { %v4925_v32 = vsel %vm10766_vm0, %v4924_v17, %v4920_v4  ;;  %v10824_v31 = vadd.f32 %v10628_v61, %v5916_v25  ;;  %v4935_v51 = vsel %vm4934_vm13, %v7378_v33, %v4931_v30  ;;  %7385 = vpow2.f32 %v6967_v38  ;;  %2292 = vst.msk [vmem:[%s10831_s13 + $0x8] sm:$0xff] %vm2290_vm3, %v10841_v35  ;;  %v5917_v4 = vld [vmem:[#allocation3 + $0xd8] sm:$0xff] }
 0x42e   : > { %v5649_v9 = vsub.f32 1.0, %v5648_v46  ;;  %v5122_v44 = vmul.f32 %v4925_v32, %v8496_v1  ;;  %v4940_v22 = vsel %vm10795_vm1, %v4939_v58, %v4935_v51  ;;  %7387 = vpow2.f32 %v6968_v8  ;;  %v5926_v51 = vld [vmem:[#allocation3 + $0x178] sm:$0xff] }
 0x42f   : > { %v10837_v33 = vadd.f32 %v10821_v54, %v2264_v3  ;;  %v7384_v60 = vpop.eup %7383  ;;  %v5123_v11 = vmul.f32 %v4940_v22, %v8498_v2  ;;  %v10844_v53 = vadd.f32 %v10821_v54, %v2258_v59  ;;  %v4835_v0 = vmul.f32 %v4805_v62, %v8457_v13 }
 0x430   : > { %v5650_v17 = vmul.f32 %v10801_v23, %v5649_v9  ;;  %vm5652_vm15 = vweird.f32 %v10758_v20  ;;  %v5663_v24 = vmul.f32 %v7384_v60, %v10792_v15  ;;  %vm10859_vm4 = vcmp.eq.f32.partialorder %v5656_v37, 8.507059e+37 }
 0x431   : > { %2293 = vst.msk [vmem:[%s10831_s13 + $0x10] sm:$0xff] %vm2290_vm3, %v10837_v33  ;;  %v5136_v46 = vadd.f32 %v5123_v11, %v5122_v44  ;;  %vm10855_vm2 = vmor %vm5652_vm15, %vm5653_vm14  ;;  %v5659_v62 = vor.u32 1.1754944e-38, %v5658_v50  ;;  %v4848_v20 = vadd.f32 %v10299_v16, %v4834_v27  ;;  %v4849_v37 = vadd.f32 %v10309_v26, %v4835_v0 }
 0x432   : > { %v5651_v58 = vadd.f32 %v10801_v23, %v5650_v17  ;;  %v5664_v38 = vsub.f32 1.0, %v5663_v24  ;;  %2291 = vst.msk [vmem:[%s10831_s13] sm:$0xff] %vm2290_vm3, %v10844_v53  ;;  %v10875_v8 = vadd.f32 %v10651_v43, %v5917_v4  ;;  %v5671_v25 = vand.u32 2147483647, %v10792_v15 }
 0x433   : > { %v7386_v50 = vpop.eup %7385  ;;  %5137 = vadd.xlane.f32.xlu0 %v5136_v46  ;;  %v5673_v16 = vand.u32 2147483648, %v10792_v15  ;;  %v6941_v27 = vmul.f32 -1.442695, %v4848_v20  ;;  %v12572_v32 = vrot.slane %v10824_v31, 6  ;;  %vm5668_vm0 = vweird.f32 %v7384_v60 }
 0x434   : > { %v5655_v30 = vsel %vm10855_vm2, %v10801_v23, %v5651_v58  ;;  %v7388_v9 = vpop.eup %7387  ;;  %v5665_v23 = vmul.f32 %v7384_v60, %v5664_v38  ;;  %v10880_v3 = vadd.f32 1.0, %v7386_v50  ;;  %v6942_v39 = vmul.f32 -1.442695, %v4849_v37 }
 0x435   : > { %v5660_v26 = vsel %vm10859_vm4, %v5659_v62, %v5655_v30  ;;  %v10884_v44 = vadd.f32 1.0, %v7388_v9  ;;  %7389 = vpow2.f32 %v6941_v27  ;;  %v12568_v59 = vrot.slane %v10875_v8, 6 }
 0x436   : > { %v5666_v22 = vadd.f32 %v7384_v60, %v5665_v23  ;;  %vm5667_vm5 = vweird.f32 %v10792_v15  ;;  %7391 = vrcp.f32 %v10880_v3  ;;  %v5674_v17 = vor.u32 1.1754944e-38, %v5673_v16  ;;  %v5927_v15 = vld [vmem:[#allocation3 + $0x228] sm:$0xff] }
 0x437   : > { %vm5669_vm7 = vmor %vm5667_vm5, %vm5668_vm0  ;;  %7393 = vrcp.f32 %v10884_v44  ;;  %v5965_v11 = vsel %vm2274_vm12, %v12572_v32, %v5964_v10  ;;  %v10896_v0 = vadd.f32 %v10628_v61, %v5926_v51  ;;  %vm5672_vm8 = vcmp.eq.f32.partialorder %v5671_v25, 8.507059e+37 }
 0x438   : > { %v5670_v58 = vsel %vm5669_vm7, %v7384_v60, %v5666_v22  ;;  %v5717_v24 = vmul.f32 %v5660_v26, %v8496_v1  ;;  %7395 = vpow2.f32 %v6942_v39  ;;  %v5967_v56 = vsel %vm2274_vm12, %v12568_v59, %v5966_v45 }
 0x439   : > { %v5675_v46 = vsel %vm5672_vm8, %v5674_v17, %v5670_v58  ;;  %v6000_v10 = vmul.f32 %v5965_v11, %v8418_v55  ;;  %v6001_v57 = vmul.f32 %v5967_v56, %v8418_v55  ;;  %vm6147_vm1 = vweird.f32 %v10880_v3 }
 0x43a   : > { %v5718_v41 = vmul.f32 %v5675_v46, %v8498_v2  ;;  %v6151_v60 = vand.u32 2147483647, %v10880_v3  ;;  %v10910_v20 = vadd.f32 %v10651_v43, %v5927_v15  ;;  %v5980_v28 = vrot.slane %v10896_v0, 6 }
 0x43b   : > { %v7390_v62 = vpop.eup %7389  ;;  %v6014_v45 = vadd.f32 %v10542_v14, %v6000_v10  ;;  %v6015_v37 = vadd.f32 %v10588_v42, %v6001_v57  ;;  %v6153_v25 = vand.u32 2147483648, %v10880_v3  ;;  %vm6162_vm9 = vweird.f32 %v10884_v44  ;;  %v4553_v42 = vpop.xlane.xlu0 %4552 }
 0x43c   : > { %v7392_v4 = vpop.eup %7391  ;;  %v5736_v30 = vadd.f32 %v5718_v41, %v5717_v24  ;;  %v10913_v38 = vadd.f32 1.0, %v7390_v62  ;;  %v5982_v16 = vrot.slane %v10910_v20, 6  ;;  %v6166_v23 = vand.u32 2147483647, %v10884_v44  ;;  %v12781_v62 = vld [vmem:[#allocation10_spill] sm:$0xff] }
 0x43d   : > { %v7394_v50 = vpop.eup %7393  ;;  %v6143_v55 = vmul.f32 %v7392_v4, %v10880_v3  ;;  %v6168_v39 = vand.u32 2147483648, %v10884_v44  ;;  %vm10925_vm10 = vcmp.eq.f32.partialorder %v6151_v60, 8.507059e+37  ;;  %v6010_v26 = vmul.f32 %v5980_v28, %v8737_v47 }
 0x43e   : > { %v7396_v27 = vpop.eup %7395  ;;  %5737 = vadd.xlane.f32.xlu2 %v5736_v30  ;;  %v6158_v9 = vmul.f32 %v7394_v50, %v10884_v44  ;;  %7397 = vrcp.f32 %v10913_v38  ;;  %v6965_v17 = vmul.f32 -1.442695, %v6014_v45  ;;  %v6966_v11 = vmul.f32 -1.442695, %v6015_v37 }
 0x43f   : > { %v6144_v14 = vsub.f32 1.0, %v6143_v55  ;;  %v10929_v51 = vadd.f32 1.0, %v7396_v27  ;;  %v6011_v58 = vmul.f32 %v5982_v16, %v8737_v47  ;;  %vm6148_vm11 = vweird.f32 %v7392_v4  ;;  %v12782_v55 = vld [vmem:[#allocation11_spill] sm:$0xff] }
 0x440   : > { %v6159_v22 = vsub.f32 1.0, %v6158_v9  ;;  %v6154_v15 = vor.u32 1.1754944e-38, %v6153_v25  ;;  %vm6163_vm13 = vweird.f32 %v7394_v50  ;;  %vm10938_vm14 = vcmp.eq.f32.partialorder %v6166_v23, 8.507059e+37  ;;  %vm6149_vm15 = vmor %vm6147_vm1, %vm6148_vm11 }
 0x441   : > { %v6145_v24 = vmul.f32 %v7392_v4, %v6144_v14  ;;  %7399 = vrcp.f32 %v10929_v51  ;;  %v6169_v41 = vor.u32 1.1754944e-38, %v6168_v39  ;;  %v6024_v57 = vadd.f32 %v10461_v5, %v6010_v26  ;;  %vm6164_vm2 = vmor %vm6162_vm9, %vm6163_vm13 }
 0x442   : > { %v6160_v46 = vmul.f32 %v7394_v50, %v6159_v22  ;;  %7401 = vpow2.f32 %v6965_v17  ;;  %v6025_v60 = vadd.f32 %v12781_v62, %v6011_v58  ;;  %v5011_v37 = vand.u32 2147483647, %v10913_v38 }
 0x443   : > { %v6146_v10 = vadd.f32 %v7392_v4, %v6145_v24  ;;  %7403 = vpow2.f32 %v6966_v11  ;;  %v12783_v25 = vrot.slane %v12782_v55, 2  ;;  %v5013_v23 = vand.u32 2147483648, %v10913_v38 }
 0x444   : > { %v7398_v30 = vpop.eup %7397  ;;  %v6161_v45 = vadd.f32 %v7394_v50, %v6160_v46  ;;  %v6975_v39 = vmul.f32 -1.442695, %v6024_v57  ;;  %v5026_v26 = vand.u32 2147483647, %v10929_v51  ;;  %v6976_v22 = vmul.f32 -1.442695, %v6025_v60  ;;  %v2270_v57 = vpop.xlane.xlu1 %2269 }
 0x445   : > { %v4840_v27 = vmul.f32 %v12783_v25, %v8737_v47  ;;  %v6150_v9 = vsel %vm6149_vm15, %v7392_v4, %v6146_v10  ;;  %v5003_v5 = vmul.f32 %v7398_v30, %v10913_v38  ;;  %v5028_v46 = vand.u32 2147483648, %v10929_v51 }
 0x446   : > { %v6155_v3 = vsel %vm10925_vm10, %v6154_v15, %v6150_v9  ;;  %v6165_v14 = vsel %vm6164_vm2, %v7394_v50, %v6161_v45  ;;  %7405 = vpow2.f32 %v6975_v39  ;;  %v2267_v50 = vpop.xlane.xlu2 %2266  ;;  %vm5008_vm4 = vweird.f32 %v7398_v30  ;;  %v12784_v39 = vld [vmem:[#allocation12_spill] sm:$0xff] }
 0x447   : > { %v7400_v17 = vpop.eup %7399  ;;  %v6170_v11 = vsel %vm10938_vm14, %v6169_v41, %v6165_v14  ;;  %v6296_v4 = vmul.f32 %v6155_v3, %v8496_v1  ;;  %v5004_v44 = vsub.f32 1.0, %v5003_v5  ;;  %7407 = vpow2.f32 %v6976_v22 }
 0x448   : > { %v6297_v58 = vmul.f32 %v6170_v11, %v8498_v2  ;;  %v5018_v24 = vmul.f32 %v7400_v17, %v10929_v51  ;;  %v7402_v15 = vpop.eup %7401  ;;  %v10964_v56 = vadd.f32 %v10821_v54, %v4553_v42  ;;  %v10967_v41 = vadd.f32 %v10821_v54, %v2267_v50 }
 0x449   : > { %v5005_v10 = vmul.f32 %v7398_v30, %v5004_v44  ;;  %v7404_v62 = vpop.eup %7403  ;;  %v10969_v55 = vadd.f32 1.0, %v7402_v15  ;;  %v10972_v25 = vadd.f32 %v10821_v54, %v2270_v57  ;;  %vm5007_vm0 = vweird.f32 %v10913_v38 }
 0x44a   : > { %v6312_v60 = vadd.f32 %v6297_v58, %v6296_v4  ;;  %v5019_v45 = vsub.f32 1.0, %v5018_v24  ;;  %v10975_v5 = vadd.f32 1.0, %v7404_v62  ;;  %4581 = vst.msk [vmem:[%s10831_s13 + $0xc8] sm:$0xff] %vm2290_vm3, %v10964_v56  ;;  %v12785_v3 = vrot.slane %v12784_v39, 2  ;;  %vm5009_vm5 = vmor %vm5007_vm0, %vm5008_vm4  ;;  %v7646_v62 = vld [vmem:[%s12519_s6 + $0x68] sm:$0x3] }
 0x44b   : > { %v5006_v9 = vadd.f32 %v7398_v30, %v5005_v10  ;;  %v5014_v22 = vor.u32 1.1754944e-38, %v5013_v23  ;;  %vm5023_vm7 = vweird.f32 %v7400_v17  ;;  %7409 = vrcp.f32 %v10969_v55  ;;  %2294 = vst.msk [vmem:[%s10831_s13 + $0x18] sm:$0xff] %vm2290_vm3, %v10967_v41 }
 0x44c   : > { %v4841_v14 = vmul.f32 %v12785_v3, %v8737_v47  ;;  %6313 = vadd.xlane.f32.xlu1 %v6312_v60  ;;  %v5020_v11 = vmul.f32 %v7400_v17, %v5019_v45  ;;  %v7406_v38 = vpop.eup %7405  ;;  %vm5012_vm8 = vcmp.eq.f32.partialorder %v5011_v37, 8.507059e+37  ;;  %vm5022_vm1 = vweird.f32 %v10929_v51  ;;  %2295 = vst.msk [vmem:[%s10831_s13 + $0x20] sm:$0xff] %vm2290_vm3, %v10972_v25  ;;  %v7645_v51 = vld [vmem:[%s12519_s6 + $0x60] sm:$0x3] }
 0x44d   : > { %v5010_v4 = vsel %vm5009_vm5, %v7398_v30, %v5006_v9  ;;  %7411 = vrcp.f32 %v10975_v5  ;;  %v7408_v47 = vpop.eup %7407  ;;  %vm5027_vm9 = vcmp.eq.f32.partialorder %v5026_v26, 8.507059e+37  ;;  %v5029_v58 = vor.u32 1.1754944e-38, %v5028_v46  ;;  %vm5024_vm10 = vmor %vm5022_vm1, %vm5023_vm7 }
 0x44e   : > { %v5015_v44 = vsel %vm5012_vm8, %v5014_v22, %v5010_v4  ;;  %v5021_v23 = vadd.f32 %v7400_v17, %v5020_v11  ;;  %v6121_v24 = vand.u32 2147483647, %v10969_v55  ;;  %v6123_v42 = vand.u32 2147483648, %v10969_v55 }
 0x44f   : > { %v10995_v50 = vadd.f32 1.0, %v7406_v38  ;;  %v4854_v30 = vadd.f32 %v7645_v51, %v4840_v27  ;;  %v5128_v15 = vmul.f32 %v5015_v44, %v8496_v1  ;;  %v6136_v10 = vand.u32 2147483647, %v10975_v5 }
 0x450   : > { %v5025_v37 = vsel %vm5024_vm10, %v7400_v17, %v5021_v23  ;;  %v11002_v57 = vadd.f32 1.0, %v7408_v47  ;;  %v6138_v46 = vand.u32 2147483648, %v10975_v5  ;;  %v4855_v60 = vadd.f32 %v7646_v62, %v4841_v14 }
 0x451   : > { %v5030_v26 = vsel %vm5027_vm9, %v5029_v58, %v5025_v37  ;;  %7413 = vrcp.f32 %v10995_v50  ;;  %v7410_v45 = vpop.eup %7409  ;;  %vm6117_vm11 = vweird.f32 %v10969_v55  ;;  %vm6132_vm13 = vweird.f32 %v10975_v5  ;;  %v5924_v58 = vld [vmem:[#allocation3 + $0x2d0] sm:$0xff]  ;;  %v5925_v37 = vld [vmem:[#allocation3 + $0x1b8] sm:$0xff] }
 0x452   : > { %v5129_v27 = vmul.f32 %v5030_v26, %v8498_v2  ;;  %7415 = vrcp.f32 %v11002_v57  ;;  %v6113_v9 = vmul.f32 %v7410_v45, %v10969_v55  ;;  %vm11014_vm14 = vcmp.eq.f32.partialorder %v6121_v24, 8.507059e+37 }
 0x453   : > { %v7412_v17 = vpop.eup %7411  ;;  %v6124_v3 = vor.u32 1.1754944e-38, %v6123_v42  ;;  %v6273_v22 = vand.u32 2147483648, %v10995_v50  ;;  %vm11020_vm15 = vcmp.eq.f32.partialorder %v6136_v10, 8.507059e+37  ;;  %v6271_v4 = vand.u32 2147483647, %v10995_v50 }
 0x454   : > { %v5145_v14 = vadd.f32 %v5129_v27, %v5128_v15  ;;  %v6128_v11 = vmul.f32 %v7412_v17, %v10975_v5  ;;  %v6114_v47 = vsub.f32 1.0, %v6113_v9  ;;  %vm6118_vm2 = vweird.f32 %v7410_v45 }
 0x455   : > { %v6139_v44 = vor.u32 1.1754944e-38, %v6138_v46  ;;  %v6286_v23 = vand.u32 2147483647, %v11002_v57  ;;  %vm6133_vm4 = vweird.f32 %v7412_v17  ;;  %vm6267_vm0 = vweird.f32 %v10995_v50  ;;  %vm6119_vm1 = vmor %vm6117_vm11, %vm6118_vm2 }
 0x456   : > { %5146 = vadd.xlane.f32.xlu0 %v5145_v14  ;;  %v6129_v24 = vsub.f32 1.0, %v6128_v11  ;;  %v6947_v42 = vmul.f32 -1.442695, %v4854_v30  ;;  %v6948_v51 = vmul.f32 -1.442695, %v4855_v60  ;;  %v6115_v10 = vmul.f32 %v7410_v45, %v6114_v47  ;;  %vm6134_vm9 = vmor %vm6132_vm13, %vm6133_vm4 }
 0x457   : > { %v7414_v15 = vpop.eup %7413  ;;  %v6274_v26 = vor.u32 1.1754944e-38, %v6273_v22  ;;  %vm6282_vm5 = vweird.f32 %v11002_v57  ;;  %v11029_v62 = vadd.f32 %v10628_v61, %v5924_v58  ;;  %v11032_v46 = vadd.f32 %v10651_v43, %v5925_v37  ;;  %v5329_v37 = vld [vmem:[#allocation3 + $0x120] sm:$0xf0] }
 0x458   : > { %v7416_v27 = vpop.eup %7415  ;;  %v6130_v9 = vmul.f32 %v7412_v17, %v6129_v24  ;;  %v6263_v14 = vmul.f32 %v7414_v15, %v10995_v50  ;;  %vm11035_vm7 = vcmp.eq.f32.partialorder %v6271_v4, 8.507059e+37  ;;  %v6288_v30 = vand.u32 2147483648, %v11002_v57 }
 0x459   : > { %7417 = vpow2.f32 %v6947_v42  ;;  %v6116_v60 = vadd.f32 %v7410_v45, %v6115_v10  ;;  %vm6268_vm8 = vweird.f32 %v7414_v15  ;;  %v6278_v22 = vmul.f32 %v7416_v27, %v11002_v57 }
 0x45a   : > { %7419 = vpow2.f32 %v6948_v51  ;;  %v6131_v47 = vadd.f32 %v7412_v17, %v6130_v9  ;;  %v6264_v58 = vsub.f32 1.0, %v6263_v14  ;;  %v12575_v24 = vrot.slane %v11029_v62, 6  ;;  %vm6269_vm11 = vmor %vm6267_vm0, %vm6268_vm8 }
 0x45b   : > { %v12571_v4 = vrot.slane %v11032_v46, 6  ;;  %v6120_v59 = vsel %vm6119_vm1, %v7410_v45, %v6116_v60  ;;  %v6279_v42 = vsub.f32 1.0, %v6278_v22  ;;  %vm6283_vm10 = vweird.f32 %v7416_v27 }
 0x45c   : > { %v5345_v51 = vadd.f32 %v10344_v12, %v5329_v37  ;;  %v6125_v55 = vsel %vm11014_vm14, %v6124_v3, %v6120_v59  ;;  %v6135_v10 = vsel %vm6134_vm9, %v7412_v17, %v6131_v47  ;;  %v6265_v9 = vmul.f32 %v7414_v15, %v6264_v58  ;;  %v5330_v17 = vld [vmem:[#allocation3 + $0x68] sm:$0xf0]  ;;  %vm6284_vm14 = vmor %vm6282_vm5, %vm6283_vm10 }
 0x45d   : > { %v5981_v14 = vsel %vm2274_vm12, %v12575_v24, %v5980_v28  ;;  %v6140_v45 = vsel %vm11020_vm15, %v6139_v44, %v6135_v10  ;;  %v6294_v5 = vmul.f32 %v6125_v55, %v8496_v1  ;;  %v6280_v60 = vmul.f32 %v7416_v27, %v6279_v42 }
 0x45e   : > { %v5983_v59 = vsel %vm2274_vm12, %v12571_v4, %v5982_v16  ;;  %v6295_v0 = vmul.f32 %v6140_v45, %v8498_v2  ;;  %v6266_v3 = vadd.f32 %v7414_v15, %v6265_v9  ;;  %v6008_v22 = vmul.f32 %v5981_v14, %v8649_v19  ;;  %v12792_v45 = vld [vmem:[#allocation15_spill] sm:$0xff] }
 0x45f   : > { %v7418_v39 = vpop.eup %7417  ;;  %v5346_v28 = vadd.f32 %v10349_v21, %v5330_v17  ;;  %v6281_v44 = vadd.f32 %v7416_v27, %v6280_v60  ;;  %vm6287_vm13 = vcmp.eq.f32.partialorder %v6286_v23, 8.507059e+37  ;;  %v6289_v20 = vor.u32 1.1754944e-38, %v6288_v30  ;;  %v12794_v60 = vld [vmem:[#allocation16_spill] sm:$0xff] }
 0x460   : > { %v7420_v38 = vpop.eup %7419  ;;  %v11071_v47 = vadd.f32 1.0, %v7418_v39  ;;  %v6309_v16 = vadd.f32 %v6295_v0, %v6294_v5  ;;  %v6270_v58 = vsel %vm6269_vm11, %v7414_v15, %v6266_v3  ;;  %v6009_v42 = vmul.f32 %v5983_v59, %v8649_v19  ;;  %v4562_v0 = vpop.xlane.xlu0 %4561 }
 0x461   : > { %v11076_v37 = vadd.f32 1.0, %v7420_v38  ;;  %v6275_v55 = vsel %vm11035_vm7, %v6274_v26, %v6270_v58  ;;  %v6285_v50 = vsel %vm6284_vm14, %v7416_v27, %v6281_v44  ;;  %v6022_v23 = vadd.f32 %v10703_v7, %v6008_v22  ;;  %v2273_v3 = vpop.xlane.xlu2 %2272 }
 0x462   : > { %7421 = vrcp.f32 %v11071_v47  ;;  %6310 = vadd.xlane.f32.xlu2 %v6309_v16  ;;  %v6290_v30 = vsel %vm6287_vm13, %v6289_v20, %v6285_v50  ;;  %v6304_v15 = vmul.f32 %v6275_v55, %v8496_v1  ;;  %v5373_v10 = vrot.slane %v5345_v51, 4  ;;  %v4556_v16 = vpop.xlane.xlu1 %4555  ;;  %v11111_v55 = vld [vmem:[%s12519_s6] sm:$0xff] }
 0x463   : > { %v5376_v9 = vrot.slane %v5346_v28, 4  ;;  %v6305_v57 = vmul.f32 %v6290_v30, %v8498_v2  ;;  %7423 = vrcp.f32 %v11076_v37  ;;  %v6023_v26 = vadd.f32 %v10714_v29, %v6009_v42 }
 0x464   : > { %v6324_v19 = vsel %vm2274_vm12, %v6304_v15, 0.0  ;;  %v6973_v27 = vmul.f32 -1.442695, %v6022_v23  ;;  %v12793_v7 = vrot.slane %v12792_v45, 4  ;;  %v12795_v59 = vrot.slane %v12794_v60, 4  ;;  %v11117_v23 = vld [vmem:[%s12519_s6 + $0x8] sm:$0xff] }
 0x465   : > { %v6325_v11 = vsel %vm2274_vm12, %v6305_v57, 0.0  ;;  %v6974_v39 = vmul.f32 -1.442695, %v6023_v26  ;;  %v5101_v38 = vand.u32 2147483647, %v11071_v47  ;;  %v11100_v44 = vadd.f32 %v10821_v54, %v4562_v0  ;;  %v5923_v0 = vld [vmem:[#allocation3 + $0x138] sm:$0xff] }
 0x466   : > { %v6326_v14 = vadd.f32 %v6325_v11, %v6324_v19  ;;  %v5375_v5 = vsel %vm3086_vm6, %v5373_v10, %v12793_v7  ;;  %v5378_v51 = vsel %vm3086_vm6, %v5376_v9, %v12795_v59  ;;  %7425 = vpow2.f32 %v6973_v27  ;;  %v5922_v9 = vld [vmem:[#allocation3 + $0x150] sm:$0xff]  ;;  %v5338_v7 = vld [vmem:[#allocation3 + $0x108] sm:$0xff] }
 0x467   : > { %v5413_v22 = vmul.f32 %v5375_v5, %v8389_v34  ;;  %v5414_v28 = vmul.f32 %v5378_v51, %v8389_v34  ;;  %v11103_v20 = vadd.f32 %v10821_v54, %v2273_v3  ;;  %7427 = vpow2.f32 %v6974_v39  ;;  %4584 = vst.msk [vmem:[%s10831_s13 + $0xe0] sm:$0xff] %vm2290_vm3, %v11100_v44 }
 0x468   : > { %v7422_v17 = vpop.eup %7421  ;;  %6327 = vadd.xlane.f32.xlu1 %v6326_v14  ;;  %v11106_v42 = vadd.f32 %v10821_v54, %v4556_v16  ;;  %vm5097_vm15 = vweird.f32 %v11071_v47  ;;  %v5103_v57 = vand.u32 2147483648, %v11071_v47  ;;  %vm5112_vm2 = vweird.f32 %v11076_v37  ;;  %v2279_v49 = vpop.xlane.xlu0 %2278 }
 0x469   : > { %v5093_v29 = vmul.f32 %v7422_v17, %v11071_v47  ;;  %v7424_v58 = vpop.eup %7423  ;;  %v5427_v50 = vadd.f32 %v11111_v55, %v5413_v22  ;;  %v5428_v30 = vadd.f32 %v11117_v23, %v5414_v28  ;;  %2296 = vst.msk [vmem:[%s10831_s13 + $0x28] sm:$0xff] %vm2290_vm3, %v11103_v20  ;;  %v11131_v11 = vadd.f32 %v10628_v61, %v5922_v9 }
 0x46a   : > { %v5108_v10 = vmul.f32 %v7424_v58, %v11076_v37  ;;  %vm5098_vm4 = vweird.f32 %v7422_v17  ;;  %4582 = vst.msk [vmem:[%s10831_s13 + $0xd0] sm:$0xff] %vm2290_vm3, %v11106_v42  ;;  %vm11136_vm0 = vcmp.eq.f32.partialorder %v5101_v38, 8.507059e+37  ;;  %v5116_v5 = vand.u32 2147483647, %v11076_v37 }
 0x46b   : > { %v5094_v15 = vsub.f32 1.0, %v5093_v29  ;;  %v6949_v19 = vmul.f32 -1.442695, %v5427_v50  ;;  %v6950_v14 = vmul.f32 -1.442695, %v5428_v30  ;;  %v5118_v60 = vand.u32 2147483648, %v11076_v37  ;;  %vm5099_vm7 = vmor %vm5097_vm15, %vm5098_vm4 }
 0x46c   : > { %v5109_v27 = vsub.f32 1.0, %v5108_v10  ;;  %v7426_v45 = vpop.eup %7425  ;;  %vm5113_vm5 = vweird.f32 %v7424_v58  ;;  %v5104_v22 = vor.u32 1.1754944e-38, %v5103_v57  ;;  %v11148_v28 = vadd.f32 %v10651_v43, %v5923_v0 }
 0x46d   : > { %v5095_v26 = vmul.f32 %v7422_v17, %v5094_v15  ;;  %7429 = vpow2.f32 %v6949_v19  ;;  %v11142_v39 = vadd.f32 1.0, %v7426_v45  ;;  %v7428_v3 = vpop.eup %7427  ;;  %v12573_v29 = vrot.slane %v11131_v11, 6  ;;  %vm5114_vm8 = vmor %vm5112_vm2, %vm5113_vm5  ;;  %v5337_v15 = vld [vmem:[#allocation3 + $0x2a8] sm:$0xff] }
 0x46e   : > { %v5110_v51 = vmul.f32 %v7424_v58, %v5109_v27  ;;  %7431 = vpow2.f32 %v6950_v14  ;;  %v11151_v50 = vadd.f32 1.0, %v7428_v3  ;;  %vm5117_vm1 = vcmp.eq.f32.partialorder %v5116_v5, 8.507059e+37 }
 0x46f   : > { %v5096_v59 = vadd.f32 %v7422_v17, %v5095_v26  ;;  %7433 = vrcp.f32 %v11142_v39  ;;  %v5119_v47 = vor.u32 1.1754944e-38, %v5118_v60  ;;  %v6241_v26 = vand.u32 2147483647, %v11142_v39 }
 0x470   : > { %v5111_v16 = vadd.f32 %v7424_v58, %v5110_v51  ;;  %7435 = vrcp.f32 %v11151_v50  ;;  %v5973_v37 = vsel %vm2274_vm12, %v5968_v18, %v12573_v29  ;;  %v12569_v27 = vrot.slane %v11148_v28, 6 }
 0x471   : > { %v5100_v38 = vsel %vm5099_vm7, %v7422_v17, %v5096_v59  ;;  %v11161_v17 = vadd.f32 %v10344_v12, %v5337_v15  ;;  %v6243_v45 = vand.u32 2147483648, %v11142_v39  ;;  %v6256_v60 = vand.u32 2147483647, %v11151_v50 }
 0x472   : > { %v5105_v30 = vsel %vm11136_vm0, %v5104_v22, %v5100_v38  ;;  %v5115_v10 = vsel %vm5114_vm8, %v7424_v58, %v5111_v16  ;;  %v6258_v59 = vand.u32 2147483648, %v11151_v50  ;;  %v11178_v40 = vadd.f32 %v10349_v21, %v5338_v7 }
 0x473   : > { %v5134_v9 = vmul.f32 %v5105_v30, %v8496_v1  ;;  %v7430_v57 = vpop.eup %7429  ;;  %v5120_v19 = vsel %vm5117_vm1, %v5119_v47, %v5115_v10  ;;  %vm6237_vm9 = vweird.f32 %v11142_v39  ;;  %vm6252_vm10 = vweird.f32 %v11151_v50 }
 0x474   : > { %v5135_v58 = vmul.f32 %v5120_v19, %v8498_v2  ;;  %v11173_v12 = vadd.f32 1.0, %v7430_v57  ;;  %v7432_v5 = vpop.eup %7431  ;;  %v5975_v21 = vsel %vm2274_vm12, %v5970_v36, %v12569_v27  ;;  %v6004_v38 = vmul.f32 %v5973_v37, %v8457_v13 }
 0x475   : > { %v5154_v14 = vsel %vm2274_vm12, %v5134_v9, 0.0  ;;  %v7434_v18 = vpop.eup %7433  ;;  %v11182_v0 = vadd.f32 1.0, %v7432_v5  ;;  %vm11193_vm11 = vcmp.eq.f32.partialorder %v6241_v26, 8.507059e+37  ;;  %v6244_v47 = vor.u32 1.1754944e-38, %v6243_v45  ;;  %v11212_v45 = vld [vmem:[%s12519_s6 + $0x30] sm:$0xff] }
 0x476   : > { %v5155_v51 = vsel %vm2274_vm12, %v5135_v58, 0.0  ;;  %7437 = vrcp.f32 %v11173_v12  ;;  %v6233_v22 = vmul.f32 %v7434_v18, %v11142_v39  ;;  %v7436_v16 = vpop.eup %7435  ;;  %v12570_v15 = vrot.slane %v11161_v17, 4 }
 0x477   : > { %v5156_v3 = vadd.f32 %v5155_v51, %v5154_v14  ;;  %7439 = vrcp.f32 %v11182_v0  ;;  %vm6238_vm13 = vweird.f32 %v7434_v18  ;;  %v6248_v9 = vmul.f32 %v7436_v16, %v11151_v50 }
 0x478   : > { %v6234_v10 = vsub.f32 1.0, %v6233_v22  ;;  %vm11200_vm14 = vcmp.eq.f32.partialorder %v6256_v60, 8.507059e+37  ;;  %v6259_v36 = vor.u32 1.1754944e-38, %v6258_v59  ;;  %vm6253_vm15 = vweird.f32 %v7436_v16  ;;  %v11219_v59 = vld [vmem:[%s12519_s6 + $0x38] sm:$0xff]  ;;  %vm6239_vm5 = vmor %vm6237_vm9, %vm6238_vm13 }
 0x479   : > { %5157 = vadd.xlane.f32.xlu0 %v5156_v3  ;;  %v5506_v57 = vand.u32 2147483647, %v11173_v12  ;;  %v5508_v19 = vand.u32 2147483648, %v11173_v12  ;;  %v6005_v26 = vmul.f32 %v5975_v21, %v8457_v13  ;;  %v6249_v58 = vsub.f32 1.0, %v6248_v9  ;;  %vm6254_vm7 = vmor %vm6252_vm10, %vm6253_vm15 }
 0x47a   : > { %v6235_v37 = vmul.f32 %v7434_v18, %v6234_v10  ;;  %vm5502_vm2 = vweird.f32 %v11173_v12  ;;  %v5521_v14 = vand.u32 2147483647, %v11182_v0  ;;  %v6018_v7 = vadd.f32 %v11212_v45, %v6004_v38 }
 0x47b   : > { %v5523_v60 = vand.u32 2147483648, %v11182_v0  ;;  %v6019_v51 = vadd.f32 %v11219_v59, %v6005_v26  ;;  %v12574_v3 = vrot.slane %v11178_v40, 4  ;;  %v5392_v22 = vsel %vm3086_vm6, %v12570_v15, %v5391_v63  ;;  %v12802_v63 = vld [vmem:[#allocation9_spill] sm:$0xff] }
 0x47c   : > { %v7438_v5 = vpop.eup %7437  ;;  %v6236_v21 = vadd.f32 %v7434_v18, %v6235_v37  ;;  %v6250_v38 = vmul.f32 %v7436_v16, %v6249_v58  ;;  %vm5517_vm0 = vweird.f32 %v11182_v0  ;;  %v6969_v26 = vmul.f32 -1.442695, %v6018_v7 }
 0x47d   : > { %v5498_v10 = vmul.f32 %v7438_v5, %v11173_v12  ;;  %vm5503_vm4 = vweird.f32 %v7438_v5  ;;  %v7440_v9 = vpop.eup %7439  ;;  %v6970_v27 = vmul.f32 -1.442695, %v6019_v51  ;;  %v5394_v48 = vsel %vm3086_vm6, %v12574_v3, %v5393_v52 }
 0x47e   : > { %v5421_v37 = vmul.f32 %v5392_v22, %v12802_v63  ;;  %v6240_v58 = vsel %vm6239_vm5, %v7434_v18, %v6236_v21  ;;  %v6251_v15 = vadd.f32 %v7436_v16, %v6250_v38  ;;  %v5513_v32 = vmul.f32 %v7440_v9, %v11182_v0  ;;  %v4559_v38 = vpop.xlane.xlu2 %4558  ;;  %vm5504_vm9 = vmor %vm5502_vm2, %vm5503_vm4 }
 0x47f   : > { %v5499_v4 = vsub.f32 1.0, %v5498_v10  ;;  %v6245_v29 = vsel %vm11193_vm11, %v6244_v47, %v6240_v58  ;;  %vm5518_vm8 = vweird.f32 %v7440_v9  ;;  %7441 = vpow2.f32 %v6969_v26 }
 0x480   : > { %vm2297_vm1 = vcmask 1024   ;;  %v6255_v39 = vsel %vm6254_vm7, %v7436_v16, %v6251_v15  ;;  %v6302_v52 = vmul.f32 %v6245_v29, %v8496_v1  ;;  %v5514_v7 = vsub.f32 1.0, %v5513_v32  ;;  %v4568_v16 = vpop.xlane.xlu1 %4567  ;;  %vm5519_vm11 = vmor %vm5517_vm0, %vm5518_vm8 }
 0x481   : > { %v5500_v18 = vmul.f32 %v7438_v5, %v5499_v4  ;;  %v6260_v51 = vsel %vm11200_vm14, %v6259_v36, %v6255_v39  ;;  %7443 = vpow2.f32 %v6970_v27  ;;  %v11249_v30 = vadd.f32 %v10821_v54, %v2279_v49  ;;  %v11256_v4 = vld [vmem:[%s12519_s6 + $0x40] sm:$0xff] }
 0x482   : > { %v5422_v50 = vmul.f32 %v5394_v48, %v12802_v63  ;;  %v6303_v47 = vmul.f32 %v6260_v51, %v8498_v2  ;;  %v5515_v21 = vmul.f32 %v7440_v9, %v5514_v7  ;;  %v5435_v32 = vadd.f32 %v11256_v4, %v5421_v37 }
 0x483   : > { %v5501_v22 = vadd.f32 %v7438_v5, %v5500_v18  ;;  %v5509_v29 = vor.u32 1.1754944e-38, %v5508_v19  ;;  %2298 = vst.msk [vmem:[%s10831_s13 + $0x30] sm:$0x3] %vm2297_vm1, %v11249_v30  ;;  %v11266_v27 = vadd.f32 %v10821_v54, %v4559_v38  ;;  %v11269_v15 = vadd.f32 %v10821_v54, %v4568_v16 }
 0x484   : > { %v5436_v36 = vadd.f32 %v11274_v6, %v5422_v50  ;;  %v6321_v12 = vadd.f32 %v6303_v47, %v6302_v52  ;;  %vm5507_vm10 = vcmp.eq.f32.partialorder %v5506_v57, 8.507059e+37  ;;  %v5516_v19 = vadd.f32 %v7440_v9, %v5515_v21 }
 0x485   : > { %v5505_v10 = vsel %vm5504_vm9, %v7438_v5, %v5501_v22  ;;  %v7442_v26 = vpop.eup %7441  ;;  %v5524_v37 = vor.u32 1.1754944e-38, %v5523_v60  ;;  %4583 = vst.msk [vmem:[%s10831_s13 + $0xd8] sm:$0xff] %vm2290_vm3, %v11266_v27  ;;  %v6957_v58 = vmul.f32 -1.442695, %v5435_v32  ;;  %vm5522_vm13 = vcmp.eq.f32.partialorder %v5521_v14, 8.507059e+37 }
 0x486   : > { %v5510_v48 = vsel %vm5507_vm10, %v5509_v29, %v5505_v10  ;;  %6322 = vadd.xlane.f32.xlu2 %v6321_v12  ;;  %v5520_v49 = vsel %vm5519_vm11, %v7440_v9, %v5516_v19  ;;  %v6074_v57 = vadd.f32 1.0, %v7442_v26  ;;  %4586 = vst.msk [vmem:[%s10831_s13 + $0xf0] sm:$0xff] %vm2290_vm3, %v11269_v15  ;;  %v6958_v18 = vmul.f32 -1.442695, %v5436_v36  ;;  %v4573_v9 = vpop.xlane.xlu0 %4572  ;;  %v4565_v14 = vpop.xlane.xlu2 %4564 }
 0x487   : > { %v5707_v5 = vmul.f32 %v5510_v48, %v8496_v1  ;;  %v7444_v39 = vpop.eup %7443  ;;  %v5525_v52 = vsel %vm5522_vm13, %v5524_v37, %v5520_v49  ;;  %7445 = vpow2.f32 %v6957_v58  ;;  %v2307_v51 = vsel %vm2297_vm1, %v11249_v30, -inf }
 0x488   : > { %v5708_v60 = vmul.f32 %v5525_v52, %v8498_v2  ;;  %v11290_v7 = vadd.f32 1.0, %v7444_v39  ;;  %7447 = vrcp.f32 %v6074_v57  ;;  %v11296_v50 = vadd.f32 %v10821_v54, %v4573_v9  ;;  %v5914_v39 = vld [vmem:[#allocation3 + $0x188] sm:$0xc0]  ;;  %v2857_v3 = vpop.xlane.xlu1 %2856 }
 0x489   : > { %7449 = vpow2.f32 %v6958_v18  ;;  %v11299_v47 = vadd.f32 %v10821_v54, %v4565_v14  ;;  %v2301_v21 = vsel %vm2290_vm3, %v10837_v33, -inf  ;;  %v11305_v16 = vsel %vm2290_vm3, %v10841_v35, -inf }
 0x48a   : > { %v5721_v0 = vadd.f32 %v5708_v60, %v5707_v5  ;;  %7451 = vrcp.f32 %v11290_v7  ;;  %v11309_v32 = vsel %vm2290_vm3, %v10844_v53, -inf  ;;  %v11313_v29 = vsel %vm2290_vm3, %v10972_v25, -inf  ;;  %4587 = vst.msk [vmem:[%s10831_s13 + $0xf8] sm:$0x3] %vm2297_vm1, %v11296_v50 }
 0x48b   : > { %v2302_v10 = vsel %vm2290_vm3, %v10967_v41, -inf  ;;  %v11324_v19 = vsel %vm2290_vm3, %v11103_v20, -inf  ;;  %v2308_v48 = vmax.f32 %v2301_v21, %v2307_v51  ;;  %4585 = vst.msk [vmem:[%s10831_s13 + $0xe8] sm:$0xff] %vm2290_vm3, %v11299_v47  ;;  %v6181_v58 = vand.u32 2147483647, %v6074_v57 }
 0x48c   : > { %5722 = vadd.xlane.f32.xlu0 %v5721_v0  ;;  %v6183_v49 = vand.u32 2147483648, %v6074_v57  ;;  %v5930_v9 = vadd.f32 %v10628_v61, %v5914_v39  ;;  %v6196_v14 = vand.u32 2147483647, %v11290_v7  ;;  %v6198_v51 = vand.u32 2147483648, %v11290_v7 }
 0x48d   : > { %v7446_v22 = vpop.eup %7445  ;;  %vm6177_vm15 = vweird.f32 %v6074_v57  ;;  %vm11343_vm2 = vcmp.eq.f32.partialorder %v6181_v58, 8.507059e+37  ;;  %vm6192_vm4 = vweird.f32 %v11290_v7  ;;  %v5915_v58 = vld [vmem:[#allocation3 + $0x20] sm:$0xc0] }
 0x48e   : > { %v7448_v38 = vpop.eup %7447  ;;  %v11315_v36 = vadd.f32 1.0, %v7446_v22  ;;  %v6184_v61 = vor.u32 1.1754944e-38, %v6183_v49  ;;  %v5958_v0 = vrot.slane %v5930_v9, 6  ;;  %vm11348_vm7 = vcmp.eq.f32.partialorder %v6196_v14, 8.507059e+37 }
 0x48f   : > { %v7450_v12 = vpop.eup %7449  ;;  %v6173_v26 = vmul.f32 %v7448_v38, %v6074_v57  ;;  %vm6178_vm14 = vweird.f32 %v7448_v38  ;;  %v5931_v9 = vadd.f32 %v10651_v43, %v5915_v58 }
 0x490   : > { %v7452_v37 = vpop.eup %7451  ;;  %v11329_v5 = vadd.f32 1.0, %v7450_v12  ;;  %7453 = vrcp.f32 %v11315_v36  ;;  %v11341_v12 = vmax.f32 %v2308_v48, %v2302_v10  ;;  %vm6179_vm5 = vmor %vm6177_vm15, %vm6178_vm14  ;;  %v6199_v10 = vor.u32 1.1754944e-38, %v6198_v51 }
 0x491   : > { %v6174_v18 = vsub.f32 1.0, %v6173_v26  ;;  %v6188_v60 = vmul.f32 %v7452_v37, %v11290_v7  ;;  %vm6193_vm0 = vweird.f32 %v7452_v37  ;;  %v5628_v57 = vand.u32 2147483648, %v11315_v36 }
 0x492   : > { %7455 = vrcp.f32 %v11329_v5  ;;  %v11354_v48 = vadd.f32 %v10821_v54, %v2857_v3  ;;  %vm6194_vm8 = vmor %vm6192_vm4, %vm6193_vm0  ;;  %vm5622_vm9 = vweird.f32 %v11315_v36  ;;  %v5626_v54 = vand.u32 2147483647, %v11315_v36 }
 0x493   : > { %v6175_v22 = vmul.f32 %v7448_v38, %v6174_v18  ;;  %v6189_v21 = vsub.f32 1.0, %v6188_v60  ;;  %v12808_v3 = vrot.slane %v11029_v62, 6  ;;  %v12810_v7 = vrot.slane %v10824_v31, 6 }
 0x494   : > { %12807 = vst [vmem:[#allocation10_spill] sm:$0xff] %v11354_v48  ;;  %v5629_v58 = vor.u32 1.1754944e-38, %v5628_v57  ;;  %v5641_v62 = vand.u32 2147483647, %v11329_v5  ;;  %v12812_v18 = vrot.slane %v11148_v28, 6  ;;  %vm5627_vm14 = vcmp.eq.f32.partialorder %v5626_v54, 8.507059e+37  ;;  %v2851_v54 = vpop.xlane.xlu0 %2850 }
 0x495   : > { %v6176_v39 = vadd.f32 %v7448_v38, %v6175_v22  ;;  %v6190_v52 = vmul.f32 %v7452_v37, %v6189_v21  ;;  %2881 = vst.msk [vmem:[%s10831_s13 + $0x42] sm:$0xff] %vm2290_vm3, %v11354_v48 }
 0x496   : > { %v7454_v24 = vpop.eup %7453 }
 0x497   : > { %v6180_v49 = vsel %vm6179_vm5, %v7448_v38, %v6176_v39  ;;  %v6191_v60 = vadd.f32 %v7452_v37, %v6190_v52  ;;  %v5618_v22 = vmul.f32 %v7454_v24, %v11315_v36  ;;  %v12809_v38 = vrot.slane %v11131_v11, 6 }
 0x498   : > { %v7456_v21 = vpop.eup %7455  ;;  %v6185_v14 = vsel %vm11343_vm2, %v6184_v61, %v6180_v49  ;;  %v5960_v61 = vsel %vm2274_vm12, %v5958_v0, %v12810_v7  ;;  %vm5623_vm10 = vweird.f32 %v7454_v24  ;;  %v12811_v0 = vrot.slane %v11032_v46, 6 }
 0x499   : > { %v5977_v43 = vsel %vm2274_vm12, %v12809_v38, %v12808_v3  ;;  %v6195_v52 = vsel %vm6194_vm8, %v7452_v37, %v6191_v60  ;;  %v6298_v51 = vmul.f32 %v6185_v14, %v8496_v1  ;;  %v5619_v26 = vsub.f32 1.0, %v5618_v22  ;;  %vm5624_vm11 = vmor %vm5622_vm9, %vm5623_vm10 }
 0x49a   : > { %v6200_v39 = vsel %vm11348_vm7, %v6199_v10, %v6195_v52  ;;  %v5633_v49 = vmul.f32 %v7456_v21, %v11329_v5  ;;  %v5961_v37 = vrot.slane %v5931_v9, 6  ;;  %v5643_v22 = vand.u32 2147483648, %v11329_v5 }
 0x49b   : > { %v6299_v11 = vmul.f32 %v6200_v39, %v8498_v2  ;;  %v5620_v48 = vmul.f32 %v7454_v24, %v5619_v26  ;;  %v5998_v31 = vmul.f32 %v5960_v61, %v8389_v34  ;;  %v5979_v10 = vsel %vm2274_vm12, %v12812_v18, %v12811_v0 }
 0x49c   : > { %v5634_v60 = vsub.f32 1.0, %v5633_v49  ;;  %v12813_v3 = vrot.slane %v10875_v8, 6  ;;  %v6006_v52 = vmul.f32 %v5977_v43, %v12802_v63  ;;  %vm5638_vm13 = vweird.f32 %v7456_v21 }
 0x49d   : > { %v6315_v57 = vadd.f32 %v6299_v11, %v6298_v51  ;;  %v5621_v14 = vadd.f32 %v7454_v24, %v5620_v48  ;;  %v6012_v46 = vadd.f32 %v11111_v55, %v5998_v31  ;;  %v6007_v48 = vmul.f32 %v5979_v10, %v12802_v63 }
 0x49e   : > { %v5963_v38 = vsel %vm2274_vm12, %v5961_v37, %v12813_v3  ;;  %v5635_v9 = vmul.f32 %v7456_v21, %v5634_v60  ;;  %v6020_v8 = vadd.f32 %v11256_v4, %v6006_v52  ;;  %vm5637_vm12 = vweird.f32 %v11329_v5  ;;  %v2854_v4 = vpop.xlane.xlu2 %2853  ;;  %v11403_v5 = vld [vmem:[#allocation4] ss:$0 sm:$0xff]  ;;  %v2860_v3 = vpop.xlane.xlu0 %2859 }
 0x49f   : > { %v5999_v26 = vmul.f32 %v5963_v38, %v8389_v34  ;;  %6316 = vadd.xlane.f32.xlu2 %v6315_v57  ;;  %v5625_v28 = vsel %vm5624_vm11, %v7454_v24, %v5621_v14  ;;  %vm5639_vm15 = vmor %vm5637_vm12, %vm5638_vm13  ;;  %v5644_v43 = vor.u32 1.1754944e-38, %v5643_v22  ;;  %v6963_v61 = vmul.f32 -1.442695, %v6012_v46  ;;  %v12820_v52 = vld [vmem:[#allocation14_spill] sm:$0xff] }
 0x4a0   : > { %v5630_v51 = vsel %vm5627_vm14, %v5629_v58, %v5625_v28  ;;  %v5636_v7 = vadd.f32 %v7456_v21, %v5635_v9  ;;  %v6021_v34 = vadd.f32 %v11274_v6, %v6007_v48  ;;  %v6971_v39 = vmul.f32 -1.442695, %v6020_v8 }
 0x4a1   : > { %v6013_v36 = vadd.f32 %v11117_v23, %v5999_v26  ;;  %vm5642_vm2 = vcmp.eq.f32.partialorder %v5641_v62, 8.507059e+37  ;;  %v5715_v24 = vmul.f32 %v5630_v51, %v8496_v1  ;;  %7457 = vpow2.f32 %v6963_v61 }
 0x4a2   : > { %v5640_v55 = vsel %vm5639_vm15, %v7456_v21, %v5636_v7  ;;  %v11406_v23 = vadd.f32 %v11403_v5, %v2851_v54  ;;  %v11409_v6 = vadd.f32 %v11403_v5, %v2854_v4  ;;  %v2866_v21 = vpop.xlane.xlu1 %2865  ;;  %v12814_v49 = vmax.f32 %v11305_v16, %v11324_v19 }
 0x4a3   : > { %v6964_v63 = vmul.f32 -1.442695, %v6013_v36  ;;  %v5645_v58 = vsel %vm5642_vm2, %v5644_v43, %v5640_v55  ;;  %v12815_v62 = vmax.f32 %v11309_v32, %v11313_v29  ;;  %v11419_v60 = vadd.f32 %v11403_v5, %v2866_v21  ;;  %v12817_v32 = vld [vmem:[#allocation13_spill] sm:$0xff] }
 0x4a4   : > { %v5716_v37 = vmul.f32 %v5645_v58, %v8498_v2  ;;  %2879 = vst.msk [vmem:[%s10831_s13 + $0x32] sm:$0xff] %vm2290_vm3, %v11406_v23  ;;  %v6972_v22 = vmul.f32 -1.442695, %v6021_v34  ;;  %v12816_v16 = vrot.slane %v11161_v17, 4  ;;  %v12818_v29 = vrot.slane %v12817_v32, 4 }
 0x4a5   : > { %v2309_v11 = vmax.f32 %v12815_v62, %v12814_v49  ;;  %7459 = vpow2.f32 %v6964_v63  ;;  %2880 = vst.msk [vmem:[%s10831_s13 + $0x3a] sm:$0xff] %vm2290_vm3, %v11409_v6  ;;  %v12819_v38 = vrot.slane %v11178_v40, 4  ;;  %v12821_v9 = vrot.slane %v12820_v52, 4 }
 0x4a6   : > { %7461 = vpow2.f32 %v6971_v39  ;;  %v5733_v0 = vadd.f32 %v5716_v37, %v5715_v24  ;;  %v5388_v19 = vsel %vm3086_vm6, %v12818_v29, %v12816_v16  ;;  %2884 = vst.msk [vmem:[%s10831_s13 + $0x5a] sm:$0xff] %vm2290_vm3, %v11419_v60  ;;  %v2863_v17 = vpop.xlane.xlu2 %2862  ;;  %v11447_v48 = vadd.f32 %v11403_v5, %v2860_v3  ;;  %v2871_v16 = vpop.xlane.xlu0 %2870 }
 0x4a7   : > { %v2311_v31 = vmax.f32 %v2309_v11, %v11341_v12  ;;  %7463 = vpow2.f32 %v6972_v22  ;;  %v7458_v18 = vpop.eup %7457  ;;  %v5419_v10 = vmul.f32 %v5388_v19, %v8457_v13  ;;  %v5390_v26 = vsel %vm3086_vm6, %v12821_v9, %v12819_v38 }
 0x4a8   : > { %5734 = vadd.xlane.f32.xlu0 %v5733_v0  ;;  %v11437_v14 = vadd.f32 1.0, %v7458_v18  ;;  %v11450_v8 = vadd.f32 %v11403_v5, %v2863_v17  ;;  %2882 = vst.msk [vmem:[%s10831_s13 + $0x4a] sm:$0xff] %vm2290_vm3, %v11447_v48  ;;  %v5420_v40 = vmul.f32 %v5390_v26, %v8457_v13  ;;  %v11497_v18 = vadd.f32 %v11403_v5, %v2871_v16 }
 0x4a9   : > { %v2312_v57 = vrot.slane %v2311_v31, 4  ;;  %v5433_v7 = vadd.f32 %v11212_v45, %v5419_v10 }
 0x4aa   : > { %7465 = vrcp.f32 %v11437_v14  ;;  %2883 = vst.msk [vmem:[%s10831_s13 + $0x52] sm:$0xff] %vm2290_vm3, %v11450_v8  ;;  %v6091_v34 = vand.u32 2147483647, %v11437_v14  ;;  %v6093_v39 = vand.u32 2147483648, %v11437_v14  ;;  %v3440_v13 = vpop.xlane.xlu1 %3439  ;;  %v5434_v24 = vadd.f32 %v11219_v59, %v5420_v40 }
 0x4ab   : > { %v7460_v12 = vpop.eup %7459  ;;  %v11459_v36 = vmax.f32 %v2311_v31, %v2312_v57  ;;  %v6955_v63 = vmul.f32 -1.442695, %v5433_v7  ;;  %vm6087_vm6 = vweird.f32 %v11437_v14  ;;  %v11480_v49 = vadd.f32 %v11403_v5, %v3440_v13  ;;  %2885 = vst.msk [vmem:[%s10831_s13 + $0x62] sm:$0x3] %vm2297_vm1, %v11497_v18 }
 0x4ac   : > { %v7462_v46 = vpop.eup %7461  ;;  %v11444_v28 = vadd.f32 1.0, %v7460_v12  ;;  %vm11482_vm0 = vcmp.eq.f32.partialorder %v6091_v34, 8.507059e+37  ;;  %v6094_v11 = vor.u32 1.1754944e-38, %v6093_v39  ;;  %v6956_v0 = vmul.f32 -1.442695, %v5434_v24 }
 0x4ad   : > { %v7464_v51 = vpop.eup %7463  ;;  %v11461_v43 = vadd.f32 1.0, %v7462_v46  ;;  %v2314_v4 = vrot.slane %v11459_v36, 2  ;;  %3466 = vst.msk [vmem:[%s10831_s13 + $0x6c] sm:$0xff] %vm2290_vm3, %v11480_v49 }
 0x4ae   : > { %7467 = vrcp.f32 %v11444_v28  ;;  %v11463_v61 = vadd.f32 1.0, %v7464_v51  ;;  %v6106_v55 = vand.u32 2147483647, %v11444_v28  ;;  %v6108_v45 = vand.u32 2147483648, %v11444_v28  ;;  %v3443_v7 = vpop.xlane.xlu2 %3442  ;;  %v3437_v16 = vpop.xlane.xlu0 %3436 }
 0x4af   : > { %7469 = vrcp.f32 %v11461_v43  ;;  %vm6102_vm4 = vweird.f32 %v11444_v28  ;;  %vm6207_vm7 = vweird.f32 %v11461_v43  ;;  %v6211_v19 = vand.u32 2147483647, %v11461_v43 }
 0x4b0   : > { %7471 = vrcp.f32 %v11463_v61  ;;  %v7466_v54 = vpop.eup %7465  ;;  %vm11487_vm5 = vcmp.eq.f32.partialorder %v6106_v55, 8.507059e+37  ;;  %v6109_v31 = vor.u32 1.1754944e-38, %v6108_v45  ;;  %v6213_v17 = vand.u32 2147483648, %v11461_v43 }
 0x4b1   : > { %v6083_v21 = vmul.f32 %v7466_v54, %v11437_v14  ;;  %7473 = vpow2.f32 %v6955_v63  ;;  %vm6088_vm8 = vweird.f32 %v7466_v54  ;;  %vm6222_vm10 = vweird.f32 %v11463_v61 }
 0x4b2   : > { %7475 = vpow2.f32 %v6956_v0  ;;  %v6226_v26 = vand.u32 2147483647, %v11463_v61  ;;  %vm6089_vm11 = vmor %vm6087_vm6, %vm6088_vm8  ;;  %v6228_v40 = vand.u32 2147483648, %v11463_v61  ;;  %v3449_v34 = vpop.xlane.xlu1 %3448  ;;  %v11514_v45 = vadd.f32 %v11403_v5, %v3443_v7 }
 0x4b3   : > { %v6084_v22 = vsub.f32 1.0, %v6083_v21  ;;  %v6214_v0 = vor.u32 1.1754944e-38, %v6213_v17  ;;  %vm6212_vm2 = vcmp.eq.f32.partialorder %v6211_v19, 8.507059e+37 }
 0x4b4   : > { %v7468_v58 = vpop.eup %7467  ;;  %3467 = vst.msk [vmem:[%s10831_s13 + $0x74] sm:$0xff] %vm2290_vm3, %v11514_v45  ;;  %v6229_v37 = vor.u32 1.1754944e-38, %v6228_v40 }
 0x4b5   : > { %v6098_v59 = vmul.f32 %v7468_v58, %v11444_v28  ;;  %v7470_v32 = vpop.eup %7469  ;;  %v6085_v12 = vmul.f32 %v7466_v54, %v6084_v22  ;;  %vm6103_vm9 = vweird.f32 %v7468_v58 }
 0x4b6   : > { %v7472_v10 = vpop.eup %7471  ;;  %v6203_v57 = vmul.f32 %v7470_v32, %v11461_v43  ;;  %vm6208_vm13 = vweird.f32 %v7470_v32  ;;  %vm6104_vm14 = vmor %vm6102_vm4, %vm6103_vm9  ;;  %vm6227_vm4 = vcmp.eq.f32.partialorder %v6226_v26, 8.507059e+37  ;;  %v3452_v19 = vpop.xlane.xlu2 %3451 }
 0x4b7   : > { %v6099_v29 = vsub.f32 1.0, %v6098_v59  ;;  %v6218_v38 = vmul.f32 %v7472_v10, %v11463_v61  ;;  %v6086_v52 = vadd.f32 %v7466_v54, %v6085_v12  ;;  %v7474_v39 = vpop.eup %7473  ;;  %vm6223_vm12 = vweird.f32 %v7472_v10  ;;  %vm6209_vm15 = vmor %vm6207_vm7, %vm6208_vm13 }
 0x4b8   : > { %v6204_v9 = vsub.f32 1.0, %v6203_v57  ;;  %v11518_v21 = vadd.f32 1.0, %v7474_v39  ;;  %v7476_v59 = vpop.eup %7475  ;;  %vm6224_vm6 = vmor %vm6222_vm10, %vm6223_vm12  ;;  %v11549_v26 = vadd.f32 %v11403_v5, %v3452_v19  ;;  %v4589_v39 = vsel %vm2290_vm3, %v11106_v42, -inf }
 0x4b9   : > { %v6100_v3 = vmul.f32 %v7468_v58, %v6099_v29  ;;  %v6219_v51 = vsub.f32 1.0, %v6218_v38  ;;  %v6090_v55 = vsel %vm6089_vm11, %v7466_v54, %v6086_v52  ;;  %v11530_v62 = vadd.f32 1.0, %v7476_v59 }
 0x4ba   : > { %v6205_v13 = vmul.f32 %v7470_v32, %v6204_v9  ;;  %v6095_v14 = vsel %vm11482_vm0, %v6094_v11, %v6090_v55  ;;  %7477 = vrcp.f32 %v11518_v21  ;;  %v4028_v17 = vpop.xlane.xlu1 %4027  ;;  %v11543_v38 = vadd.f32 %v11403_v5, %v3449_v34  ;;  %3470 = vst.msk [vmem:[%s10831_s13 + $0x8c] sm:$0xff] %vm2290_vm3, %v11549_v26 }
 0x4bb   : > { %v6101_v46 = vadd.f32 %v7468_v58, %v6100_v3  ;;  %v6220_v63 = vmul.f32 %v7472_v10, %v6219_v51  ;;  %v6292_v22 = vmul.f32 %v6095_v14, %v8496_v1  ;;  %7479 = vrcp.f32 %v11530_v62 }
 0x4bc   : > { %v6206_v28 = vadd.f32 %v7470_v32, %v6205_v13  ;;  %3469 = vst.msk [vmem:[%s10831_s13 + $0x84] sm:$0xff] %vm2290_vm3, %v11543_v38  ;;  %v4588_v51 = vsel %vm2290_vm3, %v10964_v56, -inf  ;;  %v11561_v7 = vadd.f32 %v11403_v5, %v4028_v17  ;;  %v4590_v55 = vsel %vm2290_vm3, %v11266_v27, -inf }
 0x4bd   : > { %v6105_v24 = vsel %vm6104_vm14, %v7468_v58, %v6101_v46  ;;  %v6221_v58 = vadd.f32 %v7472_v10, %v6220_v63  ;;  %v4596_v63 = vsel %vm2297_vm1, %v11296_v50, -inf  ;;  %v4592_v59 = vsel %vm2290_vm3, %v11299_v47, -inf }
 0x4be   : > { %v6110_v54 = vsel %vm11487_vm5, %v6109_v31, %v6105_v24  ;;  %v6210_v11 = vsel %vm6209_vm15, %v7470_v32, %v6206_v28  ;;  %v2315_v32 = vmax.f32 %v11459_v36, %v2314_v4  ;;  %v3446_v4 = vpop.xlane.xlu0 %3445  ;;  %v4594_v24 = vsel %vm2290_vm3, %v11269_v15, -inf  ;;  %4052 = vst.msk [vmem:[%s10831_s13 + $0xa6] sm:$0xff] %vm2290_vm3, %v11561_v7 }
 0x4bf   : > { %v6293_v29 = vmul.f32 %v6110_v54, %v8498_v2  ;;  %v6215_v12 = vsel %vm6212_vm2, %v6214_v0, %v6210_v11  ;;  %v6225_v57 = vsel %vm6224_vm6, %v7472_v10, %v6221_v58  ;;  %v11546_v10 = vadd.f32 %v11403_v5, %v3437_v16  ;;  %v4025_v11 = vpop.xlane.xlu2 %4024 }
 0x4c0   : > { %v6230_v43 = vsel %vm6227_vm4, %v6229_v37, %v6225_v57  ;;  %v6300_v3 = vmul.f32 %v6215_v12, %v8496_v1  ;;  %v7478_v52 = vpop.eup %7477  ;;  %v2316_v40 = vrot.slane %v2315_v32, 1  ;;  %v11564_v34 = vadd.f32 %v11403_v5, %v3446_v4 }
 0x4c1   : > { %v6306_v31 = vadd.f32 %v6293_v29, %v6292_v22  ;;  %v6301_v61 = vmul.f32 %v6230_v43, %v8498_v2  ;;  %v5588_v36 = vmul.f32 %v7478_v52, %v11518_v21  ;;  %v7480_v46 = vpop.eup %7479  ;;  %3465 = vst.msk [vmem:[%s10831_s13 + $0x64] sm:$0xff] %vm2290_vm3, %v11546_v10  ;;  %v5598_v54 = vand.u32 2147483648, %v11518_v21 }
 0x4c2   : > { %v5603_v14 = vmul.f32 %v7480_v46, %v11530_v62  ;;  %vm5593_vm0 = vweird.f32 %v7478_v52  ;;  %v5596_v28 = vand.u32 2147483647, %v11518_v21  ;;  %3468 = vst.msk [vmem:[%s10831_s13 + $0x7c] sm:$0xff] %vm2290_vm3, %v11564_v34  ;;  %v11588_v16 = vmax.f32 %v2315_v32, %v2316_v40  ;;  %v4037_v37 = vpop.xlane.xlu1 %4036 }
 0x4c3   : > { %6307 = vadd.xlane.f32.xlu0 %v6306_v31  ;;  %v6318_v9 = vadd.f32 %v6301_v61, %v6300_v3  ;;  %v5589_v13 = vsub.f32 1.0, %v5588_v36  ;;  %vm5592_vm5 = vweird.f32 %v11518_v21  ;;  %v5611_v29 = vand.u32 2147483647, %v11530_v62 }
 0x4c4   : > { %v5604_v0 = vsub.f32 1.0, %v5603_v14  ;;  %v5613_v58 = vand.u32 2147483648, %v11530_v62  ;;  %vm5608_vm7 = vweird.f32 %v7480_v46  ;;  %v11594_v57 = vadd.f32 %v11403_v5, %v4025_v11  ;;  %vm5594_vm8 = vmor %vm5592_vm5, %vm5593_vm0 }
 0x4c5   : > { %v5590_v22 = vmul.f32 %v7478_v52, %v5589_v13  ;;  %v4597_v43 = vmax.f32 %v4590_v55, %v4596_v63  ;;  %v4593_v3 = vmax.f32 %v4588_v51, %v4592_v59  ;;  %v5599_v32 = vor.u32 1.1754944e-38, %v5598_v54 }
 0x4c6   : > { %v5605_v12 = vmul.f32 %v7480_v46, %v5604_v0  ;;  %v11598_v21 = vadd.f32 %v11403_v5, %v4037_v37  ;;  %vm5597_vm9 = vcmp.eq.f32.partialorder %v5596_v28, 8.507059e+37  ;;  %vm5607_vm10 = vweird.f32 %v11530_v62  ;;  %4051 = vst.msk [vmem:[%s10831_s13 + $0x9e] sm:$0xff] %vm2290_vm3, %v11594_v57  ;;  %v3457_v17 = vpop.xlane.xlu0 %3456 }
 0x4c7   : > { %v5591_v31 = vadd.f32 %v7478_v52, %v5590_v22  ;;  %vm5609_vm11 = vmor %vm5607_vm10, %vm5608_vm7  ;;  %v5614_v36 = vor.u32 1.1754944e-38, %v5613_v58  ;;  %v11608_v4 = vadd.f32 %v11403_v5, %v3457_v17  ;;  %v4595_v51 = vmax.f32 %v4589_v39, %v4594_v24  ;;  %v4034_v39 = vpop.xlane.xlu2 %4033 }
 0x4c8   : > { %v5606_v19 = vadd.f32 %v7480_v46, %v5605_v12  ;;  %4055 = vst.msk [vmem:[%s10831_s13 + $0xbe] sm:$0xff] %vm2290_vm3, %v11598_v21  ;;  %vm5612_vm13 = vcmp.eq.f32.partialorder %v5611_v29, 8.507059e+37  ;;  %v4591_v55 = vsel %vm2290_vm3, %v11100_v44, -inf  ;;  %v2319_v14 = vsub.f32 %v10841_v35, %v11588_v16 }
 0x4c9   : > { %v5595_v61 = vsel %vm5594_vm8, %v7478_v52, %v5591_v31  ;;  %v2318_v52 = vsub.f32 %v10844_v53, %v11588_v16  ;;  %3471 = vst.msk [vmem:[%s10831_s13 + $0x94] sm:$0x3] %vm2297_vm1, %v11608_v4  ;;  %v2320_v63 = vsub.f32 %v10837_v33, %v11588_v16  ;;  %v4599_v59 = vmax.f32 %v4597_v43, %v4591_v55 }
 0x4ca   : > { %v5610_v40 = vsel %vm5609_vm11, %v7480_v46, %v5606_v19  ;;  %v4598_v53 = vmax.f32 %v4593_v3, %v4595_v51  ;;  %v5141_v24 = vpop.xlane.xlu1 %5140  ;;  %v2322_v54 = vsub.f32 %v10972_v25, %v11588_v16  ;;  %v2327_v28 = vmul.f32 1.442695, %v2319_v14 }
 0x4cb   : > { %6319 = vadd.xlane.f32.xlu0 %v6318_v9  ;;  %v5600_v9 = vsel %vm5597_vm9, %v5599_v32, %v5595_v61  ;;  %v5615_v13 = vsel %vm5612_vm13, %v5614_v36, %v5610_v40  ;;  %v2325_v22 = vmul.f32 1.442695, %v2318_v52  ;;  %v11628_v0 = vadd.f32 %v11403_v5, %v4034_v39 }
 0x4cc   : > { %v5713_v62 = vmul.f32 %v5600_v9, %v8496_v1  ;;  %v5714_v46 = vmul.f32 %v5615_v13, %v8498_v2  ;;  %v2321_v1 = vsub.f32 %v10967_v41, %v11588_v16  ;;  %v2323_v33 = vsub.f32 %v11103_v20, %v11588_v16 }
 0x4cd   : > { %v11633_v2 = vadd.f32 %v11403_v5, %v5141_v24  ;;  %7481 = vpow2.f32 %v2325_v22  ;;  %v2329_v41 = vmul.f32 1.442695, %v2320_v63  ;;  %v2324_v25 = vsub.f32 %v11249_v30, %v11588_v16  ;;  %4054 = vst.msk [vmem:[%s10831_s13 + $0xb6] sm:$0xff] %vm2290_vm3, %v11628_v0 }
 0x4ce   : > { %v5730_v35 = vadd.f32 %v5714_v46, %v5713_v62  ;;  %v2331_v29 = vmul.f32 1.442695, %v2321_v1  ;;  %v4600_v58 = vmax.f32 %v4598_v53, %v4599_v59  ;;  %v4022_v11 = vpop.xlane.xlu0 %4021  ;;  %7483 = vpow2.f32 %v2327_v28 }
 0x4cf   : > { %v2333_v37 = vmul.f32 1.442695, %v2322_v54  ;;  %5167 = vst.msk [vmem:[%s10831_s13 + $0x102] sm:$0xff] %vm2290_vm3, %v11633_v2  ;;  %v11644_v20 = vadd.f32 %v11403_v5, %v4022_v11  ;;  %7485 = vpow2.f32 %v2329_v41  ;;  %v2335_v31 = vmul.f32 1.442695, %v2323_v33  ;;  %v5144_v43 = vpop.xlane.xlu2 %5143 }
 0x4d0   : > { %7487 = vpow2.f32 %v2331_v29  ;;  %v2337_v30 = vmul.f32 1.442695, %v2324_v25  ;;  %v4601_v16 = vrot.slane %v4600_v58, 4  ;;  %v11654_v61 = vadd.f32 %v11403_v5, %v5144_v43 }
 0x4d1   : > { %4050 = vst.msk [vmem:[%s10831_s13 + $0x96] sm:$0xff] %vm2290_vm3, %v11644_v20  ;;  %7489 = vpow2.f32 %v2333_v37 }
 0x4d2   : > { %v5150_v3 = vpop.xlane.xlu1 %5149  ;;  %7491 = vpow2.f32 %v2335_v31  ;;  %v4602_v51 = vmax.f32 %v4600_v58, %v4601_v16  ;;  %5168 = vst.msk [vmem:[%s10831_s13 + $0x10a] sm:$0xff] %vm2290_vm3, %v11654_v61 }
 0x4d3   : > { %5731 = vadd.xlane.f32.xlu0 %v5730_v35  ;;  %v11649_v12 = vpop.eup %7481  ;;  %v11657_v19 = vadd.f32 %v11403_v5, %v5150_v3  ;;  %7493 = vpow2.f32 %v2337_v30 }
 0x4d4   : > { %v11651_v32 = vpop.eup %7483  ;;  %v2339_v9 = vsel %vm2290_vm3, %v11649_v12, 0.0  ;;  %v4603_v46 = vrot.slane %v4602_v51, 2 }
 0x4d5   : > { %v11659_v17 = vpop.eup %7485  ;;  %v2340_v36 = vsel %vm2290_vm3, %v11651_v32, 0.0  ;;  %5170 = vst.msk [vmem:[%s10831_s13 + $0x11a] sm:$0xff] %vm2290_vm3, %v11657_v19 }
 0x4d6   : > { %v11665_v52 = vpop.eup %7487  ;;  %v4031_v40 = vpop.xlane.xlu0 %4030  ;;  %v2341_v62 = vadd.f32 %v2340_v36, %v2339_v9  ;;  %v2342_v13 = vsel %vm2290_vm3, %v11659_v17, 0.0  ;;  %v4604_v29 = vmax.f32 %v4602_v51, %v4603_v46 }
 0x4d7   : > { %v11674_v55 = vadd.f32 %v11403_v5, %v4031_v40  ;;  %v11678_v14 = vpop.eup %7489  ;;  %v2344_v59 = vsel %vm2290_vm3, %v11665_v52, 0.0  ;;  %v5153_v39 = vpop.xlane.xlu2 %5152 }
 0x4d8   : > { %v2343_v63 = vadd.f32 %v2342_v13, %v2341_v62  ;;  %v11685_v53 = vpop.eup %7491  ;;  %v2346_v54 = vsel %vm2290_vm3, %v11678_v14, 0.0  ;;  %v11692_v28 = vadd.f32 %v11403_v5, %v5153_v39  ;;  %v4605_v37 = vrot.slane %v4604_v29, 1 }
 0x4d9   : > { %4053 = vst.msk [vmem:[%s10831_s13 + $0xae] sm:$0xff] %vm2290_vm3, %v11674_v55  ;;  %v11689_v22 = vpop.eup %7493  ;;  %v2348_v41 = vsel %vm2290_vm3, %v11685_v53, 0.0 }
 0x4da   : > { %v2345_v1 = vadd.f32 %v2344_v59, %v2343_v63  ;;  %v5729_v24 = vpop.xlane.xlu1 %5728  ;;  %5171 = vst.msk [vmem:[%s10831_s13 + $0x122] sm:$0xff] %vm2290_vm3, %v11692_v28  ;;  %v2350_v58 = vsel %vm2297_vm1, %v11689_v22, 0.0  ;;  %v4606_v40 = vmax.f32 %v4604_v29, %v4605_v37  ;;  %v2894_v63 = vsel %vm2297_vm1, %v11497_v18, -inf  ;;  %v12826_v59 = vld [vmem:[#allocation10_spill] sm:$0xff] }
 0x4db   : > { %v11695_v35 = vadd.f32 %v11403_v5, %v5729_v24  ;;  %v2888_v46 = vsel %vm2290_vm3, %v12826_v59, -inf }
 0x4dc   : > { %v2347_v33 = vadd.f32 %v2346_v54, %v2345_v1  ;;  %v4607_v39 = vsub.f32 %v10964_v56, %v4606_v40  ;;  %v4608_v24 = vsub.f32 %v11106_v42, %v4606_v40  ;;  %v2886_v54 = vsel %vm2290_vm3, %v11406_v23, -inf }
 0x4dd   : > { %5753 = vst.msk [vmem:[%s10831_s13 + $0x13c] sm:$0xff] %vm2290_vm3, %v11695_v35  ;;  %v2895_v56 = vmax.f32 %v2888_v46, %v2894_v63  ;;  %v2889_v63 = vsel %vm2290_vm3, %v11447_v48, -inf }
 0x4de   : > { %v2349_v25 = vadd.f32 %v2348_v41, %v2347_v33  ;;  %v4042_v30 = vpop.xlane.xlu0 %4041  ;;  %v2887_v33 = vsel %vm2290_vm3, %v11409_v6, -inf  ;;  %v2890_v41 = vsel %vm2290_vm3, %v11450_v8, -inf }
 0x4df   : > { %v11708_v43 = vadd.f32 %v11403_v5, %v4042_v30  ;;  %v5726_v3 = vpop.xlane.xlu2 %5725 }
 0x4e0   : > { %v2351_v11 = vadd.f32 %v2350_v58, %v2349_v25  ;;  %v11711_v36 = vadd.f32 %v11403_v5, %v5726_v3  ;;  %v4609_v25 = vsub.f32 %v11266_v27, %v4606_v40  ;;  %v2892_v58 = vsel %vm2290_vm3, %v11419_v60, -inf }
 0x4e1   : > { %4056 = vst.msk [vmem:[%s10831_s13 + $0xc6] sm:$0x3] %vm2297_vm1, %v11708_v43  ;;  %v4610_v27 = vsub.f32 %v11100_v44, %v4606_v40  ;;  %v4614_v3 = vmul.f32 1.442695, %v4607_v39  ;;  %v4612_v44 = vsub.f32 %v11269_v15, %v4606_v40 }
 0x4e2   : > { %v2352_v31 = vrot.slane %v2351_v11, 4  ;;  %v5743_v9 = vpop.xlane.xlu1 %5742  ;;  %5752 = vst.msk [vmem:[%s10831_s13 + $0x134] sm:$0xff] %vm2290_vm3, %v11711_v36  ;;  %v4618_v46 = vmul.f32 1.442695, %v4609_v25 }
 0x4e3   : > { %v11714_v51 = vadd.f32 %v11403_v5, %v5743_v9  ;;  %v4611_v9 = vsub.f32 %v11299_v47, %v4606_v40  ;;  %v4620_v47 = vmul.f32 1.442695, %v4610_v27 }
 0x4e4   : > { %v2353_v16 = vadd.f32 %v2352_v31, %v2351_v11 }
 0x4e5   : > { %5757 = vst.msk [vmem:[%s10831_s13 + $0x15c] sm:$0x3] %vm2297_vm1, %v11714_v51  ;;  %v4622_v39 = vmul.f32 1.442695, %v4611_v9 }
 0x4e6   : > { %v2354_v62 = vrot.slane %v2353_v16, 2  ;;  %v5138_v29 = vpop.xlane.xlu0 %5137 }
 0x4e7   : > { %v11741_v42 = vadd.f32 %v11403_v5, %v5138_v29  ;;  %v5738_v37 = vpop.xlane.xlu2 %5737  ;;  %v2897_v29 = vmax.f32 %v2895_v56, %v2889_v63 }
 0x4e8   : > { %v2355_v13 = vadd.f32 %v2354_v62, %v2353_v16  ;;  %v11744_v30 = vadd.f32 %v11403_v5, %v5738_v37  ;;  %v2891_v62 = vmax.f32 %v2886_v54, %v2890_v41 }
 0x4e9   : > { %5166 = vst.msk [vmem:[%s10831_s13 + $0xfa] sm:$0xff] %vm2290_vm3, %v11741_v42 }
 0x4ea   : > { %v2356_v1 = vrot.slane %v2355_v13, 1  ;;  %v6314_v31 = vpop.xlane.xlu1 %6313  ;;  %5756 = vst.msk [vmem:[%s10831_s13 + $0x154] sm:$0xff] %vm2290_vm3, %v11744_v30 }
 0x4eb   : > { %v11747_v16 = vadd.f32 %v11403_v5, %v6314_v31  ;;  %v4624_v31 = vmul.f32 1.442695, %v4612_v44 }
 0x4ec   : > { %v2357_v11 = vadd.f32 %v2356_v1, %v2355_v13  ;;  %v4616_v13 = vmul.f32 1.442695, %v4608_v24  ;;  %v2893_v1 = vmax.f32 %v2887_v33, %v2892_v58  ;;  %v4613_v24 = vsub.f32 %v11296_v50, %v4606_v40 }
 0x4ed   : > { %6338 = vst.msk [vmem:[%s10831_s13 + $0x16e] sm:$0xff] %vm2290_vm3, %v11747_v16 }
 0x4ee   : > { %7495 = vrcp.f32 %v2357_v11  ;;  %v2896_v54 = vmax.f32 %v2891_v62, %v2893_v1  ;;  %v4626_v33 = vmul.f32 1.442695, %v4613_v24  ;;  %v2369_v27 = vand.u32 2147483648, %v2357_v11 }
 0x4ef   : > { %7497 = vpow2.f32 %v4614_v3  ;;  %v2367_v9 = vand.u32 2147483647, %v2357_v11  ;;  %vm2363_vm12 = vweird.f32 %v2357_v11 }
 0x4f0   : > { %7499 = vpow2.f32 %v4616_v13  ;;  %v2898_v37 = vmax.f32 %v2896_v54, %v2897_v29 }
 0x4f1   : > { %7501 = vpow2.f32 %v4618_v46  ;;  %vm2368_vm2 = vcmp.eq.f32.partialorder %v2367_v9, 8.507059e+37 }
 0x4f2   : > { %7503 = vpow2.f32 %v4620_v47  ;;  %v2899_v15 = vrot.slane %v2898_v37, 4  ;;  %v2370_v47 = vor.u32 1.1754944e-38, %v2369_v27 }
 0x4f3   : > { %7505 = vpow2.f32 %v4622_v39 }
 0x4f4   : > { %v7496_v41 = vpop.eup %7495  ;;  %7507 = vpow2.f32 %v4624_v31  ;;  %v2900_v54 = vmax.f32 %v2898_v37, %v2899_v15 }
 0x4f5   : > { %v2359_v25 = vmul.f32 %v7496_v41, %v2357_v11  ;;  %v11764_v58 = vpop.eup %7497  ;;  %vm2364_vm14 = vweird.f32 %v7496_v41  ;;  %7509 = vpow2.f32 %v4626_v33 }
 0x4f6   : > { %v11766_v63 = vpop.eup %7499  ;;  %v4628_v50 = vsel %vm2290_vm3, %v11764_v58, 0.0  ;;  %vm2365_vm15 = vmor %vm2363_vm12, %vm2364_vm14  ;;  %v2901_v9 = vrot.slane %v2900_v54, 2 }
 0x4f7   : > { %v2360_v56 = vsub.f32 1.0, %v2359_v25  ;;  %v11770_v40 = vpop.eup %7501  ;;  %v4629_v62 = vsel %vm2290_vm3, %v11766_v63, 0.0 }
 0x4f8   : > { %v11774_v13 = vpop.eup %7503  ;;  %v4630_v46 = vadd.f32 %v4629_v62, %v4628_v50  ;;  %v4631_v29 = vsel %vm2290_vm3, %v11770_v40, 0.0 }
 0x4f9   : > { %v2361_v3 = vmul.f32 %v7496_v41, %v2360_v56  ;;  %v11778_v44 = vpop.eup %7505  ;;  %v4633_v31 = vsel %vm2290_vm3, %v11774_v13, 0.0 }
 0x4fa   : > { %v4632_v39 = vadd.f32 %v4631_v29, %v4630_v46  ;;  %v11782_v25 = vpop.eup %7507  ;;  %v4635_v56 = vsel %vm2290_vm3, %v11778_v44, 0.0 }
 0x4fb   : > { %v2362_v1 = vadd.f32 %v7496_v41, %v2361_v3  ;;  %v11795_v27 = vpop.eup %7509 }
 0x4fc   : > { %v4634_v33 = vadd.f32 %v4633_v31, %v4632_v39  ;;  %v4639_v62 = vsel %vm2297_vm1, %v11795_v27, 0.0 }
 0x4fd   : > { %v2366_v24 = vsel %vm2365_vm15, %v7496_v41, %v2362_v1  ;;  %v2902_v1 = vmax.f32 %v2900_v54, %v2901_v9  ;;  %v6328_v54 = vpop.xlane.xlu1 %6327  ;;  %v3472_v9 = vsel %vm2290_vm3, %v11546_v10, -inf }
 0x4fe   : > { %v2371_v11 = vsel %vm2368_vm2, %v2370_v47, %v2366_v24  ;;  %v4636_v3 = vadd.f32 %v4635_v56, %v4634_v33  ;;  %v6311_v47 = vpop.xlane.xlu2 %6310  ;;  %v11826_v33 = vadd.f32 %v11403_v5, %v6328_v54 }
 0x4ff   : > { %v2374_v41 = vmul.f32 %v11659_v17, %v2371_v11  ;;  %v2372_v37 = vmul.f32 %v11649_v12, %v2371_v11  ;;  %v2373_v15 = vmul.f32 %v11651_v32, %v2371_v11  ;;  %v2376_v50 = vmul.f32 %v11678_v14, %v2371_v11 }
 0x500   : > { %v2375_v17 = vmul.f32 %v11665_v52, %v2371_v11  ;;  %v4637_v12 = vsel %vm2290_vm3, %v11782_v25, 0.0  ;;  %v2377_v32 = vmul.f32 %v11685_v53, %v2371_v11  ;;  %v2378_v52 = vmul.f32 %v11689_v22, %v2371_v11  ;;  %v5147_v53 = vpop.xlane.xlu0 %5146  ;;  %6342 = vst.msk [vmem:[%s10831_s13 + $0x18e] sm:$0x3] %vm2297_vm1, %v11826_v33 }
 0x501   : > { %2405 = vperm.xlu0 %7021, %v2374_v41   ;;  %2381 = vst.msk [vmem:[%s11788_s17 + $0x10] sm:$0xff] %vm2290_vm3, %v2374_v41  ;;  %2395 = vperm.xlu1 %7022, %v2372_v37   ;;  %v4638_v14 = vadd.f32 %v4637_v12, %v4636_v3  ;;  %v11820_v39 = vadd.f32 %v11403_v5, %v5147_v53  ;;  %v2903_v22 = vrot.slane %v2902_v1, 1  ;;  %v3474_v3 = vsel %vm2290_vm3, %v11514_v45, -inf }
 0x502   : > { %2379 = vst.msk [vmem:[%s11788_s17] sm:$0xff] %vm2290_vm3, %v2372_v37  ;;  %2400 = vperm.xlu2 %7023, %v2373_v15   ;;  %v11823_v24 = vadd.f32 %v11403_v5, %v6311_v47  ;;  %v3480_v37 = vsel %vm2297_vm1, %v11608_v4, -inf }
 0x503   : > { %2380 = vst.msk [vmem:[%s11788_s17 + $0x8] sm:$0xff] %vm2290_vm3, %v2373_v15  ;;  %v4640_v46 = vadd.f32 %v4639_v62, %v4638_v14  ;;  %v2904_v41 = vmax.f32 %v2902_v1, %v2903_v22  ;;  %v3481_v14 = vmax.f32 %v3474_v3, %v3480_v37  ;;  %v3475_v22 = vsel %vm2290_vm3, %v11564_v34, -inf }
 0x504   : > { %2383 = vst.msk [vmem:[%s11788_s17 + $0x20] sm:$0xff] %vm2290_vm3, %v2376_v50 }
 0x505   : > { %2382 = vst.msk [vmem:[%s11788_s17 + $0x18] sm:$0xff] %vm2290_vm3, %v2375_v17  ;;  %v4641_v29 = vrot.slane %v4640_v46, 4  ;;  %v2906_v53 = vsub.f32 %v11409_v6, %v2904_v41  ;;  %v2907_v47 = vsub.f32 %v12826_v59, %v2904_v41  ;;  %v2909_v37 = vsub.f32 %v11450_v8, %v2904_v41 }
 0x506   : > { %2384 = vst.msk [vmem:[%s11788_s17 + $0x28] sm:$0xff] %vm2290_vm3, %v2377_v32  ;;  %v6323_v1 = vpop.xlane.xlu2 %6322 }
 0x507   : > { %2385 = vst.msk [vmem:[%s11788_s17 + $0x30] sm:$0x3] %vm2297_vm1, %v2378_v52  ;;  %v4642_v31 = vadd.f32 %v4641_v29, %v4640_v46  ;;  %v3476_v46 = vsel %vm2290_vm3, %v11543_v38, -inf  ;;  %v2905_v29 = vsub.f32 %v11406_v23, %v2904_v41  ;;  %v2914_v23 = vmul.f32 1.442695, %v2906_v53 }
 0x508   : > { %5169 = vst.msk [vmem:[%s10831_s13 + $0x112] sm:$0xff] %vm2290_vm3, %v11820_v39  ;;  %v3477_v54 = vmax.f32 %v3472_v9, %v3476_v46  ;;  %v2916_v6 = vmul.f32 1.442695, %v2907_v47 }
 0x509   : > { %2415 = vperm.xlu0 %7021, %v2376_v50   ;;  %2410 = vperm.xlu1 %7022, %v2375_v17   ;;  %v4643_v11 = vrot.slane %v4642_v31, 2  ;;  %6337 = vst.msk [vmem:[%s10831_s13 + $0x166] sm:$0xff] %vm2290_vm3, %v11823_v24  ;;  %v5158_v50 = vpop.xlane.xlu0 %5157  ;;  %v3478_v17 = vsel %vm2290_vm3, %v11549_v26, -inf }
 0x50a   : > { %2420 = vperm.xlu2 %7023, %v2377_v32   ;;  %v11846_v12 = vadd.f32 %v11403_v5, %v5158_v50  ;;  %v3473_v32 = vsel %vm2290_vm3, %v11480_v49, -inf  ;;  %v2910_v50 = vsub.f32 %v11419_v60, %v2904_v41 }
 0x50b   : > { %v4644_v56 = vadd.f32 %v4643_v11, %v4642_v31  ;;  %v3479_v31 = vmax.f32 %v3473_v32, %v3478_v17  ;;  %v11861_v11 = vadd.f32 %v11403_v5, %v6323_v1  ;;  %v2911_v17 = vsub.f32 %v11497_v18, %v2904_v41 }
 0x50c   : > { %5172 = vst.msk [vmem:[%s10831_s13 + $0x12a] sm:$0x3] %vm2297_vm1, %v11846_v12  ;;  %v2922_v8 = vmul.f32 1.442695, %v2910_v50 }
 0x50d   : > { %v4645_v15 = vrot.slane %v4644_v56, 1  ;;  %6341 = vst.msk [vmem:[%s10831_s13 + $0x186] sm:$0xff] %vm2290_vm3, %v11861_v11  ;;  %v3482_v59 = vmax.f32 %v3477_v54, %v3479_v31 }
 0x50f   : > { %v4646_v62 = vadd.f32 %v4645_v15, %v4644_v56  ;;  %v3483_v56 = vmax.f32 %v3481_v14, %v3475_v22  ;;  %v2912_v15 = vmul.f32 1.442695, %v2905_v29  ;;  %v2924_v29 = vmul.f32 1.442695, %v2911_v17 }
 0x511   : > { %2425 = vperm.xlu1 %7022, %v2378_v52   ;;  %7511 = vrcp.f32 %v4646_v62  ;;  %v2908_v52 = vsub.f32 %v11447_v48, %v2904_v41  ;;  %v3484_v32 = vmax.f32 %v3482_v59, %v3483_v56  ;;  %v2920_v48 = vmul.f32 1.442695, %v2909_v37 }
 0x512   : > { %7513 = vpow2.f32 %v2912_v15  ;;  %v4658_v47 = vand.u32 2147483648, %v4646_v62  ;;  %v4656_v31 = vand.u32 2147483647, %v4646_v62  ;;  %vm4652_vm4 = vweird.f32 %v4646_v62 }
 0x513   : > { %v2918_v3 = vmul.f32 1.442695, %v2908_v52  ;;  %7515 = vpow2.f32 %v2914_v23  ;;  %v3485_v53 = vrot.slane %v3484_v32, 4 }
 0x514   : > { %7517 = vpow2.f32 %v2916_v6  ;;  %v4659_v23 = vor.u32 1.1754944e-38, %v4658_v47  ;;  %vm4657_vm5 = vcmp.eq.f32.partialorder %v4656_v31, 8.507059e+37 }
 0x515   : > { %7519 = vpow2.f32 %v2918_v3  ;;  %v3486_v15 = vmax.f32 %v3484_v32, %v3485_v53 }
 0x516   : > { %7521 = vpow2.f32 %v2920_v48 }
 0x517   : > { %v7512_v9 = vpop.eup %7511  ;;  %7523 = vpow2.f32 %v2922_v8 }
 0x518   : > { %v4648_v14 = vmul.f32 %v7512_v9, %v4646_v62  ;;  %v11870_v1 = vpop.eup %7513  ;;  %vm4653_vm6 = vweird.f32 %v7512_v9  ;;  %7525 = vpow2.f32 %v2924_v29 }
 0x519   : > { %v11872_v60 = vpop.eup %7515  ;;  %v2926_v18 = vsel %vm2290_vm3, %v11870_v1, 0.0  ;;  %vm4654_vm0 = vmor %vm4652_vm4, %vm4653_vm6 }
 0x51a   : > { %v4649_v46 = vsub.f32 1.0, %v4648_v14  ;;  %v11876_v41 = vpop.eup %7517  ;;  %v2927_v22 = vsel %vm2290_vm3, %v11872_v60, 0.0 }
 0x51b   : > { %v2928_v56 = vadd.f32 %v2927_v22, %v2926_v18  ;;  %v11880_v37 = vpop.eup %7519  ;;  %v2929_v6 = vsel %vm2290_vm3, %v11876_v41, 0.0 }
 0x51c   : > { %v4650_v54 = vmul.f32 %v7512_v9, %v4649_v46  ;;  %v11884_v3 = vpop.eup %7521  ;;  %v2931_v14 = vsel %vm2290_vm3, %v11880_v37, 0.0 }
 0x51d   : > { %v2930_v50 = vadd.f32 %v2929_v6, %v2928_v56  ;;  %v11891_v8 = vpop.eup %7523  ;;  %v6317_v56 = vpop.xlane.xlu2 %6316 }
 0x51e   : > { %v4651_v52 = vadd.f32 %v7512_v9, %v4650_v54 }
 0x51f   : > { %v2932_v29 = vadd.f32 %v2931_v14, %v2930_v50 }
 0x520   : > { %v4655_v59 = vsel %vm4654_vm0, %v7512_v9, %v4651_v52  ;;  %v3487_v9 = vrot.slane %v3486_v15, 2  ;;  %v5723_v52 = vpop.xlane.xlu0 %5722  ;;  %vm12827_vm0 = vcmask 261120  }
 0x521   : > { %v4660_v17 = vsel %vm4657_vm5, %v4659_v23, %v4655_v59  ;;  %v11916_v6 = vadd.f32 %v11403_v5, %v5723_v52  ;;  %v11919_v59 = vadd.f32 %v11403_v5, %v6317_v56  ;;  %vm12828_vm5 = vmmov %vm12827_vm0 }
 0x522   : > { %v4663_v62 = vmul.f32 %v11770_v40, %v4660_v17  ;;  %v4661_v48 = vmul.f32 %v11764_v58, %v4660_v17  ;;  %v4665_v32 = vmul.f32 %v11778_v44, %v4660_v17  ;;  %v4662_v46 = vmul.f32 %v11766_v63, %v4660_v17  ;;  %v11899_v44 = vpop.eup %7525 }
 0x523   : > { %v4664_v58 = vmul.f32 %v11774_v13, %v4660_v17  ;;  %v2933_v40 = vsel %vm2290_vm3, %v11884_v3, 0.0  ;;  %v2935_v63 = vsel %vm2290_vm3, %v11891_v8, 0.0  ;;  %v3488_v47 = vmax.f32 %v3486_v15, %v3487_v9  ;;  %5751 = vst.msk [vmem:[%s10831_s13 + $0x12c] sm:$0xff] %vm2290_vm3, %v11916_v6 }
 0x524   : > { %4694 = vperm.xlu0 %7021, %v4663_v62   ;;  %4670 = vst.msk [vmem:[%s11788_s17 + $0xd8] sm:$0xff] %vm2290_vm3, %v4663_v62  ;;  %4684 = vperm.xlu2 %7023, %v4661_v48   ;;  %v2934_v53 = vadd.f32 %v2933_v40, %v2932_v29  ;;  %v2937_v13 = vsel %vm2297_vm1, %v11899_v44, 0.0  ;;  %v4666_v18 = vmul.f32 %v11782_v25, %v4660_v17  ;;  %v4065_v29 = vsel %vm2297_vm1, %v11708_v43, -inf }
 0x525   : > { %4668 = vst.msk [vmem:[%s11788_s17 + $0xc8] sm:$0xff] %vm2290_vm3, %v4661_v48  ;;  %4689 = vperm.xlu1 %7022, %v4662_v46   ;;  %v4667_v22 = vmul.f32 %v11795_v27, %v4660_v17  ;;  %v3489_v15 = vrot.slane %v3488_v47, 1  ;;  %v11931_v48 = vld [vmem:[#allocation4] ss:$0 sm:$0xff] }
 0x526   : > { %4672 = vst.msk [vmem:[%s11788_s17 + $0xe8] sm:$0xff] %vm2290_vm3, %v4665_v32  ;;  %v2936_v54 = vadd.f32 %v2935_v63, %v2934_v53 }
 0x527   : > { %4669 = vst.msk [vmem:[%s11788_s17 + $0xd0] sm:$0xff] %vm2290_vm3, %v4662_v46  ;;  %v3490_v25 = vmax.f32 %v3488_v47, %v3489_v15  ;;  %v4059_v46 = vsel %vm2290_vm3, %v11561_v7, -inf }
 0x528   : > { %4671 = vst.msk [vmem:[%s11788_s17 + $0xe0] sm:$0xff] %vm2290_vm3, %v4664_v58  ;;  %v2938_v31 = vadd.f32 %v2937_v13, %v2936_v54  ;;  %v5735_v5 = vpop.xlane.xlu0 %5734  ;;  %v4063_v54 = vsel %vm2290_vm3, %v11598_v21, -inf  ;;  %v4057_v13 = vsel %vm2290_vm3, %v11644_v20, -inf }
 0x529   : > { %4673 = vst.msk [vmem:[%s11788_s17 + $0xf0] sm:$0xff] %vm2290_vm3, %v4666_v18  ;;  %v3491_v14 = vsub.f32 %v11546_v10, %v3490_v25  ;;  %v3492_v9 = vsub.f32 %v11480_v49, %v3490_v25  ;;  %v3494_v40 = vsub.f32 %v11564_v34, %v3490_v25  ;;  %v3495_v63 = vsub.f32 %v11543_v38, %v3490_v25 }
 0x52a   : > { %v2939_v23 = vrot.slane %v2938_v31, 4  ;;  %4674 = vst.msk [vmem:[%s11788_s17 + $0xf8] sm:$0x3] %vm2297_vm1, %v4667_v22  ;;  %v4058_v49 = vsel %vm2290_vm3, %v11594_v57, -inf  ;;  %v3496_v34 = vsub.f32 %v11549_v26, %v3490_v25  ;;  %v4061_v38 = vsel %vm2290_vm3, %v11628_v0, -inf }
 0x52b   : > { %6339 = vst.msk [vmem:[%s10831_s13 + $0x176] sm:$0xff] %vm2290_vm3, %v11919_v59  ;;  %v3498_v10 = vmul.f32 1.442695, %v3491_v14  ;;  %v3500_v47 = vmul.f32 1.442695, %v3492_v9  ;;  %v4062_v52 = vmax.f32 %v4057_v13, %v4061_v38  ;;  %v4064_v15 = vmax.f32 %v4058_v49, %v4063_v54 }
 0x52c   : > { %4704 = vperm.xlu0 %7021, %v4665_v32   ;;  %4699 = vperm.xlu2 %7023, %v4664_v58   ;;  %v2940_v50 = vadd.f32 %v2939_v23, %v2938_v31  ;;  %v11934_v32 = vadd.f32 %v11931_v48, %v5735_v5  ;;  %v3493_v58 = vsub.f32 %v11514_v45, %v3490_v25  ;;  %v3506_v56 = vmul.f32 1.442695, %v3495_v63 }
 0x52d   : > { %4709 = vperm.xlu1 %7022, %v4666_v18   ;;  %v4066_v31 = vmax.f32 %v4059_v46, %v4065_v29  ;;  %v3504_v18 = vmul.f32 1.442695, %v3494_v40  ;;  %v4060_v23 = vsel %vm2290_vm3, %v11674_v55, -inf  ;;  %v4067_v14 = vmax.f32 %v4062_v52, %v4064_v15 }
 0x52e   : > { %v2941_v27 = vrot.slane %v2940_v50, 2  ;;  %5755 = vst.msk [vmem:[%s10831_s13 + $0x14c] sm:$0xff] %vm2290_vm3, %v11934_v32  ;;  %v3502_v45 = vmul.f32 1.442695, %v3493_v58 }
 0x530   : > { %v2942_v17 = vadd.f32 %v2941_v27, %v2940_v50  ;;  %v4068_v27 = vmax.f32 %v4066_v31, %v4060_v23 }
 0x532   : > { %v2943_v62 = vrot.slane %v2942_v17, 1  ;;  %v4069_v46 = vmax.f32 %v4067_v14, %v4068_v27 }
 0x534   : > { %4714 = vperm.xlu2 %7023, %v4667_v22   ;;  %v2944_v53 = vadd.f32 %v2943_v62, %v2942_v17  ;;  %v3497_v22 = vsub.f32 %v11608_v4, %v3490_v25  ;;  %v3508_v17 = vmul.f32 1.442695, %v3496_v34  ;;  %v4070_v34 = vrot.slane %v4069_v46, 4 }
 0x536   : > { %7527 = vrcp.f32 %v2944_v53  ;;  %v6308_v50 = vpop.xlane.xlu0 %6307  ;;  %v3510_v62 = vmul.f32 1.442695, %v3497_v22  ;;  %v2954_v13 = vand.u32 2147483647, %v2944_v53  ;;  %vm2950_vm8 = vweird.f32 %v2944_v53 }
 0x537   : > { %7529 = vpow2.f32 %v3498_v10  ;;  %v11961_v26 = vadd.f32 %v11931_v48, %v6308_v50 }
 0x538   : > { %7531 = vpow2.f32 %v3500_v47  ;;  %v2956_v47 = vand.u32 2147483648, %v2944_v53  ;;  %vm2955_vm10 = vcmp.eq.f32.partialorder %v2954_v13, 8.507059e+37 }
 0x539   : > { %7533 = vpow2.f32 %v3502_v45  ;;  %6336 = vst.msk [vmem:[%s10831_s13 + $0x15e] sm:$0xff] %vm2290_vm3, %v11961_v26 }
 0x53a   : > { %7535 = vpow2.f32 %v3504_v18 }
 0x53b   : > { %7537 = vpow2.f32 %v3506_v56  ;;  %v2957_v56 = vor.u32 1.1754944e-38, %v2956_v47 }
 0x53c   : > { %v7528_v5 = vpop.eup %7527  ;;  %7539 = vpow2.f32 %v3508_v17  ;;  %v4071_v17 = vmax.f32 %v4069_v46, %v4070_v34 }
 0x53d   : > { %v11966_v4 = vpop.eup %7529  ;;  %v2946_v25 = vmul.f32 %v7528_v5, %v2944_v53  ;;  %7541 = vpow2.f32 %v3510_v62  ;;  %vm2951_vm7 = vweird.f32 %v7528_v5 }
 0x53e   : > { %v11968_v9 = vpop.eup %7531  ;;  %v3512_v29 = vsel %vm2290_vm3, %v11966_v4, 0.0  ;;  %vm2952_vm9 = vmor %vm2950_vm8, %vm2951_vm7 }
 0x53f   : > { %v11972_v58 = vpop.eup %7533  ;;  %v2947_v40 = vsub.f32 1.0, %v2946_v25  ;;  %v3513_v63 = vsel %vm2290_vm3, %v11968_v9, 0.0  ;;  %vm12829_vm7 = vmmov %vm12827_vm0 }
 0x540   : > { %v11976_v10 = vpop.eup %7535  ;;  %v3514_v49 = vadd.f32 %v3513_v63, %v3512_v29  ;;  %v3515_v45 = vsel %vm2290_vm3, %v11972_v58, 0.0  ;;  %vm12830_vm8 = vmmov %vm12827_vm0 }
 0x541   : > { %v2948_v54 = vmul.f32 %v7528_v5, %v2947_v40  ;;  %v11980_v31 = vpop.eup %7537  ;;  %v3517_v22 = vsel %vm2290_vm3, %v11976_v10, 0.0 }
 0x542   : > { %v3516_v18 = vadd.f32 %v3515_v45, %v3514_v49  ;;  %v11984_v52 = vpop.eup %7539  ;;  %v3519_v50 = vsel %vm2290_vm3, %v11980_v31, 0.0 }
 0x543   : > { %v2949_v38 = vadd.f32 %v7528_v5, %v2948_v54  ;;  %v11988_v27 = vpop.eup %7541  ;;  %v6320_v54 = vpop.xlane.xlu0 %6319 }
 0x544   : > { %v3518_v15 = vadd.f32 %v3517_v22, %v3516_v18  ;;  %v3523_v46 = vsel %vm2297_vm1, %v11988_v27, 0.0 }
 0x545   : > { %v2953_v23 = vsel %vm2952_vm9, %v7528_v5, %v2949_v38  ;;  %v3521_v5 = vsel %vm2290_vm3, %v11984_v52, 0.0  ;;  %vm12831_vm9 = vmmov %vm12827_vm0 }
 0x546   : > { %v2958_v62 = vsel %vm2955_vm10, %v2957_v56, %v2953_v23  ;;  %v3520_v53 = vadd.f32 %v3519_v50, %v3518_v15 }
 0x547   : > { %v2961_v14 = vmul.f32 %v11876_v41, %v2958_v62  ;;  %v2963_v25 = vmul.f32 %v11884_v3, %v2958_v62  ;;  %v2960_v29 = vmul.f32 %v11872_v60, %v2958_v62  ;;  %v2959_v40 = vmul.f32 %v11870_v1, %v2958_v62 }
 0x548   : > { %v3522_v63 = vadd.f32 %v3521_v5, %v3520_v53  ;;  %v2964_v41 = vmul.f32 %v11891_v8, %v2958_v62  ;;  %v2962_v60 = vmul.f32 %v11880_v37, %v2958_v62  ;;  %v4072_v3 = vrot.slane %v4071_v17, 2 }
 0x549   : > { %2992 = vperm.xlu0 %7021, %v2961_v14   ;;  %2968 = vst.msk [vmem:[%s11788_s17 + $0x42] sm:$0xff] %vm2290_vm3, %v2961_v14  ;;  %2987 = vperm.xlu1 %7022, %v2960_v29   ;;  %v2965_v49 = vmul.f32 %v11899_v44, %v2958_v62  ;;  %v12012_v8 = vadd.f32 %v11931_v48, %v6320_v54  ;;  %v5174_v54 = vsel %vm2290_vm3, %v11633_v2, -inf }
 0x54a   : > { %2970 = vst.msk [vmem:[%s11788_s17 + $0x52] sm:$0xff] %vm2290_vm3, %v2963_v25  ;;  %2982 = vperm.xlu2 %7023, %v2959_v40   ;;  %v3524_v1 = vadd.f32 %v3523_v46, %v3522_v63  ;;  %v4073_v37 = vmax.f32 %v4071_v17, %v4072_v3 }
 0x54b   : > { %2967 = vst.msk [vmem:[%s11788_s17 + $0x3a] sm:$0xff] %vm2290_vm3, %v2960_v29  ;;  %v5732_v38 = vpop.xlane.xlu0 %5731  ;;  %v5181_v29 = vsel %vm2297_vm1, %v11846_v12, -inf }
 0x54c   : > { %2966 = vst.msk [vmem:[%s11788_s17 + $0x32] sm:$0xff] %vm2290_vm3, %v2959_v40  ;;  %v3525_v47 = vrot.slane %v3524_v1, 4  ;;  %v4074_v34 = vrot.slane %v4073_v37, 1  ;;  %v12022_v22 = vadd.f32 %v11931_v48, %v5732_v38  ;;  %v5175_v48 = vsel %vm2290_vm3, %v11654_v61, -inf }
 0x54d   : > { %2971 = vst.msk [vmem:[%s11788_s17 + $0x5a] sm:$0xff] %vm2290_vm3, %v2964_v41 }
 0x54e   : > { %2969 = vst.msk [vmem:[%s11788_s17 + $0x4a] sm:$0xff] %vm2290_vm3, %v2962_v60  ;;  %v3526_v13 = vadd.f32 %v3525_v47, %v3524_v1  ;;  %v4075_v15 = vmax.f32 %v4073_v37, %v4074_v34  ;;  %v5182_v1 = vmax.f32 %v5175_v48, %v5181_v29 }
 0x54f   : > { %2972 = vst.msk [vmem:[%s11788_s17 + $0x62] sm:$0x3] %vm2297_vm1, %v2965_v49 }
 0x550   : > { %v3527_v45 = vrot.slane %v3526_v13, 2  ;;  %6340 = vst.msk [vmem:[%s10831_s13 + $0x17e] sm:$0xff] %vm2290_vm3, %v12012_v8  ;;  %v4076_v23 = vsub.f32 %v11644_v20, %v4075_v15  ;;  %v4077_v50 = vsub.f32 %v11594_v57, %v4075_v15  ;;  %v4078_v17 = vsub.f32 %v11561_v7, %v4075_v15 }
 0x551   : > { %3002 = vperm.xlu0 %7021, %v2963_v25   ;;  %3007 = vperm.xlu1 %7022, %v2964_v41   ;;  %5754 = vst.msk [vmem:[%s10831_s13 + $0x144] sm:$0xff] %vm2290_vm3, %v12022_v22  ;;  %v4079_v62 = vsub.f32 %v11674_v55, %v4075_v15  ;;  %v4080_v40 = vsub.f32 %v11628_v0, %v4075_v15  ;;  %v5177_v57 = vsel %vm2290_vm3, %v11657_v19, -inf  ;;  %v5179_v7 = vsel %vm2290_vm3, %v11692_v28, -inf  ;;  %s6658_s13 = sshll.u32 %s394_s15, 3 }
 0x552   : > { %2997 = vperm.xlu2 %7023, %v2962_v60   ;;  %v3528_v44 = vadd.f32 %v3527_v45, %v3526_v13  ;;  %v4083_v53 = vmul.f32 1.442695, %v4076_v23  ;;  %v4085_v14 = vmul.f32 1.442695, %v4077_v50  ;;  %v4087_v63 = vmul.f32 1.442695, %v4078_v17 }
 0x553   : > { %v5173_v20 = vsel %vm2290_vm3, %v11741_v42, -inf  ;;  %v4081_v46 = vsub.f32 %v11598_v21, %v4075_v15  ;;  %v4089_v41 = vmul.f32 1.442695, %v4079_v62  ;;  %v4082_v60 = vsub.f32 %v11708_v43, %v4075_v15  ;;  %s12279_s30 = scalar_lea.vmem [#allocation5], %s6658_s13  ;;  %s7675_s13 = scalar_lea.hbm %s12522_s9, 24 }
 0x554   : > { %v3529_v18 = vrot.slane %v3528_v44, 1  ;;  %v5178_v13 = vmax.f32 %v5173_v20, %v5177_v57  ;;  %v5176_v43 = vsel %vm2290_vm3, %v11820_v39, -inf  ;;  %s6522_s3 = sshll.u32 %s12279_s30, 4  ;;  %s6523_s3 = int_to_ptr.vmem [resolvable:$true] %s6522_s3 }
 0x555   : > { %v4093_v45 = vmul.f32 1.442695, %v4081_v46  ;;  %v4095_v34 = vmul.f32 1.442695, %v4082_v60  ;;  %v5184_v15 = vmax.f32 %v5182_v1, %v5176_v43 }
 0x556   : > { %v3530_v56 = vadd.f32 %v3529_v18, %v3528_v44  ;;  %v5180_v44 = vmax.f32 %v5174_v54, %v5179_v7 }
 0x558   : > { %7543 = vrcp.f32 %v3530_v56  ;;  %v3540_v0 = vand.u32 2147483647, %v3530_v56  ;;  %v3542_v3 = vand.u32 2147483648, %v3530_v56  ;;  %vm3536_vm13 = vweird.f32 %v3530_v56 }
 0x559   : > { %7545 = vpow2.f32 %v4083_v53  ;;  %v5183_v50 = vmax.f32 %v5178_v13, %v5180_v44 }
 0x55a   : > { %3012 = vperm.xlu2 %7023, %v2965_v49   ;;  %7547 = vpow2.f32 %v4085_v14  ;;  %v4091_v49 = vmul.f32 1.442695, %v4080_v40  ;;  %v3543_v18 = vor.u32 1.1754944e-38, %v3542_v3  ;;  %vm3541_vm12 = vcmp.eq.f32.partialorder %v3540_v0, 8.507059e+37 }
 0x55b   : > { %7549 = vpow2.f32 %v4087_v63  ;;  %v5185_v63 = vmax.f32 %v5183_v50, %v5184_v15 }
 0x55c   : > { %7551 = vpow2.f32 %v4089_v41 }
 0x55d   : > { %7553 = vpow2.f32 %v4091_v49 }
 0x55e   : > { %v7544_v25 = vpop.eup %7543  ;;  %7555 = vpow2.f32 %v4093_v45 }
 0x55f   : > { %v3532_v5 = vmul.f32 %v7544_v25, %v3530_v56  ;;  %vm3537_vm11 = vweird.f32 %v7544_v25  ;;  %v12046_v21 = vpop.eup %7545  ;;  %7557 = vpow2.f32 %v4095_v34 }
 0x560   : > { %vm3538_vm14 = vmor %vm3536_vm13, %vm3537_vm11  ;;  %v12050_v38 = vpop.eup %7547  ;;  %v4097_v17 = vsel %vm2290_vm3, %v12046_v21, 0.0 }
 0x561   : > { %v3533_v55 = vsub.f32 1.0, %v3532_v5  ;;  %v4098_v62 = vsel %vm2290_vm3, %v12050_v38, 0.0  ;;  %v12056_v53 = vpop.eup %7549  ;;  %vm12832_vm11 = vmmov %vm12827_vm0 }
 0x562   : > { %v12063_v40 = vpop.eup %7551 }
 0x563   : > { %v3534_v47 = vmul.f32 %v7544_v25, %v3533_v55  ;;  %v4102_v7 = vsel %vm2290_vm3, %v12063_v40, 0.0  ;;  %v5186_v55 = vrot.slane %v5185_v63, 4 }
 0x565   : > { %v3535_v37 = vadd.f32 %v7544_v25, %v3534_v47  ;;  %v5187_v1 = vmax.f32 %v5185_v63, %v5186_v55 }
 0x567   : > { %v3539_v23 = vsel %vm3538_vm14, %v7544_v25, %v3535_v37  ;;  %v5188_v49 = vrot.slane %v5187_v1, 2 }
 0x568   : > { %v3544_v56 = vsel %vm3541_vm12, %v3543_v18, %v3539_v23  ;;  %v5766_v23 = vsel %vm2297_vm1, %v11714_v51, -inf }
 0x569   : > { %v3547_v14 = vmul.f32 %v11972_v58, %v3544_v56  ;;  %v3545_v48 = vmul.f32 %v11966_v4, %v3544_v56  ;;  %v3549_v25 = vmul.f32 %v11980_v31, %v3544_v56  ;;  %v3548_v29 = vmul.f32 %v11976_v10, %v3544_v56  ;;  %v12072_v10 = vpop.eup %7553 }
 0x56a   : > { %v3546_v5 = vmul.f32 %v11968_v9, %v3544_v56  ;;  %v4099_v4 = vadd.f32 %v4098_v62, %v4097_v17  ;;  %v3551_v58 = vmul.f32 %v11988_v27, %v3544_v56  ;;  %v4100_v9 = vsel %vm2290_vm3, %v12056_v53, 0.0  ;;  %v12081_v20 = vpop.eup %7555 }
 0x56b   : > { %3578 = vperm.xlu0 %7021, %v3547_v14   ;;  %3554 = vst.msk [vmem:[%s11788_s17 + $0x74] sm:$0xff] %vm2290_vm3, %v3547_v14  ;;  %3568 = vperm.xlu1 %7022, %v3545_v48   ;;  %v3550_v31 = vmul.f32 %v11984_v52, %v3544_v56  ;;  %v4104_v46 = vsel %vm2290_vm3, %v12072_v10, 0.0  ;;  %v12089_v41 = vpop.eup %7557  ;;  %v4106_v60 = vsel %vm2290_vm3, %v12081_v20, 0.0  ;;  %v5189_v37 = vmax.f32 %v5187_v1, %v5188_v49 }
 0x56c   : > { %3552 = vst.msk [vmem:[%s11788_s17 + $0x64] sm:$0xff] %vm2290_vm3, %v3545_v48  ;;  %3573 = vperm.xlu2 %7023, %v3546_v5   ;;  %v4101_v57 = vadd.f32 %v4100_v9, %v4099_v4  ;;  %v4108_v3 = vsel %vm2297_vm1, %v12089_v41, 0.0  ;;  %v5760_v14 = vsel %vm2290_vm3, %v11695_v35, -inf }
 0x56d   : > { %3556 = vst.msk [vmem:[%s11788_s17 + $0x84] sm:$0xff] %vm2290_vm3, %v3549_v25  ;;  %v5190_v34 = vrot.slane %v5189_v37, 1  ;;  %v5767_v4 = vmax.f32 %v5760_v14, %v5766_v23 }
 0x56e   : > { %3555 = vst.msk [vmem:[%s11788_s17 + $0x7c] sm:$0xff] %vm2290_vm3, %v3548_v29  ;;  %v4103_v27 = vadd.f32 %v4102_v7, %v4101_v57  ;;  %v5761_v57 = vsel %vm2290_vm3, %v12022_v22, -inf }
 0x56f   : > { %3553 = vst.msk [vmem:[%s11788_s17 + $0x6c] sm:$0xff] %vm2290_vm3, %v3546_v5  ;;  %v5191_v15 = vmax.f32 %v5189_v37, %v5190_v34  ;;  %v5769_v1 = vmax.f32 %v5767_v4, %v5761_v57 }
 0x570   : > { %3558 = vst.msk [vmem:[%s11788_s17 + $0x94] sm:$0x3] %vm2297_vm1, %v3551_v58  ;;  %v4105_v52 = vadd.f32 %v4104_v46, %v4103_v27 }
 0x571   : > { %3557 = vst.msk [vmem:[%s11788_s17 + $0x8c] sm:$0xff] %vm2290_vm3, %v3550_v31  ;;  %v5192_v50 = vsub.f32 %v11741_v42, %v5191_v15  ;;  %v5193_v56 = vsub.f32 %v11633_v2, %v5191_v15  ;;  %v5194_v17 = vsub.f32 %v11654_v61, %v5191_v15  ;;  %v5195_v62 = vsub.f32 %v11820_v39, %v5191_v15 }
 0x572   : > { %v4107_v0 = vadd.f32 %v4106_v60, %v4105_v52  ;;  %v5762_v2 = vsel %vm2290_vm3, %v11934_v32, -inf  ;;  %v5197_v61 = vsub.f32 %v11692_v28, %v5191_v15  ;;  %v5198_v9 = vsub.f32 %v11846_v12, %v5191_v15 }
 0x573   : > { %3588 = vperm.xlu0 %7021, %v3549_v25   ;;  %3583 = vperm.xlu1 %7022, %v3548_v29   ;;  %v5196_v25 = vsub.f32 %v11657_v19, %v5191_v15  ;;  %v5199_v29 = vmul.f32 1.442695, %v5192_v50  ;;  %v5201_v5 = vmul.f32 1.442695, %v5193_v56  ;;  %v5203_v63 = vmul.f32 1.442695, %v5194_v17 }
 0x574   : > { %3593 = vperm.xlu2 %7023, %v3550_v31   ;;  %v4109_v47 = vadd.f32 %v4108_v3, %v4107_v0  ;;  %v5205_v39 = vmul.f32 1.442695, %v5195_v62  ;;  %v5758_v19 = vsel %vm2290_vm3, %v11916_v6, -inf  ;;  %v5759_v28 = vsel %vm2290_vm3, %v11711_v36, -inf }
 0x575   : > { %v5207_v55 = vmul.f32 1.442695, %v5196_v25  ;;  %v5763_v27 = vmax.f32 %v5758_v19, %v5762_v2  ;;  %v5209_v12 = vmul.f32 1.442695, %v5197_v61  ;;  %v2401_v61 = vpop.permute.xlu2 %2400 }
 0x576   : > { %v4110_v54 = vrot.slane %v4109_v47, 4 }
 0x578   : > { %v4111_v13 = vadd.f32 %v4110_v54, %v4109_v47  ;;  %v5211_v47 = vmul.f32 1.442695, %v5198_v9 }
 0x57a   : > { %v4112_v45 = vrot.slane %v4111_v13, 2 }
 0x57b   : > { %3598 = vperm.xlu1 %7022, %v3551_v58   ;;  %v5764_v58 = vsel %vm2290_vm3, %v11744_v30, -inf }
 0x57c   : > { %v4113_v44 = vadd.f32 %v4112_v45, %v4111_v13  ;;  %v5765_v60 = vmax.f32 %v5759_v28, %v5764_v58 }
 0x57d   : > { %v2421_v28 = vpop.permute.xlu2 %2420 }
 0x57e   : > { %v4114_v43 = vrot.slane %v4113_v44, 1  ;;  %v5768_v13 = vmax.f32 %v5763_v27, %v5765_v60  ;;  %v2406_v60 = vpop.permute.xlu0 %2405 }
 0x580   : > { %v4115_v18 = vadd.f32 %v4114_v43, %v4113_v44 }
 0x582   : > { %7559 = vrcp.f32 %v4115_v18  ;;  %v4127_v7 = vand.u32 2147483648, %v4115_v18  ;;  %v4125_v52 = vand.u32 2147483647, %v4115_v18  ;;  %vm4121_vm2 = vweird.f32 %v4115_v18 }
 0x583   : > { %7561 = vpow2.f32 %v5199_v29 }
 0x584   : > { %7563 = vpow2.f32 %v5201_v5  ;;  %v4128_v49 = vor.u32 1.1754944e-38, %v4127_v7  ;;  %vm4126_vm4 = vcmp.eq.f32.partialorder %v4125_v52, 8.507059e+37 }
 0x585   : > { %7565 = vpow2.f32 %v5203_v63 }
 0x586   : > { %7567 = vpow2.f32 %v5205_v39 }
 0x587   : > { %7569 = vpow2.f32 %v5207_v55  ;;  %v2387_v55 = vld [vmem:[%s7899_s12 + $0x8] sm:$0xff] }
 0x588   : > { %v7560_v48 = vpop.eup %7559  ;;  %7571 = vpow2.f32 %v5209_v12 }
 0x589   : > { %v4117_v42 = vmul.f32 %v7560_v48, %v4115_v18  ;;  %vm4122_vm15 = vweird.f32 %v7560_v48  ;;  %v12118_v3 = vpop.eup %7561  ;;  %v5770_v18 = vmax.f32 %v5768_v13, %v5769_v1  ;;  %7573 = vpow2.f32 %v5211_v47  ;;  %v2386_v1 = vld [vmem:[%s7899_s12] sm:$0xff] }
 0x58a   : > { %vm4123_vm6 = vmor %vm4121_vm2, %vm4122_vm15  ;;  %v12120_v54 = vpop.eup %7563  ;;  %v5213_v45 = vsel %vm2290_vm3, %v12118_v3, 0.0  ;;  %v6349_v47 = vsel %vm2290_vm3, %v11861_v11, -inf  ;;  %v2429_v13 = vmul.f32 %v2401_v61, %v2387_v55  ;;  %v4685_v55 = vpop.permute.xlu2 %4684  ;;  %vm12833_vm15 = vcmask 254976  }
 0x58b   : > { %v4118_v31 = vsub.f32 1.0, %v4117_v42  ;;  %v12124_v44 = vpop.eup %7565  ;;  %v5214_v43 = vsel %vm2290_vm3, %v12120_v54, 0.0  ;;  %vm12834_vm2 = vmmov %vm12827_vm0 }
 0x58c   : > { %v12131_v56 = vpop.eup %7567  ;;  %v5215_v62 = vadd.f32 %v5214_v43, %v5213_v45  ;;  %v2388_v43 = vld [vmem:[%s7899_s12 + $0x10] sm:$0xff] }
 0x58d   : > { %v4119_v46 = vmul.f32 %v7560_v48, %v4118_v31 }
 0x58f   : > { %v4120_v0 = vadd.f32 %v7560_v48, %v4119_v46  ;;  %v6347_v46 = vsel %vm2290_vm3, %v12012_v8, -inf }
 0x591   : > { %v4124_v37 = vsel %vm4123_vm6, %v7560_v48, %v4120_v0  ;;  %v5771_v48 = vrot.slane %v5770_v18, 4  ;;  %v2396_v0 = vpop.permute.xlu1 %2395  ;;  %vm12835_vm6 = vmmov %vm12827_vm0 }
 0x592   : > { %v4129_v34 = vsel %vm4126_vm4, %v4128_v49, %v4124_v37  ;;  %v6343_v49 = vsel %vm2290_vm3, %v11961_v26, -inf  ;;  %v2428_v37 = vmul.f32 %v2396_v0, %v2386_v1  ;;  %vm12836_vm4 = vmmov %vm12827_vm0 }
 0x593   : > { %v4132_v15 = vmul.f32 %v12056_v53, %v4129_v34  ;;  %v4131_v23 = vmul.f32 %v12050_v38, %v4129_v34  ;;  %v4130_v50 = vmul.f32 %v12046_v21, %v4129_v34  ;;  %v4134_v17 = vmul.f32 %v12072_v10, %v4129_v34  ;;  %v12139_v21 = vpop.eup %7569 }
 0x594   : > { %v4135_v14 = vmul.f32 %v12081_v20, %v4129_v34  ;;  %v5216_v38 = vsel %vm2290_vm3, %v12124_v44, 0.0  ;;  %v4133_v53 = vmul.f32 %v12063_v40, %v4129_v34  ;;  %v4136_v25 = vmul.f32 %v12089_v41, %v4129_v34  ;;  %v12149_v29 = vpop.eup %7571 }
 0x595   : > { %4163 = vperm.xlu0 %7021, %v4132_v15   ;;  %4139 = vst.msk [vmem:[%s11788_s17 + $0xa6] sm:$0xff] %vm2290_vm3, %v4132_v15  ;;  %4158 = vperm.xlu1 %7022, %v4131_v23   ;;  %v5217_v10 = vadd.f32 %v5216_v38, %v5215_v62  ;;  %v5218_v20 = vsel %vm2290_vm3, %v12131_v56, 0.0  ;;  %v5220_v63 = vsel %vm2290_vm3, %v12139_v21, 0.0  ;;  %v12157_v40 = vpop.eup %7573  ;;  %v5772_v41 = vmax.f32 %v5770_v18, %v5771_v48 }
 0x596   : > { %4138 = vst.msk [vmem:[%s11788_s17 + $0x9e] sm:$0xff] %vm2290_vm3, %v4131_v23  ;;  %4153 = vperm.xlu2 %7023, %v4130_v50   ;;  %v5222_v58 = vsel %vm2290_vm3, %v12149_v29, 0.0  ;;  %v5224_v2 = vsel %vm2297_vm1, %v12157_v40, 0.0  ;;  %v6348_v45 = vmax.f32 %v6343_v49, %v6347_v46  ;;  %v6344_v18 = vsel %vm2290_vm3, %v11823_v24, -inf }
 0x597   : > { %4137 = vst.msk [vmem:[%s11788_s17 + $0x96] sm:$0xff] %vm2290_vm3, %v4130_v50  ;;  %v5219_v5 = vadd.f32 %v5218_v20, %v5217_v10  ;;  %v5773_v9 = vrot.slane %v5772_v41, 2  ;;  %v6351_v15 = vsel %vm2297_vm1, %v11826_v33, -inf  ;;  %v2435_v50 = vsel %vm12827_vm0, %v2428_v37, 0.0  ;;  %v2390_v20 = vld [vmem:[%s7899_s12 + $0x20] sm:$0xff] }
 0x598   : > { %4141 = vst.msk [vmem:[%s11788_s17 + $0xb6] sm:$0xff] %vm2290_vm3, %v4134_v17  ;;  %v6345_v62 = vsel %vm2290_vm3, %v11747_v16, -inf  ;;  %v2436_v38 = vsel %vm12828_vm5, %v2429_v13, 0.0  ;;  %vm2454_vm0 = vcmask 253952   ;;  %vm12837_vm5 = vmmov %vm12834_vm2 }
 0x599   : > { %4142 = vst.msk [vmem:[%s11788_s17 + $0xbe] sm:$0xff] %vm2290_vm3, %v4135_v14  ;;  %v5221_v4 = vadd.f32 %v5220_v63, %v5219_v5  ;;  %v5774_v57 = vmax.f32 %v5772_v41, %v5773_v9  ;;  %v6352_v10 = vmax.f32 %v6345_v62, %v6351_v15  ;;  %v2389_v5 = vld [vmem:[%s7899_s12 + $0x18] sm:$0xff] }
 0x59a   : > { %4140 = vst.msk [vmem:[%s11788_s17 + $0xae] sm:$0xff] %vm2290_vm3, %v4133_v53 }
 0x59b   : > { %4143 = vst.msk [vmem:[%s11788_s17 + $0xc6] sm:$0x3] %vm2297_vm1, %v4136_v25  ;;  %v5223_v42 = vadd.f32 %v5222_v58, %v5221_v4  ;;  %v5775_v52 = vrot.slane %v5774_v57, 1 }
 0x59d   : > { %4173 = vperm.xlu0 %7021, %v4134_v17   ;;  %4178 = vperm.xlu1 %7022, %v4135_v14   ;;  %v5225_v39 = vadd.f32 %v5224_v2, %v5223_v42  ;;  %v12182_v23 = vmax.f32 %v5774_v57, %v5775_v52  ;;  %v6350_v17 = vmax.f32 %v6344_v18, %v6349_v47  ;;  %v6346_v14 = vsel %vm2290_vm3, %v11919_v59, -inf  ;;  %v2416_v42 = vpop.permute.xlu0 %2415  ;;  %v2411_v2 = vpop.permute.xlu1 %2410 }
 0x59e   : > { %4168 = vperm.xlu2 %7023, %v4133_v53   ;;  %v2430_v53 = vmul.f32 %v2406_v60, %v2388_v43  ;;  %v6354_v41 = vmax.f32 %v6352_v10, %v6346_v14  ;;  %v2392_v43 = vld [vmem:[%s7899_s12 + $0x30] sm:$0x3] }
 0x59f   : > { %v5226_v19 = vrot.slane %v5225_v39, 4  ;;  %v6353_v48 = vmax.f32 %v6348_v45, %v6350_v17  ;;  %v5777_v63 = vsub.f32 %v11916_v6, %v12182_v23  ;;  %v5778_v4 = vsub.f32 %v11711_v36, %v12182_v23 }
 0x5a0   : > { %v5780_v58 = vsub.f32 %v12022_v22, %v12182_v23  ;;  %v5779_v61 = vsub.f32 %v11695_v35, %v12182_v23  ;;  %v2438_v9 = vsel %vm12829_vm7, %v2430_v53, 0.0  ;;  %v5781_v52 = vsub.f32 %v11934_v32, %v12182_v23  ;;  %vm12838_vm7 = vmmov %vm12834_vm2 }
 0x5a1   : > { %v5227_v31 = vadd.f32 %v5226_v19, %v5225_v39  ;;  %v2391_v39 = vld [vmem:[%s7899_s12 + $0x28] sm:$0xff]  ;;  %v2432_v19 = vmul.f32 %v2416_v42, %v2390_v20  ;;  %v5784_v57 = vmul.f32 1.442695, %v5777_v63  ;;  %v6355_v6 = vmax.f32 %v6353_v48, %v6354_v41 }
 0x5a2   : > { %v5786_v36 = vmul.f32 1.442695, %v5778_v4  ;;  %v5788_v35 = vmul.f32 1.442695, %v5779_v61  ;;  %v2433_v60 = vmul.f32 %v2421_v28, %v2391_v39  ;;  %v5782_v49 = vsub.f32 %v11744_v30, %v12182_v23  ;;  %v4675_v48 = vld [vmem:[%s7899_s12 + $0xc8] sm:$0xff] }
 0x5a3   : > { %v5228_v7 = vrot.slane %v5227_v31, 2  ;;  %v2442_v47 = vsel %vm12831_vm9, %v2432_v19, 0.0  ;;  %v5783_v32 = vsub.f32 %v11714_v51, %v12182_v23  ;;  %v5792_v28 = vmul.f32 1.442695, %v5781_v52  ;;  %vm12840_vm9 = vmmov %vm12833_vm15 }
 0x5a4   : > { %v2444_v15 = vsel %vm12832_vm11, %v2433_v60, 0.0  ;;  %v5794_v62 = vmul.f32 1.442695, %v5782_v49  ;;  %v4678_v49 = vld [vmem:[%s7899_s12 + $0xe0] sm:$0xff] }
 0x5a5   : > { %v5229_v27 = vadd.f32 %v5228_v7, %v5227_v31  ;;  %v2431_v31 = vmul.f32 %v2411_v2, %v2389_v5  ;;  %v5796_v20 = vmul.f32 1.442695, %v5783_v32  ;;  %v4695_v63 = vpop.permute.xlu0 %4694 }
 0x5a6   : > { %4183 = vperm.xlu2 %7023, %v4136_v25   ;;  %v2437_v25 = vadd.f32 %v2436_v38, %v2435_v50  ;;  %v2426_v50 = vpop.permute.xlu1 %2425  ;;  %v6356_v38 = vrot.slane %v6355_v6, 4 }
 0x5a7   : > { %v5230_v12 = vrot.slane %v5229_v27, 1  ;;  %v2440_v22 = vsel %vm12830_vm8, %v2431_v31, 0.0  ;;  %v2434_v17 = vmul.f32 %v2426_v50, %v2392_v43  ;;  %v4717_v31 = vmul.f32 %v4685_v55, %v4675_v48  ;;  %v4679_v50 = vld [vmem:[%s7899_s12 + $0xe8] sm:$0xff]  ;;  %vm12839_vm8 = vmmov %vm12834_vm2 }
 0x5a8   : > { %v6357_v19 = vmax.f32 %v6355_v6, %v6356_v38  ;;  %v4677_v6 = vld [vmem:[%s7899_s12 + $0xd8] sm:$0xff] }
 0x5a9   : > { %v12175_v34 = vadd.f32 %v5230_v12, %v5229_v27  ;;  %v2439_v27 = vadd.f32 %v2438_v9, %v2437_v25  ;;  %v5790_v12 = vmul.f32 1.442695, %v5780_v58  ;;  %v2446_v25 = vsel %vm12833_vm15, %v2434_v17, 0.0  ;;  %vm12842_vm15 = vmmov %vm12834_vm2 }
 0x5ab   : > { %7575 = vrcp.f32 %v12175_v34  ;;  %v2441_v1 = vadd.f32 %v2440_v22, %v2439_v27  ;;  %v5241_v13 = vand.u32 2147483647, %v12175_v34  ;;  %v5243_v37 = vand.u32 2147483648, %v12175_v34  ;;  %v4676_v27 = vld [vmem:[%s7899_s12 + $0xd0] sm:$0xff] }
 0x5ac   : > { %7577 = vpow2.f32 %v5784_v57  ;;  %vm5237_vm13 = vweird.f32 %v12175_v34 }
 0x5ad   : > { %7579 = vpow2.f32 %v5786_v36  ;;  %v2443_v45 = vadd.f32 %v2442_v47, %v2441_v1  ;;  %vm5242_vm12 = vcmp.eq.f32.partialorder %v5241_v13, 8.507059e+37  ;;  %v5244_v51 = vor.u32 1.1754944e-38, %v5243_v37 }
 0x5ae   : > { %7581 = vpow2.f32 %v5788_v35  ;;  %v4690_v55 = vpop.permute.xlu1 %4689  ;;  %v4724_v1 = vsel %vm12834_vm2, %v4717_v31, 0.0 }
 0x5af   : > { %7583 = vpow2.f32 %v5790_v12  ;;  %v2445_v23 = vadd.f32 %v2444_v15, %v2443_v45  ;;  %v4718_v22 = vmul.f32 %v4690_v55, %v4676_v27 }
 0x5b0   : > { %7585 = vpow2.f32 %v5792_v28 }
 0x5b1   : > { %v7576_v7 = vpop.eup %7575  ;;  %v2447_v4 = vadd.f32 %v2446_v25, %v2445_v23  ;;  %7587 = vpow2.f32 %v5794_v62 }
 0x5b2   : > { %v5233_v46 = vmul.f32 %v7576_v7, %v12175_v34  ;;  %vm5238_vm10 = vweird.f32 %v7576_v7  ;;  %v12217_v14 = vpop.eup %7577  ;;  %v4700_v34 = vpop.permute.xlu2 %4699  ;;  %7589 = vpow2.f32 %v5796_v20 }
 0x5b3   : > { %vm5239_vm14 = vmor %vm5237_vm13, %vm5238_vm10  ;;  %v12219_v53 = vpop.eup %7579  ;;  %v5798_v41 = vsel %vm2290_vm3, %v12217_v14, 0.0  ;;  %v4720_v62 = vmul.f32 %v4700_v34, %v4678_v49 }
 0x5b4   : > { %v5234_v0 = vsub.f32 1.0, %v5233_v46  ;;  %v5799_v58 = vsel %vm2290_vm3, %v12219_v53, 0.0  ;;  %v12227_v42 = vpop.eup %7581 }
 0x5b5   : > { %v12232_v9 = vpop.eup %7583  ;;  %v5801_v36 = vsel %vm2290_vm3, %v12227_v42, 0.0 }
 0x5b6   : > { %v5235_v18 = vmul.f32 %v7576_v7, %v5234_v0  ;;  %v12245_v46 = vpop.eup %7585  ;;  %v5803_v35 = vsel %vm2290_vm3, %v12232_v9, 0.0  ;;  %v4725_v0 = vsel %vm12835_vm6, %v4718_v22, 0.0  ;;  %vm12843_vm6 = vmmov %vm12834_vm2 }
 0x5b7   : > { %v12255_v60 = vpop.eup %7587  ;;  %v4726_v37 = vadd.f32 %v4725_v0, %v4724_v1  ;;  %v5805_v45 = vsel %vm2290_vm3, %v12245_v46, 0.0 }
 0x5b8   : > { %v5236_v30 = vadd.f32 %v7576_v7, %v5235_v18  ;;  %v12268_v43 = vpop.eup %7589  ;;  %v5807_v17 = vsel %vm2290_vm3, %v12255_v60, 0.0 }
 0x5b9   : > { %v5809_v48 = vsel %vm2297_vm1, %v12268_v43, 0.0 }
 0x5ba   : > { %v5240_v10 = vsel %vm5239_vm14, %v7576_v7, %v5236_v30  ;;  %v2448_v7 = vrot.slane %v2447_v4, 4  ;;  %v4715_v28 = vpop.permute.xlu2 %4714  ;;  %v4705_v30 = vpop.permute.xlu0 %4704  ;;  %vm12841_vm14 = vmmov %vm12834_vm2 }
 0x5bb   : > { %v5245_v5 = vsel %vm5242_vm12, %v5244_v51, %v5240_v10  ;;  %v4721_v25 = vmul.f32 %v4705_v30, %v4679_v50 }
 0x5bc   : > { %v5248_v2 = vmul.f32 %v12124_v44, %v5245_v5  ;;  %v5246_v61 = vmul.f32 %v12118_v3, %v5245_v5  ;;  %v5247_v39 = vmul.f32 %v12120_v54, %v5245_v5  ;;  %v5251_v57 = vmul.f32 %v12149_v29, %v5245_v5 }
 0x5bd   : > { %v5249_v3 = vmul.f32 %v12131_v56, %v5245_v5  ;;  %v5800_v54 = vadd.f32 %v5799_v58, %v5798_v41  ;;  %v5252_v44 = vmul.f32 %v12157_v40, %v5245_v5  ;;  %v2449_v29 = vadd.f32 %v2448_v7, %v2447_v4  ;;  %v4680_v41 = vld [vmem:[%s7899_s12 + $0xf0] sm:$0xff]  ;;  %v4710_v58 = vpop.permute.xlu1 %4709 }
 0x5be   : > { %5279 = vperm.xlu0 %7021, %v5248_v2   ;;  %5255 = vst.msk [vmem:[%s11788_s17 + $0x10a] sm:$0xff] %vm2290_vm3, %v5248_v2  ;;  %5269 = vperm.xlu1 %7022, %v5246_v61   ;;  %v5250_v56 = vmul.f32 %v12139_v21, %v5245_v5  ;;  %v6358_v40 = vrot.slane %v6357_v19, 2  ;;  %v4719_v21 = vmul.f32 %v4695_v63, %v4677_v6  ;;  %v4681_v5 = vld [vmem:[%s7899_s12 + $0xf8] sm:$0x3]  ;;  %v4729_v63 = vsel %vm12837_vm5, %v4720_v62, 0.0  ;;  %vm12845_vm5 = vmmov %vm12834_vm2 }
 0x5bf   : > { %5253 = vst.msk [vmem:[%s11788_s17 + $0xfa] sm:$0xff] %vm2290_vm3, %v5246_v61  ;;  %5274 = vperm.xlu2 %7023, %v5247_v39   ;;  %v5802_v52 = vadd.f32 %v5801_v36, %v5800_v54  ;;  %v2450_v12 = vrot.slane %v2449_v29, 2  ;;  %v4723_v61 = vmul.f32 %v4715_v28, %v4681_v5  ;;  %v4722_v31 = vmul.f32 %v4710_v58, %v4680_v41 }
 0x5c0   : > { %5254 = vst.msk [vmem:[%s11788_s17 + $0x102] sm:$0xff] %vm2290_vm3, %v5247_v39  ;;  %v6359_v18 = vmax.f32 %v6357_v19, %v6358_v40  ;;  %v4727_v38 = vsel %vm12836_vm4, %v4719_v21, 0.0  ;;  %v4731_v39 = vsel %vm12838_vm7, %v4721_v25, 0.0  ;;  %vm12844_vm4 = vmmov %vm12834_vm2 }
 0x5c1   : > { %5258 = vst.msk [vmem:[%s11788_s17 + $0x122] sm:$0xff] %vm2290_vm3, %v5251_v57  ;;  %v5804_v47 = vadd.f32 %v5803_v35, %v5802_v52  ;;  %v2451_v13 = vadd.f32 %v2450_v12, %v2449_v29  ;;  %v4728_v10 = vadd.f32 %v4727_v38, %v4726_v37  ;;  %v4735_v6 = vsel %vm12840_vm9, %v4723_v61, 0.0  ;;  %v2973_v38 = vld [vmem:[%s7899_s12 + $0x32] sm:$0xff]  ;;  %vm12846_vm7 = vmmov %vm12840_vm9 }
 0x5c2   : > { %5256 = vst.msk [vmem:[%s11788_s17 + $0x112] sm:$0xff] %vm2290_vm3, %v5249_v3  ;;  %v6360_v34 = vrot.slane %v6359_v18, 1  ;;  %v2983_v54 = vpop.permute.xlu2 %2982  ;;  %vm12848_vm9 = vmmov %vm12834_vm2 }
 0x5c3   : > { %5259 = vst.msk [vmem:[%s11788_s17 + $0x12a] sm:$0x3] %vm2297_vm1, %v5252_v44  ;;  %v5806_v32 = vadd.f32 %v5805_v45, %v5804_v47  ;;  %v2452_v15 = vrot.slane %v2451_v13, 1  ;;  %v4730_v2 = vadd.f32 %v4729_v63, %v4728_v10  ;;  %v3015_v41 = vmul.f32 %v2983_v54, %v2973_v38 }
 0x5c4   : > { %5257 = vst.msk [vmem:[%s11788_s17 + $0x11a] sm:$0xff] %vm2290_vm3, %v5250_v56  ;;  %v6361_v7 = vmax.f32 %v6359_v18, %v6360_v34 }
 0x5c5   : > { %v5808_v51 = vadd.f32 %v5807_v17, %v5806_v32  ;;  %v2453_v23 = vadd.f32 %v2452_v15, %v2451_v13  ;;  %v2974_v15 = vld [vmem:[%s7899_s12 + $0x3a] sm:$0xff]  ;;  %v2988_v50 = vpop.permute.xlu1 %2987 }
 0x5c6   : > { %5294 = vperm.xlu0 %7021, %v5251_v57   ;;  %5284 = vperm.xlu1 %7022, %v5249_v3   ;;  %v4732_v57 = vadd.f32 %v4731_v39, %v4730_v2  ;;  %v4733_v3 = vsel %vm12839_vm8, %v4722_v31, 0.0  ;;  %v6362_v22 = vsub.f32 %v11961_v26, %v6361_v7  ;;  %v6363_v52 = vsub.f32 %v11823_v24, %v6361_v7  ;;  %v2975_v39 = vld [vmem:[%s7899_s12 + $0x42] sm:$0xff]  ;;  %vm12847_vm8 = vmmov %vm12834_vm2 }
 0x5c7   : > { %5299 = vperm.xlu2 %7023, %v5252_v44   ;;  %v5810_v20 = vadd.f32 %v5809_v48, %v5808_v51  ;;  %2455 = vst.msk [vmem:[%s12279_s30] sm:$0x1] %vm2454_vm0, %v2453_v23  ;;  %v6364_v40 = vsub.f32 %v11747_v16, %v6361_v7  ;;  %v6365_v0 = vsub.f32 %v11919_v59, %v6361_v7  ;;  %v2993_v23 = vpop.permute.xlu0 %2992 }
 0x5c8   : > { %v4734_v44 = vadd.f32 %v4733_v3, %v4732_v57  ;;  %v6369_v1 = vmul.f32 1.442695, %v6362_v22  ;;  %v6371_v47 = vmul.f32 1.442695, %v6363_v52  ;;  %v6367_v37 = vsub.f32 %v11861_v11, %v6361_v7  ;;  %v2976_v22 = vld [vmem:[%s7899_s12 + $0x4a] sm:$0xff] }
 0x5c9   : > { %v5811_v4 = vrot.slane %v5810_v20, 4  ;;  %v6373_v49 = vmul.f32 1.442695, %v6364_v40  ;;  %v6375_v45 = vmul.f32 1.442695, %v6365_v0  ;;  %v3016_v25 = vmul.f32 %v2988_v50, %v2974_v15 }
 0x5ca   : > { %v4736_v55 = vadd.f32 %v4735_v6, %v4734_v44  ;;  %v12294_v24 = vpop.permute.xlu2 %2997  ;;  %v6379_v18 = vmul.f32 1.442695, %v6367_v37 }
 0x5cb   : > { %v5812_v19 = vadd.f32 %v5811_v4, %v5810_v20 }
 0x5cc   : > { %v4737_v35 = vrot.slane %v4736_v55, 4 }
 0x5cd   : > { %v5813_v27 = vrot.slane %v5812_v19, 2 }
 0x5ce   : > { %5289 = vperm.xlu1 %7022, %v5250_v56   ;;  %v6366_v56 = vsub.f32 %v12012_v8, %v6361_v7  ;;  %v4738_v21 = vadd.f32 %v4737_v35, %v4736_v55  ;;  %v6368_v8 = vsub.f32 %v11826_v33, %v6361_v7  ;;  %v3023_v7 = vsel %vm12841_vm14, %v3016_v25, 0.0  ;;  %v3560_v25 = vld [vmem:[%s7899_s12 + $0x6c] sm:$0xff]  ;;  %vm12851_vm14 = vmmov %vm12834_vm2 }
 0x5cf   : > { %v5814_v29 = vadd.f32 %v5813_v27, %v5812_v19 }
 0x5d0   : > { %v4739_v13 = vrot.slane %v4738_v21, 2  ;;  %v6377_v26 = vmul.f32 1.442695, %v6366_v56  ;;  %v6381_v17 = vmul.f32 1.442695, %v6368_v8 }
 0x5d1   : > { %v5815_v36 = vrot.slane %v5814_v29, 1 }
 0x5d2   : > { %v4740_v16 = vadd.f32 %v4739_v13, %v4738_v21  ;;  %v3013_v19 = vpop.permute.xlu2 %3012 }
 0x5d3   : > { %v5816_v12 = vadd.f32 %v5815_v36, %v5814_v29  ;;  %v3022_v29 = vsel %vm12842_vm15, %v3015_v41, 0.0  ;;  %v3017_v36 = vmul.f32 %v2993_v23, %v2975_v39 }
 0x5d4   : > { %v4741_v59 = vrot.slane %v4740_v16, 1 }
 0x5d5   : > { %7591 = vrcp.f32 %v5816_v12  ;;  %v5828_v48 = vand.u32 2147483648, %v5816_v12  ;;  %v5826_v63 = vand.u32 2147483647, %v5816_v12  ;;  %vm5822_vm11 = vweird.f32 %v5816_v12 }
 0x5d6   : > { %7593 = vpow2.f32 %v6369_v1  ;;  %v4742_v11 = vadd.f32 %v4741_v59, %v4740_v16  ;;  %v2979_v16 = vld [vmem:[%s7899_s12 + $0x62] sm:$0x3]  ;;  %v2978_v59 = vld [vmem:[%s7899_s12 + $0x5a] sm:$0xff] }
 0x5d7   : > { %7595 = vpow2.f32 %v6371_v47  ;;  %v5829_v57 = vor.u32 1.1754944e-38, %v5828_v48  ;;  %vm5827_vm12 = vcmp.eq.f32.partialorder %v5826_v63, 8.507059e+37  ;;  %v3018_v47 = vmul.f32 %v12294_v24, %v2976_v22 }
 0x5d8   : > { %7597 = vpow2.f32 %v6373_v49  ;;  %4743 = vst.msk [vmem:[%s12279_s30 + $0x4] sm:$0x1] %vm2454_vm0, %v4742_v11 }
 0x5d9   : > { %7599 = vpow2.f32 %v6375_v45  ;;  %v3027_v8 = vsel %vm12843_vm6, %v3018_v47, 0.0  ;;  %v3564_v47 = vld [vmem:[%s7899_s12 + $0x8c] sm:$0xff]  ;;  %vm12852_vm6 = vmmov %vm12844_vm4 }
 0x5da   : > { %7601 = vpow2.f32 %v6377_v26  ;;  %v3574_v45 = vpop.permute.xlu2 %3573 }
 0x5db   : > { %v7592_v32 = vpop.eup %7591  ;;  %7603 = vpow2.f32 %v6379_v18  ;;  %v3602_v39 = vmul.f32 %v3574_v45, %v3560_v25 }
 0x5dc   : > { %v5818_v28 = vmul.f32 %v7592_v32, %v5816_v12  ;;  %v12298_v30 = vpop.eup %7593  ;;  %vm5823_vm10 = vweird.f32 %v7592_v32  ;;  %7605 = vpow2.f32 %v6381_v17  ;;  %v3024_v12 = vadd.f32 %v3023_v7, %v3022_v29  ;;  %v3561_v7 = vld [vmem:[%s7899_s12 + $0x74] sm:$0xff] }
 0x5dd   : > { %v12300_v62 = vpop.eup %7595  ;;  %v6383_v33 = vsel %vm2290_vm3, %v12298_v30, 0.0  ;;  %vm5824_vm13 = vmor %vm5822_vm11, %vm5823_vm10 }
 0x5de   : > { %v5819_v51 = vsub.f32 1.0, %v5818_v28  ;;  %v12307_v10 = vpop.eup %7597  ;;  %v6384_v20 = vsel %vm2290_vm3, %v12300_v62, 0.0  ;;  %v3021_v28 = vmul.f32 %v3013_v19, %v2979_v16  ;;  %vm12849_vm10 = vmmov %vm12834_vm2 }
 0x5df   : > { %v12311_v5 = vpop.eup %7599  ;;  %v6385_v4 = vadd.f32 %v6384_v20, %v6383_v33  ;;  %v6386_v58 = vsel %vm2290_vm3, %v12307_v10, 0.0  ;;  %vm12850_vm11 = vmmov %vm12834_vm2 }
 0x5e0   : > { %v5820_v34 = vmul.f32 %v7592_v32, %v5819_v51  ;;  %v12315_v2 = vpop.eup %7601  ;;  %v6388_v27 = vsel %vm2290_vm3, %v12311_v5, 0.0  ;;  %v3033_v33 = vsel %vm12846_vm7, %v3021_v28, 0.0 }
 0x5e1   : > { %v6387_v31 = vadd.f32 %v6386_v58, %v6385_v4  ;;  %v12321_v44 = vpop.eup %7603  ;;  %v6390_v6 = vsel %vm2290_vm3, %v12315_v2, 0.0  ;;  %v3559_v4 = vld [vmem:[%s7899_s12 + $0x64] sm:$0xff] }
 0x5e2   : > { %v5821_v61 = vadd.f32 %v7592_v32, %v5820_v34  ;;  %v12335_v1 = vpop.eup %7605  ;;  %v6392_v0 = vsel %vm2290_vm3, %v12321_v44, 0.0  ;;  %v3594_v58 = vpop.permute.xlu2 %3593 }
 0x5e3   : > { %v6389_v54 = vadd.f32 %v6388_v27, %v6387_v31  ;;  %v6394_v37 = vsel %vm2297_vm1, %v12335_v1, 0.0 }
 0x5e4   : > { %v5825_v3 = vsel %vm5824_vm13, %v7592_v32, %v5821_v61  ;;  %v3008_v32 = vpop.permute.xlu1 %3007 }
 0x5e5   : > { %v12326_v55 = vsel %vm5827_vm12, %v5829_v57, %v5825_v3  ;;  %v6391_v21 = vadd.f32 %v6390_v6, %v6389_v54  ;;  %v3020_v50 = vmul.f32 %v3008_v32, %v2978_v59  ;;  %v3609_v54 = vsel %vm12848_vm9, %v3602_v39, 0.0 }
 0x5e6   : > { %v5831_v52 = vmul.f32 %v12217_v14, %v12326_v55  ;;  %v5832_v40 = vmul.f32 %v12219_v53, %v12326_v55  ;;  %v5833_v35 = vmul.f32 %v12227_v42, %v12326_v55  ;;  %v5834_v56 = vmul.f32 %v12232_v9, %v12326_v55  ;;  %v2977_v53 = vld [vmem:[%s7899_s12 + $0x52] sm:$0xff]  ;;  %v3003_v42 = vpop.permute.xlu0 %3002 }
 0x5e7   : > { %v5835_v14 = vmul.f32 %v12245_v46, %v12326_v55  ;;  %v3025_v9 = vsel %vm12834_vm2, %v3017_v36, 0.0  ;;  %v5836_v49 = vmul.f32 %v12255_v60, %v12326_v55  ;;  %v6393_v46 = vadd.f32 %v6392_v0, %v6391_v21 }
 0x5e8   : > { %5854 = vperm.xlu0 %7021, %v5831_v52   ;;  %5838 = vst.msk [vmem:[%s11788_s17 + $0x12c] sm:$0xff] %vm2290_vm3, %v5831_v52  ;;  %5859 = vperm.xlu1 %7022, %v5832_v40   ;;  %v3026_v13 = vadd.f32 %v3025_v9, %v3024_v12  ;;  %v3019_v26 = vmul.f32 %v3003_v42, %v2977_v53  ;;  %v3031_v51 = vsel %vm12845_vm5, %v3020_v50, 0.0  ;;  %v3563_v52 = vld [vmem:[%s7899_s12 + $0x84] sm:$0xff] }
 0x5e9   : > { %5839 = vst.msk [vmem:[%s11788_s17 + $0x134] sm:$0xff] %vm2290_vm3, %v5832_v40  ;;  %5864 = vperm.xlu2 %7023, %v5833_v35   ;;  %v6395_v24 = vadd.f32 %v6394_v37, %v6393_v46  ;;  %v12375_v22 = vmul.f32 %v12268_v43, %v12326_v55 }
 0x5ea   : > { %5840 = vst.msk [vmem:[%s11788_s17 + $0x13c] sm:$0xff] %vm2290_vm3, %v5833_v35  ;;  %v3028_v18 = vadd.f32 %v3027_v8, %v3026_v13  ;;  %v3029_v11 = vsel %vm12844_vm4, %v3019_v26, 0.0  ;;  %v3562_v35 = vld [vmem:[%s7899_s12 + $0x7c] sm:$0xff]  ;;  %v3606_v26 = vmul.f32 %v3594_v58, %v3564_v47  ;;  %v3565_v8 = vld [vmem:[%s7899_s12 + $0x94] sm:$0x3]  ;;  %vm12853_vm4 = vmmov %vm12846_vm7 }
 0x5eb   : > { %5841 = vst.msk [vmem:[%s11788_s17 + $0x144] sm:$0xff] %vm2290_vm3, %v5834_v56  ;;  %v6396_v60 = vrot.slane %v6395_v24, 4  ;;  %vm12854_vm7 = vmmov %vm12845_vm5 }
 0x5ec   : > { %5842 = vst.msk [vmem:[%s11788_s17 + $0x14c] sm:$0xff] %vm2290_vm3, %v5835_v14  ;;  %v3030_v17 = vadd.f32 %v3029_v11, %v3028_v18  ;;  %v3569_v61 = vpop.permute.xlu1 %3568  ;;  %v3617_v50 = vsel %vm12852_vm6, %v3606_v26, 0.0  ;;  %vm12866_vm6 = vmmov %vm12853_vm4 }
 0x5ed   : > { %5843 = vst.msk [vmem:[%s11788_s17 + $0x154] sm:$0xff] %vm2290_vm3, %v5836_v49  ;;  %v6397_v15 = vadd.f32 %v6396_v60, %v6395_v24  ;;  %v3601_v31 = vmul.f32 %v3569_v61, %v3559_v4  ;;  %v4147_v61 = vld [vmem:[%s7899_s12 + $0xae] sm:$0xff] }
 0x5ee   : > { %v3032_v23 = vadd.f32 %v3031_v51, %v3030_v17  ;;  %v3579_v63 = vpop.permute.xlu0 %3578  ;;  %5844 = vst.msk [vmem:[%s11788_s17 + $0x15c] sm:$0x3] %vm2297_vm1, %v12375_v22 }
 0x5ef   : > { %v6398_v38 = vrot.slane %v6397_v15, 2  ;;  %v3608_v3 = vsel %vm12847_vm8, %v3601_v31, 0.0  ;;  %v3603_v6 = vmul.f32 %v3579_v63, %v3561_v7  ;;  %vm12855_vm8 = vmmov %vm12845_vm5 }
 0x5f0   : > { %5869 = vperm.xlu0 %7021, %v5834_v56   ;;  %5874 = vperm.xlu1 %7022, %v5835_v14   ;;  %v3034_v20 = vadd.f32 %v3033_v33, %v3032_v23  ;;  %v3610_v36 = vadd.f32 %v3609_v54, %v3608_v3  ;;  %v4154_v9 = vpop.permute.xlu2 %4153 }
 0x5f1   : > { %5879 = vperm.xlu2 %7023, %v5836_v49   ;;  %v6399_v48 = vadd.f32 %v6398_v38, %v6397_v15  ;;  %v3611_v14 = vsel %vm12849_vm10, %v3603_v6, 0.0  ;;  %v4144_v38 = vld [vmem:[%s7899_s12 + $0x96] sm:$0xff]  ;;  %vm12859_vm10 = vmmov %vm12853_vm4 }
 0x5f2   : > { %v3035_v41 = vrot.slane %v3034_v20, 4  ;;  %v3612_v55 = vadd.f32 %v3611_v14, %v3610_v36 }
 0x5f3   : > { %v6400_v34 = vrot.slane %v6399_v48, 1 }
 0x5f4   : > { %v3036_v57 = vadd.f32 %v3035_v41, %v3034_v20  ;;  %v3584_v56 = vpop.permute.xlu1 %3583  ;;  %v4186_v41 = vmul.f32 %v4154_v9, %v4144_v38 }
 0x5f5   : > { %v6401_v19 = vadd.f32 %v6400_v34, %v6399_v48  ;;  %v3604_v53 = vmul.f32 %v3584_v56, %v3562_v35 }
 0x5f6   : > { %v3037_v27 = vrot.slane %v3036_v57, 2  ;;  %v3589_v40 = vpop.permute.xlu0 %3588 }
 0x5f7   : > { %7607 = vrcp.f32 %v6401_v19  ;;  %v3605_v43 = vmul.f32 %v3589_v40, %v3563_v52  ;;  %v3613_v49 = vsel %vm12850_vm11, %v3604_v53, 0.0  ;;  %v6413_v37 = vand.u32 2147483648, %v6401_v19  ;;  %v4150_v52 = vld [vmem:[%s7899_s12 + $0xc6] sm:$0x3] }
 0x5f8   : > { %v3038_v29 = vadd.f32 %v3037_v27, %v3036_v57  ;;  %v3614_v13 = vadd.f32 %v3613_v49, %v3612_v55  ;;  %v6411_v16 = vand.u32 2147483647, %v6401_v19  ;;  %vm6407_vm12 = vweird.f32 %v6401_v19  ;;  %v4169_v20 = vpop.permute.xlu2 %4168 }
 0x5f9   : > { %v3615_v45 = vsel %vm12851_vm14, %v3605_v43, 0.0  ;;  %v6414_v28 = vor.u32 1.1754944e-38, %v6413_v37  ;;  %v4189_v27 = vmul.f32 %v4169_v20, %v4147_v61 }
 0x5fa   : > { %v3039_v12 = vrot.slane %v3038_v29, 1  ;;  %v3616_v60 = vadd.f32 %v3615_v45, %v3614_v13  ;;  %vm6412_vm2 = vcmp.eq.f32.partialorder %v6411_v16, 8.507059e+37 }
 0x5fc   : > { %v3040_v0 = vadd.f32 %v3039_v12, %v3038_v29  ;;  %v3599_v18 = vpop.permute.xlu1 %3598  ;;  %v3618_v51 = vadd.f32 %v3617_v50, %v3616_v60  ;;  %v4149_v12 = vld [vmem:[%s7899_s12 + $0xbe] sm:$0xff]  ;;  %v5263_v50 = vld [vmem:[%s7899_s12 + $0x112] sm:$0xff] }
 0x5fd   : > { %v7608_v21 = vpop.eup %7607  ;;  %v3607_v11 = vmul.f32 %v3599_v18, %v3565_v8 }
 0x5fe   : > { %v6403_v42 = vmul.f32 %v7608_v21, %v6401_v19  ;;  %3041 = vst.msk [vmem:[%s12279_s30 + $0x1] sm:$0x1] %vm2454_vm0, %v3040_v0  ;;  %vm6408_vm13 = vweird.f32 %v7608_v21  ;;  %v4148_v19 = vld [vmem:[%s7899_s12 + $0xb6] sm:$0xff] }
 0x5ff   : > { %vm6409_vm15 = vmor %vm6407_vm12, %vm6408_vm13  ;;  %v3619_v23 = vsel %vm12853_vm4, %v3607_v11, 0.0 }
 0x600   : > { %v6404_v46 = vsub.f32 1.0, %v6403_v42  ;;  %v3620_v63 = vadd.f32 %v3619_v23, %v3618_v51  ;;  %v4184_v40 = vpop.permute.xlu2 %4183 }
 0x601   : > { %v4192_v47 = vmul.f32 %v4184_v40, %v4150_v52 }
 0x602   : > { %v6405_v24 = vmul.f32 %v7608_v21, %v6404_v46 }
 0x603   : > { %v4204_v46 = vsel %vm12859_vm10, %v4192_v47, 0.0  ;;  %v6430_v47 = vld [vmem:[%s7899_s12 + $0x15e] sm:$0xff] }
 0x604   : > { %v6406_v32 = vadd.f32 %v7608_v21, %v6405_v24 }
 0x606   : > { %v6410_v15 = vsel %vm6409_vm15, %v7608_v21, %v6406_v32  ;;  %v5261_v32 = vld [vmem:[%s7899_s12 + $0x102] sm:$0xff] }
 0x607   : > { %v4164_v59 = vpop.permute.xlu0 %4163  ;;  %v6415_v17 = vsel %vm6412_vm2, %v6414_v28, %v6410_v15  ;;  %v4159_v39 = vpop.permute.xlu1 %4158 }
 0x608   : > { %v6418_v33 = vmul.f32 %v12307_v10, %v6415_v17  ;;  %v6417_v48 = vmul.f32 %v12300_v62, %v6415_v17  ;;  %v6416_v25 = vmul.f32 %v12298_v30, %v6415_v17  ;;  %v6421_v34 = vmul.f32 %v12321_v44, %v6415_v17  ;;  %v4146_v10 = vld [vmem:[%s7899_s12 + $0xa6] sm:$0xff]  ;;  %v4145_v62 = vld [vmem:[%s7899_s12 + $0x9e] sm:$0xff] }
 0x609   : > { %v6420_v4 = vmul.f32 %v12315_v2, %v6415_v17  ;;  %v6419_v30 = vmul.f32 %v12311_v5, %v6415_v17  ;;  %v3621_v44 = vrot.slane %v3620_v63, 4  ;;  %v6422_v58 = vmul.f32 %v12335_v1, %v6415_v17 }
 0x60a   : > { %6449 = vperm.xlu2 %7023, %v6418_v33   ;;  %6425 = vst.msk [vmem:[%s11788_s17 + $0x16e] sm:$0xff] %vm2290_vm3, %v6418_v33  ;;  %6444 = vperm.xlu1 %7022, %v6417_v48   ;;  %v4188_v57 = vmul.f32 %v4164_v59, %v4146_v10  ;;  %v4187_v7 = vmul.f32 %v4159_v39, %v4145_v62  ;;  %v4193_v5 = vsel %vm12845_vm5, %v4186_v41, 0.0  ;;  %v5260_v59 = vld [vmem:[%s7899_s12 + $0xfa] sm:$0xff]  ;;  %v5266_v41 = vld [vmem:[%s7899_s12 + $0x12a] sm:$0x3] }
 0x60b   : > { %6424 = vst.msk [vmem:[%s11788_s17 + $0x166] sm:$0xff] %vm2290_vm3, %v6417_v48  ;;  %6439 = vperm.xlu0 %7021, %v6416_v25   ;;  %v3622_v31 = vadd.f32 %v3621_v44, %v3620_v63 }
 0x60c   : > { %6423 = vst.msk [vmem:[%s11788_s17 + $0x15e] sm:$0xff] %vm2290_vm3, %v6416_v25  ;;  %v4194_v3 = vsel %vm12854_vm7, %v4187_v7, 0.0  ;;  %v4196_v36 = vsel %vm12855_vm8, %v4188_v57, 0.0  ;;  %v5265_v25 = vld [vmem:[%s7899_s12 + $0x122] sm:$0xff] }
 0x60d   : > { %6428 = vst.msk [vmem:[%s11788_s17 + $0x186] sm:$0xff] %vm2290_vm3, %v6421_v34  ;;  %v3623_v1 = vrot.slane %v3622_v31, 2  ;;  %v4195_v6 = vadd.f32 %v4194_v3, %v4193_v5 }
 0x60e   : > { %6427 = vst.msk [vmem:[%s11788_s17 + $0x17e] sm:$0xff] %vm2290_vm3, %v6420_v4 }
 0x60f   : > { %v4174_v2 = vpop.permute.xlu0 %4173  ;;  %6426 = vst.msk [vmem:[%s11788_s17 + $0x176] sm:$0xff] %vm2290_vm3, %v6419_v30  ;;  %v3624_v29 = vadd.f32 %v3623_v1, %v3622_v31  ;;  %v4197_v35 = vadd.f32 %v4196_v36, %v4195_v6  ;;  %vm12856_vm3 = vmmov %vm12845_vm5  ;;  %v4179_v42 = vpop.permute.xlu1 %4178 }
 0x610   : > { %v4190_v54 = vmul.f32 %v4174_v2, %v4148_v19  ;;  %6429 = vst.msk [vmem:[%s11788_s17 + $0x18e] sm:$0x3] %vm2297_vm1, %v6422_v58  ;;  %v4198_v56 = vsel %vm12856_vm3, %v4189_v27, 0.0  ;;  %vm12857_vm9 = vmmov %vm12856_vm3  ;;  %v4191_v9 = vmul.f32 %v4179_v42, %v4149_v12 }
 0x611   : > { %v3625_v21 = vrot.slane %v3624_v29, 1  ;;  %v4199_v53 = vadd.f32 %v4198_v56, %v4197_v35  ;;  %vm12858_vm1 = vmmov %vm12856_vm3 }
 0x612   : > { %6464 = vperm.xlu2 %7023, %v6421_v34   ;;  %6459 = vperm.xlu1 %7022, %v6420_v4   ;;  %v4200_v14 = vsel %vm12857_vm9, %v4190_v54, 0.0  ;;  %v4202_v55 = vsel %vm12858_vm1, %v4191_v9, 0.0  ;;  %vm12860_vm11 = vmmov %vm12858_vm1  ;;  %v5264_v34 = vld [vmem:[%s7899_s12 + $0x11a] sm:$0xff] }
 0x613   : > { %6454 = vperm.xlu0 %7021, %v6419_v30   ;;  %v3626_v0 = vadd.f32 %v3625_v21, %v3624_v29  ;;  %v4201_v43 = vadd.f32 %v4200_v14, %v4199_v53  ;;  %vm12861_vm13 = vmmov %vm12858_vm1  ;;  %v5845_v21 = vld [vmem:[%s7899_s12 + $0x12c] sm:$0xff]  ;;  %v5846_v14 = vld [vmem:[%s7899_s12 + $0x134] sm:$0xff] }
 0x614   : > { %vm12862_vm14 = vmmov %vm12858_vm1 }
 0x615   : > { %3627 = vst.msk [vmem:[%s12279_s30 + $0x2] sm:$0x1] %vm2454_vm0, %v3626_v0  ;;  %v4203_v49 = vadd.f32 %v4202_v55, %v4201_v43  ;;  %vm12863_vm12 = vmmov %vm12858_vm1  ;;  %v6431_v0 = vld [vmem:[%s7899_s12 + $0x166] sm:$0xff]  ;;  %v5847_v55 = vld [vmem:[%s7899_s12 + $0x13c] sm:$0xff] }
 0x616   : > { %vm12864_vm15 = vmmov %vm12858_vm1 }
 0x617   : > { %v4205_v13 = vadd.f32 %v4204_v46, %v4203_v49  ;;  %vm12865_vm2 = vmmov %vm12858_vm1  ;;  %v5848_v49 = vld [vmem:[%s7899_s12 + $0x144] sm:$0xff] }
 0x618   : > { %vm12867_vm4 = vmmov %vm12858_vm1 }
 0x619   : > { %v4206_v37 = vrot.slane %v4205_v13, 4  ;;  %v5275_v18 = vpop.permute.xlu2 %5274  ;;  %vm12868_vm5 = vmmov %vm12858_vm1 }
 0x61a   : > { %6469 = vperm.xlu1 %7022, %v6422_v58   ;;  %v5303_v15 = vmul.f32 %v5275_v18, %v5261_v32  ;;  %vm12869_vm7 = vmmov %vm12858_vm1 }
 0x61b   : > { %5884 = vperm.xlu0 %7021, %v12375_v22   ;;  %v4207_v26 = vadd.f32 %v4206_v37, %v4205_v13  ;;  %v5262_v22 = vld [vmem:[%s7899_s12 + $0x10a] sm:$0xff]  ;;  %vm12870_vm8 = vmmov %vm12858_vm1 }
 0x61c   : > { %v5310_v51 = vsel %vm12861_vm13, %v5303_v15, 0.0  ;;  %v6434_v15 = vld [vmem:[%s7899_s12 + $0x17e] sm:$0xff]  ;;  %vm12871_vm3 = vmmov %vm12858_vm1 }
 0x61d   : > { %v4208_v24 = vrot.slane %v4207_v26, 2  ;;  %vm12872_vm9 = vmmov %vm12858_vm1 }
 0x61e   : > { %vm12873_vm10 = vmmov %vm12858_vm1 }
 0x61f   : > { %v4209_v16 = vadd.f32 %v4208_v24, %v4207_v26  ;;  %vm12875_vm13 = vmmov %vm12858_vm1 }
 0x621   : > { %v4210_v45 = vrot.slane %v4209_v16, 1  ;;  %v5300_v10 = vpop.permute.xlu2 %5299 }
 0x622   : > { %v5308_v39 = vmul.f32 %v5300_v10, %v5266_v41 }
 0x623   : > { %v4211_v8 = vadd.f32 %v4210_v45, %v4209_v16  ;;  %v6432_v16 = vld [vmem:[%s7899_s12 + $0x16e] sm:$0xff] }
 0x624   : > { %v5320_v7 = vsel %vm12866_vm6, %v5308_v39, 0.0 }
 0x625   : > { %4212 = vst.msk [vmem:[%s12279_s30 + $0x3] sm:$0x1] %vm2454_vm0, %v4211_v8 }
 0x630   : > { %v5270_v60 = vpop.permute.xlu1 %5269  ;;  %v5280_v28 = vpop.permute.xlu0 %5279 }
 0x631   : > { %v5302_v11 = vmul.f32 %v5270_v60, %v5260_v59  ;;  %v5304_v23 = vmul.f32 %v5280_v28, %v5262_v22  ;;  %v5849_v28 = vld [vmem:[%s7899_s12 + $0x14c] sm:$0xff]  ;;  %v6433_v22 = vld [vmem:[%s7899_s12 + $0x176] sm:$0xff] }
 0x633   : > { %v5309_v38 = vsel %vm12860_vm11, %v5302_v11, 0.0  ;;  %v5312_v63 = vsel %vm12862_vm14, %v5304_v23, 0.0  ;;  %vm12874_vm11 = vmmov %vm12858_vm1 }
 0x634   : > { %v5311_v48 = vadd.f32 %v5310_v51, %v5309_v38  ;;  %vm12876_vm14 = vmmov %vm12858_vm1 }
 0x636   : > { %v5313_v62 = vadd.f32 %v5312_v63, %v5311_v48  ;;  %v6435_v48 = vld [vmem:[%s7899_s12 + $0x186] sm:$0xff] }
 0x638   : > { %v5285_v17 = vpop.permute.xlu1 %5284  ;;  %v5295_v20 = vpop.permute.xlu0 %5294 }
 0x639   : > { %v5305_v33 = vmul.f32 %v5285_v17, %v5263_v50  ;;  %v5307_v44 = vmul.f32 %v5295_v20, %v5265_v25 }
 0x63b   : > { %v5314_v4 = vsel %vm12863_vm12, %v5305_v33, 0.0  ;;  %v5318_v31 = vsel %vm12865_vm2, %v5307_v44, 0.0  ;;  %vm12877_vm12 = vmmov %vm12858_vm1 }
 0x63c   : > { %v5315_v61 = vadd.f32 %v5314_v4, %v5313_v62  ;;  %v5850_v4 = vld [vmem:[%s7899_s12 + $0x154] sm:$0xff]  ;;  %vm12879_vm2 = vmmov %vm12866_vm6 }
 0x640   : > { %v5290_v30 = vpop.permute.xlu1 %5289 }
 0x641   : > { %v5306_v58 = vmul.f32 %v5290_v30, %v5264_v34 }
 0x643   : > { %v5316_v19 = vsel %vm12864_vm15, %v5306_v58, 0.0  ;;  %v5865_v36 = vpop.permute.xlu2 %5864  ;;  %vm12878_vm15 = vmmov %vm12866_vm6 }
 0x644   : > { %v5317_v2 = vadd.f32 %v5316_v19, %v5315_v61  ;;  %v5889_v45 = vmul.f32 %v5865_v36, %v5847_v55  ;;  %v6436_v19 = vld [vmem:[%s7899_s12 + $0x18e] sm:$0x3] }
 0x646   : > { %v5319_v57 = vadd.f32 %v5318_v31, %v5317_v2  ;;  %v5897_v50 = vsel %vm12871_vm3, %v5889_v45, 0.0 }
 0x648   : > { %v5321_v5 = vadd.f32 %v5320_v7, %v5319_v57  ;;  %v5851_v57 = vld [vmem:[%s7899_s12 + $0x15c] sm:$0x3]  ;;  %s6978_s12 = sshll.u32 %s7804_s8, 3  ;;  %s6500_s8 = scalar_lea.sflag [#allocation6], %s394_s15 }
 0x649   : > { %s6520_s16 = scalar_lea.hbm %s12522_s9, %s6978_s12 }
 0x64a   : > { %v5322_v27 = vrot.slane %v5321_v5, 4  ;;  %s6524_s18 = sshll.u32 %s6520_s16, 4  ;;  %s6525_s18 = int_to_ptr.hbm [resolvable:$true] %s6524_s18 }
 0x64b   : > { %v5880_v35 = vpop.permute.xlu2 %5879  ;;  %s7669_s23 = sshra.s32 %s6525_s18, 4  ;;  %s7670_s23 = int_to_ptr.hbm [resolvable:$true] %s7669_s23 }
 0x64c   : > { %v5323_v1 = vadd.f32 %v5322_v27, %v5321_v5  ;;  %v5892_v58 = vmul.f32 %v5880_v35, %v5850_v4  ;;  %s7671_s25 = scalar_lea.hbm %s7670_s23, 8  ;;  %p7676_p1 = scmp.lt.s32.totalorder %s7670_s23, %s12522_s9 }
 0x64d   : > { %p7672_p12 = scmp.ne.s32.totalorder %s7670_s23, %s7671_s25  ;;  %p7677_p2 = scmp.lt.s32.totalorder %s7675_s13, %s7671_s25 }
 0x64e   : > { %v5324_v3 = vrot.slane %v5323_v1, 2 }
 0x64f   : > { %p7673_p13 = pnand %p7672_p12, %p7821_p5  ;;  %p7678_p3 = por %p7677_p2, %p7676_p1 }
 0x650   : > { %v5325_v54 = vadd.f32 %v5324_v3, %v5323_v1  ;;  %v5903_v3 = vsel %vm12877_vm12, %v5892_v58, 0.0 }
 0x651   : > { %p7674_p0 = pneg %p7673_p13 }
 0x652   : > { %v5326_v6 = vrot.slane %v5325_v54, 1 }
 0x653   : > { %p7679_p4 = pnand %p7678_p3, %p7674_p0 }
 0x654   : > { %v5327_v29 = vadd.f32 %v5326_v6, %v5325_v54 }
 0x656   : > { %5328 = vst.msk [vmem:[%s12279_s30 + $0x5] sm:$0x1] %vm2454_vm0, %v5327_v29 }
 0x65a   : > { %v5860_v52 = vpop.permute.xlu1 %5859  ;;  %v5855_v40 = vpop.permute.xlu0 %5854 }
 0x65b   : > { %v5887_v53 = vmul.f32 %v5855_v40, %v5845_v21  ;;  %v5888_v42 = vmul.f32 %v5860_v52, %v5846_v14 }
 0x65d   : > { %v5894_v37 = vsel %vm12867_vm4, %v5887_v53, 0.0  ;;  %v5895_v26 = vsel %vm12868_vm5, %v5888_v42, 0.0 }
 0x65e   : > { %v5896_v32 = vadd.f32 %v5895_v26, %v5894_v37 }
 0x660   : > { %v5898_v51 = vadd.f32 %v5897_v50, %v5896_v32 }
 0x662   : > { %v5875_v12 = vpop.permute.xlu1 %5874  ;;  %v5870_v56 = vpop.permute.xlu0 %5869 }
 0x663   : > { %v5890_v8 = vmul.f32 %v5870_v56, %v5848_v49  ;;  %v5891_v20 = vmul.f32 %v5875_v12, %v5849_v28 }
 0x664   : > { %v6450_v9 = vpop.permute.xlu2 %6449 }
 0x665   : > { %v6474_v18 = vmul.f32 %v6450_v9, %v6432_v16  ;;  %v5899_v17 = vsel %vm12872_vm9, %v5890_v8, 0.0  ;;  %v5901_v61 = vsel %vm12874_vm11, %v5891_v20, 0.0 }
 0x666   : > { %v5900_v41 = vadd.f32 %v5899_v17, %v5898_v51 }
 0x667   : > { %v6482_v33 = vsel %vm12858_vm1, %v6474_v18, 0.0 }
 0x668   : > { %v5902_v2 = vadd.f32 %v5901_v61, %v5900_v41 }
 0x66a   : > { %v5904_v36 = vadd.f32 %v5903_v3, %v5902_v2 }
 0x66c   : > { %v6465_v25 = vpop.permute.xlu2 %6464 }
 0x66d   : > { %v6477_v30 = vmul.f32 %v6465_v25, %v6435_v48 }
 0x66f   : > { %v6488_v5 = vsel %vm12876_vm14, %v6477_v30, 0.0 }
 0x67c   : > { %v6445_v43 = vpop.permute.xlu1 %6444 }
 0x67d   : > { %v6473_v46 = vmul.f32 %v6445_v43, %v6431_v0  ;;  %v6440_v13 = vpop.permute.xlu0 %6439 }
 0x67e   : > { %v6472_v24 = vmul.f32 %v6440_v13, %v6430_v47 }
 0x67f   : > { %v6480_v60 = vsel %vm12869_vm7, %v6473_v46, 0.0 }
 0x680   : > { %v6479_v59 = vsel %vm12870_vm8, %v6472_v24, 0.0 }
 0x681   : > { %v6481_v11 = vadd.f32 %v6480_v60, %v6479_v59 }
 0x683   : > { %v6483_v10 = vadd.f32 %v6482_v33, %v6481_v11 }
 0x684   : > { %v6460_v38 = vpop.permute.xlu1 %6459 }
 0x685   : > { %v6455_v23 = vpop.permute.xlu0 %6454  ;;  %v6476_v34 = vmul.f32 %v6460_v38, %v6434_v15 }
 0x686   : > { %v6475_v63 = vmul.f32 %v6455_v23, %v6433_v22 }
 0x687   : > { %v6486_v39 = vsel %vm12875_vm13, %v6476_v34, 0.0 }
 0x688   : > { %v6484_v62 = vsel %vm12873_vm10, %v6475_v63, 0.0 }
 0x689   : > { %v6485_v44 = vadd.f32 %v6484_v62, %v6483_v10 }
 0x68b   : > { %v6487_v31 = vadd.f32 %v6486_v39, %v6485_v44 }
 0x68c   : > { %v6470_v7 = vpop.permute.xlu1 %6469 }
 0x68d   : > { %v6478_v27 = vmul.f32 %v6470_v7, %v6436_v19  ;;  %v5885_v1 = vpop.permute.xlu0 %5884  ;;  %v6489_v54 = vadd.f32 %v6488_v5, %v6487_v31 }
 0x68e   : > { %v5893_v6 = vmul.f32 %v5885_v1, %v5851_v57 }
 0x68f   : > { %v6490_v29 = vsel %vm12878_vm15, %v6478_v27, 0.0 }
 0x690   : > { %v6491_v52 = vadd.f32 %v6490_v29, %v6489_v54  ;;  %v5905_v40 = vsel %vm12879_vm2, %v5893_v6, 0.0 }
 0x691   : > { %v5906_v35 = vadd.f32 %v5905_v40, %v5904_v36 }
 0x692   : > { %v6492_v12 = vrot.slane %v6491_v52, 4 }
 0x693   : > { %v5907_v56 = vrot.slane %v5906_v35, 4 }
 0x694   : > { %v6493_v21 = vadd.f32 %v6492_v12, %v6491_v52 }
 0x695   : > { %v5908_v14 = vadd.f32 %v5907_v56, %v5906_v35 }
 0x696   : > { %v6494_v53 = vrot.slane %v6493_v21, 2 }
 0x697   : > { %v5909_v42 = vrot.slane %v5908_v14, 2 }
 0x698   : > { %v6495_v0 = vadd.f32 %v6494_v53, %v6493_v21 }
 0x699   : > { %v5910_v47 = vadd.f32 %v5909_v42, %v5908_v14 }
 0x69a   : > { %v6496_v9 = vrot.slane %v6495_v0, 1 }
 0x69b   : > { %v5911_v43 = vrot.slane %v5910_v47, 1 }
 0x69c   : > { %v6497_v55 = vadd.f32 %v6496_v9, %v6495_v0 }
 0x69d   : > { %v5912_v49 = vadd.f32 %v5911_v43, %v5910_v47 }
 0x69e   : > { %6498 = vst.msk [vmem:[%s12279_s30 + $0x7] sm:$0x1] %vm2454_vm0, %v6497_v55 }
 0x69f   : > { %5913 = vst.msk [vmem:[%s12279_s30 + $0x6] sm:$0x1] %vm2454_vm0, %v5912_v49 }
 0x6a0   : > { %7682 = shalt.err (!%p7679_p4)
}
 0x6a1   : > { %6981 = dma.vmem_to_hbm [thread:$0]  (%p7821_p5), %s6523_s3, 128, %s6525_s18, %s6500_s8  }
 0x6a2 PF: > { %p6987_p7 = scmp.ge.s32.totalorder %s7717_s22, 2  ;;  %s6544_s15 = sand.u32 1, %s7705_s19  }
 0x6a3   : > { %s6545_s30 = scalar_lea.sflag [#allocation6], %s6544_s15 }
 0x6a4   : > { %p6984_p8 = pnand %p6987_p7, %p7825_p6 }
 0x6a6   : > { %p6985_p9 = pneg %p6984_p8 }
 0x6a8   : > { %7700 = dma.done.wait (%p6985_p9), %s6545_s30, 128  }
 0x6a9   : > { %7702 = vsyncadd (%p6985_p9), %s6545_s30, 4294967168  ;;  %s12880_s27 = sld [smem:[#allocation8_spill]]  ;;  %p24_p10 = scmp.ge.s32.totalorder %s7808_s24, 5  }
 0x6aa   : > { %s12881_s19 = smov %s7709_s20  ;;  %s12882_s20 = smov %s7713_s21 }
 0x6ab   : > { %s12884_s22 = smov %s7808_s24  ;;  %26 = sbr.rel (!%p24_p10) target bundleno = 6 (0x6), region = 118 }
 0x6af   : > { %s12883_s21 = smov %s12880_s27 }
 0x6b0   :  { %6567 = vsyncpa [#allocation6], 1 }
 0x6b1   :  { %6569 = vsyncpa [#allocation6 + $0x1], 1 }

</bundles_post_ra>
